<compile_context>
chip_gen: v7x
topology: tpu7x:2x2x1
jax: 0.10.0
libtpu: 0.0.40
codegen_flags: <defaults>
</compile_context>

<pallas_src>
import jax
import jax.numpy as jnp
import numpy as np
from jax import lax
from jax.experimental import pallas as pl
from jax.experimental.pallas import tpu as pltpu

HIGHEST = jax.lax.Precision.HIGHEST  # reference path only


# ----------------------------------------------------------------------------
# Kernel A: conv1 + pool1 + conv2 + pool2, fully fused, batch tiled.
# ----------------------------------------------------------------------------
def _conv_stage(p1, w1pool, b1, w2p, b2r, *, TB):
    Bp = p1.shape[0]
    N1 = TB * 576      # conv1 matmul rows: (a, c, h2, w2) per image
    N2 = TB * 144      # conv2 matmul rows: (h2, w2) per image (pool2 pixels)
    bf16 = jnp.bfloat16

    def kernel(p1_ref, w1_ref, b1_ref, w2_ref, b2_ref, out_ref, y1s_ref, ic_ref):
        f32 = jnp.float32

        # ---- conv1 + pool1: one (N1,16)@(16,128) matmul ---------------------
        o1 = jnp.dot(p1_ref[...].reshape(N1, 16), w1_ref[...],
                     preferred_element_type=f32)                 # (N1, 128)
        # max over the 4 pool-1 positions (lane groups of 32) on the XLU
        m = jnp.maximum(o1, pltpu.roll(o1, 64, 1))
        m = jnp.maximum(m, pltpu.roll(m, 96, 1))
        # bias/ReLU commute with the max (bias constant per channel, monotone)
        y1 = jnp.maximum(m[:, 0:32] + b1_ref[...], 0.0)          # (N1, 32) f32
        y1 = y1.astype(bf16).reshape(TB, 2, 2, 144, 32)          # (b,a,c,h2w2,ch)

        # ---- padded-y1 scratch, parity-split: y1s[b, s, uh, uw, ch] with
        #      s = (i%2)*2 + (j%2), uh = i//2, uw = j//2, (i,j) in [0,26)^2
        #      being conv2's padded coordinates.  Zero ONLY the 1-pixel halo.
        y1s_ref[:, 0:2, 0:1, :, :] = jnp.zeros((TB, 2, 1, 13, 32), bf16)   # i = 0
        y1s_ref[:, 2:4, 12:13, :, :] = jnp.zeros((TB, 2, 1, 13, 32), bf16)  # i = 25
        y1s_ref[:, 0:1, :, 0:1, :] = jnp.zeros((TB, 1, 13, 1, 32), bf16)   # j = 0
        y1s_ref[:, 2:3, :, 0:1, :] = jnp.zeros((TB, 1, 13, 1, 32), bf16)
        y1s_ref[:, 1:2, :, 12:13, :] = jnp.zeros((TB, 1, 13, 1, 32), bf16)  # j = 25
        y1s_ref[:, 3:4, :, 12:13, :] = jnp.zeros((TB, 1, 13, 1, 32), bf16)
        # interior: y1 pixel (h,w) -> i = h+1, j = w+1
        for a in range(2):          # h parity
            for c in range(2):      # w parity
                s = (1 - a) * 2 + (1 - c)
                blk = y1[:, a, c].reshape(TB, 1, 12, 12, 32)
                y1s_ref[:, s:s + 1, a:a + 12, c:c + 12, :] = blk

        # ---- conv2 + pool2, 2x2-packed: im2col rows = pool2 pixels (h2,w2),
        #      lane group g=(dh,dw) in 4x4 = y1pad[2*h2+dh, 2*w2+dw, :] -------
        for g in range(16):
            dh, dw = g // 4, g % 4
            s = (dh % 2) * 2 + (dw % 2)
            slab = y1s_ref[:, s:s + 1, dh // 2:dh // 2 + 12,
                           dw // 2:dw // 2 + 12, :]              # (TB,1,12,12,32)
            ic_ref[:, 32 * g:32 * (g + 1)] = slab.reshape(N2, 32)

        acc = jnp.dot(ic_ref[...], w2_ref[...],
                      preferred_element_type=f32)                # (N2, 256)
        y2 = jnp.maximum(acc + b2_ref[...], 0.0)
        # max over the 2x2 pool-2 window (lane groups of 64) on the XLU
        m2 = jnp.maximum(y2, pltpu.roll(y2, 128, 1))
        m2 = jnp.maximum(m2, pltpu.roll(m2, 192, 1))
        out_ref[...] = m2[:, 0:64].reshape(TB, 144, 64).astype(bf16)

    return pl.pallas_call(
        kernel,
        out_shape=jax.ShapeDtypeStruct((Bp, 144, 64), bf16),
        grid_spec=pltpu.PrefetchScalarGridSpec(
            num_scalar_prefetch=0,
            grid=(Bp // TB,),
            in_specs=[
                pl.BlockSpec((TB, 576, 16), lambda b: (b, 0, 0)),   # 4x4 patches
                pl.BlockSpec((16, 128), lambda b: (0, 0)),          # conv1+pool1 w
                pl.BlockSpec((1, 32), lambda b: (0, 0)),            # conv1 bias
                pl.BlockSpec((512, 256), lambda b: (0, 0)),         # conv2 packed w
                pl.BlockSpec((1, 256), lambda b: (0, 0)),           # conv2 bias x4
            ],
            out_specs=pl.BlockSpec((TB, 144, 64), lambda b: (b, 0, 0)),
            scratch_shapes=[
                pltpu.VMEM((TB, 4, 13, 13, 32), bf16),   # parity-split padded y1
                pltpu.VMEM((N2, 512), bf16),             # conv2 2x2-packed im2col
            ],
        ),
        compiler_params=pltpu.CompilerParams(
            dimension_semantics=("parallel",),
            vmem_limit_bytes=32 * 1024 * 1024),
    )(p1, w1pool, b1, w2p, b2r)


# ----------------------------------------------------------------------------
# Kernel B: fc1 (batch-tiled + K-tiled, accumulated) + ReLU + fc2, fused.
# ----------------------------------------------------------------------------
def _fc_stage(xf, wfc1, bfc1, wfc2p, bfc2p):
    Bp, D = xf.shape
    TK = 2304
    assert D % TK == 0
    KT = D // TK
    BM = Bp if Bp <= 128 else 128
    M = -(-Bp // BM) * BM
    if M != Bp:
        xf = jnp.concatenate([xf, jnp.zeros((M - Bp, D), xf.dtype)], axis=0)

    def kernel(x_ref, w1_ref, b1_ref, w2_ref, b2_ref, out_ref, acc_ref):
        k = pl.program_id(1)

        @pl.when(k == 0)
        def _init():
            acc_ref[...] = jnp.zeros_like(acc_ref)

        acc_ref[...] += jnp.dot(x_ref[...], w1_ref[...],
                                preferred_element_type=jnp.float32)

        @pl.when(k == pl.num_programs(1) - 1)
        def _fin():
            h = jnp.maximum(acc_ref[...] + b1_ref[...], 0.0).astype(jnp.bfloat16)
            out_ref[...] = jnp.dot(h, w2_ref[...],
                                   preferred_element_type=jnp.float32) + b2_ref[...]

    return pl.pallas_call(
        kernel,
        out_shape=jax.ShapeDtypeStruct((M, 128), jnp.float32),
        grid_spec=pltpu.PrefetchScalarGridSpec(
            num_scalar_prefetch=0,
            grid=(M // BM, KT),
            in_specs=[
                pl.BlockSpec((BM, TK), lambda m, k: (m, k)),
                pl.BlockSpec((TK, 128), lambda m, k: (k, 0)),
                pl.BlockSpec((1, 128), lambda m, k: (0, 0)),
                pl.BlockSpec((128, 128), lambda m, k: (0, 0)),
                pl.BlockSpec((1, 128), lambda m, k: (0, 0)),
            ],
            out_specs=pl.BlockSpec((BM, 128), lambda m, k: (m, 0)),
            scratch_shapes=[pltpu.VMEM((BM, 128), jnp.float32)],
        ),
        compiler_params=pltpu.CompilerParams(
            dimension_semantics=("parallel", "arbitrary")),
    )(xf, wfc1, bfc1, wfc2p, bfc2p)


# ----------------------------------------------------------------------------
# One-time parameter preparation (hoisted out of the forward pass).
# ----------------------------------------------------------------------------
def prepare_params(params):
    f32, bf16 = jnp.float32, jnp.bfloat16

    # conv1 + pool1 fused weight (16, 128):
    # row r = pa*4+pb indexes the 4x4 input patch of a pooled pixel,
    # col = (dy*2+dx)*32 + ch indexes (pool-1 position, channel).
    w1 = params["conv1_w"].astype(f32)                         # (32,1,3,3)
    w1pool = jnp.zeros((16, 128), f32)
    for dy in range(2):
        for dx in range(2):
            for kh in range(3):
                for kw in range(3):
                    r = (dy + kh) * 4 + (dx + kw)
                    c0 = (dy * 2 + dx) * 32
                    w1pool = w1pool.at[r, c0:c0 + 32].set(w1[:, 0, kh, kw])

    # conv2 + pool2 fused (2x2-packed) weight (512, 256):
    # row = g*32 + ci with g = (dh,dw) in the 4x4 y1 neighbourhood,
    # col = q*64 + co with q = (qh,qw) the pool-2 window position.
    w2 = params["conv2_w"].astype(f32)                         # (64,32,3,3)
    w2p = jnp.zeros((512, 256), f32)
    for qh in range(2):
        for qw in range(2):
            q = qh * 2 + qw
            for kh in range(3):
                for kw in range(3):
                    g = (qh + kh) * 4 + (qw + kw)
                    w2p = w2p.at[g * 32:(g + 1) * 32,
                                 q * 64:(q + 1) * 64].set(w2[:, :, kh, kw].T)

    # fc1: permute columns from PyTorch's (c, h, w) flatten to our (h, w, c).
    wfc1 = params["fc1_w"].astype(f32).reshape(128, 64, 12, 12)
    wfc1 = jnp.transpose(wfc1, (2, 3, 1, 0)).reshape(9216, 128)

    # fc2: zero-pad to 128 output lanes so kernel B's store is lane-dense.
    wfc2p = jnp.zeros((128, 128), f32).at[:, :7].set(params["fc2_w"].astype(f32).T)
    bfc2p = jnp.zeros((1, 128), f32).at[:, :7].set(params["fc2_b"].astype(f32))

    return {
        "w1pool": w1pool.astype(bf16),
        "b1": params["conv1_b"].reshape(1, 32).astype(f32),
        "w2p": w2p.astype(bf16),
        "b2r": jnp.tile(params["conv2_b"].reshape(1, 64).astype(f32), (1, 4)),
        "wfc1": wfc1.astype(bf16),
        "bfc1": params["fc1_b"].reshape(1, 128).astype(f32),
        "wfc2p": wfc2p.astype(bf16),
        "bfc2p": bfc2p,
    }


# ----------------------------------------------------------------------------
# Forward pass.
# ----------------------------------------------------------------------------
@jax.jit
def emotion_cnn_forward(x_nchw, prepped):
    B = x_nchw.shape[0]
    TB = min(8, max(1, B // 2))          # >=2 grid steps for v7x megacore (B>=2)
    Bp = -(-B // TB) * TB
    x = x_nchw[:, 0].astype(jnp.float32)                   # (B, 48, 48)
    if Bp != B:
        x = jnp.concatenate(
            [x, jnp.zeros((Bp - B, 48, 48), jnp.float32)], axis=0)
    xpad = jnp.pad(x, ((0, 0), (1, 1), (1, 1)))            # (Bp, 50, 50)

    # 4x4 patch of each pooled pixel, row order (b, a, c, h2, w2) with
    # h = 2*h2 + a, w = 2*w2 + c; lane r = pa*4 + pb.  Small bf16 glue.
    slabs_a = []
    for a in range(2):
        slabs_c = []
        for c in range(2):
            sl = xpad[:, 2 * a:2 * a + 48, 2 * c:2 * c + 48]
            sl = sl.reshape(Bp, 12, 4, 12, 4)
            sl = jnp.transpose(sl, (0, 1, 3, 2, 4)).reshape(Bp, 144, 16)
            slabs_c.append(sl)
        slabs_a.append(jnp.stack(slabs_c, axis=1))          # (Bp, 2, 144, 16)
    p1 = jnp.stack(slabs_a, axis=1).reshape(Bp, 576, 16).astype(jnp.bfloat16)

    ya = _conv_stage(p1, prepped["w1pool"], prepped["b1"],
                     prepped["w2p"], prepped["b2r"], TB=TB)  # (Bp, 144, 64) bf16
    xf = ya.reshape(Bp, 144 * 64)

    # TODO(synk): nn.Dropout(0.25) is train-mode only; eval forward is identity.
    logits = _fc_stage(xf, prepped["wfc1"], prepped["bfc1"],
                       prepped["wfc2p"], prepped["bfc2p"])   # (M, 128) f32
    return logits[:B, :7]


# ----------------------------------------------------------------------------
# Pure-JAX reference reproducing the PyTorch forward semantics.
# ----------------------------------------------------------------------------
def reference_forward(x, params):
    def conv(x, w, b):
        y = lax.conv_general_dilated(
            x, w, window_strides=(1, 1), padding=((1, 1), (1, 1)),
            dimension_numbers=("NCHW", "OIHW", "NCHW"), precision=HIGHEST)
        return y + b[None, :, None, None]

    def pool(y):
        return lax.reduce_window(y, -jnp.inf, lax.max,
                                 (1, 1, 2, 2), (1, 1, 2, 2), "VALID")

    y = pool(jnp.maximum(conv(x, params["conv1_w"], params["conv1_b"]), 0.0))
    y = pool(jnp.maximum(conv(y, params["conv2_w"], params["conv2_b"]), 0.0))
    flat = y.reshape(x.shape[0], -1)                   # PyTorch (c, h, w) flatten
    h = jnp.maximum(jnp.dot(flat, params["fc1_w"].T, precision=HIGHEST)
                    + params["fc1_b"], 0.0)
    return jnp.dot(h, params["fc2_w"].T, precision=HIGHEST) + params["fc2_b"]


def init_params(key):
    ks = jax.random.split(key, 8)

    def n(k, shape, scale):
        return scale * jax.random.normal(k, shape, jnp.float32)

    return {
        "conv1_w": n(ks[0], (32, 1, 3, 3), 0.30),
        "conv1_b": n(ks[1], (32,), 0.10),
        "conv2_w": n(ks[2], (64, 32, 3, 3), 0.06),
        "conv2_b": n(ks[3], (64,), 0.10),
        "fc1_w":   n(ks[4], (128, 64 * 12 * 12), 0.01),
        "fc1_b":   n(ks[5], (128,), 0.05),
        "fc2_w":   n(ks[6], (7, 128), 0.08),
        "fc2_b":   n(ks[7], (7,), 0.05),
    }


if __name__ == "__main__":
    root = jax.random.PRNGKey(0)
    k_x, k_p = jax.random.split(root)

    # fc1 expects 64*12*12, so the module implies a 1-channel 48x48 input.
    x = jax.random.normal(k_x, (2, 1, 48, 48), jnp.float32)
    params = init_params(k_p)

    prepped = jax.tree_util.tree_map(jax.block_until_ready, prepare_params(params))

    out = emotion_cnn_forward(x, prepped)
    out = jax.block_until_ready(out)

    ref = reference_forward(x, params)
    assert out.shape == (2, 7), out.shape
    np.testing.assert_allclose(np.asarray(out), np.asarray(ref),
                               rtol=2e-2, atol=2e-2)
    print("KERNEL_OK")
</pallas_src>

<mosaic_0001>
module attributes {stable_mosaic.version = 11 : i64} {
  func.func @kernel(%arg0: i32, %arg1: memref<1x576x16xbf16, #tpu.memory_space<vmem>>, %arg2: memref<16x128xbf16, #tpu.memory_space<vmem>>, %arg3: memref<1x32xf32, #tpu.memory_space<vmem>>, %arg4: memref<512x256xbf16, #tpu.memory_space<vmem>>, %arg5: memref<1x256xf32, #tpu.memory_space<vmem>>, %arg6: memref<1x144x64xbf16, #tpu.memory_space<vmem>>, %arg7: memref<1x4x13x13x32xbf16, #tpu.memory_space<vmem>>, %arg8: memref<144x512xbf16, #tpu.memory_space<vmem>>) attributes {dimension_semantics = [#tpu.dimension_semantics<parallel>], iteration_bounds = array<i64: 2>, scalar_prefetch = 0 : i64, scratch_operands = 2 : i64, tpu.core_type = #tpu.core_type<tc>, window_params = [{transform_indices = @transform_0, window_bounds = array<i64: 1, 576, 16>}, {pipeline_mode = #tpu.pipeline_mode<synchronous>, transform_indices = @transform_1, window_bounds = array<i64: 16, 128>}, {pipeline_mode = #tpu.pipeline_mode<synchronous>, transform_indices = @transform_2, window_bounds = array<i64: 1, 32>}, {pipeline_mode = #tpu.pipeline_mode<synchronous>, transform_indices = @transform_3, window_bounds = array<i64: 512, 256>}, {pipeline_mode = #tpu.pipeline_mode<synchronous>, transform_indices = @transform_4, window_bounds = array<i64: 1, 256>}, {transform_indices = @transform_5, window_bounds = array<i64: 1, 144, 64>}]} {
    %c0 = arith.constant 0 : index
    %c0_0 = arith.constant 0 : index
    %c0_1 = arith.constant 0 : index
    %0 = vector.load %arg1[%c0, %c0_0, %c0_1] : memref<1x576x16xbf16, #tpu.memory_space<vmem>>, vector<1x576x16xbf16>
    %1 = vector.shape_cast %0 : vector<1x576x16xbf16> to vector<576x16xbf16>
    %c0_2 = arith.constant 0 : index
    %c0_3 = arith.constant 0 : index
    %2 = vector.load %arg2[%c0_2, %c0_3] : memref<16x128xbf16, #tpu.memory_space<vmem>>, vector<16x128xbf16>
    %cst = arith.constant dense<0.000000e+00> : vector<576x128xf32>
    %3 = tpu.matmul %1, %2, %cst {dimension_numbers = #tpu.dot_dimension_numbers<[1], [0], [0], [1], [0, 0, 1, 1], [], []>} : vector<576x16xbf16>, vector<16x128xbf16>, vector<576x128xf32> -> vector<576x128xf32>
    %c64_i32 = arith.constant 64 : i32
    %4 = tpu.dynamic_rotate %3 by %c64_i32 dim 1 : vector<576x128xf32>, i32 -> vector<576x128xf32>
    %5 = arith.maximumf %3, %4 : vector<576x128xf32>
    %c96_i32 = arith.constant 96 : i32
    %6 = tpu.dynamic_rotate %5 by %c96_i32 dim 1 : vector<576x128xf32>, i32 -> vector<576x128xf32>
    %7 = arith.maximumf %5, %6 : vector<576x128xf32>
    %8 = vector.extract_strided_slice %7 {offsets = [0, 0], sizes = [576, 32], strides = [1, 1]} : vector<576x128xf32> to vector<576x32xf32>
    %c0_4 = arith.constant 0 : index
    %c0_5 = arith.constant 0 : index
    %9 = vector.load %arg3[%c0_4, %c0_5] : memref<1x32xf32, #tpu.memory_space<vmem>>, vector<1x32xf32>
    %10 = vector.broadcast %9 : vector<1x32xf32> to vector<576x32xf32>
    %11 = arith.addf %8, %10 : vector<576x32xf32>
    %cst_6 = arith.constant 0.000000e+00 : f32
    %12 = vector.broadcast %cst_6 : f32 to vector<576x32xf32>
    %13 = arith.maximumf %11, %12 : vector<576x32xf32>
    %14 = arith.truncf %13 : vector<576x32xf32> to vector<576x32xbf16>
    %15 = vector.shape_cast %14 : vector<576x32xbf16> to vector<1x2x2x144x32xbf16>
    %cst_7 = arith.constant 0.000000e+00 : bf16
    %16 = vector.broadcast %cst_7 : bf16 to vector<1x2x1x13x32xbf16>
    %c0_8 = arith.constant 0 : index
    %c0_9 = arith.constant 0 : index
    %c0_10 = arith.constant 0 : index
    %c0_11 = arith.constant 0 : index
    %c0_12 = arith.constant 0 : index
    %17 = vector.load %arg7[%c0_8, %c0_9, %c0_10, %c0_11, %c0_12] : memref<1x4x13x13x32xbf16, #tpu.memory_space<vmem>>, vector<1x2x1x13x32xbf16>
    tpu.vector_store %arg7[%c0_8, %c0_9, %c0_10, %c0_11, %c0_12], %16 {strides = array<i32>} : memref<1x4x13x13x32xbf16, #tpu.memory_space<vmem>>, vector<1x2x1x13x32xbf16>,
    %cst_13 = arith.constant 0.000000e+00 : bf16
    %18 = vector.broadcast %cst_13 : bf16 to vector<1x2x1x13x32xbf16>
    %c0_14 = arith.constant 0 : index
    %c2 = arith.constant 2 : index
    %c12 = arith.constant 12 : index
    %c0_15 = arith.constant 0 : index
    %c0_16 = arith.constant 0 : index
    %19 = vector.load %arg7[%c0_14, %c2, %c12, %c0_15, %c0_16] : memref<1x4x13x13x32xbf16, #tpu.memory_space<vmem>>, vector<1x2x1x13x32xbf16>
    tpu.vector_store %arg7[%c0_14, %c2, %c12, %c0_15, %c0_16], %18 {strides = array<i32>} : memref<1x4x13x13x32xbf16, #tpu.memory_space<vmem>>, vector<1x2x1x13x32xbf16>,
    %cst_17 = arith.constant 0.000000e+00 : bf16
    %20 = vector.broadcast %cst_17 : bf16 to vector<1x1x13x1x32xbf16>
    %c0_18 = arith.constant 0 : index
    %c0_19 = arith.constant 0 : index
    %c0_20 = arith.constant 0 : index
    %c0_21 = arith.constant 0 : index
    %c0_22 = arith.constant 0 : index
    %21 = vector.load %arg7[%c0_18, %c0_19, %c0_20, %c0_21, %c0_22] : memref<1x4x13x13x32xbf16, #tpu.memory_space<vmem>>, vector<1x1x13x1x32xbf16>
    tpu.vector_store %arg7[%c0_18, %c0_19, %c0_20, %c0_21, %c0_22], %20 {strides = array<i32>} : memref<1x4x13x13x32xbf16, #tpu.memory_space<vmem>>, vector<1x1x13x1x32xbf16>,
    %cst_23 = arith.constant 0.000000e+00 : bf16
    %22 = vector.broadcast %cst_23 : bf16 to vector<1x1x13x1x32xbf16>
    %c0_24 = arith.constant 0 : index
    %c2_25 = arith.constant 2 : index
    %c0_26 = arith.constant 0 : index
    %c0_27 = arith.constant 0 : index
    %c0_28 = arith.constant 0 : index
    %23 = vector.load %arg7[%c0_24, %c2_25, %c0_26, %c0_27, %c0_28] : memref<1x4x13x13x32xbf16, #tpu.memory_space<vmem>>, vector<1x1x13x1x32xbf16>
    tpu.vector_store %arg7[%c0_24, %c2_25, %c0_26, %c0_27, %c0_28], %22 {strides = array<i32>} : memref<1x4x13x13x32xbf16, #tpu.memory_space<vmem>>, vector<1x1x13x1x32xbf16>,
    %cst_29 = arith.constant 0.000000e+00 : bf16
    %24 = vector.broadcast %cst_29 : bf16 to vector<1x1x13x1x32xbf16>
    %c0_30 = arith.constant 0 : index
    %c1 = arith.constant 1 : index
    %c0_31 = arith.constant 0 : index
    %c12_32 = arith.constant 12 : index
    %c0_33 = arith.constant 0 : index
    %25 = vector.load %arg7[%c0_30, %c1, %c0_31, %c12_32, %c0_33] : memref<1x4x13x13x32xbf16, #tpu.memory_space<vmem>>, vector<1x1x13x1x32xbf16>
    tpu.vector_store %arg7[%c0_30, %c1, %c0_31, %c12_32, %c0_33], %24 {strides = array<i32>} : memref<1x4x13x13x32xbf16, #tpu.memory_space<vmem>>, vector<1x1x13x1x32xbf16>,
    %cst_34 = arith.constant 0.000000e+00 : bf16
    %26 = vector.broadcast %cst_34 : bf16 to vector<1x1x13x1x32xbf16>
    %c0_35 = arith.constant 0 : index
    %c3 = arith.constant 3 : index
    %c0_36 = arith.constant 0 : index
    %c12_37 = arith.constant 12 : index
    %c0_38 = arith.constant 0 : index
    %27 = vector.load %arg7[%c0_35, %c3, %c0_36, %c12_37, %c0_38] : memref<1x4x13x13x32xbf16, #tpu.memory_space<vmem>>, vector<1x1x13x1x32xbf16>
    tpu.vector_store %arg7[%c0_35, %c3, %c0_36, %c12_37, %c0_38], %26 {strides = array<i32>} : memref<1x4x13x13x32xbf16, #tpu.memory_space<vmem>>, vector<1x1x13x1x32xbf16>,
    %28 = vector.extract_strided_slice %15 {offsets = [0, 0, 0, 0, 0], sizes = [1, 1, 1, 144, 32], strides = [1, 1, 1, 1, 1]} : vector<1x2x2x144x32xbf16> to vector<1x1x1x144x32xbf16>
    %29 = vector.shape_cast %28 : vector<1x1x1x144x32xbf16> to vector<1x144x32xbf16>
    %30 = vector.shape_cast %29 : vector<1x144x32xbf16> to vector<1x1x12x12x32xbf16>
    %c0_39 = arith.constant 0 : index
    %c3_40 = arith.constant 3 : index
    %c0_41 = arith.constant 0 : index
    %c0_42 = arith.constant 0 : index
    %c0_43 = arith.constant 0 : index
    %31 = vector.load %arg7[%c0_39, %c3_40, %c0_41, %c0_42, %c0_43] : memref<1x4x13x13x32xbf16, #tpu.memory_space<vmem>>, vector<1x1x12x12x32xbf16>
    tpu.vector_store %arg7[%c0_39, %c3_40, %c0_41, %c0_42, %c0_43], %30 {strides = array<i32>} : memref<1x4x13x13x32xbf16, #tpu.memory_space<vmem>>, vector<1x1x12x12x32xbf16>,
    %32 = vector.extract_strided_slice %15 {offsets = [0, 0, 1, 0, 0], sizes = [1, 1, 1, 144, 32], strides = [1, 1, 1, 1, 1]} : vector<1x2x2x144x32xbf16> to vector<1x1x1x144x32xbf16>
    %33 = vector.shape_cast %32 : vector<1x1x1x144x32xbf16> to vector<1x144x32xbf16>
    %34 = vector.shape_cast %33 : vector<1x144x32xbf16> to vector<1x1x12x12x32xbf16>
    %c0_44 = arith.constant 0 : index
    %c2_45 = arith.constant 2 : index
    %c0_46 = arith.constant 0 : index
    %c1_47 = arith.constant 1 : index
    %c0_48 = arith.constant 0 : index
    %35 = vector.load %arg7[%c0_44, %c2_45, %c0_46, %c1_47, %c0_48] : memref<1x4x13x13x32xbf16, #tpu.memory_space<vmem>>, vector<1x1x12x12x32xbf16>
    tpu.vector_store %arg7[%c0_44, %c2_45, %c0_46, %c1_47, %c0_48], %34 {strides = array<i32>} : memref<1x4x13x13x32xbf16, #tpu.memory_space<vmem>>, vector<1x1x12x12x32xbf16>,
    %36 = vector.extract_strided_slice %15 {offsets = [0, 1, 0, 0, 0], sizes = [1, 1, 1, 144, 32], strides = [1, 1, 1, 1, 1]} : vector<1x2x2x144x32xbf16> to vector<1x1x1x144x32xbf16>
    %37 = vector.shape_cast %36 : vector<1x1x1x144x32xbf16> to vector<1x144x32xbf16>
    %38 = vector.shape_cast %37 : vector<1x144x32xbf16> to vector<1x1x12x12x32xbf16>
    %c0_49 = arith.constant 0 : index
    %c1_50 = arith.constant 1 : index
    %c1_51 = arith.constant 1 : index
    %c0_52 = arith.constant 0 : index
    %c0_53 = arith.constant 0 : index
    %39 = vector.load %arg7[%c0_49, %c1_50, %c1_51, %c0_52, %c0_53] : memref<1x4x13x13x32xbf16, #tpu.memory_space<vmem>>, vector<1x1x12x12x32xbf16>
    tpu.vector_store %arg7[%c0_49, %c1_50, %c1_51, %c0_52, %c0_53], %38 {strides = array<i32>} : memref<1x4x13x13x32xbf16, #tpu.memory_space<vmem>>, vector<1x1x12x12x32xbf16>,
    %40 = vector.extract_strided_slice %15 {offsets = [0, 1, 1, 0, 0], sizes = [1, 1, 1, 144, 32], strides = [1, 1, 1, 1, 1]} : vector<1x2x2x144x32xbf16> to vector<1x1x1x144x32xbf16>
    %41 = vector.shape_cast %40 : vector<1x1x1x144x32xbf16> to vector<1x144x32xbf16>
    %42 = vector.shape_cast %41 : vector<1x144x32xbf16> to vector<1x1x12x12x32xbf16>
    %c0_54 = arith.constant 0 : index
    %c0_55 = arith.constant 0 : index
    %c1_56 = arith.constant 1 : index
    %c1_57 = arith.constant 1 : index
    %c0_58 = arith.constant 0 : index
    %43 = vector.load %arg7[%c0_54, %c0_55, %c1_56, %c1_57, %c0_58] : memref<1x4x13x13x32xbf16, #tpu.memory_space<vmem>>, vector<1x1x12x12x32xbf16>
    tpu.vector_store %arg7[%c0_54, %c0_55, %c1_56, %c1_57, %c0_58], %42 {strides = array<i32>} : memref<1x4x13x13x32xbf16, #tpu.memory_space<vmem>>, vector<1x1x12x12x32xbf16>,
    %c0_59 = arith.constant 0 : index
    %c0_60 = arith.constant 0 : index
    %c0_61 = arith.constant 0 : index
    %c0_62 = arith.constant 0 : index
    %c0_63 = arith.constant 0 : index
    %44 = vector.load %arg7[%c0_59, %c0_60, %c0_61, %c0_62, %c0_63] : memref<1x4x13x13x32xbf16, #tpu.memory_space<vmem>>, vector<1x1x12x12x32xbf16>
    %45 = vector.shape_cast %44 : vector<1x1x12x12x32xbf16> to vector<144x32xbf16>
    %c0_64 = arith.constant 0 : index
    %c0_65 = arith.constant 0 : index
    %46 = vector.load %arg8[%c0_64, %c0_65] : memref<144x512xbf16, #tpu.memory_space<vmem>>, vector<144x32xbf16>
    tpu.vector_store %arg8[%c0_64, %c0_65], %45 {strides = array<i32>} : memref<144x512xbf16, #tpu.memory_space<vmem>>, vector<144x32xbf16>,
    %c0_66 = arith.constant 0 : index
    %c1_67 = arith.constant 1 : index
    %c0_68 = arith.constant 0 : index
    %c0_69 = arith.constant 0 : index
    %c0_70 = arith.constant 0 : index
    %47 = vector.load %arg7[%c0_66, %c1_67, %c0_68, %c0_69, %c0_70] : memref<1x4x13x13x32xbf16, #tpu.memory_space<vmem>>, vector<1x1x12x12x32xbf16>
    %48 = vector.shape_cast %47 : vector<1x1x12x12x32xbf16> to vector<144x32xbf16>
    %c0_71 = arith.constant 0 : index
    %c32 = arith.constant 32 : index
    %49 = vector.load %arg8[%c0_71, %c32] : memref<144x512xbf16, #tpu.memory_space<vmem>>, vector<144x32xbf16>
    tpu.vector_store %arg8[%c0_71, %c32], %48 {strides = array<i32>} : memref<144x512xbf16, #tpu.memory_space<vmem>>, vector<144x32xbf16>,
    %c0_72 = arith.constant 0 : index
    %c0_73 = arith.constant 0 : index
    %c0_74 = arith.constant 0 : index
    %c1_75 = arith.constant 1 : index
    %c0_76 = arith.constant 0 : index
    %50 = vector.load %arg7[%c0_72, %c0_73, %c0_74, %c1_75, %c0_76] : memref<1x4x13x13x32xbf16, #tpu.memory_space<vmem>>, vector<1x1x12x12x32xbf16>
    %51 = vector.shape_cast %50 : vector<1x1x12x12x32xbf16> to vector<144x32xbf16>
    %c0_77 = arith.constant 0 : index
    %c64 = arith.constant 64 : index
    %52 = vector.load %arg8[%c0_77, %c64] : memref<144x512xbf16, #tpu.memory_space<vmem>>, vector<144x32xbf16>
    tpu.vector_store %arg8[%c0_77, %c64], %51 {strides = array<i32>} : memref<144x512xbf16, #tpu.memory_space<vmem>>, vector<144x32xbf16>,
    %c0_78 = arith.constant 0 : index
    %c1_79 = arith.constant 1 : index
    %c0_80 = arith.constant 0 : index
    %c1_81 = arith.constant 1 : index
    %c0_82 = arith.constant 0 : index
    %53 = vector.load %arg7[%c0_78, %c1_79, %c0_80, %c1_81, %c0_82] : memref<1x4x13x13x32xbf16, #tpu.memory_space<vmem>>, vector<1x1x12x12x32xbf16>
    %54 = vector.shape_cast %53 : vector<1x1x12x12x32xbf16> to vector<144x32xbf16>
    %c0_83 = arith.constant 0 : index
    %c96 = arith.constant 96 : index
    %55 = vector.load %arg8[%c0_83, %c96] : memref<144x512xbf16, #tpu.memory_space<vmem>>, vector<144x32xbf16>
    tpu.vector_store %arg8[%c0_83, %c96], %54 {strides = array<i32>} : memref<144x512xbf16, #tpu.memory_space<vmem>>, vector<144x32xbf16>,
    %c0_84 = arith.constant 0 : index
    %c2_85 = arith.constant 2 : index
    %c0_86 = arith.constant 0 : index
    %c0_87 = arith.constant 0 : index
    %c0_88 = arith.constant 0 : index
    %56 = vector.load %arg7[%c0_84, %c2_85, %c0_86, %c0_87, %c0_88] : memref<1x4x13x13x32xbf16, #tpu.memory_space<vmem>>, vector<1x1x12x12x32xbf16>
    %57 = vector.shape_cast %56 : vector<1x1x12x12x32xbf16> to vector<144x32xbf16>
    %c0_89 = arith.constant 0 : index
    %c128 = arith.constant 128 : index
    %58 = vector.load %arg8[%c0_89, %c128] : memref<144x512xbf16, #tpu.memory_space<vmem>>, vector<144x32xbf16>
    tpu.vector_store %arg8[%c0_89, %c128], %57 {strides = array<i32>} : memref<144x512xbf16, #tpu.memory_space<vmem>>, vector<144x32xbf16>,
    %c0_90 = arith.constant 0 : index
    %c3_91 = arith.constant 3 : index
    %c0_92 = arith.constant 0 : index
    %c0_93 = arith.constant 0 : index
    %c0_94 = arith.constant 0 : index
    %59 = vector.load %arg7[%c0_90, %c3_91, %c0_92, %c0_93, %c0_94] : memref<1x4x13x13x32xbf16, #tpu.memory_space<vmem>>, vector<1x1x12x12x32xbf16>
    %60 = vector.shape_cast %59 : vector<1x1x12x12x32xbf16> to vector<144x32xbf16>
    %c0_95 = arith.constant 0 : index
    %c160 = arith.constant 160 : index
    %61 = vector.load %arg8[%c0_95, %c160] : memref<144x512xbf16, #tpu.memory_space<vmem>>, vector<144x32xbf16>
    tpu.vector_store %arg8[%c0_95, %c160], %60 {strides = array<i32>} : memref<144x512xbf16, #tpu.memory_space<vmem>>, vector<144x32xbf16>,
    %c0_96 = arith.constant 0 : index
    %c2_97 = arith.constant 2 : index
    %c0_98 = arith.constant 0 : index
    %c1_99 = arith.constant 1 : index
    %c0_100 = arith.constant 0 : index
    %62 = vector.load %arg7[%c0_96, %c2_97, %c0_98, %c1_99, %c0_100] : memref<1x4x13x13x32xbf16, #tpu.memory_space<vmem>>, vector<1x1x12x12x32xbf16>
    %63 = vector.shape_cast %62 : vector<1x1x12x12x32xbf16> to vector<144x32xbf16>
    %c0_101 = arith.constant 0 : index
    %c192 = arith.constant 192 : index
    %64 = vector.load %arg8[%c0_101, %c192] : memref<144x512xbf16, #tpu.memory_space<vmem>>, vector<144x32xbf16>
    tpu.vector_store %arg8[%c0_101, %c192], %63 {strides = array<i32>} : memref<144x512xbf16, #tpu.memory_space<vmem>>, vector<144x32xbf16>,
    %c0_102 = arith.constant 0 : index
    %c3_103 = arith.constant 3 : index
    %c0_104 = arith.constant 0 : index
    %c1_105 = arith.constant 1 : index
    %c0_106 = arith.constant 0 : index
    %65 = vector.load %arg7[%c0_102, %c3_103, %c0_104, %c1_105, %c0_106] : memref<1x4x13x13x32xbf16, #tpu.memory_space<vmem>>, vector<1x1x12x12x32xbf16>
    %66 = vector.shape_cast %65 : vector<1x1x12x12x32xbf16> to vector<144x32xbf16>
    %c0_107 = arith.constant 0 : index
    %c224 = arith.constant 224 : index
    %67 = vector.load %arg8[%c0_107, %c224] : memref<144x512xbf16, #tpu.memory_space<vmem>>, vector<144x32xbf16>
    tpu.vector_store %arg8[%c0_107, %c224], %66 {strides = array<i32>} : memref<144x512xbf16, #tpu.memory_space<vmem>>, vector<144x32xbf16>,
    %c0_108 = arith.constant 0 : index
    %c0_109 = arith.constant 0 : index
    %c1_110 = arith.constant 1 : index
    %c0_111 = arith.constant 0 : index
    %c0_112 = arith.constant 0 : index
    %68 = vector.load %arg7[%c0_108, %c0_109, %c1_110, %c0_111, %c0_112] : memref<1x4x13x13x32xbf16, #tpu.memory_space<vmem>>, vector<1x1x12x12x32xbf16>
    %69 = vector.shape_cast %68 : vector<1x1x12x12x32xbf16> to vector<144x32xbf16>
    %c0_113 = arith.constant 0 : index
    %c256 = arith.constant 256 : index
    %70 = vector.load %arg8[%c0_113, %c256] : memref<144x512xbf16, #tpu.memory_space<vmem>>, vector<144x32xbf16>
    tpu.vector_store %arg8[%c0_113, %c256], %69 {strides = array<i32>} : memref<144x512xbf16, #tpu.memory_space<vmem>>, vector<144x32xbf16>,
    %c0_114 = arith.constant 0 : index
    %c1_115 = arith.constant 1 : index
    %c1_116 = arith.constant 1 : index
    %c0_117 = arith.constant 0 : index
    %c0_118 = arith.constant 0 : index
    %71 = vector.load %arg7[%c0_114, %c1_115, %c1_116, %c0_117, %c0_118] : memref<1x4x13x13x32xbf16, #tpu.memory_space<vmem>>, vector<1x1x12x12x32xbf16>
    %72 = vector.shape_cast %71 : vector<1x1x12x12x32xbf16> to vector<144x32xbf16>
    %c0_119 = arith.constant 0 : index
    %c288 = arith.constant 288 : index
    %73 = vector.load %arg8[%c0_119, %c288] : memref<144x512xbf16, #tpu.memory_space<vmem>>, vector<144x32xbf16>
    tpu.vector_store %arg8[%c0_119, %c288], %72 {strides = array<i32>} : memref<144x512xbf16, #tpu.memory_space<vmem>>, vector<144x32xbf16>,
    %c0_120 = arith.constant 0 : index
    %c0_121 = arith.constant 0 : index
    %c1_122 = arith.constant 1 : index
    %c1_123 = arith.constant 1 : index
    %c0_124 = arith.constant 0 : index
    %74 = vector.load %arg7[%c0_120, %c0_121, %c1_122, %c1_123, %c0_124] : memref<1x4x13x13x32xbf16, #tpu.memory_space<vmem>>, vector<1x1x12x12x32xbf16>
    %75 = vector.shape_cast %74 : vector<1x1x12x12x32xbf16> to vector<144x32xbf16>
    %c0_125 = arith.constant 0 : index
    %c320 = arith.constant 320 : index
    %76 = vector.load %arg8[%c0_125, %c320] : memref<144x512xbf16, #tpu.memory_space<vmem>>, vector<144x32xbf16>
    tpu.vector_store %arg8[%c0_125, %c320], %75 {strides = array<i32>} : memref<144x512xbf16, #tpu.memory_space<vmem>>, vector<144x32xbf16>,
    %c0_126 = arith.constant 0 : index
    %c1_127 = arith.constant 1 : index
    %c1_128 = arith.constant 1 : index
    %c1_129 = arith.constant 1 : index
    %c0_130 = arith.constant 0 : index
    %77 = vector.load %arg7[%c0_126, %c1_127, %c1_128, %c1_129, %c0_130] : memref<1x4x13x13x32xbf16, #tpu.memory_space<vmem>>, vector<1x1x12x12x32xbf16>
    %78 = vector.shape_cast %77 : vector<1x1x12x12x32xbf16> to vector<144x32xbf16>
    %c0_131 = arith.constant 0 : index
    %c352 = arith.constant 352 : index
    %79 = vector.load %arg8[%c0_131, %c352] : memref<144x512xbf16, #tpu.memory_space<vmem>>, vector<144x32xbf16>
    tpu.vector_store %arg8[%c0_131, %c352], %78 {strides = array<i32>} : memref<144x512xbf16, #tpu.memory_space<vmem>>, vector<144x32xbf16>,
    %c0_132 = arith.constant 0 : index
    %c2_133 = arith.constant 2 : index
    %c1_134 = arith.constant 1 : index
    %c0_135 = arith.constant 0 : index
    %c0_136 = arith.constant 0 : index
    %80 = vector.load %arg7[%c0_132, %c2_133, %c1_134, %c0_135, %c0_136] : memref<1x4x13x13x32xbf16, #tpu.memory_space<vmem>>, vector<1x1x12x12x32xbf16>
    %81 = vector.shape_cast %80 : vector<1x1x12x12x32xbf16> to vector<144x32xbf16>
    %c0_137 = arith.constant 0 : index
    %c384 = arith.constant 384 : index
    %82 = vector.load %arg8[%c0_137, %c384] : memref<144x512xbf16, #tpu.memory_space<vmem>>, vector<144x32xbf16>
    tpu.vector_store %arg8[%c0_137, %c384], %81 {strides = array<i32>} : memref<144x512xbf16, #tpu.memory_space<vmem>>, vector<144x32xbf16>,
    %c0_138 = arith.constant 0 : index
    %c3_139 = arith.constant 3 : index
    %c1_140 = arith.constant 1 : index
    %c0_141 = arith.constant 0 : index
    %c0_142 = arith.constant 0 : index
    %83 = vector.load %arg7[%c0_138, %c3_139, %c1_140, %c0_141, %c0_142] : memref<1x4x13x13x32xbf16, #tpu.memory_space<vmem>>, vector<1x1x12x12x32xbf16>
    %84 = vector.shape_cast %83 : vector<1x1x12x12x32xbf16> to vector<144x32xbf16>
    %c0_143 = arith.constant 0 : index
    %c416 = arith.constant 416 : index
    %85 = vector.load %arg8[%c0_143, %c416] : memref<144x512xbf16, #tpu.memory_space<vmem>>, vector<144x32xbf16>
    tpu.vector_store %arg8[%c0_143, %c416], %84 {strides = array<i32>} : memref<144x512xbf16, #tpu.memory_space<vmem>>, vector<144x32xbf16>,
    %c0_144 = arith.constant 0 : index
    %c2_145 = arith.constant 2 : index
    %c1_146 = arith.constant 1 : index
    %c1_147 = arith.constant 1 : index
    %c0_148 = arith.constant 0 : index
    %86 = vector.load %arg7[%c0_144, %c2_145, %c1_146, %c1_147, %c0_148] : memref<1x4x13x13x32xbf16, #tpu.memory_space<vmem>>, vector<1x1x12x12x32xbf16>
    %87 = vector.shape_cast %86 : vector<1x1x12x12x32xbf16> to vector<144x32xbf16>
    %c0_149 = arith.constant 0 : index
    %c448 = arith.constant 448 : index
    %88 = vector.load %arg8[%c0_149, %c448] : memref<144x512xbf16, #tpu.memory_space<vmem>>, vector<144x32xbf16>
    tpu.vector_store %arg8[%c0_149, %c448], %87 {strides = array<i32>} : memref<144x512xbf16, #tpu.memory_space<vmem>>, vector<144x32xbf16>,
    %c0_150 = arith.constant 0 : index
    %c3_151 = arith.constant 3 : index
    %c1_152 = arith.constant 1 : index
    %c1_153 = arith.constant 1 : index
    %c0_154 = arith.constant 0 : index
    %89 = vector.load %arg7[%c0_150, %c3_151, %c1_152, %c1_153, %c0_154] : memref<1x4x13x13x32xbf16, #tpu.memory_space<vmem>>, vector<1x1x12x12x32xbf16>
    %90 = vector.shape_cast %89 : vector<1x1x12x12x32xbf16> to vector<144x32xbf16>
    %c0_155 = arith.constant 0 : index
    %c480 = arith.constant 480 : index
    %91 = vector.load %arg8[%c0_155, %c480] : memref<144x512xbf16, #tpu.memory_space<vmem>>, vector<144x32xbf16>
    tpu.vector_store %arg8[%c0_155, %c480], %90 {strides = array<i32>} : memref<144x512xbf16, #tpu.memory_space<vmem>>, vector<144x32xbf16>,
    %c0_156 = arith.constant 0 : index
    %c0_157 = arith.constant 0 : index
    %92 = vector.load %arg8[%c0_156, %c0_157] : memref<144x512xbf16, #tpu.memory_space<vmem>>, vector<144x512xbf16>
    %c0_158 = arith.constant 0 : index
    %c0_159 = arith.constant 0 : index
    %93 = vector.load %arg4[%c0_158, %c0_159] : memref<512x256xbf16, #tpu.memory_space<vmem>>, vector<512x256xbf16>
    %cst_160 = arith.constant dense<0.000000e+00> : vector<144x256xf32>
    %94 = tpu.matmul %92, %93, %cst_160 {dimension_numbers = #tpu.dot_dimension_numbers<[1], [0], [0], [1], [0, 0, 1, 1], [], []>} : vector<144x512xbf16>, vector<512x256xbf16>, vector<144x256xf32> -> vector<144x256xf32>
    %c0_161 = arith.constant 0 : index
    %c0_162 = arith.constant 0 : index
    %95 = vector.load %arg5[%c0_161, %c0_162] : memref<1x256xf32, #tpu.memory_space<vmem>>, vector<1x256xf32>
    %96 = vector.broadcast %95 : vector<1x256xf32> to vector<144x256xf32>
    %97 = arith.addf %94, %96 : vector<144x256xf32>
    %cst_163 = arith.constant 0.000000e+00 : f32
    %98 = vector.broadcast %cst_163 : f32 to vector<144x256xf32>
    %99 = arith.maximumf %97, %98 : vector<144x256xf32>
    %c128_i32 = arith.constant 128 : i32
    %100 = tpu.dynamic_rotate %99 by %c128_i32 dim 1 : vector<144x256xf32>, i32 -> vector<144x256xf32>
    %101 = arith.maximumf %99, %100 : vector<144x256xf32>
    %c192_i32 = arith.constant 192 : i32
    %102 = tpu.dynamic_rotate %101 by %c192_i32 dim 1 : vector<144x256xf32>, i32 -> vector<144x256xf32>
    %103 = arith.maximumf %101, %102 : vector<144x256xf32>
    %104 = vector.extract_strided_slice %103 {offsets = [0, 0], sizes = [144, 64], strides = [1, 1]} : vector<144x256xf32> to vector<144x64xf32>
    %105 = vector.shape_cast %104 : vector<144x64xf32> to vector<1x144x64xf32>
    %106 = arith.truncf %105 : vector<1x144x64xf32> to vector<1x144x64xbf16>
    %c0_164 = arith.constant 0 : index
    %c0_165 = arith.constant 0 : index
    %c0_166 = arith.constant 0 : index
    %107 = vector.load %arg6[%c0_164, %c0_165, %c0_166] : memref<1x144x64xbf16, #tpu.memory_space<vmem>>, vector<1x144x64xbf16>
    tpu.vector_store %arg6[%c0_164, %c0_165, %c0_166], %106 {strides = array<i32>} : memref<1x144x64xbf16, #tpu.memory_space<vmem>>, vector<1x144x64xbf16>,
    return
  }
  func.func @transform_0(%arg0: i32) -> (i32, i32, i32) {
    %c0_i32 = arith.constant 0 : i32
    %c0_i32_0 = arith.constant 0 : i32
    %c0_i32_1 = arith.constant 0 : i32
    return %arg0, %c0_i32, %c0_i32_0 : i32, i32, i32
  }
  func.func @transform_1(%arg0: i32) -> (i32, i32) {
    %c0_i32 = arith.constant 0 : i32
    %c0_i32_0 = arith.constant 0 : i32
    %c0_i32_1 = arith.constant 0 : i32
    return %c0_i32, %c0_i32_0 : i32, i32
  }
  func.func @transform_2(%arg0: i32) -> (i32, i32) {
    %c0_i32 = arith.constant 0 : i32
    %c0_i32_0 = arith.constant 0 : i32
    %c0_i32_1 = arith.constant 0 : i32
    return %c0_i32, %c0_i32_0 : i32, i32
  }
  func.func @transform_3(%arg0: i32) -> (i32, i32) {
    %c0_i32 = arith.constant 0 : i32
    %c0_i32_0 = arith.constant 0 : i32
    %c0_i32_1 = arith.constant 0 : i32
    return %c0_i32, %c0_i32_0 : i32, i32
  }
  func.func @transform_4(%arg0: i32) -> (i32, i32) {
    %c0_i32 = arith.constant 0 : i32
    %c0_i32_0 = arith.constant 0 : i32
    %c0_i32_1 = arith.constant 0 : i32
    return %c0_i32, %c0_i32_0 : i32, i32
  }
  func.func @transform_5(%arg0: i32) -> (i32, i32, i32) {
    %c0_i32 = arith.constant 0 : i32
    %c0_i32_0 = arith.constant 0 : i32
    %c0_i32_1 = arith.constant 0 : i32
    return %arg0, %c0_i32, %c0_i32_0 : i32, i32, i32
  }
}

module attributes {stable_mosaic.version = 11 : i64} {
  func.func @kernel(%arg0: i32, %arg1: i32, %arg2: memref<2x2304xbf16, #tpu.memory_space<vmem>>, %arg3: memref<2304x128xbf16, #tpu.memory_space<vmem>>, %arg4: memref<1x128xf32, #tpu.memory_space<vmem>>, %arg5: memref<128x128xbf16, #tpu.memory_space<vmem>>, %arg6: memref<1x128xf32, #tpu.memory_space<vmem>>, %arg7: memref<2x128xf32, #tpu.memory_space<vmem>>, %arg8: memref<2x128xf32, #tpu.memory_space<vmem>>) attributes {dimension_semantics = [#tpu.dimension_semantics<parallel>, #tpu.dimension_semantics<arbitrary>], iteration_bounds = array<i64: 1, 4>, scalar_prefetch = 0 : i64, scratch_operands = 1 : i64, tpu.core_type = #tpu.core_type<tc>, window_params = [{transform_indices = @transform_0, window_bounds = array<i64: 2, 2304>}, {transform_indices = @transform_1, window_bounds = array<i64: 2304, 128>}, {pipeline_mode = #tpu.pipeline_mode<synchronous>, transform_indices = @transform_2, window_bounds = array<i64: 1, 128>}, {pipeline_mode = #tpu.pipeline_mode<synchronous>, transform_indices = @transform_3, window_bounds = array<i64: 128, 128>}, {pipeline_mode = #tpu.pipeline_mode<synchronous>, transform_indices = @transform_4, window_bounds = array<i64: 1, 128>}, {transform_indices = @transform_5, window_bounds = array<i64: 2, 128>}]} {
    %c0_i32 = arith.constant 0 : i32
    %0 = arith.cmpi eq, %arg1, %c0_i32 : i32
    %1 = arith.extui %0 : i1 to i32
    %c0_i32_0 = arith.constant 0 : i32
    %2 = arith.cmpi ne, %1, %c0_i32_0 : i32
    scf.if %2 {
      %cst_9 = arith.constant 0.000000e+00 : f32
      %12 = vector.broadcast %cst_9 : f32 to vector<2x128xf32>
      %c0_10 = arith.constant 0 : index
      %c0_11 = arith.constant 0 : index
      %13 = vector.load %arg8[%c0_10, %c0_11] : memref<2x128xf32, #tpu.memory_space<vmem>>, vector<2x128xf32>
      tpu.vector_store %arg8[%c0_10, %c0_11], %12 {strides = array<i32>} : memref<2x128xf32, #tpu.memory_space<vmem>>, vector<2x128xf32>,
    } else {
    }
    %c0 = arith.constant 0 : index
    %c0_1 = arith.constant 0 : index
    %3 = vector.load %arg8[%c0, %c0_1] : memref<2x128xf32, #tpu.memory_space<vmem>>, vector<2x128xf32>
    %c0_2 = arith.constant 0 : index
    %c0_3 = arith.constant 0 : index
    %4 = vector.load %arg2[%c0_2, %c0_3] : memref<2x2304xbf16, #tpu.memory_space<vmem>>, vector<2x2304xbf16>
    %c0_4 = arith.constant 0 : index
    %c0_5 = arith.constant 0 : index
    %5 = vector.load %arg3[%c0_4, %c0_5] : memref<2304x128xbf16, #tpu.memory_space<vmem>>, vector<2304x128xbf16>
    %cst = arith.constant dense<0.000000e+00> : vector<2x128xf32>
    %6 = tpu.matmul %4, %5, %cst {dimension_numbers = #tpu.dot_dimension_numbers<[1], [0], [0], [1], [0, 0, 1, 1], [], []>} : vector<2x2304xbf16>, vector<2304x128xbf16>, vector<2x128xf32> -> vector<2x128xf32>
    %7 = arith.addf %3, %6 : vector<2x128xf32>
    %c0_6 = arith.constant 0 : index
    %c0_7 = arith.constant 0 : index
    %8 = vector.load %arg8[%c0_6, %c0_7] : memref<2x128xf32, #tpu.memory_space<vmem>>, vector<2x128xf32>
    tpu.vector_store %arg8[%c0_6, %c0_7], %7 {strides = array<i32>} : memref<2x128xf32, #tpu.memory_space<vmem>>, vector<2x128xf32>,
    %c3_i32 = arith.constant 3 : i32
    %9 = arith.cmpi eq, %arg1, %c3_i32 : i32
    %10 = arith.extui %9 : i1 to i32
    %c0_i32_8 = arith.constant 0 : i32
    %11 = arith.cmpi ne, %10, %c0_i32_8 : i32
    scf.if %11 {
      %c0_9 = arith.constant 0 : index
      %c0_10 = arith.constant 0 : index
      %12 = vector.load %arg8[%c0_9, %c0_10] : memref<2x128xf32, #tpu.memory_space<vmem>>, vector<2x128xf32>
      %c0_11 = arith.constant 0 : index
      %c0_12 = arith.constant 0 : index
      %13 = vector.load %arg4[%c0_11, %c0_12] : memref<1x128xf32, #tpu.memory_space<vmem>>, vector<1x128xf32>
      %14 = vector.broadcast %13 : vector<1x128xf32> to vector<2x128xf32>
      %15 = arith.addf %12, %14 : vector<2x128xf32>
      %cst_13 = arith.constant 0.000000e+00 : f32
      %16 = vector.broadcast %cst_13 : f32 to vector<2x128xf32>
      %17 = arith.maximumf %15, %16 : vector<2x128xf32>
      %18 = arith.truncf %17 : vector<2x128xf32> to vector<2x128xbf16>
      %c0_14 = arith.constant 0 : index
      %c0_15 = arith.constant 0 : index
      %19 = vector.load %arg5[%c0_14, %c0_15] : memref<128x128xbf16, #tpu.memory_space<vmem>>, vector<128x128xbf16>
      %cst_16 = arith.constant dense<0.000000e+00> : vector<2x128xf32>
      %20 = tpu.matmul %18, %19, %cst_16 {dimension_numbers = #tpu.dot_dimension_numbers<[1], [0], [0], [1], [0, 0, 1, 1], [], []>} : vector<2x128xbf16>, vector<128x128xbf16>, vector<2x128xf32> -> vector<2x128xf32>
      %c0_17 = arith.constant 0 : index
      %c0_18 = arith.constant 0 : index
      %21 = vector.load %arg6[%c0_17, %c0_18] : memref<1x128xf32, #tpu.memory_space<vmem>>, vector<1x128xf32>
      %22 = vector.broadcast %21 : vector<1x128xf32> to vector<2x128xf32>
      %23 = arith.addf %20, %22 : vector<2x128xf32>
      %c0_19 = arith.constant 0 : index
      %c0_20 = arith.constant 0 : index
      %24 = vector.load %arg7[%c0_19, %c0_20] : memref<2x128xf32, #tpu.memory_space<vmem>>, vector<2x128xf32>
      tpu.vector_store %arg7[%c0_19, %c0_20], %23 {strides = array<i32>} : memref<2x128xf32, #tpu.memory_space<vmem>>, vector<2x128xf32>,
    } else {
    }
    return
  }
  func.func @transform_0(%arg0: i32, %arg1: i32) -> (i32, i32) {
    %c0_i32 = arith.constant 0 : i32
    return %arg0, %arg1 : i32, i32
  }
  func.func @transform_1(%arg0: i32, %arg1: i32) -> (i32, i32) {
    %c0_i32 = arith.constant 0 : i32
    %c0_i32_0 = arith.constant 0 : i32
    return %arg1, %c0_i32 : i32, i32
  }
  func.func @transform_2(%arg0: i32, %arg1: i32) -> (i32, i32) {
    %c0_i32 = arith.constant 0 : i32
    %c0_i32_0 = arith.constant 0 : i32
    %c0_i32_1 = arith.constant 0 : i32
    return %c0_i32, %c0_i32_0 : i32, i32
  }
  func.func @transform_3(%arg0: i32, %arg1: i32) -> (i32, i32) {
    %c0_i32 = arith.constant 0 : i32
    %c0_i32_0 = arith.constant 0 : i32
    %c0_i32_1 = arith.constant 0 : i32
    return %c0_i32, %c0_i32_0 : i32, i32
  }
  func.func @transform_4(%arg0: i32, %arg1: i32) -> (i32, i32) {
    %c0_i32 = arith.constant 0 : i32
    %c0_i32_0 = arith.constant 0 : i32
    %c0_i32_1 = arith.constant 0 : i32
    return %c0_i32, %c0_i32_0 : i32, i32
  }
  func.func @transform_5(%arg0: i32, %arg1: i32) -> (i32, i32) {
    %c0_i32 = arith.constant 0 : i32
    %c0_i32_0 = arith.constant 0 : i32
    return %arg0, %c0_i32 : i32, i32
  }
}

</mosaic_0001>

<bundles_post_ra>
// kernel: emotion_cnn_forward.3
= control target key start
LH: loop header
LB: loop body
LE: loop exit
PB: predicated region body
PF: predicated region fallthrough
CT: control target
= control target key end

     0   :  { %10 = vsyncpa [#allocation4], 0  ;;  %s2800_s18 = smov 0   ;;  %s2802_s19 = smov 0   ;;  %s3075_s0 = inlined_call_operand.vmem [shape: bf16[2,9216], index: 0, kind: input, shape index: {}]   ;;  %s3076_s1 = inlined_call_operand.vmem [shape: bf16[9216,128], index: 1, kind: input, shape index: {}]   ;;  %s3077_s2 = inlined_call_operand.vmem [shape: f32[1,128], index: 2, kind: input, shape index: {}]   ;;  %s3078_s3 = inlined_call_operand.vmem [shape: bf16[128,128], index: 3, kind: input, shape index: {}]   ;;  %s3079_s4 = inlined_call_operand.vmem [shape: f32[1,128], index: 4, kind: input, shape index: {}]   ;;  %s3080_s5 = inlined_call_operand.hbm [shape: f32[2,128], index: 5, kind: output, shape index: {}]  }
   0x1   :  { %s2804_s20 = smov 0  }
   0x2 LB: > { %s2129_s21 = sadd.s32 4294967295, %s2763_s20   ;;  %s25_s22 = sadd.s32 1, %s2759_s19  ;;  %s2763_s20 = sphi %s2804_s20, %s16_s20   ;;  %s2759_s19 = sphi %s2802_s19, %s3083_s19   ;;  %s2755_s18 = sphi %s2800_s18, %s3082_s18  }
   0x3   : > { %p26_p0 = scmp.ge.s32.totalorder %s25_s22, 4  ;;  %p2132_p1 = scmp.ge.s32.totalorder %s2763_s20, 1 }
   0x4   : > { %p217_p2 = scmp.lt.s32.totalorder %s2763_s20, 5 }
   0x5   : > { %s3085_s22 = smov (%p26_p0, %s25_s22), 0 }
   0x6   : > { %p218_p3 = pnand %p2132_p1, %p217_p2 }
   0x7   : > { %s248_s23 = smul.u32 (!%p218_p3), 18, %s2755_s18  ;;  %p2134_p6 = scmp.ne.s32.totalorder (!%p218_p3), %s2755_s18, 0 }
   0x8   : > { %221 = sbr.rel (%p218_p3) target bundleno = 659 (0x293), region = 40 }
   0x9   : > { %s257_s24 = smul.u32 (!%p218_p3), 288, %s2755_s18  ;;  %p251_p4 = scmp.lt.s32.totalorder (!%p218_p3), %s248_s23, 71 }
   0xb   : > { %p258_p5 = scmp.lt.s32.totalorder (!%p218_p3), %s257_s24, 1151 }
   0xf   : > { %s3087_s23 = smov (!%p251_p4, %s248_s23), 71  ;;  %s3089_s24 = smov (!%p258_p5, %s257_s24), 1151 }
  0x10   : > { %s2826_s27 = scalar_lea.vmem %s3075_s0, %s3087_s23  ;;  %s2133_s28 = sshll.u32 %s3089_s24, 2  ;;  %v2765_v0 = vmov (!%p2134_p6), 0.0  }
  0x11   : > { %s2831_s6 = scalar_lea.vmem %s3076_s1, %s2133_s28  ;;  %267 = sbr.rel (%p2134_p6) target bundleno = 24 (0x18), region = 44  ;;  %268 = vst [vmem:[#allocation2] sm:$0x3] (!%p2134_p6), %v2765_v0 }
  0x18 PF: > { %v2557_v1 = vld [vmem:[%s2831_s6 + $0x40] sm:$0xff]   ;;  %v2561_v5 = vld [vmem:[%s2831_s6 + $0x48] sm:$0xff]   ;;  %v2565_v9 = vld [vmem:[%s2831_s6 + $0x50] sm:$0xff]   ;;  %v568_v30 = vlaneseq  ;;  %v2766_v36 = vmov 1966171168   ;;  %p2280_p7 = scmp.ne.s32.totalorder %s2755_s18, 3 }
  0x19   : > { %v2558_v2 = vld [vmem:[%s2831_s6 + $0xc0] sm:$0xff]   ;;  %2295 = vmatprep.subr.bf16.mxu0 %v2557_v1  ;;  %v2562_v6 = vld [vmem:[%s2831_s6 + $0xc8] sm:$0xff]   ;;  %v2566_v10 = vld [vmem:[%s2831_s6 + $0xd0] sm:$0xff]   ;;  %v566_v37 = vunpack.c.l.s4 %v2766_v36  ;;  %vm2768_vm0 = vmmov (!%p2280_p7), 0  }
  0x1a   : > { %v2559_v3 = vld [vmem:[%s2831_s6] sm:$0xff]   ;;  %2317 = vmatprep.subr.bf16.mxu1 %v2558_v2  ;;  %v2563_v7 = vld [vmem:[%s2831_s6 + $0x8] sm:$0xff]   ;;  %v2567_v11 = vld [vmem:[%s2831_s6 + $0x10] sm:$0xff]   ;;  %v569_v34 = vshrl.u32 %v568_v30, 7 }
  0x1b   : > { %v2560_v4 = vld [vmem:[%s2831_s6 + $0x80] sm:$0xff]   ;;  %2296 = vmatpush3.bf16.msra.mxu0 %v2559_v3  ;;  %v2564_v8 = vld [vmem:[%s2831_s6 + $0x88] sm:$0xff]   ;;  %v2568_v12 = vld [vmem:[%s2831_s6 + $0x90] sm:$0xff]   ;;  %v567_v40 = vunpack.c.0.s8 %v566_v37 }
  0x1c   : > { %2318 = vmatpush3.bf16.msra.mxu1 %v2560_v4  ;;  %2297 = vmatprep.subr.bf16.mxu0 %v2561_v5  ;;  %v2569_v13 = vld [vmem:[%s2831_s6 + $0x58] sm:$0xff]   ;;  %v2573_v17 = vld [vmem:[%s2831_s6 + $0x60] sm:$0xff]   ;;  %v2577_v21 = vld [vmem:[%s2831_s6 + $0x68] sm:$0xff]  }
  0x1d   : > { %2319 = vmatprep.subr.bf16.mxu1 %v2562_v6  ;;  %v2570_v14 = vld [vmem:[%s2831_s6 + $0xd8] sm:$0xff]   ;;  %v2574_v18 = vld [vmem:[%s2831_s6 + $0xe0] sm:$0xff]   ;;  %v2578_v22 = vld [vmem:[%s2831_s6 + $0xe8] sm:$0xff]   ;;  %v2869_v42 = vsub.s32 %v567_v40, %v569_v34 }
  0x1e   : > { %v2571_v15 = vld [vmem:[%s2831_s6 + $0x18] sm:$0xff]   ;;  %v2575_v19 = vld [vmem:[%s2831_s6 + $0x20] sm:$0xff]   ;;  %v2579_v23 = vld [vmem:[%s2831_s6 + $0x28] sm:$0xff]  }
  0x1f   : > { %2298 = vmatpush3.bf16.msra.mxu0 %v2563_v7  ;;  %v2572_v16 = vld [vmem:[%s2831_s6 + $0x98] sm:$0xff]   ;;  %v2576_v20 = vld [vmem:[%s2831_s6 + $0xa0] sm:$0xff]   ;;  %v2580_v24 = vld [vmem:[%s2831_s6 + $0xa8] sm:$0xff]  }
  0x20   : > { %2320 = vmatpush3.bf16.msra.mxu1 %v2564_v8  ;;  %2299 = vmatprep.subr.bf16.mxu0 %v2565_v9  ;;  %v2581_v25 = vld [vmem:[%s2831_s6 + $0x70] sm:$0xff]   ;;  %v2585_v29 = vld [vmem:[%s2831_s6 + $0x78] sm:$0xff]   ;;  %v2590_v35 = vld [vmem:[%s2831_s6 + $0x140] sm:$0xff]  }
  0x21   : > { %2321 = vmatprep.subr.bf16.mxu1 %v2566_v10  ;;  %v2582_v26 = vld [vmem:[%s2831_s6 + $0xf0] sm:$0xff]   ;;  %v2586_v31 = vld [vmem:[%s2831_s6 + $0xf8] sm:$0xff]   ;;  %v270_v38 = vld [vmem:[%s2826_s27] sm:$0xff] }
  0x22   : > { %v2583_v27 = vld [vmem:[%s2831_s6 + $0x30] sm:$0xff]   ;;  %v2587_v32 = vld [vmem:[%s2831_s6 + $0x38] sm:$0xff]   ;;  %v564_v39 = vcombine.high %v270_v38, %v270_v38  ;;  %v2592_v41 = vld [vmem:[%s2831_s6 + $0x1c0] sm:$0xff]   ;;  %v571_v43 = vrot.slane %v270_v38, %v2869_v42 }
  0x23   : > { %2300 = vmatpush3.bf16.msra.mxu0 %v2567_v11  ;;  %v2584_v28 = vld [vmem:[%s2831_s6 + $0xb0] sm:$0xff]   ;;  %v2588_v33 = vld [vmem:[%s2831_s6 + $0xb8] sm:$0xff]   ;;  %v2591_v49 = vld [vmem:[%s2831_s6 + $0x100] sm:$0xff]  }
  0x24   : > { %2322 = vmatpush3.bf16.msra.mxu1 %v2568_v12  ;;  %2301 = vmatprep.subr.bf16.mxu0 %v2569_v13  ;;  %v2873_v44 = vrot.slane %v564_v39, %v2869_v42  ;;  %v579_v45 = vcombine.high %v571_v43, %v571_v43  ;;  %v587_v46 = vrot.slane %v571_v43, %v2869_v42  ;;  %v2594_v52 = vld [vmem:[%s2831_s6 + $0x148] sm:$0xff]   ;;  %v2593_v54 = vld [vmem:[%s2831_s6 + $0x180] sm:$0xff]   ;;  %v2598_v58 = vld [vmem:[%s2831_s6 + $0x150] sm:$0xff]  }
  0x25   : > { %2323 = vmatprep.subr.bf16.mxu1 %v2570_v14  ;;  %v2596_v55 = vld [vmem:[%s2831_s6 + $0x1c8] sm:$0xff]   ;;  %v2600_v60 = vld [vmem:[%s2831_s6 + $0x1d0] sm:$0xff]   ;;  %v2602_v62 = vld [vmem:[%s2831_s6 + $0x158] sm:$0xff]  }
  0x26   : > { %v580_v47 = vcombine.high %v2873_v44, %v2873_v44  ;;  %v601_v48 = vrot.slane %v579_v45, %v2869_v42  ;;  %v609_v51 = vcombine.high %v587_v46, %v587_v46  ;;  %v2595_v57 = vld [vmem:[%s2831_s6 + $0x108] sm:$0xff]   ;;  %v2599_v61 = vld [vmem:[%s2831_s6 + $0x110] sm:$0xff]   ;;  %v2604_v0 = vld [vmem:[%s2831_s6 + $0x1d8] sm:$0xff]  }
  0x27   : > { %2302 = vmatpush3.bf16.msra.mxu0 %v2571_v15  ;;  %v2597_v59 = vld [vmem:[%s2831_s6 + $0x188] sm:$0xff]   ;;  %v2601_v63 = vld [vmem:[%s2831_s6 + $0x190] sm:$0xff]   ;;  %v2603_v1 = vld [vmem:[%s2831_s6 + $0x118] sm:$0xff]  }
  0x28   : > { %2324 = vmatpush3.bf16.msra.mxu1 %v2572_v16  ;;  %2303 = vmatprep.subr.bf16.mxu0 %v2573_v17  ;;  %v608_v50 = vrot.slane %v580_v47, %v2869_v42  ;;  %v611_v53 = vcombine.high %v601_v48, %v601_v48  ;;  %v2606_v2 = vld [vmem:[%s2831_s6 + $0x160] sm:$0xff]   ;;  %v2605_v3 = vld [vmem:[%s2831_s6 + $0x198] sm:$0xff]   ;;  %v2610_v6 = vld [vmem:[%s2831_s6 + $0x168] sm:$0xff]  }
  0x29   : > { %2325 = vmatprep.subr.bf16.mxu1 %v2574_v18  ;;  %1598 = vmatprep.mubr.bf16.mxu0 %v601_v48  ;;  %v2608_v4 = vld [vmem:[%s2831_s6 + $0x1e0] sm:$0xff]   ;;  %v2612_v8 = vld [vmem:[%s2831_s6 + $0x1e8] sm:$0xff]   ;;  %v2614_v10 = vld [vmem:[%s2831_s6 + $0x170] sm:$0xff]   ;;  %v594_v18 = vrot.slane %v2873_v44, %v2869_v42 }
  0x2a   : > { %v612_v56 = vcombine.high %v608_v50, %v608_v50  ;;  %1638 = vmatprep.mubr.bf16.mxu1 %v611_v53  ;;  %v2607_v5 = vld [vmem:[%s2831_s6 + $0x120] sm:$0xff]   ;;  %v2611_v9 = vld [vmem:[%s2831_s6 + $0x128] sm:$0xff]   ;;  %v2616_v12 = vld [vmem:[%s2831_s6 + $0x1f0] sm:$0xff]  }
  0x2b   : > { %2304 = vmatpush3.bf16.msra.mxu0 %v2575_v19  ;;  %v2609_v7 = vld [vmem:[%s2831_s6 + $0x1a0] sm:$0xff]   ;;  %v2613_v11 = vld [vmem:[%s2831_s6 + $0x1a8] sm:$0xff]   ;;  %v2615_v13 = vld [vmem:[%s2831_s6 + $0x130] sm:$0xff]  }
  0x2c   : > { %2326 = vmatpush3.bf16.msra.mxu1 %v2576_v20  ;;  %2305 = vmatprep.subr.bf16.mxu0 %v2577_v21  ;;  %v2618_v14 = vld [vmem:[%s2831_s6 + $0x178] sm:$0xff]   ;;  %v2617_v15 = vld [vmem:[%s2831_s6 + $0x1b0] sm:$0xff]   ;;  %v2622_v19 = vld [vmem:[%s2831_s6 + $0x240] sm:$0xff]  }
  0x2d   : > { %2327 = vmatprep.subr.bf16.mxu1 %v2578_v22  ;;  %v2620_v16 = vld [vmem:[%s2831_s6 + $0x1f8] sm:$0xff]   ;;  %v2624_v21 = vld [vmem:[%s2831_s6 + $0x2c0] sm:$0xff]   ;;  %v2632_v30 = vld [vmem:[%s2831_s6 + $0x2d0] sm:$0xff]  }
  0x2e   : > { %v2619_v17 = vld [vmem:[%s2831_s6 + $0x138] sm:$0xff]   ;;  %v2623_v22 = vld [vmem:[%s2831_s6 + $0x200] sm:$0xff]   ;;  %v2642_v40 = vld [vmem:[%s2831_s6 + $0x268] sm:$0xff]  }
  0x2f   : > { %2306 = vmatpush3.bf16.msra.mxu0 %v2579_v23  ;;  %v2621_v20 = vld [vmem:[%s2831_s6 + $0x1b8] sm:$0xff]   ;;  %v610_v23 = vcombine.high %v594_v18, %v594_v18  ;;  %v2638_v36 = vld [vmem:[%s2831_s6 + $0x260] sm:$0xff]   ;;  %v2644_v43 = vld [vmem:[%s2831_s6 + $0x2e8] sm:$0xff]  }
  0x30   : > { %2328 = vmatpush3.bf16.msra.mxu1 %v2580_v24  ;;  %2307 = vmatprep.subr.bf16.mxu0 %v2581_v25  ;;  %v2626_v24 = vld [vmem:[%s2831_s6 + $0x248] sm:$0xff]   ;;  %v2625_v25 = vld [vmem:[%s2831_s6 + $0x280] sm:$0xff]   ;;  %v2636_v34 = vld [vmem:[%s2831_s6 + $0x2d8] sm:$0xff]  }
  0x31   : > { %2329 = vmatprep.subr.bf16.mxu1 %v2582_v26  ;;  %v2628_v26 = vld [vmem:[%s2831_s6 + $0x2c8] sm:$0xff]   ;;  %v2637_v37 = vld [vmem:[%s2831_s6 + $0x298] sm:$0xff]   ;;  %v2640_v38 = vld [vmem:[%s2831_s6 + $0x2e0] sm:$0xff]  }
  0x32   : > { %v2639_v39 = vld [vmem:[%s2831_s6 + $0x220] sm:$0xff]   ;;  %v2643_v44 = vld [vmem:[%s2831_s6 + $0x228] sm:$0xff]   ;;  %v2647_v53 = vld [vmem:[%s2831_s6 + $0x230] sm:$0xff]  }
  0x33   : > { %2308 = vmatpush3.bf16.msra.mxu0 %v2583_v27  ;;  %v2627_v27 = vld [vmem:[%s2831_s6 + $0x208] sm:$0xff]  }
  0x34   : > { %2330 = vmatpush3.bf16.msra.mxu1 %v2584_v28  ;;  %2309 = vmatprep.subr.bf16.mxu0 %v2585_v29  ;;  %v2630_v28 = vld [vmem:[%s2831_s6 + $0x250] sm:$0xff]   ;;  %v2629_v29 = vld [vmem:[%s2831_s6 + $0x288] sm:$0xff]  }
  0x35   : > { %2331 = vmatprep.subr.bf16.mxu1 %v2586_v31  ;;  %v2631_v31 = vld [vmem:[%s2831_s6 + $0x210] sm:$0xff]   ;;  %v271_v45 = vld [vmem:[%s2826_s27 + $0x8] sm:$0xff] }
  0x36   : > { %v620_v47 = vrot.slane %v271_v45, %v2869_v42  ;;  %v613_v48 = vcombine.high %v271_v45, %v271_v45  ;;  %v2693_v45 = vld [vmem:[%s2831_s6 + $0x458] sm:$0xff]  }
  0x37   : > { %2310 = vmatpush3.bf16.msra.mxu0 %v2587_v32  ;;  %v2634_v32 = vld [vmem:[%s2831_s6 + $0x258] sm:$0xff]  }
  0x38   : > { %2332 = vmatpush3.bf16.msra.mxu1 %v2588_v33  ;;  %2339 = vmatprep.subr.bf16.mxu0 %v2590_v35  ;;  %v2633_v33 = vld [vmem:[%s2831_s6 + $0x290] sm:$0xff]   ;;  %v2635_v35 = vld [vmem:[%s2831_s6 + $0x218] sm:$0xff]  }
  0x39   : > { %2361 = vmatprep.subr.bf16.mxu1 %v2592_v41  ;;  %v2641_v41 = vld [vmem:[%s2831_s6 + $0x2a0] sm:$0xff]  }
  0x3a   : > { %1599 = vmatmul.mubr.bf16.vlgmr.msra.gmra.mrb[0].mxu0 %v587_v46  ;;  %v2646_v46 = vld [vmem:[%s2831_s6 + $0x270] sm:$0xff]  }
  0x3b   : > { %2340 = vmatpush3.bf16.msra.mxu0 %v2591_v49  ;;  %1639 = vmatmul.mubr.bf16.vlgmr.msra.gmra.mrb[0].mxu1 %v609_v51  ;;  %v2645_v49 = vld [vmem:[%s2831_s6 + $0x2a8] sm:$0xff]   ;;  %v628_v51 = vcombine.high %v620_v47, %v620_v47 }
  0x3c   : > { %2341 = vmatprep.subr.bf16.mxu0 %v2594_v52  ;;  %2362 = vmatpush3.bf16.msra.mxu1 %v2593_v54  ;;  %v2941_v52 = vrot.slane %v613_v48, %v2869_v42  ;;  %v2650_v54 = vld [vmem:[%s2831_s6 + $0x278] sm:$0xff]   ;;  %v2695_v48 = vld [vmem:[%s2831_s6 + $0x460] sm:$0xff]  }
  0x3d   : > { %1678 = vmatprep.mubr.bf16.mxu0 %v608_v50  ;;  %2363 = vmatprep.subr.bf16.mxu1 %v2596_v55  ;;  %v2648_v50 = vld [vmem:[%s2831_s6 + $0x2f0] sm:$0xff]   ;;  %v650_v55 = vrot.slane %v628_v51, %v2869_v42  ;;  %v2698_v51 = vld [vmem:[%s2831_s6 + $0x428] sm:$0xff]  }
  0x3e   : > { %1718 = vmatprep.mubr.bf16.mxu1 %v612_v56  ;;  %v2649_v56 = vld [vmem:[%s2831_s6 + $0x2b0] sm:$0xff]  }
  0x3f   : > { %2342 = vmatpush3.bf16.msra.mxu0 %v2595_v57  ;;  %v629_v57 = vcombine.high %v2941_v52, %v2941_v52 }
  0x40   : > { %2343 = vmatprep.subr.bf16.mxu0 %v2598_v58  ;;  %2364 = vmatpush3.bf16.msra.mxu1 %v2597_v59  ;;  %v2652_v58 = vld [vmem:[%s2831_s6 + $0x2f8] sm:$0xff]   ;;  %v660_v59 = vcombine.high %v650_v55, %v650_v55 }
  0x41   : > { %2365 = vmatprep.subr.bf16.mxu1 %v2600_v60  ;;  %v2651_v60 = vld [vmem:[%s2831_s6 + $0x238] sm:$0xff]  }
  0x43   : > { %2344 = vmatpush3.bf16.msra.mxu0 %v2599_v61  ;;  %v636_v61 = vrot.slane %v620_v47, %v2869_v42  ;;  %v2694_v47 = vld [vmem:[%s2831_s6 + $0x418] sm:$0xff]  }
  0x44   : > { %2345 = vmatprep.subr.bf16.mxu0 %v2602_v62  ;;  %2366 = vmatpush3.bf16.msra.mxu1 %v2601_v63  ;;  %v2654_v62 = vld [vmem:[%s2831_s6 + $0x340] sm:$0xff]   ;;  %v2653_v63 = vld [vmem:[%s2831_s6 + $0x2b8] sm:$0xff]  }
  0x45   : > { %2367 = vmatprep.subr.bf16.mxu1 %v2604_v0  ;;  %v657_v0 = vrot.slane %v629_v57, %v2869_v42 }
  0x47   : > { %2346 = vmatpush3.bf16.msra.mxu0 %v2603_v1  ;;  %v2656_v1 = vld [vmem:[%s2831_s6 + $0x3c0] sm:$0xff]  }
  0x48   : > { %2347 = vmatprep.subr.bf16.mxu0 %v2606_v2  ;;  %2368 = vmatpush3.bf16.msra.mxu1 %v2605_v3  ;;  %v2655_v2 = vld [vmem:[%s2831_s6 + $0x300] sm:$0xff]   ;;  %v658_v3 = vcombine.high %v636_v61, %v636_v61 }
  0x49   : > { %2369 = vmatprep.subr.bf16.mxu1 %v2608_v4  ;;  %v2658_v4 = vld [vmem:[%s2831_s6 + $0x348] sm:$0xff]  }
  0x4b   : > { %2348 = vmatpush3.bf16.msra.mxu0 %v2607_v5  ;;  %v2657_v5 = vld [vmem:[%s2831_s6 + $0x380] sm:$0xff]  }
  0x4c   : > { %2349 = vmatprep.subr.bf16.mxu0 %v2610_v6  ;;  %2370 = vmatpush3.bf16.msra.mxu1 %v2609_v7  ;;  %v661_v6 = vcombine.high %v657_v0, %v657_v0  ;;  %v2660_v7 = vld [vmem:[%s2831_s6 + $0x3c8] sm:$0xff]  }
  0x4d   : > { %2371 = vmatprep.subr.bf16.mxu1 %v2612_v8  ;;  %v2659_v8 = vld [vmem:[%s2831_s6 + $0x308] sm:$0xff]  }
  0x4f   : > { %2350 = vmatpush3.bf16.msra.mxu0 %v2611_v9  ;;  %v2662_v9 = vld [vmem:[%s2831_s6 + $0x350] sm:$0xff]  }
  0x50   : > { %2351 = vmatprep.subr.bf16.mxu0 %v2614_v10  ;;  %2372 = vmatpush3.bf16.msra.mxu1 %v2613_v11  ;;  %v2661_v10 = vld [vmem:[%s2831_s6 + $0x388] sm:$0xff]   ;;  %v2664_v11 = vld [vmem:[%s2831_s6 + $0x3d0] sm:$0xff]  }
  0x51   : > { %2373 = vmatprep.subr.bf16.mxu1 %v2616_v12  ;;  %v2663_v12 = vld [vmem:[%s2831_s6 + $0x310] sm:$0xff]  }
  0x53   : > { %2352 = vmatpush3.bf16.msra.mxu0 %v2615_v13  ;;  %v2666_v13 = vld [vmem:[%s2831_s6 + $0x358] sm:$0xff]  }
  0x54   : > { %2353 = vmatprep.subr.bf16.mxu0 %v2618_v14  ;;  %2374 = vmatpush3.bf16.msra.mxu1 %v2617_v15  ;;  %v2665_v14 = vld [vmem:[%s2831_s6 + $0x390] sm:$0xff]   ;;  %v2668_v15 = vld [vmem:[%s2831_s6 + $0x3d8] sm:$0xff]  }
  0x55   : > { %2375 = vmatprep.subr.bf16.mxu1 %v2620_v16  ;;  %v2667_v16 = vld [vmem:[%s2831_s6 + $0x318] sm:$0xff]  }
  0x57   : > { %2354 = vmatpush3.bf16.msra.mxu0 %v2619_v17  ;;  %v2670_v17 = vld [vmem:[%s2831_s6 + $0x360] sm:$0xff]  }
  0x58   : > { %2383 = vmatprep.subr.bf16.mxu0 %v2622_v19  ;;  %2376 = vmatpush3.bf16.msra.mxu1 %v2621_v20  ;;  %v2672_v19 = vld [vmem:[%s2831_s6 + $0x3e0] sm:$0xff]  }
  0x59   : > { %2405 = vmatprep.subr.bf16.mxu1 %v2624_v21  ;;  %v2671_v20 = vld [vmem:[%s2831_s6 + $0x320] sm:$0xff]   ;;  %v2674_v21 = vld [vmem:[%s2831_s6 + $0x368] sm:$0xff]  }
  0x5a   : > { %1679 = vmatmul.mubr.bf16.vlgmr.msra.gmra.mrb[4].mxu0 %v594_v18  ;;  %v2669_v18 = vld [vmem:[%s2831_s6 + $0x398] sm:$0xff]  }
  0x5b   : > { %2384 = vmatpush3.bf16.msra.mxu0 %v2623_v22  ;;  %1719 = vmatmul.mubr.bf16.vlgmr.msra.gmra.mrb[4].mxu1 %v610_v23  ;;  %v2673_v22 = vld [vmem:[%s2831_s6 + $0x3a0] sm:$0xff]   ;;  %v2676_v23 = vld [vmem:[%s2831_s6 + $0x3e8] sm:$0xff]  }
  0x5c   : > { %2385 = vmatprep.subr.bf16.mxu0 %v2626_v24  ;;  %2406 = vmatpush3.bf16.msra.mxu1 %v2625_v25  ;;  %v2675_v24 = vld [vmem:[%s2831_s6 + $0x328] sm:$0xff]   ;;  %v2678_v25 = vld [vmem:[%s2831_s6 + $0x370] sm:$0xff]  }
  0x5d   : > { %2407 = vmatprep.subr.bf16.mxu1 %v2628_v26  ;;  %1758 = vmatprep.mubr.bf16.mxu0 %v650_v55  ;;  %v2677_v26 = vld [vmem:[%s2831_s6 + $0x3a8] sm:$0xff]   ;;  %v2702_v55 = vld [vmem:[%s2831_s6 + $0x438] sm:$0xff]  }
  0x5e   : > { %1798 = vmatprep.mubr.bf16.mxu1 %v660_v59 }
  0x5f   : > { %2386 = vmatpush3.bf16.msra.mxu0 %v2627_v27  ;;  %v2680_v27 = vld [vmem:[%s2831_s6 + $0x3f0] sm:$0xff]  }
  0x60   : > { %2387 = vmatprep.subr.bf16.mxu0 %v2630_v28  ;;  %2408 = vmatpush3.bf16.msra.mxu1 %v2629_v29  ;;  %v2679_v28 = vld [vmem:[%s2831_s6 + $0x330] sm:$0xff]   ;;  %v2682_v29 = vld [vmem:[%s2831_s6 + $0x378] sm:$0xff]  }
  0x61   : > { %2409 = vmatprep.subr.bf16.mxu1 %v2632_v30  ;;  %v2681_v30 = vld [vmem:[%s2831_s6 + $0x3b0] sm:$0xff]  }
  0x63   : > { %2388 = vmatpush3.bf16.msra.mxu0 %v2631_v31  ;;  %v2684_v31 = vld [vmem:[%s2831_s6 + $0x3f8] sm:$0xff]  }
  0x64   : > { %2389 = vmatprep.subr.bf16.mxu0 %v2634_v32  ;;  %2410 = vmatpush3.bf16.msra.mxu1 %v2633_v33  ;;  %v2683_v32 = vld [vmem:[%s2831_s6 + $0x338] sm:$0xff]   ;;  %v643_v33 = vrot.slane %v2941_v52, %v2869_v42  ;;  %v2699_v52 = vld [vmem:[%s2831_s6 + $0x470] sm:$0xff]  }
  0x65   : > { %2411 = vmatprep.subr.bf16.mxu1 %v2636_v34  ;;  %v2687_v34 = vld [vmem:[%s2831_s6 + $0x440] sm:$0xff]  }
  0x67   : > { %2390 = vmatpush3.bf16.msra.mxu0 %v2635_v35  ;;  %v2686_v35 = vld [vmem:[%s2831_s6 + $0x3b8] sm:$0xff]  }
  0x68   : > { %2391 = vmatprep.subr.bf16.mxu0 %v2638_v36  ;;  %2412 = vmatpush3.bf16.msra.mxu1 %v2637_v37  ;;  %v2688_v36 = vld [vmem:[%s2831_s6 + $0x400] sm:$0xff]   ;;  %v659_v37 = vcombine.high %v643_v33, %v643_v33 }
  0x69   : > { %2413 = vmatprep.subr.bf16.mxu1 %v2640_v38  ;;  %v2689_v38 = vld [vmem:[%s2831_s6 + $0x448] sm:$0xff]  }
  0x6b   : > { %2392 = vmatpush3.bf16.msra.mxu0 %v2639_v39  ;;  %v2690_v39 = vld [vmem:[%s2831_s6 + $0x408] sm:$0xff]  }
  0x6c   : > { %2393 = vmatprep.subr.bf16.mxu0 %v2642_v40  ;;  %2414 = vmatpush3.bf16.msra.mxu1 %v2641_v41  ;;  %v2691_v40 = vld [vmem:[%s2831_s6 + $0x450] sm:$0xff]  }
  0x6d   : > { %2415 = vmatprep.subr.bf16.mxu1 %v2644_v43  ;;  %v2135_v41 = vld.sshfl [vmem:[%s2826_s27 + $0x10] sm:$0x11 pattern:$0x75316420] }
  0x6e   : > { %v669_v43 = vcombine.high %v2135_v41, %v2135_v41 }
  0x6f   : > { %2394 = vmatpush3.bf16.msra.mxu0 %v2643_v44  ;;  %v2692_v44 = vld [vmem:[%s2831_s6 + $0x410] sm:$0xff]  }
  0x70   : > { %2395 = vmatprep.subr.bf16.mxu0 %v2646_v46  ;;  %2416 = vmatpush3.bf16.msra.mxu1 %v2645_v49  ;;  %v683_v46 = vrot.slane %v669_v43, %v2869_v42  ;;  %v2696_v49 = vld [vmem:[%s2831_s6 + $0x420] sm:$0xff]  }
  0x71   : > { %2417 = vmatprep.subr.bf16.mxu1 %v2648_v50  ;;  %v2697_v50 = vld [vmem:[%s2831_s6 + $0x468] sm:$0xff]  }
  0x73   : > { %2396 = vmatpush3.bf16.msra.mxu0 %v2647_v53  ;;  %v2700_v53 = vld [vmem:[%s2831_s6 + $0x430] sm:$0xff]  }
  0x74   : > { %2397 = vmatprep.subr.bf16.mxu0 %v2650_v54  ;;  %2418 = vmatpush3.bf16.msra.mxu1 %v2649_v56  ;;  %v2701_v54 = vld [vmem:[%s2831_s6 + $0x478] sm:$0xff]   ;;  %v676_v56 = vrot.slane %v2135_v41, %v2869_v42 }
  0x75   : > { %2419 = vmatprep.subr.bf16.mxu1 %v2652_v58 }
  0x77   : > { %2398 = vmatpush3.bf16.msra.mxu0 %v2651_v60 }
  0x78   : > { %2427 = vmatprep.subr.bf16.mxu0 %v2654_v62  ;;  %2420 = vmatpush3.bf16.msra.mxu1 %v2653_v63 }
  0x79   : > { %2449 = vmatprep.subr.bf16.mxu1 %v2656_v1 }
  0x7a   : > { %1759 = vmatmul.mubr.bf16.vlgmr.msra.gmra.mrb[8].mxu0 %v636_v61 }
  0x7b   : > { %2428 = vmatpush3.bf16.msra.mxu0 %v2655_v2  ;;  %1838 = vmatprep.mubr.bf16.mxu0 %v657_v0 }
  0x7c   : > { %1799 = vmatmul.mubr.bf16.vlgmr.msra.gmra.mrb[8].mxu1 %v658_v3  ;;  %2429 = vmatprep.subr.bf16.mxu0 %v2658_v4 }
  0x7d   : > { %2450 = vmatpush3.bf16.msra.mxu1 %v2657_v5  ;;  %1878 = vmatprep.mubr.bf16.mxu1 %v661_v6 }
  0x7e   : > { %2451 = vmatprep.subr.bf16.mxu1 %v2660_v7 }
  0x7f   : > { %2430 = vmatpush3.bf16.msra.mxu0 %v2659_v8 }
  0x80   : > { %2431 = vmatprep.subr.bf16.mxu0 %v2662_v9 }
  0x81   : > { %2452 = vmatpush3.bf16.msra.mxu1 %v2661_v10 }
  0x82   : > { %2453 = vmatprep.subr.bf16.mxu1 %v2664_v11 }
  0x83   : > { %2432 = vmatpush3.bf16.msra.mxu0 %v2663_v12 }
  0x84   : > { %2433 = vmatprep.subr.bf16.mxu0 %v2666_v13 }
  0x85   : > { %2454 = vmatpush3.bf16.msra.mxu1 %v2665_v14 }
  0x86   : > { %2455 = vmatprep.subr.bf16.mxu1 %v2668_v15 }
  0x87   : > { %2434 = vmatpush3.bf16.msra.mxu0 %v2667_v16 }
  0x88   : > { %2435 = vmatprep.subr.bf16.mxu0 %v2670_v17 }
  0x89   : > { %2456 = vmatpush3.bf16.msra.mxu1 %v2669_v18 }
  0x8a   : > { %2457 = vmatprep.subr.bf16.mxu1 %v2672_v19 }
  0x8b   : > { %2436 = vmatpush3.bf16.msra.mxu0 %v2671_v20 }
  0x8c   : > { %2437 = vmatprep.subr.bf16.mxu0 %v2674_v21 }
  0x8d   : > { %2458 = vmatpush3.bf16.msra.mxu1 %v2673_v22 }
  0x8e   : > { %2459 = vmatprep.subr.bf16.mxu1 %v2676_v23 }
  0x8f   : > { %2438 = vmatpush3.bf16.msra.mxu0 %v2675_v24 }
  0x90   : > { %2439 = vmatprep.subr.bf16.mxu0 %v2678_v25 }
  0x91   : > { %2460 = vmatpush3.bf16.msra.mxu1 %v2677_v26 }
  0x92   : > { %2461 = vmatprep.subr.bf16.mxu1 %v2680_v27 }
  0x93   : > { %2440 = vmatpush3.bf16.msra.mxu0 %v2679_v28 }
  0x94   : > { %2441 = vmatprep.subr.bf16.mxu0 %v2682_v29 }
  0x95   : > { %2462 = vmatpush3.bf16.msra.mxu1 %v2681_v30 }
  0x96   : > { %2463 = vmatprep.subr.bf16.mxu1 %v2684_v31 }
  0x97   : > { %2442 = vmatpush3.bf16.msra.mxu0 %v2683_v32 }
  0x98   : > { %2471 = vmatprep.subr.bf16.mxu0 %v2687_v34 }
  0x99   : > { %2464 = vmatpush3.bf16.msra.mxu1 %v2686_v35 }
  0x9a   : > { %1839 = vmatmul.mubr.bf16.vlgmr.msra.gmra.mrb[12].mxu0 %v643_v33 }
  0x9b   : > { %2472 = vmatpush3.bf16.msra.mxu0 %v2688_v36  ;;  %1918 = vmatprep.mubr.bf16.mxu0 %v683_v46 }
  0x9c   : > { %1879 = vmatmul.mubr.bf16.vlgmr.msra.gmra.mrb[12].mxu1 %v659_v37  ;;  %2473 = vmatprep.subr.bf16.mxu0 %v2689_v38 }
  0x9f   : > { %2474 = vmatpush3.bf16.msra.mxu0 %v2690_v39 }
  0xa0   : > { %2475 = vmatprep.subr.bf16.mxu0 %v2691_v40 }
  0xa3   : > { %2476 = vmatpush3.bf16.msra.mxu0 %v2692_v44  ;;  %v269_v44 = vld [vmem:[#allocation2] sm:$0x3] }
  0xa4   : > { %2477 = vmatprep.subr.bf16.mxu0 %v2693_v45 }
  0xa7   : > { %2478 = vmatpush3.bf16.msra.mxu0 %v2694_v47 }
  0xa8   : > { %2479 = vmatprep.subr.bf16.mxu0 %v2695_v48  ;;  %v2703_v48 = vld [vmem:[%s3078_s3] sm:$0xff] (!%p2280_p7)  }
  0xab   : > { %2480 = vmatpush3.bf16.msra.mxu0 %v2696_v49  ;;  %v2767_v49 = vmov (!%p2280_p7), 0.0  }
  0xac   : > { %2481 = vmatprep.subr.bf16.mxu0 %v2697_v50  ;;  %v2704_v50 = vld [vmem:[%s3078_s3 + $0x8] sm:$0xff] (!%p2280_p7)  }
  0xaf   : > { %2482 = vmatpush3.bf16.msra.mxu0 %v2698_v51  ;;  %v2705_v51 = vld [vmem:[%s3078_s3 + $0x10] sm:$0xff] (!%p2280_p7)  }
  0xb0   : > { %2483 = vmatprep.subr.bf16.mxu0 %v2699_v52  ;;  %v2706_v52 = vld [vmem:[%s3078_s3 + $0x18] sm:$0xff] (!%p2280_p7)  }
  0xb3   : > { %2484 = vmatpush3.bf16.msra.mxu0 %v2700_v53  ;;  %v2707_v53 = vld [vmem:[%s3078_s3 + $0x20] sm:$0xff] (!%p2280_p7)  }
  0xb4   : > { %2485 = vmatprep.subr.bf16.mxu0 %v2701_v54  ;;  %v2708_v54 = vld [vmem:[%s3078_s3 + $0x28] sm:$0xff] (!%p2280_p7)  }
  0xb7   : > { %2486 = vmatpush3.bf16.msra.mxu0 %v2702_v55 }
  0xb8   : > { %2502 = vmatprep.subr.bf16.mxu0 (!%p2280_p7), %v2767_v49 }
  0xba   : > { %1919 = vmatmul.mubr.bf16.vlgmr.msra.gmra.mrb[16].mxu0 %v676_v56  ;;  %v2281_v56 = vld [vmem:[%s3077_s2] ss:$0 sm:$0xff] (!%p2280_p7) }
  0xbb   : > { %2503 = vmatpush3.bf16.msra.mxu0 (!%p2280_p7), %v2703_v48  ;;  %2518 = vmatprep.mubr.msk.bf16.mxu0 (!%p2280_p7), %vm2768_vm0, %v2767_v49 }
  0xbc   : > { %2504 = vmatprep.subr.bf16.mxu0 (!%p2280_p7), %v2767_v49 }
  0xbf   : > { %2505 = vmatpush3.bf16.msra.mxu0 (!%p2280_p7), %v2704_v50 }
  0xc0   : > { %2506 = vmatprep.subr.bf16.mxu0 (!%p2280_p7), %v2767_v49 }
  0xc3   : > { %2507 = vmatpush3.bf16.msra.mxu0 (!%p2280_p7), %v2705_v51 }
  0xc4   : > { %2508 = vmatprep.subr.bf16.mxu0 (!%p2280_p7), %v2767_v49 }
  0xc7   : > { %2509 = vmatpush3.bf16.msra.mxu0 (!%p2280_p7), %v2706_v52 }
  0xc8   : > { %2510 = vmatprep.subr.bf16.mxu0 (!%p2280_p7), %v2767_v49 }
  0xcb   : > { %2511 = vmatpush3.bf16.msra.mxu0 (!%p2280_p7), %v2707_v53 }
  0xcc   : > { %2512 = vmatprep.subr.bf16.mxu0 (!%p2280_p7), %v2767_v49 }
  0xcf   : > { %2513 = vmatpush3.bf16.msra.mxu0 (!%p2280_p7), %v2708_v54 }
  0xd0   : > { %2514 = vmatprep.subr.bf16.mxu0 (!%p2280_p7), %v2767_v49 }
 0x10d   : > { %v2311_v57 = vpop.f32.mrb[0].mxu0 }
 0x10e   : > { %v2312_v58 = vpop.f32.mrb[1].mxu0  ;;  %v2333_v59 = vpop.f32.mrb[0].mxu1 }
 0x10f   : > { %v2313_v60 = vadd.f32 %v2312_v58, %v2311_v57  ;;  %v2314_v61 = vpop.f32.mrb[2].mxu0  ;;  %v2334_v62 = vpop.f32.mrb[1].mxu1  ;;  %v2709_v58 = vld [vmem:[%s3078_s3 + $0x30] sm:$0xff] (!%p2280_p7)  }
 0x110   : > { %v2315_v63 = vpop.f32.mrb[3].mxu0  ;;  %v2335_v0 = vadd.f32 %v2334_v62, %v2333_v59  ;;  %v2336_v1 = vpop.f32.mrb[2].mxu1  ;;  %2515 = vmatpush3.bf16.msra.mxu0 (!%p2280_p7), %v2709_v58  ;;  %v2282_v62 = vld [vmem:[%s3079_s4] ss:$0 sm:$0xff] (!%p2280_p7) }
 0x111   : > { %v2337_v2 = vpop.f32.mrb[3].mxu1  ;;  %2516 = vmatprep.subr.bf16.mxu0 (!%p2280_p7), %v2767_v49 }
 0x112   : > { %v1641_v3 = vadd.f32 %v2335_v0, %v2313_v60  ;;  %v2710_v60 = vld [vmem:[%s3078_s3 + $0x38] sm:$0xff] (!%p2280_p7)  }
 0x114   : > { %2517 = vmatpush3.bf16.msra.mxu0 (!%p2280_p7), %v2710_v60 }
 0x12d   : > { %v2355_v4 = vpop.f32.mrb[4].mxu0 }
 0x12e   : > { %v2356_v5 = vpop.f32.mrb[5].mxu0  ;;  %v2377_v8 = vpop.f32.mrb[4].mxu1 }
 0x12f   : > { %v2357_v6 = vadd.f32 %v2356_v5, %v2355_v4  ;;  %v2358_v7 = vpop.f32.mrb[6].mxu0  ;;  %v2378_v42 = vpop.f32.mrb[5].mxu1 }
 0x130   : > { %v2359_v9 = vpop.f32.mrb[7].mxu0  ;;  %v2379_v11 = vadd.f32 %v2378_v42, %v2377_v8  ;;  %v2380_v12 = vpop.f32.mrb[6].mxu1 }
 0x131   : > { %v1681_v10 = vadd.f32 %v2357_v6, %v1641_v3  ;;  %v2381_v13 = vpop.f32.mrb[7].mxu1 }
 0x133   : > { %v1721_v14 = vadd.f32 %v2379_v11, %v1681_v10 }
 0x14d   : > { %v2399_v15 = vpop.f32.mrb[8].mxu0 }
 0x14e   : > { %v2400_v16 = vpop.f32.mrb[9].mxu0 }
 0x14f   : > { %v2401_v17 = vadd.f32 %v2400_v16, %v2399_v15  ;;  %v2402_v18 = vpop.f32.mrb[10].mxu0  ;;  %v2421_v19 = vpop.f32.mrb[8].mxu1 }
 0x150   : > { %v2403_v20 = vpop.f32.mrb[11].mxu0  ;;  %v2422_v21 = vpop.f32.mrb[9].mxu1 }
 0x151   : > { %v1761_v22 = vadd.f32 %v2401_v17, %v1721_v14  ;;  %v2423_v23 = vadd.f32 %v2422_v21, %v2421_v19  ;;  %v2424_v24 = vpop.f32.mrb[10].mxu1 }
 0x152   : > { %v2425_v25 = vpop.f32.mrb[11].mxu1 }
 0x153   : > { %v1801_v26 = vadd.f32 %v2423_v23, %v1761_v22 }
 0x16d   : > { %v2443_v27 = vpop.f32.mrb[12].mxu0 }
 0x16e   : > { %v2444_v28 = vpop.f32.mrb[13].mxu0 }
 0x16f   : > { %v2445_v29 = vadd.f32 %v2444_v28, %v2443_v27  ;;  %v2446_v30 = vpop.f32.mrb[14].mxu0  ;;  %v2465_v31 = vpop.f32.mrb[12].mxu1 }
 0x170   : > { %v2447_v32 = vpop.f32.mrb[15].mxu0  ;;  %v2466_v33 = vpop.f32.mrb[13].mxu1 }
 0x171   : > { %v1841_v34 = vadd.f32 %v2445_v29, %v1801_v26  ;;  %v2467_v35 = vadd.f32 %v2466_v33, %v2465_v31  ;;  %v2468_v36 = vpop.f32.mrb[14].mxu1 }
 0x172   : > { %v2469_v37 = vpop.f32.mrb[15].mxu1 }
 0x173   : > { %v1881_v38 = vadd.f32 %v2467_v35, %v1841_v34 }
 0x18d   : > { %v2487_v39 = vpop.f32.mrb[16].mxu0 }
 0x18e   : > { %v2488_v40 = vpop.f32.mrb[17].mxu0 }
 0x18f   : > { %v2489_v41 = vadd.f32 %v2488_v40, %v2487_v39  ;;  %v2490_v43 = vpop.f32.mrb[18].mxu0  ;;  %1931 = sbr.rel (%p2280_p7) target bundleno = 634 (0x27a), region = 48 }
 0x190   : > { %v2491_v45 = vpop.f32.mrb[19].mxu0 }
 0x191   : > { %v1921_v46 = vadd.f32 %v2489_v41, %v1881_v38 }
 0x193   : > { %v1926_v47 = vadd.f32 %v1921_v46, %v269_v44 }
 0x195   : > { %1927 = vst [vmem:[#allocation2] sm:$0x3] %v1926_v47 }
 0x19c   : > { %v1932_v55 = vld [vmem:[#allocation2] sm:$0x3] }
 0x19d   : > { %v1940_v57 = vadd.f32 %v2281_v56, %v1932_v55 }
 0x19f   : > { %v1941_v59 = vmax.f32 %v1940_v57, 0.0 }
 0x1a1   : > { %v1942_v61 = vpack.c.bf16 %v1941_v59, %v1941_v59 }
 0x1a3   : > { %2519 = vmatmul.mubr.bf16.vlgmr.msra.gmra.mrb[0].mxu0 %v1942_v61 }
 0x276   : > { %v2048_v63 = vpop.f32.mrb[0].mxu0 }
 0x277   : > { %v2049_v0 = vadd.f32 %v2282_v62, %v2048_v63  ;;  %v2520_v1 = vpop.f32.mrb[1].mxu0 }
 0x278   : > { %v2051_v2 = vpop.f32.mrb[2].mxu0 }
 0x279   : > { %2054 = vst [vmem:[#allocation3] sm:$0x3] %v2049_v0  ;;  %v2521_v3 = vpop.f32.mrb[3].mxu0 }
 0x27a PF: > { %p3040_p8 = scmp.eq.s32.totalorder %s2129_s21, 3  ;;  %s2769_s7 = smov [#allocation3]  }
 0x27b   : > { %s2064_s8 = sshll.u32 %s2769_s7, 4  ;;  %s2065_s8 = int_to_ptr.vmem [resolvable:$true] %s2064_s8 }
 0x27c   : > { %s2711_s9 = scalar_lea.vmem %s2065_s8, 32  ;;  %p2718_p12 = scmp.lt.s32.totalorder %s2065_s8, %s2065_s8 }
 0x27d   : > { %p2712_p9 = scmp.ne.s32.totalorder %s2065_s8, %s2711_s9  ;;  %p2719_p13 = scmp.lt.s32.totalorder %s2711_s9, %s2711_s9 }
 0x27f   : > { %p2713_p10 = pnand %p2712_p9, %p3040_p8  ;;  %p2720_p0 = por %p2719_p13, %p2718_p12 }
 0x281   : > { %p2714_p11 = pneg %p2713_p10 }
 0x283   : > { %p2721_p1 = pnand %p2720_p0, %p2714_p11 }
 0x285   : > { %2724 = shalt.err (!%p2721_p1)
}
 0x286   : > { %s2725_s21 = scalar_lea.hbm %s3080_s5, 32 }
 0x287   : > { %p2726_p2 = scmp.ne.s32.totalorder %s3080_s5, %s2725_s21  ;;  %p2731_p5 = scmp.lt.u32.totalorder %s2725_s21, %s3080_s5 }
 0x289   : > { %p2727_p3 = pnand %p2726_p2, %p3040_p8 }
 0x28b   : > { %p2728_p4 = pneg %p2727_p3 }
 0x28d   : > { %p2733_p6 = pnand %p2731_p5, %p2728_p4 }
 0x28f   : > { %2736 = shalt.err (!%p2733_p6)
}
 0x290   : > { %2523 = dma.vmem_to_hbm [thread:$0]  (%p3040_p8), %s2065_s8, 32, %s3080_s5, [#allocation4]  }
 0x291   : > { %2750 = dma.done.wait (%p3040_p8), [#allocation4], 32  }
 0x292   : > { %2752 = vsyncadd (%p3040_p8), [#allocation4], 4294967264 }
 0x293 PF: > { %s16_s20 = sadd.s32 1, %s2763_s20   ;;  %s3082_s18 = smov %s2759_s19 }
 0x294   : > { %p13_p7 = scmp.ge.s32.totalorder %s16_s20, 6   ;;  %s3083_s19 = smov %s3085_s22 }
 0x296   :  { %15 = sbr.rel (!%p13_p7) target bundleno = 2 (0x2), region = 79 }
 0x29d   :  { %2077 = vsyncpa [#allocation4], 1 }
 0x29e   :  { %2079 = vsyncpa [#allocation4 + $0x1], 1 }

// kernel: emotion_cnn_forward.2
= control target key start
LH: loop header
LB: loop body
LE: loop exit
PB: predicated region body
PF: predicated region fallthrough
CT: control target
= control target key end

     0   :  { %s15772_s18 = smov 0   ;;  %s20528_s0 = inlined_call_operand.vmem [shape: bf16[2,576,16], index: 0, kind: input, shape index: {}]   ;;  %s20529_s1 = inlined_call_operand.vmem [shape: bf16[16,128], index: 1, kind: input, shape index: {}]   ;;  %s20530_s2 = inlined_call_operand.vmem [shape: f32[1,32], index: 2, kind: input, shape index: {}]   ;;  %s20531_s3 = inlined_call_operand.vmem [shape: bf16[512,256], index: 3, kind: input, shape index: {}]   ;;  %s20532_s4 = inlined_call_operand.vmem [shape: f32[1,256], index: 4, kind: input, shape index: {}]   ;;  %s20533_s5 = inlined_call_operand.vmem [shape: bf16[2,144,64], index: 5, kind: output, shape index: {}]  }
   0x1 LB: > { %s14675_s19 = sadd.s32 4294967295, %s15735_s18   ;;  %p14679_p0 = scmp.ge.s32.totalorder %s15735_s18, 1  ;;  %s15735_s18 = sphi %s15772_s18, %s15_s18  }
   0x2   : > { %p187_p1 = scmp.lt.s32.totalorder %s15735_s18, 3 }
   0x4   : > { %p188_p2 = pnand %p14679_p0, %p187_p1 }
   0x6   : > { %191 = sbr.rel (%p188_p2) target bundleno = 1861 (0x745), region = 40 }
   0xd   : > { %v15553_v0 = vld [vmem:[%s20529_s1] sm:$0xff]   ;;  %p215_p3 = scmp.lt.s32.totalorder %s14675_s19, 1  ;;  %vm486_vm0 = vcmask 130048   ;;  %s15737_s26 = smov 64   ;;  %vm1538_vm1 = vsmask.f32 2304 }
   0xe   : > { %15315 = vmatprep.subr.bf16.mxu0 %v15553_v0  ;;  %s15738_s27 = smov 96   ;;  %vm1639_vm2 = vcmask 256002   ;;  %vm1556_vm4 = vcmask 253952   ;;  %vm1557_vm5 = vsmask.f32 256  ;;  %vm2087_vm7 = vcmask 254976  }
   0xf   : > { %s20814_s19 = smov (!%p215_p3, %s14675_s19), 1  ;;  %15316 = vmatpush3.bf16.msra.mxu0 %v15553_v0  ;;  %vm16144_vm3 = vmand %vm1639_vm2, %vm1538_vm1  ;;  %vm1535_vm8 = vcmask 257024   ;;  %vm4826_vm9 = vsmask.f32 1280  ;;  %vm4827_vm10 = vsmask.f32 3336 }
  0x10   : > { %s15493_s22 = smul.u32 288, %s20814_s19  ;;  %vm16261_vm6 = vmand %vm1556_vm4, %vm1557_vm5  ;;  %vm4829_vm11 = vsmask.f32 5392  ;;  %vm4831_vm12 = vsmask.f32 7448  ;;  %s15740_s30 = smov 32  }
  0x11   : > { %vm16688_vm13 = vmor %vm4826_vm9, %vm4827_vm10  ;;  %vm2672_vm2 = vsmask.f32 7938  ;;  %vm1537_vm4 = vcmask 256000   ;;  %s15494_s28 = smul.u32 72, %s20814_s19 }
  0x12   : > { %s15789_s25 = scalar_lea.vmem %s20528_s0, %s15493_s22  ;;  %vm16709_vm14 = vmor %vm16688_vm13, %vm4829_vm11  ;;  %vm6259_vm11 = vcmask 1048320  }
  0x13   : > { %v15554_v1 = vld [vmem:[%s15789_s25] sm:$0xff]   ;;  %v15555_v2 = vld [vmem:[%s15789_s25 + $0x8] sm:$0xff]   ;;  %v15556_v3 = vld [vmem:[%s15789_s25 + $0x10] sm:$0xff]   ;;  %s20448_s6 = scalar_lea.vmem %s20533_s5, %s15494_s28 }
  0x14   : > { %15317 = vmatprep.mubr.msk.bf16.mxu0 %vm486_vm0, %v15554_v1  ;;  %v15557_v4 = vld [vmem:[%s15789_s25 + $0x18] sm:$0xff]   ;;  %v15558_v5 = vld [vmem:[%s15789_s25 + $0x20] sm:$0xff]   ;;  %v15559_v6 = vld [vmem:[%s15789_s25 + $0x28] sm:$0xff]  }
  0x15   : > { %15318 = vmatmul.mubr.msk.bf16.vlgmr.msra.gmra.mrb[0].mxu0 %vm486_vm0, %v15555_v2  ;;  %v15560_v7 = vld [vmem:[%s15789_s25 + $0x30] sm:$0xff]   ;;  %v15561_v8 = vld [vmem:[%s15789_s25 + $0x38] sm:$0xff]   ;;  %v15562_v9 = vld [vmem:[%s15789_s25 + $0x40] sm:$0xff]  }
  0x16   : > { %15321 = vmatprep.mubr.msk.bf16.mxu0 %vm486_vm0, %v15556_v3  ;;  %v15563_v10 = vld [vmem:[%s15789_s25 + $0x48] sm:$0xff]   ;;  %v15564_v11 = vld [vmem:[%s15789_s25 + $0x50] sm:$0xff]   ;;  %v15565_v12 = vld [vmem:[%s15789_s25 + $0x58] sm:$0xff]  }
  0x17   : > { %v15566_v13 = vld [vmem:[%s15789_s25 + $0x60] sm:$0xff]   ;;  %v15567_v14 = vld [vmem:[%s15789_s25 + $0x68] sm:$0xff]   ;;  %v15568_v15 = vld [vmem:[%s15789_s25 + $0x70] sm:$0xff]  }
  0x18   : > { %v15569_v16 = vld [vmem:[%s15789_s25 + $0x78] sm:$0xff]   ;;  %v15570_v17 = vld [vmem:[%s15789_s25 + $0x80] sm:$0xff]   ;;  %v15571_v18 = vld [vmem:[%s15789_s25 + $0x88] sm:$0xff]  }
  0x19   : > { %v15572_v19 = vld [vmem:[%s15789_s25 + $0x90] sm:$0xff]   ;;  %v15573_v20 = vld [vmem:[%s15789_s25 + $0x98] sm:$0xff]   ;;  %v15574_v21 = vld [vmem:[%s15789_s25 + $0xa0] sm:$0xff]  }
  0x1a   : > { %v15575_v22 = vld [vmem:[%s15789_s25 + $0xa8] sm:$0xff]   ;;  %v15576_v23 = vld [vmem:[%s15789_s25 + $0xb0] sm:$0xff]   ;;  %v15577_v24 = vld [vmem:[%s15789_s25 + $0xb8] sm:$0xff]  }
  0x1b   : > { %v15578_v25 = vld [vmem:[%s15789_s25 + $0xc0] sm:$0xff]   ;;  %v15579_v26 = vld [vmem:[%s15789_s25 + $0xc8] sm:$0xff]   ;;  %v15580_v27 = vld [vmem:[%s15789_s25 + $0xd0] sm:$0xff]  }
  0x1c   : > { %v15581_v28 = vld [vmem:[%s15789_s25 + $0xd8] sm:$0xff]   ;;  %v15582_v29 = vld [vmem:[%s15789_s25 + $0xe0] sm:$0xff]   ;;  %v15583_v30 = vld [vmem:[%s15789_s25 + $0xe8] sm:$0xff]  }
  0x1d   : > { %15322 = vmatmul.mubr.msk.bf16.gmra.mrb[4].mxu0 %vm486_vm0, %v15557_v4  ;;  %v15584_v31 = vld [vmem:[%s15789_s25 + $0xf0] sm:$0xff]   ;;  %v15585_v32 = vld [vmem:[%s15789_s25 + $0xf8] sm:$0xff]   ;;  %v15586_v33 = vld [vmem:[%s15789_s25 + $0x100] sm:$0xff]  }
  0x1e   : > { %15325 = vmatprep.mubr.msk.bf16.mxu0 %vm486_vm0, %v15558_v5  ;;  %v15587_v34 = vld [vmem:[%s15789_s25 + $0x108] sm:$0xff]   ;;  %v15588_v35 = vld [vmem:[%s15789_s25 + $0x110] sm:$0xff]   ;;  %v15589_v36 = vld [vmem:[%s15789_s25 + $0x118] sm:$0xff]  }
  0x1f   : > { %vm16733_vm15 = vmor %vm16709_vm14, %vm4831_vm12 }
  0x20   : > { %vm16889_vm10 = vmand %vm1535_vm8, %vm2672_vm2 }
  0x25   : > { %15326 = vmatmul.mubr.msk.bf16.gmra.mrb[8].mxu0 %vm486_vm0, %v15559_v6 }
  0x26   : > { %15329 = vmatprep.mubr.msk.bf16.mxu0 %vm486_vm0, %v15560_v7 }
  0x2d   : > { %15330 = vmatmul.mubr.msk.bf16.gmra.mrb[12].mxu0 %vm486_vm0, %v15561_v8 }
  0x2e   : > { %15333 = vmatprep.mubr.msk.bf16.mxu0 %vm486_vm0, %v15562_v9 }
  0x35   : > { %15334 = vmatmul.mubr.msk.bf16.gmra.mrb[16].mxu0 %vm486_vm0, %v15563_v10 }
  0x36   : > { %15337 = vmatprep.mubr.msk.bf16.mxu0 %vm486_vm0, %v15564_v11 }
  0x3d   : > { %15338 = vmatmul.mubr.msk.bf16.gmra.mrb[20].mxu0 %vm486_vm0, %v15565_v12 }
  0x3e   : > { %15341 = vmatprep.mubr.msk.bf16.mxu0 %vm486_vm0, %v15566_v13 }
  0x45   : > { %15342 = vmatmul.mubr.msk.bf16.gmra.mrb[24].mxu0 %vm486_vm0, %v15567_v14 }
  0x46   : > { %15345 = vmatprep.mubr.msk.bf16.mxu0 %vm486_vm0, %v15568_v15 }
  0x4d   : > { %15346 = vmatmul.mubr.msk.bf16.gmra.mrb[28].mxu0 %vm486_vm0, %v15569_v16 }
  0x4e   : > { %15349 = vmatprep.mubr.msk.bf16.mxu0 %vm486_vm0, %v15570_v17 }
  0x55   : > { %15350 = vmatmul.mubr.msk.bf16.gmra.mrb[32].mxu0 %vm486_vm0, %v15571_v18 }
  0x56   : > { %15353 = vmatprep.mubr.msk.bf16.mxu0 %vm486_vm0, %v15572_v19 }
  0x5d   : > { %15354 = vmatmul.mubr.msk.bf16.gmra.mrb[36].mxu0 %vm486_vm0, %v15573_v20 }
  0x5e   : > { %15357 = vmatprep.mubr.msk.bf16.mxu0 %vm486_vm0, %v15574_v21 }
  0x65   : > { %15358 = vmatmul.mubr.msk.bf16.gmra.mrb[40].mxu0 %vm486_vm0, %v15575_v22 }
  0x66   : > { %15361 = vmatprep.mubr.msk.bf16.mxu0 %vm486_vm0, %v15576_v23 }
  0x6d   : > { %15362 = vmatmul.mubr.msk.bf16.gmra.mrb[44].mxu0 %vm486_vm0, %v15577_v24 }
  0x6e   : > { %15365 = vmatprep.mubr.msk.bf16.mxu0 %vm486_vm0, %v15578_v25 }
  0x75   : > { %15366 = vmatmul.mubr.msk.bf16.gmra.mrb[48].mxu0 %vm486_vm0, %v15579_v26 }
  0x76   : > { %15369 = vmatprep.mubr.msk.bf16.mxu0 %vm486_vm0, %v15580_v27 }
  0x7d   : > { %15370 = vmatmul.mubr.msk.bf16.gmra.mrb[52].mxu0 %vm486_vm0, %v15581_v28 }
  0x7e   : > { %15373 = vmatprep.mubr.msk.bf16.mxu0 %vm486_vm0, %v15582_v29 }
  0x85   : > { %15374 = vmatmul.mubr.msk.bf16.gmra.mrb[56].mxu0 %vm486_vm0, %v15583_v30 }
  0x86   : > { %15377 = vmatprep.mubr.msk.bf16.mxu0 %vm486_vm0, %v15584_v31 }
  0x8d   : > { %15378 = vmatmul.mubr.msk.bf16.gmra.mrb[60].mxu0 %vm486_vm0, %v15585_v32 }
  0x8e   : > { %15381 = vmatprep.mubr.msk.bf16.mxu0 %vm486_vm0, %v15586_v33 }
  0x95   : > { %15382 = vmatmul.mubr.msk.bf16.gmra.mrb[64].mxu0 %vm486_vm0, %v15587_v34 }
  0x96   : > { %15385 = vmatprep.mubr.msk.bf16.mxu0 %vm486_vm0, %v15588_v35 }
  0x9d   : > { %15386 = vmatmul.mubr.msk.bf16.gmra.mrb[68].mxu0 %vm486_vm0, %v15589_v36  ;;  %vm2453_vm0 = vsmask.f32 4368 }
  0x9e   : > { %vm16879_vm9 = vmor %vm1557_vm5, %vm2453_vm0 }
  0x9f   : > { %vm16907_vm5 = vmand %vm1537_vm4, %vm1538_vm1  ;;  %vm4158_vm1 = vcmask 261120  }
  0xe8   : > { %v15863_v37 = vpop.f32.mrb[0].mxu0 }
  0xe9   : > { %920 = vrot.lane.b32.xlu0 %v15863_v37, %s15737_s26  ;;  %v15867_v38 = vpop.f32.mrb[1].mxu0 }
  0xea   : > { %v15869_v39 = vpop.f32.mrb[2].mxu0 }
  0xeb   : > { %922 = vrot.lane.b32.xlu1 %v15869_v39, %s15737_s26  ;;  %v15873_v40 = vpop.f32.mrb[3].mxu0 }
  0xed   : > { %916 = vrot.lane.b32.xlu0 %v15867_v38, %s15737_s26 }
  0xef   : > { %918 = vrot.lane.b32.xlu1 %v15873_v40, %s15737_s26 }
  0xf0   : > { %v15879_v41 = vpop.f32.mrb[4].mxu0 }
  0xf1   : > { %928 = vrot.lane.b32.xlu0 %v15879_v41, %s15737_s26  ;;  %v15883_v42 = vpop.f32.mrb[5].mxu0 }
  0xf2   : > { %v15885_v43 = vpop.f32.mrb[6].mxu0 }
  0xf3   : > { %930 = vrot.lane.b32.xlu1 %v15885_v43, %s15737_s26  ;;  %v15889_v44 = vpop.f32.mrb[7].mxu0 }
  0xf5   : > { %924 = vrot.lane.b32.xlu0 %v15883_v42, %s15737_s26 }
  0xf7   : > { %926 = vrot.lane.b32.xlu1 %v15889_v44, %s15737_s26 }
  0xf8   : > { %v15895_v45 = vpop.f32.mrb[8].mxu0 }
  0xf9   : > { %936 = vrot.lane.b32.xlu0 %v15895_v45, %s15737_s26  ;;  %v15899_v46 = vpop.f32.mrb[9].mxu0 }
  0xfa   : > { %v15901_v47 = vpop.f32.mrb[10].mxu0 }
  0xfb   : > { %938 = vrot.lane.b32.xlu1 %v15901_v47, %s15737_s26  ;;  %v15905_v48 = vpop.f32.mrb[11].mxu0 }
  0xfd   : > { %932 = vrot.lane.b32.xlu0 %v15899_v46, %s15737_s26 }
  0xff   : > { %934 = vrot.lane.b32.xlu1 %v15905_v48, %s15737_s26 }
 0x100   : > { %v15911_v49 = vpop.f32.mrb[12].mxu0 }
 0x101   : > { %944 = vrot.lane.b32.xlu0 %v15911_v49, %s15737_s26  ;;  %v15915_v50 = vpop.f32.mrb[13].mxu0 }
 0x102   : > { %v15917_v51 = vpop.f32.mrb[14].mxu0 }
 0x103   : > { %946 = vrot.lane.b32.xlu1 %v15917_v51, %s15737_s26  ;;  %v15921_v52 = vpop.f32.mrb[15].mxu0 }
 0x105   : > { %940 = vrot.lane.b32.xlu0 %v15915_v50, %s15737_s26 }
 0x107   : > { %942 = vrot.lane.b32.xlu1 %v15921_v52, %s15737_s26 }
 0x108   : > { %v15927_v53 = vpop.f32.mrb[16].mxu0 }
 0x109   : > { %952 = vrot.lane.b32.xlu0 %v15927_v53, %s15737_s26  ;;  %v15931_v54 = vpop.f32.mrb[17].mxu0 }
 0x10a   : > { %v15933_v55 = vpop.f32.mrb[18].mxu0 }
 0x10b   : > { %v15935_v56 = vpop.f32.mrb[19].mxu0 }
 0x10c   : > { %950 = vrot.lane.b32.xlu1 %v15935_v56, %s15737_s26 }
 0x10d   : > { %948 = vrot.lane.b32.xlu0 %v15931_v54, %s15737_s26 }
 0x110   : > { %v15941_v57 = vpop.f32.mrb[20].mxu0 }
 0x111   : > { %954 = vrot.lane.b32.xlu0 %v15933_v55, %s15737_s26  ;;  %v15945_v58 = vpop.f32.mrb[21].mxu0 }
 0x112   : > { %v15947_v59 = vpop.f32.mrb[22].mxu0 }
 0x113   : > { %962 = vrot.lane.b32.xlu1 %v15947_v59, %s15737_s26  ;;  %v15951_v60 = vpop.f32.mrb[23].mxu0 }
 0x115   : > { %960 = vrot.lane.b32.xlu0 %v15941_v57, %s15737_s26 }
 0x117   : > { %958 = vrot.lane.b32.xlu1 %v15951_v60, %s15737_s26 }
 0x118   : > { %v15957_v61 = vpop.f32.mrb[24].mxu0 }
 0x119   : > { %956 = vrot.lane.b32.xlu0 %v15945_v58, %s15737_s26  ;;  %v15961_v62 = vpop.f32.mrb[25].mxu0 }
 0x11a   : > { %v15963_v63 = vpop.f32.mrb[26].mxu0 }
 0x11b   : > { %970 = vrot.lane.b32.xlu1 %v15963_v63, %s15737_s26  ;;  %v15967_v0 = vpop.f32.mrb[27].mxu0 }
 0x11d   : > { %968 = vrot.lane.b32.xlu0 %v15957_v61, %s15737_s26 }
 0x11f   : > { %966 = vrot.lane.b32.xlu1 %v15967_v0, %s15737_s26 }
 0x120   : > { %v15973_v1 = vpop.f32.mrb[28].mxu0 }
 0x121   : > { %964 = vrot.lane.b32.xlu0 %v15961_v62, %s15737_s26  ;;  %v15977_v2 = vpop.f32.mrb[29].mxu0 }
 0x122   : > { %v15979_v3 = vpop.f32.mrb[30].mxu0 }
 0x123   : > { %978 = vrot.lane.b32.xlu1 %v15979_v3, %s15737_s26  ;;  %v15983_v4 = vpop.f32.mrb[31].mxu0 }
 0x125   : > { %976 = vrot.lane.b32.xlu0 %v15973_v1, %s15737_s26 }
 0x127   : > { %974 = vrot.lane.b32.xlu1 %v15983_v4, %s15737_s26 }
 0x128   : > { %v15989_v5 = vpop.f32.mrb[32].mxu0 }
 0x129   : > { %972 = vrot.lane.b32.xlu0 %v15977_v2, %s15737_s26  ;;  %v15993_v6 = vpop.f32.mrb[33].mxu0 }
 0x12a   : > { %v15995_v7 = vpop.f32.mrb[34].mxu0 }
 0x12b   : > { %986 = vrot.lane.b32.xlu1 %v15995_v7, %s15737_s26  ;;  %v15999_v8 = vpop.f32.mrb[35].mxu0 }
 0x12d   : > { %984 = vrot.lane.b32.xlu0 %v15989_v5, %s15737_s26 }
 0x12f   : > { %982 = vrot.lane.b32.xlu1 %v15999_v8, %s15737_s26 }
 0x130   : > { %v16005_v9 = vpop.f32.mrb[36].mxu0 }
 0x131   : > { %980 = vrot.lane.b32.xlu0 %v15993_v6, %s15737_s26  ;;  %v16009_v10 = vpop.f32.mrb[37].mxu0 }
 0x132   : > { %v16011_v11 = vpop.f32.mrb[38].mxu0 }
 0x133   : > { %994 = vrot.lane.b32.xlu1 %v16011_v11, %s15737_s26  ;;  %v16015_v12 = vpop.f32.mrb[39].mxu0 }
 0x135   : > { %992 = vrot.lane.b32.xlu0 %v16005_v9, %s15737_s26 }
 0x137   : > { %990 = vrot.lane.b32.xlu1 %v16015_v12, %s15737_s26 }
 0x138   : > { %v16021_v13 = vpop.f32.mrb[40].mxu0 }
 0x139   : > { %988 = vrot.lane.b32.xlu0 %v16009_v10, %s15737_s26  ;;  %v16025_v14 = vpop.f32.mrb[41].mxu0 }
 0x13a   : > { %v16027_v15 = vpop.f32.mrb[42].mxu0 }
 0x13b   : > { %1002 = vrot.lane.b32.xlu1 %v16027_v15, %s15737_s26  ;;  %v16031_v16 = vpop.f32.mrb[43].mxu0 }
 0x13d   : > { %1000 = vrot.lane.b32.xlu0 %v16021_v13, %s15737_s26 }
 0x13f   : > { %998 = vrot.lane.b32.xlu1 %v16031_v16, %s15737_s26 }
 0x140   : > { %v16037_v17 = vpop.f32.mrb[44].mxu0 }
 0x141   : > { %996 = vrot.lane.b32.xlu0 %v16025_v14, %s15737_s26  ;;  %v16041_v18 = vpop.f32.mrb[45].mxu0 }
 0x142   : > { %v16043_v19 = vpop.f32.mrb[46].mxu0 }
 0x143   : > { %1010 = vrot.lane.b32.xlu1 %v16043_v19, %s15737_s26  ;;  %v16047_v20 = vpop.f32.mrb[47].mxu0 }
 0x144   : > { %20614 = vst [vmem:[#allocation4_spill] sm:$0xff] %v16047_v20 }
 0x145   : > { %1008 = vrot.lane.b32.xlu0 %v16037_v17, %s15737_s26 }
 0x147   : > { %1006 = vrot.lane.b32.xlu1 %v16047_v20, %s15737_s26 }
 0x148   : > { %v16053_v21 = vpop.f32.mrb[48].mxu0 }
 0x149   : > { %20615 = vst [vmem:[#allocation5_spill] sm:$0xff] %v16053_v21  ;;  %1004 = vrot.lane.b32.xlu0 %v16041_v18, %s15737_s26  ;;  %v16057_v22 = vpop.f32.mrb[49].mxu0 }
 0x14a   : > { %20616 = vst [vmem:[#allocation6_spill] sm:$0xff] %v16057_v22  ;;  %v16059_v23 = vpop.f32.mrb[50].mxu0 }
 0x14b   : > { %20617 = vst [vmem:[#allocation7_spill] sm:$0xff] %v16059_v23  ;;  %1018 = vrot.lane.b32.xlu1 %v16059_v23, %s15737_s26  ;;  %v16063_v24 = vpop.f32.mrb[51].mxu0 }
 0x14c   : > { %20618 = vst [vmem:[#allocation8_spill] sm:$0xff] %v16063_v24 }
 0x14d   : > { %1016 = vrot.lane.b32.xlu0 %v16053_v21, %s15737_s26 }
 0x14f   : > { %1014 = vrot.lane.b32.xlu1 %v16063_v24, %s15737_s26 }
 0x150   : > { %v16069_v25 = vpop.f32.mrb[52].mxu0 }
 0x151   : > { %20619 = vst [vmem:[#allocation9_spill] sm:$0xff] %v16069_v25  ;;  %1012 = vrot.lane.b32.xlu0 %v16057_v22, %s15737_s26  ;;  %v16073_v26 = vpop.f32.mrb[53].mxu0 }
 0x152   : > { %20620 = vst [vmem:[#allocation10_spill] sm:$0xff] %v16073_v26  ;;  %v16075_v27 = vpop.f32.mrb[54].mxu0 }
 0x153   : > { %20621 = vst [vmem:[#allocation11_spill] sm:$0xff] %v16075_v27  ;;  %1024 = vrot.lane.b32.xlu1 %v16069_v25, %s15737_s26  ;;  %v16079_v28 = vpop.f32.mrb[55].mxu0 }
 0x154   : > { %20622 = vst [vmem:[#allocation12_spill] sm:$0xff] %v16079_v28 }
 0x155   : > { %1020 = vrot.lane.b32.xlu0 %v16073_v26, %s15737_s26 }
 0x157   : > { %1026 = vrot.lane.b32.xlu1 %v16075_v27, %s15737_s26 }
 0x158   : > { %v16085_v29 = vpop.f32.mrb[56].mxu0 }
 0x159   : > { %20623 = vst [vmem:[#allocation13_spill] sm:$0xff] %v16085_v29  ;;  %1032 = vrot.lane.b32.xlu0 %v16085_v29, %s15737_s26  ;;  %v16089_v30 = vpop.f32.mrb[57].mxu0 }
 0x15a   : > { %20624 = vst [vmem:[#allocation14_spill] sm:$0xff] %v16089_v30  ;;  %v16091_v31 = vpop.f32.mrb[58].mxu0 }
 0x15b   : > { %20625 = vst [vmem:[#allocation15_spill] sm:$0xff] %v16091_v31  ;;  %v921_v32 = vpop.permute.xlu0 %920  ;;  %1022 = vrot.lane.b32.xlu1 %v16079_v28, %s15737_s26  ;;  %v16095_v33 = vpop.f32.mrb[59].mxu0 }
 0x15c   : > { %20626 = vst [vmem:[#allocation16_spill] sm:$0xff] %v16095_v33  ;;  %v16100_v35 = vmax.f32 %v15863_v37, %v921_v32 }
 0x15d   : > { %v923_v34 = vpop.permute.xlu1 %922  ;;  %1028 = vrot.lane.b32.xlu0 %v16089_v30, %s15737_s26 }
 0x15e   : > { %20627 = vst [vmem:[#allocation17_spill] sm:$0xff] %v16100_v35 }
 0x15f   : > { %v917_v36 = vpop.permute.xlu0 %916  ;;  %1034 = vrot.lane.b32.xlu1 %v16091_v31, %s15737_s26  ;;  %v16120_v31 = vmax.f32 %v15869_v39, %v923_v34 }
 0x160   : > { %v16104_v29 = vpop.f32.mrb[60].mxu0  ;;  %v16113_v30 = vmax.f32 %v15867_v38, %v917_v36 }
 0x161   : > { %20628 = vst [vmem:[#allocation18_spill] sm:$0xff] %v16104_v29  ;;  %v919_v27 = vpop.permute.xlu1 %918  ;;  %1136 = vrot.lane.b32.xlu0 %v16100_v35, %s15738_s27  ;;  %v16108_v28 = vpop.f32.mrb[61].mxu0  ;;  %20633 = vst [vmem:[#allocation23_spill] sm:$0xff] %v16120_v31 }
 0x162   : > { %20629 = vst [vmem:[#allocation19_spill] sm:$0xff] %v16108_v28  ;;  %v16110_v26 = vpop.f32.mrb[62].mxu0  ;;  %20631 = vst [vmem:[#allocation21_spill] sm:$0xff] %v16113_v30  ;;  %v16129_v38 = vmax.f32 %v15873_v40, %v919_v27  ;;  %v20638_v40 = vmov 0  ;;  %v1681_v27 = vld [vmem:[#allocation2 + $0x13c] sm:$0x4] }
 0x163   : > { %20630 = vst [vmem:[#allocation20_spill] sm:$0xff] %v16110_v26  ;;  %v929_v37 = vpop.permute.xlu0 %928  ;;  %1030 = vrot.lane.b32.xlu1 %v16095_v33, %s15737_s26  ;;  %v16117_v32 = vpop.f32.mrb[63].mxu0  ;;  %v20639_v40 = vsel %vm16144_vm3, 4294967295, %v20638_v40 }
 0x164   : > { %20632 = vst [vmem:[#allocation22_spill] sm:$0xff] %v16117_v32  ;;  %20635 = vst [vmem:[#allocation25_spill] sm:$0xff] %v16129_v38 }
 0x165   : > { %v931_v24 = vpop.permute.xlu1 %930  ;;  %1132 = vrot.lane.b32.xlu0 %v16113_v30, %s15738_s27  ;;  %20640 = vst [vmem:[#allocation28_spill] sm:$0xff] %v20639_v40  ;;  %v16151_v30 = vmax.f32 %v15879_v41, %v929_v37 }
 0x167   : > { %v925_v25 = vpop.permute.xlu0 %924  ;;  %1138 = vrot.lane.b32.xlu1 %v16120_v31, %s15738_s27  ;;  %20641 = vst [vmem:[#allocation29_spill] sm:$0xff] %v16151_v30 }
 0x168   : > { %v16126_v23 = vpop.f32.mrb[64].mxu0 }
 0x169   : > { %20634 = vst [vmem:[#allocation24_spill] sm:$0xff] %v16126_v23  ;;  %v927_v36 = vpop.permute.xlu1 %926  ;;  %1040 = vrot.lane.b32.xlu0 %v16104_v29, %s15737_s26  ;;  %v16133_v33 = vpop.f32.mrb[65].mxu0  ;;  %v1682_v29 = vsel %vm16144_vm3, 0, %v1681_v27  ;;  %v16164_v27 = vmax.f32 %v15883_v42, %v925_v25 }
 0x16a   : > { %20636 = vst [vmem:[#allocation26_spill] sm:$0xff] %v16133_v33  ;;  %v16135_v39 = vpop.f32.mrb[66].mxu0  ;;  %1683 = vst [vmem:[#allocation2 + $0x13c] sm:$0x4] %v1682_v29  ;;  %v16171_v29 = vmax.f32 %v15885_v43, %v931_v24  ;;  %v16178_v42 = vmax.f32 %v15889_v44, %v927_v36  ;;  %v1684_v44 = vld [vmem:[#allocation2 + $0x144] sm:$0x4] }
 0x16b   : > { %20637 = vst [vmem:[#allocation27_spill] sm:$0xff] %v16135_v39  ;;  %v937_v34 = vpop.permute.xlu0 %936  ;;  %1134 = vrot.lane.b32.xlu1 %v16129_v38, %s15738_s27  ;;  %v16139_v22 = vpop.f32.mrb[67].mxu0 }
 0x16c   : > { %20645 = vst [vmem:[#allocation33_spill] sm:$0xff] %v16178_v42  ;;  %v16187_v43 = vmax.f32 %v15895_v45, %v937_v34 }
 0x16d   : > { %v939_v31 = vpop.permute.xlu1 %938  ;;  %1036 = vrot.lane.b32.xlu0 %v16108_v28, %s15737_s26 }
 0x16e   : > { %v16201_v45 = vmax.f32 %v15901_v47, %v939_v31 }
 0x16f   : > { %v933_v20 = vpop.permute.xlu0 %932  ;;  %1042 = vrot.lane.b32.xlu1 %v16110_v26, %s15737_s26 }
 0x170   : > { %v16155_v38 = vpop.f32.mrb[68].mxu0 }
 0x171   : > { %20642 = vst [vmem:[#allocation30_spill] sm:$0xff] %v16155_v38  ;;  %v935_v28 = vpop.permute.xlu1 %934  ;;  %1144 = vrot.lane.b32.xlu0 %v16151_v30, %s15738_s27  ;;  %v16159_v21 = vpop.f32.mrb[69].mxu0 }
 0x172   : > { %v16161_v35 = vpop.f32.mrb[70].mxu0 }
 0x173   : > { %20643 = vst [vmem:[#allocation31_spill] sm:$0xff] %v16161_v35  ;;  %v945_v41 = vpop.permute.xlu0 %944  ;;  %1038 = vrot.lane.b32.xlu1 %v16117_v32, %s15737_s26  ;;  %v16168_v37 = vpop.f32.mrb[71].mxu0 }
 0x174   : > { %20644 = vst [vmem:[#allocation32_spill] sm:$0xff] %v16168_v37  ;;  %v16217_v31 = vmax.f32 %v15911_v49, %v945_v41 }
 0x175   : > { %v947_v26 = vpop.permute.xlu1 %946  ;;  %1140 = vrot.lane.b32.xlu0 %v16164_v27, %s15738_s27 }
 0x176   : > { %20647 = vst [vmem:[#allocation35_spill] sm:$0xff] %v16217_v31  ;;  %v16231_v41 = vmax.f32 %v15917_v51, %v947_v26 }
 0x177   : > { %v941_v30 = vpop.permute.xlu0 %940  ;;  %1146 = vrot.lane.b32.xlu1 %v16171_v29, %s15738_s27 }
 0x179   : > { %1048 = vrot.lane.b32.xlu0 %v16126_v23, %s15737_s26  ;;  %v943_v25 = vpop.permute.xlu1 %942  ;;  %v1685_v23 = vsel %vm16144_vm3, 0, %v1684_v44 }
 0x17a   : > { %1686 = vst [vmem:[#allocation2 + $0x144] sm:$0x4] %v1685_v23  ;;  %v16208_v23 = vmax.f32 %v15905_v48, %v935_v28  ;;  %v1687_v28 = vld [vmem:[#allocation2 + $0x14c] sm:$0x4] }
 0x17b   : > { %v953_v32 = vpop.permute.xlu0 %952  ;;  %1142 = vrot.lane.b32.xlu1 %v16178_v42, %s15738_s27  ;;  %v16196_v42 = vmax.f32 %v15899_v46, %v933_v20  ;;  %v1688_v49 = vsel %vm16144_vm3, 0, %v1687_v28 }
 0x17c   : > { %20646 = vst [vmem:[#allocation34_spill] sm:$0xff] %v16208_v23  ;;  %1689 = vst [vmem:[#allocation2 + $0x14c] sm:$0x4] %v1688_v49 }
 0x17d   : > { %1044 = vrot.lane.b32.xlu0 %v16133_v33, %s15737_s26 }
 0x17e   : > { %v951_v36 = vpop.permute.xlu1 %950 }
 0x17f   : > { %v949_v24 = vpop.permute.xlu0 %948  ;;  %1050 = vrot.lane.b32.xlu1 %v16135_v39, %s15737_s26 }
 0x180   : > { %v16246_v51 = vmax.f32 %v15931_v54, %v949_v24  ;;  %v20649_v54 = vmov 0 }
 0x181   : > { %1152 = vrot.lane.b32.xlu0 %v16187_v43, %s15738_s27  ;;  %v20650_v54 = vsel %vm16261_vm6, 4294967295, %v20649_v54 }
 0x182   : > { %20651 = vst [vmem:[#allocation37_spill] sm:$0xff] %v20650_v54 }
 0x183   : > { %v955_v33 = vpop.permute.xlu0 %954  ;;  %1046 = vrot.lane.b32.xlu1 %v16139_v22, %s15737_s26 }
 0x185   : > { %v963_v34 = vpop.permute.xlu1 %962  ;;  %1148 = vrot.lane.b32.xlu0 %v16196_v42, %s15738_s27 }
 0x186   : > { %v16278_v49 = vmax.f32 %v15947_v59, %v963_v34 }
 0x187   : > { %v961_v39 = vpop.permute.xlu0 %960  ;;  %1154 = vrot.lane.b32.xlu1 %v16201_v45, %s15738_s27 }
 0x189   : > { %v959_v46 = vpop.permute.xlu1 %958  ;;  %1056 = vrot.lane.b32.xlu0 %v16155_v38, %s15737_s26  ;;  %v16224_v38 = vmax.f32 %v15915_v50, %v941_v30  ;;  %v16241_v30 = vmax.f32 %v15921_v52, %v943_v25  ;;  %v1599_v52 = vld [vmem:[#allocation2 + $0xd0] sm:$0x1]  ;;  %v16256_v25 = vmax.f32 %v15941_v57, %v961_v39 }
 0x18b   : > { %v957_v20 = vpop.permute.xlu0 %956  ;;  %1150 = vrot.lane.b32.xlu1 %v16208_v23, %s15738_s27 }
 0x18c   : > { %v16273_v57 = vmax.f32 %v15945_v58, %v957_v20  ;;  %v16288_v58 = vmax.f32 %v15951_v60, %v959_v46 }
 0x18d   : > { %v971_v47 = vpop.permute.xlu1 %970  ;;  %1052 = vrot.lane.b32.xlu0 %v16159_v21, %s15737_s26 }
 0x18f   : > { %v969_v44 = vpop.permute.xlu0 %968  ;;  %1058 = vrot.lane.b32.xlu1 %v16161_v35, %s15737_s26 }
 0x191   : > { %v967_v48 = vpop.permute.xlu1 %966  ;;  %1160 = vrot.lane.b32.xlu0 %v16217_v31, %s15738_s27  ;;  %v16236_v31 = vmax.f32 %v15927_v53, %v953_v32  ;;  %v16251_v53 = vmax.f32 %v15933_v55, %v955_v33  ;;  %v1600_v55 = vsel %vm16261_vm6, 0, %v1599_v52  ;;  %v16268_v33 = vmax.f32 %v15935_v56, %v951_v36 }
 0x192   : > { %1601 = vst [vmem:[#allocation2 + $0xd0] sm:$0x1] %v1600_v55  ;;  %v16283_v56 = vmax.f32 %v15957_v61, %v969_v44  ;;  %v16298_v61 = vmax.f32 %v15963_v63, %v971_v47  ;;  %v1690_v63 = vld [vmem:[#allocation2 + $0x154] sm:$0x4] }
 0x193   : > { %v965_v23 = vpop.permute.xlu0 %964  ;;  %1054 = vrot.lane.b32.xlu1 %v16168_v37, %s15737_s26  ;;  %20648 = vst [vmem:[#allocation36_spill] sm:$0xff] %v16251_v53 }
 0x194   : > { %v16293_v59 = vmax.f32 %v15961_v62, %v965_v23  ;;  %v16308_v62 = vmax.f32 %v15967_v0, %v967_v48 }
 0x195   : > { %v979_v35 = vpop.permute.xlu1 %978  ;;  %1156 = vrot.lane.b32.xlu0 %v16224_v38, %s15738_s27 }
 0x196   : > { %v16322_v0 = vmax.f32 %v15979_v3, %v979_v35 }
 0x197   : > { %v977_v50 = vpop.permute.xlu0 %976  ;;  %1162 = vrot.lane.b32.xlu1 %v16231_v41, %s15738_s27 }
 0x198   : > { %v16303_v60 = vmax.f32 %v15973_v1, %v977_v50  ;;  %v1691_v1 = vsel %vm16144_vm3, 0, %v1690_v63  ;;  %v1608_v50 = vld [vmem:[#allocation2 + $0xe8] sm:$0x1] }
 0x199   : > { %v975_v37 = vpop.permute.xlu1 %974  ;;  %1168 = vrot.lane.b32.xlu0 %v16236_v31, %s15738_s27  ;;  %1692 = vst [vmem:[#allocation2 + $0x154] sm:$0x4] %v1691_v1 }
 0x19a   : > { %v16336_v63 = vmax.f32 %v15983_v4, %v975_v37 }
 0x19b   : > { %v973_v26 = vpop.permute.xlu0 %972  ;;  %1158 = vrot.lane.b32.xlu1 %v16241_v30, %s15738_s27 }
 0x19c   : > { %v16315_v47 = vmax.f32 %v15977_v2, %v973_v26  ;;  %v1609_v2 = vsel %vm16261_vm6, 0, %v1608_v50 }
 0x19d   : > { %v987_v32 = vpop.permute.xlu1 %986  ;;  %1164 = vrot.lane.b32.xlu0 %v16246_v51, %s15738_s27  ;;  %1610 = vst [vmem:[#allocation2 + $0xe8] sm:$0x1] %v1609_v2 }
 0x19f   : > { %v985_v28 = vpop.permute.xlu0 %984  ;;  %1170 = vrot.lane.b32.xlu1 %v16251_v53, %s15738_s27 }
 0x1a0   : > { %v16331_v26 = vmax.f32 %v15989_v5, %v985_v28  ;;  %v16348_v5 = vmax.f32 %v15995_v7, %v987_v32 }
 0x1a1   : > { %v983_v24 = vpop.permute.xlu1 %982  ;;  %1176 = vrot.lane.b32.xlu0 %v16256_v25, %s15738_s27 }
 0x1a2   : > { %v16360_v50 = vmax.f32 %v15999_v8, %v983_v24  ;;  %v1617_v8 = vld [vmem:[#allocation2 + $0x100] sm:$0x1] }
 0x1a3   : > { %v981_v39 = vpop.permute.xlu0 %980  ;;  %1166 = vrot.lane.b32.xlu1 %v16268_v33, %s15738_s27  ;;  %v1618_v24 = vsel %vm16261_vm6, 0, %v1617_v8 }
 0x1a4   : > { %v16343_v35 = vmax.f32 %v15993_v6, %v981_v39  ;;  %v1602_v6 = vld [vmem:[#allocation2 + $0xd8] sm:$0x1]  ;;  %v1605_v39 = vld [vmem:[#allocation2 + $0xe0] sm:$0x1]  ;;  %20653 = vst [vmem:[#allocation39_spill] sm:$0xff] %v16360_v50 }
 0x1a5   : > { %v995_v53 = vpop.permute.xlu1 %994  ;;  %1172 = vrot.lane.b32.xlu0 %v16273_v57, %s15738_s27  ;;  %v1603_v7 = vsel %vm16261_vm6, 0, %v1602_v6  ;;  %1619 = vst [vmem:[#allocation2 + $0x100] sm:$0x1] %v1618_v24 }
 0x1a6   : > { %1604 = vst [vmem:[#allocation2 + $0xd8] sm:$0x1] %v1603_v7 }
 0x1a7   : > { %v993_v36 = vpop.permute.xlu0 %992  ;;  %1178 = vrot.lane.b32.xlu1 %v16278_v49, %s15738_s27 }
 0x1a8   : > { %v16355_v4 = vmax.f32 %v16005_v9, %v993_v36  ;;  %v1606_v9 = vsel %vm16261_vm6, 0, %v1605_v39 }
 0x1a9   : > { %v991_v20 = vpop.permute.xlu1 %990  ;;  %1184 = vrot.lane.b32.xlu0 %v16283_v56, %s15738_s27  ;;  %1607 = vst [vmem:[#allocation2 + $0xe0] sm:$0x1] %v1606_v9 }
 0x1aa   : > { %20652 = vst [vmem:[#allocation38_spill] sm:$0xff] %v16355_v4  ;;  %v16392_v39 = vmax.f32 %v16015_v12, %v991_v20  ;;  %v1611_v12 = vld [vmem:[#allocation2 + $0xf0] sm:$0x1]  ;;  %v1614_v20 = vld [vmem:[#allocation2 + $0xf8] sm:$0x1] }
 0x1ab   : > { %v989_v34 = vpop.permute.xlu0 %988  ;;  %1174 = vrot.lane.b32.xlu1 %v16288_v58, %s15738_s27  ;;  %v1612_v9 = vsel %vm16261_vm6, 0, %v1611_v12 }
 0x1ac   : > { %v16371_v32 = vmax.f32 %v16009_v10, %v989_v34  ;;  %20657 = vst [vmem:[#allocation43_spill] sm:$0xff] %v16392_v39  ;;  %1613 = vst [vmem:[#allocation2 + $0xf0] sm:$0x1] %v1612_v9  ;;  %v1693_v9 = vld [vmem:[#allocation2 + $0x15c] sm:$0x4] }
 0x1ad   : > { %v1003_v44 = vpop.permute.xlu1 %1002  ;;  %1180 = vrot.lane.b32.xlu0 %v16293_v59, %s15738_s27 }
 0x1ae   : > { %20654 = vst [vmem:[#allocation40_spill] sm:$0xff] %v16371_v32 }
 0x1af   : > { %v1001_v46 = vpop.permute.xlu0 %1000  ;;  %1186 = vrot.lane.b32.xlu1 %v16298_v61, %s15738_s27 }
 0x1b0   : > { %v16385_v10 = vmax.f32 %v16021_v13, %v1001_v46  ;;  %v16406_v13 = vmax.f32 %v16027_v15, %v1003_v44 }
 0x1b1   : > { %v16310_v23 = vpop.permute.xlu1 %998  ;;  %1192 = vrot.lane.b32.xlu0 %v16303_v60, %s15738_s27 }
 0x1b2   : > { %20656 = vst [vmem:[#allocation42_spill] sm:$0xff] %v16385_v10  ;;  %20659 = vst [vmem:[#allocation45_spill] sm:$0xff] %v16406_v13  ;;  %v16425_v15 = vmax.f32 %v16031_v16, %v16310_v23  ;;  %v15739_v16 = vmov 1983009808  }
 0x1b3   : > { %v997_v52 = vpop.permute.xlu0 %996  ;;  %1182 = vrot.lane.b32.xlu1 %v16308_v62, %s15738_s27  ;;  %v1731_v23 = vunpack.c.l.s4 %v15739_v16  ;;  %v20667_v16 = vld [vmem:[#allocation4_spill] sm:$0xff] }
 0x1b4   : > { %20661 = vst [vmem:[#allocation47_spill] sm:$0xff] %v16425_v15 }
 0x1b5   : > { %v16324_v48 = vpop.permute.xlu1 %1010  ;;  %1188 = vrot.lane.b32.xlu0 %v16315_v47, %s15738_s27 }
 0x1b7   : > { %v1009_v55 = vpop.permute.xlu0 %1008  ;;  %1194 = vrot.lane.b32.xlu1 %v16322_v0, %s15738_s27 }
 0x1b9   : > { %v16338_v3 = vpop.permute.xlu1 %1006  ;;  %1200 = vrot.lane.b32.xlu0 %v16331_v26, %s15738_s27 }
 0x1bb   : > { %v1005_v1 = vpop.permute.xlu0 %1004  ;;  %1190 = vrot.lane.b32.xlu1 %v16336_v63, %s15738_s27 }
 0x1bc   : > { %v16432_v24 = vmax.f32 %v16041_v18, %v1005_v1  ;;  %v1694_v1 = vsel %vm16144_vm3, 0, %v1693_v9 }
 0x1bd   : > { %v16350_v28 = vpop.permute.xlu1 %1018  ;;  %1196 = vrot.lane.b32.xlu0 %v16343_v35, %s15738_s27  ;;  %1695 = vst [vmem:[#allocation2 + $0x15c] sm:$0x4] %v1694_v1 }
 0x1be   : > { %20662 = vst [vmem:[#allocation48_spill] sm:$0xff] %v16432_v24 }
 0x1bf   : > { %v1017_v37 = vpop.permute.xlu0 %1016  ;;  %1202 = vrot.lane.b32.xlu1 %v16348_v5, %s15738_s27 }
 0x1c1   : > { %v16362_v2 = vpop.permute.xlu1 %1014  ;;  %1208 = vrot.lane.b32.xlu0 %v16355_v4, %s15738_s27  ;;  %v16378_v4 = vmax.f32 %v16011_v11, %v995_v53  ;;  %v16399_v11 = vmax.f32 %v16025_v14, %v997_v52  ;;  %v1615_v14 = vsel %vm16261_vm6, 0, %v1614_v20  ;;  %v16417_v52 = vmax.f32 %v16037_v17, %v1009_v55 }
 0x1c2   : > { %1616 = vst [vmem:[#allocation2 + $0xf8] sm:$0x1] %v1615_v14  ;;  %v16438_v55 = vmax.f32 %v16043_v19, %v16324_v48  ;;  %v1733_v20 = vlaneseq  ;;  %v20664_v14 = vld [vmem:[#allocation17_spill] sm:$0xff]  ;;  %v16453_v19 = vld [vmem:[%s20530_s2] ss:$0 sm:$0xff] }
 0x1c3   : > { %v1013_v36 = vpop.permute.xlu0 %1012  ;;  %1198 = vrot.lane.b32.xlu1 %v16360_v50, %s15738_s27  ;;  %20655 = vst [vmem:[#allocation41_spill] sm:$0xff] %v16378_v4  ;;  %20658 = vst [vmem:[#allocation44_spill] sm:$0xff] %v16399_v11 }
 0x1c4   : > { %20660 = vst [vmem:[#allocation46_spill] sm:$0xff] %v16417_v52  ;;  %20663 = vst [vmem:[#allocation49_spill] sm:$0xff] %v16438_v55 }
 0x1c5   : > { %v16380_v6 = vpop.permute.xlu1 %1024  ;;  %1204 = vrot.lane.b32.xlu0 %v16371_v32, %s15738_s27 }
 0x1c7   : > { %v16387_v34 = vpop.permute.xlu0 %1020  ;;  %1210 = vrot.lane.b32.xlu1 %v16378_v4, %s15738_s27 }
 0x1c9   : > { %v16394_v7 = vpop.permute.xlu1 %1026  ;;  %1216 = vrot.lane.b32.xlu0 %v16385_v10, %s15738_s27  ;;  %v20672_v10 = vld [vmem:[#allocation6_spill] sm:$0xff] }
 0x1cb   : > { %v16401_v53 = vpop.permute.xlu0 %1032  ;;  %1206 = vrot.lane.b32.xlu1 %v16392_v39, %s15738_s27 }
 0x1cd   : > { %v16408_v46 = vpop.permute.xlu1 %1022  ;;  %1212 = vrot.lane.b32.xlu0 %v16399_v11, %s15738_s27  ;;  %v20671_v11 = vld [vmem:[#allocation23_spill] sm:$0xff] }
 0x1cf   : > { %v16419_v8 = vpop.permute.xlu0 %1028  ;;  %1218 = vrot.lane.b32.xlu1 %v16406_v13, %s15738_s27 }
 0x1d1   : > { %v16427_v44 = vpop.permute.xlu1 %1034  ;;  %1224 = vrot.lane.b32.xlu0 %v16417_v52, %s15738_s27  ;;  %v20665_v52 = vld [vmem:[#allocation5_spill] sm:$0xff] }
 0x1d3   : > { %v1137_v17 = vpop.permute.xlu0 %1136  ;;  %1214 = vrot.lane.b32.xlu1 %v16425_v15, %s15738_s27  ;;  %v16448_v15 = vmax.f32 %v20665_v52, %v1017_v37  ;;  %v20670_v52 = vld [vmem:[#allocation21_spill] sm:$0xff] }
 0x1d4   : > { %v1278_v18 = vmax.f32 %v20664_v14, %v1137_v17  ;;  %v1732_v17 = vunpack.c.0.s8 %v1731_v23  ;;  %v16461_v14 = vshrl.u32 %v1733_v20, 7 }
 0x1d5   : > { %v16440_v12 = vpop.permute.xlu1 %1030  ;;  %1220 = vrot.lane.b32.xlu0 %v16432_v24, %s15738_s27  ;;  %20666 = vst [vmem:[#allocation17_spill] sm:$0xff] %v16448_v15  ;;  %v16459_v24 = vmax.f32 %v20667_v16, %v16338_v3  ;;  %v1623_v3 = vld [vmem:[#allocation2 + $0x110] sm:$0x1] }
 0x1d6   : > { %20669 = vst [vmem:[#allocation4_spill] sm:$0xff] %v16461_v14  ;;  %v1357_v37 = vadd.f32 %v16453_v19, %v1278_v18  ;;  %v1624_v20 = vsel %vm16261_vm6, 0, %v1623_v3  ;;  %v20674_v18 = vld [vmem:[#allocation7_spill] sm:$0xff]  ;;  %v20677_v3 = vld [vmem:[#allocation9_spill] sm:$0xff] }
 0x1d7   : > { %v1133_v48 = vpop.permute.xlu0 %1132  ;;  %1226 = vrot.lane.b32.xlu1 %v16438_v55, %s15738_s27  ;;  %20668 = vst [vmem:[#allocation5_spill] sm:$0xff] %v16459_v24  ;;  %v16469_v55 = vmax.f32 %v20672_v10, %v1013_v36  ;;  %v16480_v16 = vmax.f32 %v20674_v18, %v16350_v28  ;;  %1625 = vst [vmem:[#allocation2 + $0x110] sm:$0x1] %v1624_v20  ;;  %v1620_v20 = vld [vmem:[#allocation2 + $0x108] sm:$0x1] }
 0x1d8   : > { %v1276_v13 = vmax.f32 %v20670_v52, %v1133_v48  ;;  %v1429_v10 = vmax.f32 %v1357_v37, 0.0  ;;  %v20679_v37 = vld [vmem:[#allocation8_spill] sm:$0xff] }
 0x1d9   : > { %v1139_v9 = vpop.permute.xlu1 %1138  ;;  %1232 = vrot.lane.b32.xlu0 %v16448_v15, %s15738_s27  ;;  %20673 = vst [vmem:[#allocation21_spill] sm:$0xff] %v16469_v55  ;;  %20675 = vst [vmem:[#allocation23_spill] sm:$0xff] %v16480_v16 }
 0x1da   : > { %v1279_v39 = vmax.f32 %v20671_v11, %v1139_v9  ;;  %v16483_v11 = vsub.s32 %v1732_v17, %v16461_v14  ;;  %v1355_v48 = vadd.f32 %v16453_v19, %v1276_v13  ;;  %v16500_v13 = vmax.f32 %v20679_v37, %v16362_v2 }
 0x1db   : > { %v16471_v1 = vpop.permute.xlu0 %1040  ;;  %1222 = vrot.lane.b32.xlu1 %v16459_v24, %s15738_s27  ;;  %v16491_v24 = vmax.f32 %v20677_v3, %v16380_v6  ;;  %v1621_v6 = vsel %vm16261_vm6, 0, %v1620_v20 }
 0x1dc   : > { %v1358_v23 = vadd.f32 %v16453_v19, %v1279_v39  ;;  %v20676_v39 = vld [vmem:[#allocation25_spill] sm:$0xff]  ;;  %20680 = vst [vmem:[#allocation7_spill] sm:$0xff] %v16500_v13  ;;  %1622 = vst [vmem:[#allocation2 + $0x108] sm:$0x1] %v1621_v6 }
 0x1dd   : > { %v1135_v36 = vpop.permute.xlu1 %1134  ;;  %1228 = vrot.lane.b32.xlu0 %v16469_v55, %s15738_s27  ;;  %20678 = vst [vmem:[#allocation6_spill] sm:$0xff] %v16491_v24 }
 0x1de   : > { %v1430_v9 = vmax.f32 %v1358_v23, 0.0  ;;  %v1277_v52 = vmax.f32 %v20676_v39, %v1135_v36  ;;  %v1427_v36 = vmax.f32 %v1355_v48, 0.0  ;;  %v20683_v48 = vld [vmem:[#allocation11_spill] sm:$0xff] }
 0x1df   : > { %v16493_v28 = vpop.permute.xlu0 %1036  ;;  %1234 = vrot.lane.b32.xlu1 %v16480_v16, %s15738_s27  ;;  %v16516_v20 = vmax.f32 %v20683_v48, %v16394_v7 }
 0x1e0   : > { %v1500_v17 = vpack.c.bf16 %v1430_v9, %v1429_v10  ;;  %v14757_v18 = vpack.c.bf16 %v1430_v9, %v1430_v9  ;;  %v1356_v14 = vadd.f32 %v16453_v19, %v1277_v52  ;;  %v20681_v52 = vld [vmem:[#allocation10_spill] sm:$0xff] }
 0x1e1   : > { %v1043_v23 = vpop.permute.xlu1 %1042  ;;  %1240 = vrot.lane.b32.xlu0 %v16491_v24, %s15738_s27  ;;  %v16510_v3 = vmax.f32 %v20681_v52, %v16387_v34  ;;  %20684 = vst [vmem:[#allocation9_spill] sm:$0xff] %v16516_v20 }
 0x1e2   : > { %v1753_v39 = vrot.slane %v1500_v17, %v16483_v11  ;;  %v1760_v10 = vrot.slane %v14757_v18, %v16483_v11  ;;  %v1428_v9 = vmax.f32 %v1356_v14, 0.0  ;;  %v20685_v17 = vld [vmem:[#allocation29_spill] sm:$0xff] }
 0x1e3   : > { %20682 = vst [vmem:[#allocation25_spill] sm:$0xff] %v16510_v3  ;;  %v1145_v2 = vpop.permute.xlu0 %1144  ;;  %1230 = vrot.lane.b32.xlu1 %v16500_v13, %s15738_s27 }
 0x1e4   : > { %v1761_v37 = vcombine.high %v1753_v39, %v1753_v39  ;;  %v1762_v24 = vcombine.high %v1760_v10, %v1760_v10  ;;  %v1499_v16 = vpack.c.bf16 %v1428_v9, %v1427_v36  ;;  %v14756_v55 = vpack.c.bf16 %v1428_v9, %v1428_v9  ;;  %v20686_v36 = vld [vmem:[#allocation13_spill] sm:$0xff] }
 0x1e5   : > { %v1282_v14 = vmax.f32 %v20685_v17, %v1145_v2  ;;  %v1039_v18 = vpop.permute.xlu1 %1038  ;;  %1236 = vrot.lane.b32.xlu0 %v16510_v3, %s15738_s27  ;;  %v16526_v9 = vmax.f32 %v20686_v36, %v16401_v53  ;;  %v20690_v36 = vld [vmem:[#allocation14_spill] sm:$0xff] }
 0x1e6   : > { %v1911_v34 = vrot.slane %v1761_v37, %v16483_v11  ;;  %v1912_v6 = vcombine.low %v1760_v10, %v1762_v24  ;;  %v1736_v52 = vrot.slane %v1499_v16, %v16483_v11  ;;  %v1743_v13 = vrot.slane %v14756_v55, %v16483_v11  ;;  %v20688_v16 = vld [vmem:[#allocation12_spill] sm:$0xff] }
 0x1e7   : > { %20687 = vst [vmem:[#allocation8_spill] sm:$0xff] %v16526_v9  ;;  %v1141_v7 = vpop.permute.xlu0 %1140  ;;  %1242 = vrot.lane.b32.xlu1 %v16516_v20, %s15738_s27  ;;  %v16535_v55 = vmax.f32 %v20688_v16, %v16408_v46  ;;  %v16546_v46 = vmax.f32 %v20690_v36, %v16419_v8  ;;  %v20694_v8 = vld [vmem:[#allocation16_spill] sm:$0xff] }
 0x1e8   : > { %v1919_v2 = vrot.slane %v1912_v6, %v16483_v11  ;;  %2090 = vst.msk [vmem:[#allocation2 + $0x144] sm:$0x3] %vm2087_vm7, %v1911_v34  ;;  %v1744_v48 = vcombine.high %v1736_v52, %v1736_v52  ;;  %v1745_v37 = vcombine.high %v1743_v13, %v1743_v13  ;;  %v1896_v24 = vrot.slane %v1743_v13, %v16483_v11  ;;  %v20701_v36 = vld [vmem:[#allocation20_spill] sm:$0xff] }
 0x1e9   : > { %20689 = vst [vmem:[#allocation10_spill] sm:$0xff] %v16535_v55  ;;  %v1280_v53 = vmax.f32 %v16164_v27, %v1141_v7  ;;  %v1147_v10 = vpop.permute.xlu1 %1146  ;;  %1248 = vrot.lane.b32.xlu0 %v16526_v9, %s15738_s27  ;;  %v1361_v34 = vadd.f32 %v16453_v19, %v1282_v14  ;;  %20691 = vst [vmem:[#allocation11_spill] sm:$0xff] %v16546_v46 }
 0x1ea   : > { %2091 = vst.msk [vmem:[#allocation2 + $0x148] sm:$0xf] %vm1535_vm8, %v1919_v2  ;;  %v1882_v17 = vcombine.low %v1736_v52, %v1744_v48  ;;  %v1897_v6 = vcombine.low %v1745_v37, %v1753_v39  ;;  %v1283_v13 = vmax.f32 %v16171_v29, %v1147_v10  ;;  %v20692_v52 = vld [vmem:[#allocation15_spill] sm:$0xff]  ;;  %v16562_v48 = vmax.f32 %v20694_v8, %v16440_v12  ;;  %v20696_v10 = vld [vmem:[#allocation33_spill] sm:$0xff]  ;;  %v20703_v12 = vld [vmem:[#allocation22_spill] sm:$0xff] }
 0x1eb   : > { %2088 = vst.msk [vmem:[#allocation2 + $0x13c] sm:$0x3] %vm2087_vm7, %v1896_v24  ;;  %v1049_v16 = vpop.permute.xlu0 %1048  ;;  %1238 = vrot.lane.b32.xlu1 %v16535_v55, %s15738_s27  ;;  %v16555_v2 = vmax.f32 %v20692_v52, %v16427_v44  ;;  %v1359_v29 = vadd.f32 %v16453_v19, %v1280_v53  ;;  %v1433_v37 = vmax.f32 %v1361_v34, 0.0  ;;  %v20697_v44 = vld [vmem:[#allocation18_spill] sm:$0xff]  ;;  %v20699_v53 = vld [vmem:[#allocation19_spill] sm:$0xff]  ;;  %v16576_v52 = vmax.f32 %v20701_v36, %v1043_v23 }
 0x1ec   : > { %v1889_v27 = vrot.slane %v1882_v17, %v16483_v11  ;;  %v1904_v7 = vrot.slane %v1897_v6, %v16483_v11  ;;  %v1362_v39 = vadd.f32 %v16453_v19, %v1283_v13  ;;  %20695 = vst [vmem:[#allocation13_spill] sm:$0xff] %v16562_v48  ;;  %v16569_v6 = vmax.f32 %v20697_v44, %v16471_v1  ;;  %v20707_v44 = vld [vmem:[#allocation26_spill] sm:$0xff] }
 0x1ed   : > { %20693 = vst [vmem:[#allocation29_spill] sm:$0xff] %v16555_v2  ;;  %v1143_v14 = vpop.permute.xlu1 %1142  ;;  %1244 = vrot.lane.b32.xlu0 %v16546_v46, %s15738_s27  ;;  %v16573_v13 = vmax.f32 %v20699_v53, %v16493_v28  ;;  %20702 = vst [vmem:[#allocation15_spill] sm:$0xff] %v16576_v52  ;;  %v16579_v8 = vmax.f32 %v20703_v12, %v1039_v18  ;;  %v1431_v28 = vmax.f32 %v1359_v29, 0.0  ;;  %v20709_v12 = vld [vmem:[#allocation27_spill] sm:$0xff] }
 0x1ee   : > { %2086 = vst.msk [vmem:[#allocation2 + $0x138] sm:$0xf] %vm1535_vm8, %v1889_v27  ;;  %2089 = vst.msk [vmem:[#allocation2 + $0x140] sm:$0xf] %vm1535_vm8, %v1904_v7  ;;  %v1434_v24 = vmax.f32 %v1362_v39, 0.0  ;;  %v1281_v17 = vmax.f32 %v20696_v10, %v1143_v14  ;;  %v20705_v39 = vld [vmem:[#allocation24_spill] sm:$0xff] }
 0x1ef   : > { %20698 = vst [vmem:[#allocation12_spill] sm:$0xff] %v16569_v6  ;;  %20700 = vst [vmem:[#allocation14_spill] sm:$0xff] %v16573_v13  ;;  %v1045_v27 = vpop.permute.xlu0 %1044  ;;  %1250 = vrot.lane.b32.xlu1 %v16555_v2, %s15738_s27  ;;  %v16584_v14 = vmax.f32 %v20705_v39, %v1049_v16  ;;  %v16587_v10 = vld.sshfl [vmem:[#allocation2 + $0x144] sm:$0x13 pattern:$0x76325410] }
 0x1f0   : > { %20704 = vst [vmem:[#allocation16_spill] sm:$0xff] %v16579_v8  ;;  %v1502_v34 = vpack.c.bf16 %v1434_v24, %v1433_v37  ;;  %v14759_v7 = vpack.c.bf16 %v1434_v24, %v1434_v24  ;;  %v1360_v1 = vadd.f32 %v16453_v19, %v1281_v17  ;;  %v16590_v23 = vmax.f32 %v20707_v44, %v1045_v27  ;;  %v14915_v15 = vld.sshfl [vmem:[#allocation2 + $0x144] sm:$0x3 pattern:$0x76325410] }
 0x1f1   : > { %20706 = vst [vmem:[#allocation33_spill] sm:$0xff] %v16584_v14  ;;  %v1051_v53 = vpop.permute.xlu1 %1050  ;;  %1256 = vrot.lane.b32.xlu0 %v16569_v6, %s15738_s27  ;;  %v8216_v18 = vshll.u32 %v16587_v10, 16  ;;  %v8220_v37 = vshrl.u32 %v16587_v10, 16 }
 0x1f2   : > { %20708 = vst [vmem:[#allocation18_spill] sm:$0xff] %v16590_v23  ;;  %v1787_v24 = vrot.slane %v1502_v34, %v16483_v11  ;;  %v16598_v16 = vrot.slane %v14759_v7, %v16483_v11  ;;  %v1432_v17 = vmax.f32 %v1360_v1, 0.0  ;;  %v16600_v36 = vld.sshfl [vmem:[#allocation2 + $0x148] sm:$0x33 pattern:$0x76325410]  ;;  %v16605_v27 = vmax.f32 %v20709_v12, %v1051_v53 }
 0x1f3   : > { %v1153_v39 = vpop.permute.xlu0 %1152  ;;  %1246 = vrot.lane.b32.xlu1 %v16562_v48, %s15738_s27  ;;  %v16611_v44 = vcombine.high %v16600_v36, %v16600_v36  ;;  %v16613_v34 = vld.sshfl [vmem:[#allocation2 + $0x13c] sm:$0x13 pattern:$0x76325410]  ;;  %v16615_v7 = vrot.slane %v8216_v18, 7  ;;  %v16617_v1 = vrot.slane %v8220_v37, 6 }
 0x1f4   : > { %20710 = vst [vmem:[#allocation19_spill] sm:$0xff] %v16605_v27  ;;  %v1795_v29 = vcombine.high %v1787_v24, %v1787_v24  ;;  %v1956_v12 = vrot.slane %v16598_v16, %v16483_v11  ;;  %v1501_v48 = vpack.c.bf16 %v1432_v17, %v1431_v28  ;;  %v14913_v6 = vld.sshfl [vmem:[#allocation2 + $0x13c] sm:$0x3 pattern:$0x76325410]  ;;  %v14758_v2 = vpack.c.bf16 %v1432_v17, %v1432_v17 }
 0x1f5   : > { %v1286_v46 = vmax.f32 %v16187_v43, %v1153_v39  ;;  %v1047_v55 = vpop.permute.xlu1 %1046  ;;  %1252 = vrot.lane.b32.xlu0 %v16573_v13, %s15738_s27  ;;  %v14912_v18 = vld.sshfl [vmem:[#allocation2 + $0x138] sm:$0x33 pattern:$0x76325410]  ;;  %v6914_v37 = vcombine.low %v16600_v36, %v16611_v44 }
 0x1f6   : > { %v1942_v53 = vcombine.low %v1787_v24, %v1795_v29  ;;  %2096 = vst.msk [vmem:[#allocation2 + $0x15c] sm:$0x3] %vm2087_vm7, %v1956_v12  ;;  %v1770_v28 = vrot.slane %v1501_v48, %v16483_v11  ;;  %v16633_v17 = vmax.f32 %v16139_v22, %v1047_v55  ;;  %v16635_v43 = vld.sshfl [vmem:[#allocation2 + $0x140] sm:$0x33 pattern:$0x76325410]  ;;  %v16637_v39 = vcombine.high %v14912_v18, %v14912_v18 }
 0x1f7   : > { %v1777_v13 = vrot.slane %v14758_v2, %v16483_v11  ;;  %v1365_v20 = vadd.f32 %v16453_v19, %v1286_v46  ;;  %v1149_v3 = vpop.permute.xlu0 %1148  ;;  %1258 = vrot.lane.b32.xlu1 %v16576_v52, %s15738_s27  ;;  %v6897_v24 = vcombine.low %v14913_v6, %v16635_v43  ;;  %v16646_v48 = vcombine.high %v16635_v43, %v16635_v43 }
 0x1f8   : > { %20711 = vst [vmem:[#allocation20_spill] sm:$0xff] %v16633_v17  ;;  %v1949_v22 = vrot.slane %v1942_v53, %v16483_v11  ;;  %v1778_v55 = vcombine.high %v1770_v28, %v1770_v28  ;;  %v1926_v29 = vrot.slane %v1770_v28, %v16483_v11  ;;  %v1284_v12 = vmax.f32 %v16196_v42, %v1149_v3 }
 0x1f9   : > { %v1779_v2 = vcombine.high %v1777_v13, %v1777_v13  ;;  %v1437_v9 = vmax.f32 %v1365_v20, 0.0  ;;  %v1155_v46 = vpop.permute.xlu1 %1154  ;;  %1264 = vrot.lane.b32.xlu0 %v16584_v14, %s15738_s27  ;;  %v6896_v52 = vcombine.low %v14912_v18, %v16637_v39  ;;  %v16655_v6 = vrot.slane %v6897_v24, %v16483_v11 }
 0x1fa   : > { %2095 = vst.msk [vmem:[#allocation2 + $0x158] sm:$0xf] %vm1535_vm8, %v1949_v22  ;;  %v1927_v53 = vcombine.low %v1778_v55, %v1777_v13  ;;  %v1363_v42 = vadd.f32 %v16453_v19, %v1284_v12  ;;  %v1287_v3 = vmax.f32 %v16201_v45, %v1155_v46  ;;  %v6913_v20 = vcombine.low %v16646_v48, %v14915_v15  ;;  %v20712_v12 = vld [vmem:[#allocation30_spill] sm:$0xff] }
 0x1fb   : > { %2092 = vst.msk [vmem:[#allocation2 + $0x14c] sm:$0x3] %vm2087_vm7, %v1926_v29  ;;  %v1941_v28 = vrot.slane %v1779_v2, %v16483_v11  ;;  %v1057_v14 = vpop.permute.xlu0 %1056  ;;  %1254 = vrot.lane.b32.xlu1 %v16579_v8, %s15738_s27  ;;  %v16666_v24 = vrot.slane %v6896_v52, %v16483_v11  ;;  %v16669_v22 = vrot.slane %v6914_v37, %v16483_v11  ;;  %v8163_v13 = vshrl.u32 %v14912_v18, 16 }
 0x1fc   : > { %v1934_v55 = vrot.slane %v1927_v53, %v16483_v11  ;;  %v1435_v29 = vmax.f32 %v1363_v42, 0.0  ;;  %v1366_v45 = vadd.f32 %v16453_v19, %v1287_v3  ;;  %v16674_v15 = vmax.f32 %v20712_v12, %v1057_v14  ;;  %v20714_v3 = vld [vmem:[#allocation34_spill] sm:$0xff] }
 0x1fd   : > { %2094 = vst.msk [vmem:[#allocation2 + $0x154] sm:$0x3] %vm2087_vm7, %v1941_v28  ;;  %v1151_v2 = vpop.permute.xlu1 %1150  ;;  %1260 = vrot.lane.b32.xlu0 %v16590_v23, %s15738_s27  ;;  %v16682_v37 = vrot.slane %v6913_v20, %v16483_v11  ;;  %v8165_v46 = vrot.slane %v8163_v13, 6  ;;  %v8166_v53 = vshll.u32 %v14912_v18, 16  ;;  %v8172_v12 = vshll.u32 %v16637_v39, 16 }
 0x1fe   : > { %20713 = vst [vmem:[#allocation22_spill] sm:$0xff] %v16674_v15  ;;  %2093 = vst.msk [vmem:[#allocation2 + $0x150] sm:$0xf] %vm1535_vm8, %v1934_v55  ;;  %v1438_v42 = vmax.f32 %v1366_v45, 0.0  ;;  %v1285_v14 = vmax.f32 %v20714_v3, %v1151_v2  ;;  %v8176_v52 = vshrl.u32 %v16637_v39, 16  ;;  %v8182_v13 = vshll.u32 %v16613_v34, 16 }
 0x1ff   : > { %v1053_v23 = vpop.permute.xlu0 %1052  ;;  %1266 = vrot.lane.b32.xlu1 %v16605_v27, %s15738_s27  ;;  %v8168_v20 = vrot.slane %v8166_v53, 7  ;;  %v8186_v55 = vshrl.u32 %v16613_v34, 16  ;;  %v16713_v27 = vrot.slane %v8172_v12, 7 }
 0x200   : > { %v1504_v45 = vpack.c.bf16 %v1438_v42, %v1437_v9  ;;  %v14761_v2 = vpack.c.bf16 %v1438_v42, %v1438_v42  ;;  %v1364_v3 = vadd.f32 %v16453_v19, %v1285_v14  ;;  %v16702_v8 = vmax.f32 %v16159_v21, %v1053_v23 }
 0x201   : > { %1272 = vrot.lane.b32.xlu0 %v16674_v15, %s15738_s27  ;;  %v1059_v39 = vpop.permute.xlu1 %1058  ;;  %v8169_v18 = vor.u32 %v8168_v20, %v8165_v46  ;;  %v8178_v9 = vrot.slane %v8176_v52, 6  ;;  %v20720_v15 = vld [vmem:[#allocation31_spill] sm:$0xff]  ;;  %v16727_v52 = vrot.slane %v8182_v13, 7  ;;  %v8188_v12 = vrot.slane %v8186_v55, 6 }
 0x202   : > { %20717 = vst [vmem:[#allocation24_spill] sm:$0xff] %v16702_v8  ;;  %v1821_v21 = vrot.slane %v1504_v45, %v16483_v11  ;;  %v1828_v23 = vrot.slane %v14761_v2, %v16483_v11  ;;  %v1436_v14 = vmax.f32 %v1364_v3, 0.0  ;;  %v16720_v4 = vmax.f32 %v20720_v15, %v1059_v39 }
 0x203   : > { %v1161_v28 = vpop.permute.xlu0 %1160  ;;  %1262 = vrot.lane.b32.xlu1 %v16633_v17, %s15738_s27  ;;  %v16724_v40 = vrot.slane %v8169_v18, 2  ;;  %v8179_v46 = vor.u32 %v8178_v9, %v16713_v27  ;;  %v20723_v18 = vld [vmem:[#allocation35_spill] sm:$0xff] }
 0x204   : > { %v1829_v20 = vcombine.high %v1821_v21, %v1821_v21  ;;  %v1830_v42 = vcombine.high %v1828_v23, %v1828_v23  ;;  %v1986_v45 = vrot.slane %v1821_v21, %v16483_v11  ;;  %v1503_v2 = vpack.c.bf16 %v1436_v14, %v1435_v29 }
 0x205   : > { %v14760_v3 = vpack.c.bf16 %v1436_v14, %v1436_v14  ;;  %v1290_v39 = vmax.f32 %v20723_v18, %v1161_v28  ;;  %1268 = vrot.lane.b32.xlu0 %v16702_v8, %s15738_s27  ;;  %v1055_v13 = vpop.permute.xlu1 %1054  ;;  %v16740_v55 = vld.sshfl [vmem:[#allocation2 + $0x150] sm:$0x33 pattern:$0x76325410]  ;;  %v8175_v29 = vsel %vm16733_vm15, %v16724_v40, %v16713_v27  ;;  %v8180_v9 = vrot.slane %v8179_v46, 2  ;;  %v20724_v28 = vld [vmem:[#allocation32_spill] sm:$0xff] }
 0x206   : > { %v1987_v53 = vcombine.low %v1829_v20, %v1828_v23  ;;  %v2001_v21 = vrot.slane %v1830_v42, %v16483_v11  ;;  %2100 = vst.msk [vmem:[#allocation2 + $0x16c] sm:$0x3] %vm2087_vm7, %v1986_v45  ;;  %v1804_v14 = vrot.slane %v1503_v2, %v16483_v11  ;;  %v16750_v18 = vmax.f32 %v20724_v28, %v1055_v13  ;;  %v14917_v8 = vld.sshfl [vmem:[#allocation2 + $0x14c] sm:$0x3 pattern:$0x76325410] }
 0x207   : > { %v1811_v17 = vrot.slane %v14760_v3, %v16483_v11  ;;  %v1369_v32 = vadd.f32 %v16453_v19, %v1290_v39  ;;  %v1157_v50 = vpop.permute.xlu0 %1156  ;;  %1274 = vrot.lane.b32.xlu1 %v16720_v4, %s15738_s27  ;;  %v16758_v40 = vcombine.high %v16740_v55, %v16740_v55  ;;  %v6930_v27 = vcombine.low %v14917_v8, %v16740_v55  ;;  %v14919_v2 = vld.sshfl [vmem:[#allocation2 + $0x154] sm:$0x3 pattern:$0x76325410] }
 0x208   : > { %v1994_v42 = vrot.slane %v1987_v53, %v16483_v11  ;;  %2102 = vst.msk [vmem:[#allocation2 + $0x174] sm:$0x3] %vm2087_vm7, %v2001_v21  ;;  %v1812_v23 = vcombine.high %v1804_v14, %v1804_v14  ;;  %v20725_v46 = vcombine.high %v16598_v16, %v16598_v16  ;;  %v1288_v45 = vmax.f32 %v16224_v38, %v1157_v50 }
 0x209   : > { %v1813_v3 = vcombine.high %v1811_v17, %v1811_v17  ;;  %v1441_v39 = vmax.f32 %v1369_v32, 0.0  ;;  %v20726_v13 = vcombine.low %v16666_v24, %v16655_v6  ;;  %v1163_v8 = vpop.permute.xlu1 %1162  ;;  %v6931_v53 = vcombine.low %v16758_v40, %v14919_v2 }
 0x20a   : > { %v1957_v20 = vcombine.low %v20725_v46, %v1804_v14  ;;  %v6938_v21 = vrot.slane %v6930_v27, %v16483_v11  ;;  %2101 = vst.msk [vmem:[#allocation2 + $0x170] sm:$0xf] %vm1535_vm8, %v1994_v42  ;;  %v1971_v38 = vrot.slane %v1812_v23, %v16483_v11  ;;  %v1367_v50 = vadd.f32 %v16453_v19, %v1288_v45 }
 0x20b   : > { %7049 = vrot.lane.b32.xlu0 %v20726_v13, %s15740_s30  ;;  %v1291_v32 = vmax.f32 %v16231_v41, %v1163_v8  ;;  %v1972_v14 = vcombine.low %v1811_v17, %v1813_v3  ;;  %v1169_v28 = vpop.permute.xlu0 %1168  ;;  %1270 = vrot.lane.b32.xlu1 %v16750_v18, %s15738_s27  ;;  %v6945_v6 = vrot.slane %v6931_v53, %v16483_v11  ;;  %v8197_v2 = vshrl.u32 %v16635_v43, 16 }
 0x20c   : > { %v1964_v16 = vrot.slane %v1957_v20, %v16483_v11  ;;  %v8185_v24 = vsel %vm16733_vm15, %v8180_v9, %v16727_v52  ;;  %v8189_v27 = vor.u32 %v8188_v12, %v16727_v52  ;;  %2098 = vst.msk [vmem:[#allocation2 + $0x164] sm:$0x3] %vm2087_vm7, %v1971_v38  ;;  %v1439_v42 = vmax.f32 %v1367_v50, 0.0 }
 0x20d   : > { %v1370_v41 = vadd.f32 %v16453_v19, %v1291_v32  ;;  %v1294_v17 = vmax.f32 %v16236_v31, %v1169_v28  ;;  %v20727_v23 = vcombine.high %v16613_v34, %v16613_v34  ;;  %v1979_v20 = vrot.slane %v1972_v14, %v16483_v11  ;;  %v1159_v52 = vpop.permute.xlu1 %1158 }
 0x20e   : > { %2097 = vst.msk [vmem:[#allocation2 + $0x160] sm:$0xf] %vm1535_vm8, %v1964_v16  ;;  %v20728_v9 = vcombine.low %v16682_v37, %v16669_v22  ;;  %v6946_v12 = vcombine.low %v6938_v21, %v6945_v6  ;;  %v8190_v45 = vrot.slane %v8189_v27, 2  ;;  %v1289_v31 = vmax.f32 %v16241_v30, %v1159_v52 }
 0x20f   : > { %v8192_v46 = vshll.u32 %v20727_v23, 16  ;;  %v1442_v3 = vmax.f32 %v1370_v41, 0.0  ;;  %v1373_v13 = vadd.f32 %v16453_v19, %v1294_v17  ;;  %2099 = vst.msk [vmem:[#allocation2 + $0x168] sm:$0xf] %vm1535_vm8, %v1979_v20  ;;  %v1165_v34 = vpop.permute.xlu0 %1164  ;;  %v8199_v53 = vrot.slane %v8197_v2, 6 }
 0x210   : > { %7051 = vrot.lane.b32.xlu0 %v20728_v9, %s15740_s30  ;;  %v8200_v16 = vshll.u32 %v16635_v43, 16  ;;  %v8206_v22 = vshll.u32 %v16646_v48, 16  ;;  %v16803_v37 = vcombine.low %v8175_v29, %v8185_v24  ;;  %v1368_v32 = vadd.f32 %v16453_v19, %v1289_v31  ;;  %v20729_v24 = vld [vmem:[#allocation36_spill] sm:$0xff] }
 0x211   : > { %v8194_v8 = vrot.slane %v8192_v46, 7  ;;  %v1506_v21 = vpack.c.bf16 %v1442_v3, %v1441_v39  ;;  %v14763_v38 = vpack.c.bf16 %v1442_v3, %v1442_v3  ;;  %v1445_v50 = vmax.f32 %v1373_v13, 0.0  ;;  %v1171_v30 = vpop.permute.xlu1 %1170 }
 0x212   : > { %v1292_v14 = vmax.f32 %v16246_v51, %v1165_v34  ;;  %v8202_v6 = vrot.slane %v8200_v16, 7  ;;  %v16810_v27 = vrot.slane %v8206_v22, 7  ;;  %v1440_v39 = vmax.f32 %v1368_v32, 0.0 }
 0x213   : > { %v8195_v28 = vsel %vm16733_vm15, %v8190_v45, %v8194_v8  ;;  %v1855_v43 = vrot.slane %v1506_v21, %v16483_v11  ;;  %v1862_v29 = vrot.slane %v14763_v38, %v16483_v11  ;;  %v1295_v41 = vmax.f32 %v20729_v24, %v1171_v30  ;;  %v1177_v23 = vpop.permute.xlu0 %1176 }
 0x214   : > { %7053 = vrot.lane.b32.xlu0 %v6946_v12, %s15740_s30  ;;  %v1371_v17 = vadd.f32 %v16453_v19, %v1292_v14  ;;  %v8203_v51 = vor.u32 %v8202_v6, %v8199_v53  ;;  %v8578_v46 = vrot.slane %v16803_v37, %v16483_v11  ;;  %v8210_v20 = vshrl.u32 %v16646_v48, 16 }
 0x215   : > { %v1863_v9 = vcombine.high %v1855_v43, %v1855_v43  ;;  %v1864_v52 = vcombine.high %v1862_v29, %v1862_v29  ;;  %v1505_v12 = vpack.c.bf16 %v1440_v39, %v1439_v42  ;;  %v14762_v45 = vpack.c.bf16 %v1440_v39, %v1440_v39  ;;  %v1167_v8 = vpop.permute.xlu1 %1166 }
 0x216   : > { %v1443_v2 = vmax.f32 %v1371_v17, 0.0  ;;  %v1374_v3 = vadd.f32 %v16453_v19, %v1295_v41  ;;  %v1298_v13 = vmax.f32 %v16256_v25, %v1177_v23  ;;  %v8204_v31 = vrot.slane %v8203_v51, 2 }
 0x217   : > { %v2031_v34 = vrot.slane %v1863_v9, %v16483_v11  ;;  %v2032_v16 = vcombine.low %v1862_v29, %v1864_v52  ;;  %v1838_v53 = vrot.slane %v1505_v12, %v16483_v11  ;;  %v1845_v22 = vrot.slane %v14762_v45, %v16483_v11  ;;  %v1173_v25 = vpop.permute.xlu0 %1172 }
 0x218   : > { %v1446_v37 = vmax.f32 %v1374_v3, 0.0  ;;  %v16825_v48 = vadd.f32 %v16453_v19, %v1298_v13  ;;  %v8209_v42 = vsel %vm16733_vm15, %v8204_v31, %v16810_v27  ;;  %v1293_v21 = vmax.f32 %v16268_v33, %v1167_v8 }
 0x219   : > { %v2039_v38 = vrot.slane %v2032_v16, %v16483_v11  ;;  %2106 = vst.msk [vmem:[#allocation2 + $0x184] sm:$0x3] %vm2087_vm7, %v2031_v34  ;;  %v1846_v32 = vcombine.high %v1838_v53, %v1838_v53  ;;  %v1847_v14 = vcombine.high %v1845_v22, %v1845_v22  ;;  %v2016_v30 = vrot.slane %v1845_v22, %v16483_v11 }
 0x21a   : > { %v1508_v6 = vpack.c.bf16 %v1446_v37, %v1445_v50  ;;  %v14765_v29 = vpack.c.bf16 %v1446_v37, %v1446_v37  ;;  %v1449_v39 = vmax.f32 %v16825_v48, 0.0  ;;  %v8571_v24 = vcombine.low %v8195_v28, %v8209_v42 }
 0x21b   : > { %2107 = vst.msk [vmem:[#allocation2 + $0x188] sm:$0xf] %vm1535_vm8, %v2039_v38  ;;  %v2002_v41 = vcombine.low %v1838_v53, %v1846_v32  ;;  %v2017_v17 = vcombine.low %v1847_v14, %v1855_v43  ;;  %v1372_v33 = vadd.f32 %v16453_v19, %v1293_v21  ;;  %v1296_v23 = vmax.f32 %v16273_v57, %v1173_v25 }
 0x21c   : > { %2104 = vst.msk [vmem:[#allocation2 + $0x17c] sm:$0x3] %vm2087_vm7, %v2016_v30  ;;  %v2127_v51 = vrot.slane %v1508_v6, %v16483_v11  ;;  %v16841_v50 = vrot.slane %v14765_v29, %v16483_v11  ;;  %v8585_v9 = vrot.slane %v8571_v24, %v16483_v11  ;;  %v8212_v28 = vrot.slane %v8210_v20, 6 }
 0x21d   : > { %v2009_v52 = vrot.slane %v2002_v41, %v16483_v11  ;;  %v2024_v43 = vrot.slane %v2017_v17, %v16483_v11  ;;  %v1444_v12 = vmax.f32 %v1372_v33, 0.0  ;;  %v16847_v45 = vadd.f32 %v16453_v19, %v1296_v23  ;;  %v16870_v41 = vld.sshfl [vmem:[#allocation2 + $0x14c] sm:$0x13 pattern:$0x76325410]  ;;  %v1179_v33 = vpop.permute.xlu1 %1178 }
 0x21e   : > { %v2135_v3 = vcombine.high %v2127_v51, %v2127_v51  ;;  %v2136_v57 = vcombine.high %v16841_v50, %v16841_v50  ;;  %v2287_v13 = vrot.slane %v16841_v50, %v16483_v11  ;;  %v8586_v31 = vcombine.low %v8578_v46, %v8585_v9 }
 0x21f   : > { %2103 = vst.msk [vmem:[#allocation2 + $0x178] sm:$0xf] %vm1535_vm8, %v2009_v52  ;;  %2105 = vst.msk [vmem:[#allocation2 + $0x180] sm:$0xf] %vm1535_vm8, %v2024_v43  ;;  %v1507_v20 = vpack.c.bf16 %v1444_v12, %v1443_v2  ;;  %v14764_v8 = vpack.c.bf16 %v1444_v12, %v1444_v12  ;;  %v1447_v34 = vmax.f32 %v16847_v45, 0.0  ;;  %v8213_v16 = vor.u32 %v8212_v28, %v16810_v27  ;;  %v1185_v28 = vpop.permute.xlu0 %1184 }
 0x220   : > { %v2273_v53 = vcombine.low %v2127_v51, %v2135_v3  ;;  %v2464_v22 = vshrl.u32 %v2287_v13, 16  ;;  %v2467_v37 = vshll.u32 %v2287_v13, 16  ;;  %8723 = vrot.lane.b32.xlu0 %v8586_v31, %s15738_s27  ;;  %v20730_v42 = vor.u32 %v16617_v1, %v16615_v7 }
 0x221   : > { %v1872_v21 = vrot.slane %v1507_v20, %v16483_v11  ;;  %v1879_v25 = vrot.slane %v14764_v8, %v16483_v11  ;;  %v8214_v38 = vrot.slane %v8213_v16, 2  ;;  %v20731_v2 = vcombine.high %v16587_v10, %v16587_v10 }
 0x222   : > { %v8224_v46 = vrot.slane %v20730_v42, 2  ;;  %v2280_v27 = vrot.slane %v2273_v53, %v16483_v11  ;;  %v2466_v14 = vrot.slane %v2464_v22, 7  ;;  %v8231_v30 = vshrl.u32 %v16600_v36, 16 }
 0x223   : > { %v8226_v32 = vshll.u32 %v20731_v2, 16  ;;  %v8234_v6 = vshll.u32 %v16600_v36, 16  ;;  %v1880_v29 = vcombine.high %v1872_v21, %v1872_v21  ;;  %v1881_v24 = vcombine.high %v1879_v25, %v1879_v25 }
 0x224   : > { %v2046_v1 = vrot.slane %v1872_v21, %v16483_v11  ;;  %v8219_v17 = vsel %vm16733_vm15, %v8214_v38, %v16615_v7  ;;  %v2456_v10 = vshrl.u32 %v2280_v27, 16  ;;  %v2459_v23 = vshll.u32 %v2280_v27, 16  ;;  %v2674_v7 = vld [vmem:[#allocation2 + $0xd0] sm:$0xf] }
 0x225   : > { %v2469_v51 = vor.u32 %v2467_v37, %v2466_v14  ;;  %v8228_v9 = vrot.slane %v8226_v32, 7  ;;  %v2047_v52 = vcombine.low %v1880_v29, %v1879_v25  ;;  %v2061_v43 = vrot.slane %v1881_v24, %v16483_v11  ;;  %v16896_v21 = vld.sshfl [vmem:[#allocation2 + $0x158] sm:$0x33 pattern:$0x76325410]  ;;  %v1175_v29 = vpop.permute.xlu1 %1174 }
 0x226   : > { %2108 = vst.msk [vmem:[#allocation2 + $0x18c] sm:$0x3] %vm2087_vm7, %v2046_v1  ;;  %v8233_v36 = vrot.slane %v8231_v30, 6  ;;  %v8236_v12 = vrot.slane %v8234_v6, 7  ;;  %v2458_v13 = vrot.slane %v2456_v10, 7  ;;  %v8240_v20 = vshll.u32 %v16611_v44, 16 }
 0x227   : > { %v8229_v31 = vsel %vm16733_vm15, %v8224_v46, %v8228_v9  ;;  %v8244_v8 = vshrl.u32 %v16611_v44, 16  ;;  %v2054_v53 = vrot.slane %v2047_v52, %v16483_v11  ;;  %2110 = vst.msk [vmem:[#allocation2 + $0x194] sm:$0x3] %vm2087_vm7, %v2061_v43  ;;  %v8250_v37 = vshll.u32 %v16870_v41, 16  ;;  %v2677_v46 = vld [vmem:[#allocation2 + $0xd4] sm:$0x7]  ;;  %v1181_v9 = vpop.permute.xlu0 %1180 }
 0x228   : > { %v8237_v22 = vor.u32 %v8236_v12, %v8233_v36  ;;  %v8587_v42 = vcombine.low %v8219_v17, %v8229_v31  ;;  %v2461_v25 = vor.u32 %v2459_v23, %v2458_v13  ;;  %v2462_v38 = vrot.slane %v2458_v13, 4  ;;  %v16903_v6 = vld.sshfl [vmem:[#allocation2 + $0x160] sm:$0x33 pattern:$0x76325410] }
 0x229   : > { %v8242_v44 = vrot.slane %v8240_v20, 7  ;;  %v8246_v2 = vrot.slane %v8244_v8, 6  ;;  %2109 = vst.msk [vmem:[#allocation2 + $0x190] sm:$0xf] %vm1535_vm8, %v2054_v53  ;;  %v16899_v27 = vrot.slane %v8250_v37, 7  ;;  %v1299_v30 = vmax.f32 %v16278_v49, %v1179_v33 }
 0x22a   : > { %v8238_v32 = vrot.slane %v8237_v22, 2  ;;  %v8595_v14 = vrot.slane %v8587_v42, %v16483_v11  ;;  %v20736_v24 = vmov 0  ;;  %v2470_v1 = vsel %vm16879_vm9, %v2462_v38, %v2469_v51  ;;  %v14921_v43 = vld.sshfl [vmem:[#allocation2 + $0x15c] sm:$0x3 pattern:$0x76325410] }
 0x22b   : > { %v20737_v24 = vsel %vm16907_vm5, 4294967295, %v20736_v24  ;;  %v2675_v17 = vsel %vm16889_vm10, %v2461_v25, %v2674_v7  ;;  %v8247_v10 = vor.u32 %v8246_v2, %v8242_v44  ;;  %v1302_v23 = vmax.f32 %v16283_v56, %v1185_v28  ;;  %v16933_v20 = vld.sshfl [vmem:[#allocation2 + $0x168] sm:$0x33 pattern:$0x76325410] }
 0x22c   : > { %20738 = vst [vmem:[#allocation26_spill] sm:$0xff] %v20737_v24  ;;  %2676 = vst [vmem:[#allocation2 + $0xd0] sm:$0xf] %v2675_v17  ;;  %v2678_v49 = vsel %vm16907_vm5, %v2470_v1, %v2677_v46  ;;  %v8243_v33 = vsel %vm16733_vm15, %v8238_v32, %v8242_v44  ;;  %v1378_v52 = vadd.f32 %v16453_v19, %v1299_v30  ;;  %v1187_v17 = vpop.permute.xlu1 %1186 }
 0x22d   : > { %v16923_v51 = vcombine.high %v16896_v21, %v16896_v21  ;;  %2679 = vst [vmem:[#allocation2 + $0xd4] sm:$0x7] %v2678_v49  ;;  %v8248_v36 = vrot.slane %v8247_v10, 2  ;;  %v16926_v12 = vadd.f32 %v16453_v19, %v1302_v23  ;;  %v6948_v56 = vcombine.low %v14921_v43, %v16903_v6 }
 0x22e   : > { %v1297_v28 = vmax.f32 %v16288_v58, %v1175_v29  ;;  %v1450_v7 = vmax.f32 %v1378_v52, 0.0  ;;  %v1300_v31 = vmax.f32 %v16293_v59, %v1181_v9  ;;  %v16937_v8 = vcombine.high %v16903_v6, %v16903_v6  ;;  %v16948_v38 = vld.sshfl [vmem:[#allocation2 + $0x164] sm:$0x3 pattern:$0x76325410] }
 0x22f   : > { %v6947_v13 = vcombine.low %v16896_v21, %v16923_v51  ;;  %v8253_v53 = vsel %vm16733_vm15, %v8248_v36, %v16899_v27  ;;  %v1453_v22 = vmax.f32 %v16926_v12, 0.0  ;;  %v6962_v58 = vrot.slane %v6948_v56, %v16483_v11 }
 0x230   : > { %v1376_v37 = vadd.f32 %v16453_v19, %v1297_v28  ;;  %v8588_v42 = vcombine.low %v8243_v33, %v8253_v53  ;;  %v1510_v59 = vpack.c.bf16 %v1450_v7, %v1449_v39  ;;  %v14767_v46 = vpack.c.bf16 %v1450_v7, %v1450_v7 }
 0x231   : > { %v6955_v25 = vrot.slane %v6947_v13, %v16483_v11  ;;  %v16951_v2 = vadd.f32 %v16453_v19, %v1300_v31  ;;  %v11929_v32 = vcombine.low %v16903_v6, %v16937_v8  ;;  %v11930_v30 = vcombine.low %v16948_v38, %v16933_v20 }
 0x232   : > { %v1448_v44 = vmax.f32 %v1376_v37, 0.0  ;;  %v8602_v29 = vrot.slane %v8588_v42, %v16483_v11  ;;  %v2161_v48 = vrot.slane %v1510_v59, %v16483_v11  ;;  %v2168_v39 = vrot.slane %v14767_v46, %v16483_v11 }
 0x233   : > { %v6963_v1 = vcombine.low %v6955_v25, %v6962_v58  ;;  %v1451_v9 = vmax.f32 %v16951_v2, 0.0  ;;  %v11937_v49 = vrot.slane %v11929_v32, %v16483_v11  ;;  %v11944_v7 = vrot.slane %v11930_v30, %v16483_v11 }
 0x234   : > { %v1509_v10 = vpack.c.bf16 %v1448_v44, %v1447_v34  ;;  %v14766_v23 = vpack.c.bf16 %v1448_v44, %v1448_v44  ;;  %v8603_v33 = vcombine.low %v8595_v14, %v8602_v29  ;;  %v2169_v52 = vcombine.high %v2161_v48, %v2161_v48 }
 0x235   : > { %v2170_v43 = vcombine.high %v2168_v39, %v2168_v39  ;;  %v2317_v36 = vrot.slane %v2161_v48, %v16483_v11  ;;  %v1303_v13 = vmax.f32 %v16298_v61, %v1187_v17  ;;  %v11945_v42 = vcombine.low %v11937_v49, %v11944_v7  ;;  %v2692_v7 = vld [vmem:[#allocation2 + $0xe8] sm:$0xf] }
 0x236   : > { %v2144_v56 = vrot.slane %v1509_v10, %v16483_v11  ;;  %v2151_v28 = vrot.slane %v14766_v23, %v16483_v11  ;;  %8725 = vrot.lane.b32.xlu0 %v8603_v33, %s15738_s27  ;;  %v2318_v45 = vcombine.low %v2169_v52, %v2168_v39 }
 0x237   : > { %v2332_v34 = vrot.slane %v2170_v43, %v16483_v11  ;;  %v2496_v31 = vshrl.u32 %v2317_v36, 16  ;;  %v2499_v53 = vshll.u32 %v2317_v36, 16  ;;  %v1382_v29 = vadd.f32 %v16453_v19, %v1303_v13 }
 0x238   : > { %v2152_v14 = vcombine.high %v2144_v56, %v2144_v56  ;;  %v2153_v58 = vcombine.high %v2151_v28, %v2151_v28  ;;  %v2288_v37 = vcombine.low %v2136_v57, %v2144_v56  ;;  %v2325_v59 = vrot.slane %v2318_v45, %v16483_v11  ;;  %v1193_v56 = vpop.permute.xlu0 %1192 }
 0x239   : > { %v2498_v46 = vrot.slane %v2496_v31, 7  ;;  %v2512_v25 = vshrl.u32 %v2332_v34, 16  ;;  %v2515_v44 = vshll.u32 %v2332_v34, 16  ;;  %v1454_v36 = vmax.f32 %v1382_v29, 0.0  ;;  %v2695_v34 = vld [vmem:[#allocation2 + $0xec] sm:$0x7] }
 0x23a   : > { %v2295_v61 = vrot.slane %v2288_v37, %v16483_v11  ;;  %v2302_v32 = vrot.slane %v2152_v14, %v16483_v11  ;;  %v2303_v30 = vcombine.low %v2151_v28, %v2153_v58  ;;  %v2504_v39 = vshrl.u32 %v2325_v59, 16  ;;  %7055 = vrot.lane.b32.xlu0 %v6963_v1, %s15740_s30  ;;  %v2680_v58 = vld [vmem:[#allocation2 + $0xd8] sm:$0xf]  ;;  %v2683_v37 = vld [vmem:[#allocation2 + $0xdc] sm:$0x7] }
 0x23b   : > { %v2501_v48 = vor.u32 %v2499_v53, %v2498_v46  ;;  %v2507_v17 = vshll.u32 %v2325_v59, 16  ;;  %v2514_v10 = vrot.slane %v2512_v25, 7  ;;  %v1512_v1 = vpack.c.bf16 %v1454_v36, %v1453_v22  ;;  %v16991_v22 = vld.sshfl [vmem:[#allocation2 + $0x170] sm:$0x33 pattern:$0x76325410] }
 0x23c   : > { %v2310_v50 = vrot.slane %v2303_v30, %v16483_v11  ;;  %v2472_v57 = vshrl.u32 %v2295_v61, 16  ;;  %v2475_v23 = vshll.u32 %v2295_v61, 16  ;;  %v2480_v49 = vshrl.u32 %v2302_v32, 16  ;;  %v2686_v30 = vld [vmem:[#allocation2 + $0xe0] sm:$0xf] }
 0x23d   : > { %v2506_v33 = vrot.slane %v2504_v39, 7  ;;  %v2517_v52 = vor.u32 %v2515_v44, %v2514_v10  ;;  %v2483_v43 = vshll.u32 %v2302_v32, 16  ;;  %v14769_v14 = vpack.c.bf16 %v1454_v36, %v1454_v36  ;;  %v2689_v39 = vld [vmem:[#allocation2 + $0xe4] sm:$0x7] }
 0x23e   : > { %v2474_v28 = vrot.slane %v2472_v57, 7  ;;  %v2482_v45 = vrot.slane %v2480_v49, 7  ;;  %v2488_v19 = vshrl.u32 %v2310_v50, 16  ;;  %v2491_v13 = vshll.u32 %v2310_v50, 16  ;;  %12037 = vrot.lane.b32.xlu0 %v11945_v42, %s15740_s30  ;;  %v1183_v57 = vpop.permute.xlu1 %1182 }
 0x23f   : > { %v2509_v31 = vor.u32 %v2507_v17, %v2506_v33  ;;  %v2510_v53 = vrot.slane %v2506_v33, 4  ;;  %v16988_v29 = vrot.slane %v1512_v1, %v16483_v11  ;;  %v2202_v12 = vrot.slane %v14769_v14, %v16483_v11 }
 0x240   : > { %v2477_v59 = vor.u32 %v2475_v23, %v2474_v28  ;;  %v2478_v46 = vrot.slane %v2474_v28, 4  ;;  %v2485_v25 = vor.u32 %v2483_v43, %v2482_v45  ;;  %v2490_v44 = vrot.slane %v2488_v19, 7  ;;  %v1189_v43 = vpop.permute.xlu0 %1188  ;;  %v17008_v45 = vld.sshfl [vmem:[#allocation2 + $0x16c] sm:$0x3 pattern:$0x76325410] }
 0x241   : > { %v2518_v61 = vsel %vm16879_vm9, %v2510_v53, %v2517_v52  ;;  %v2693_v32 = vsel %vm16889_vm10, %v2509_v31, %v2692_v7  ;;  %v2203_v33 = vcombine.high %v16988_v29, %v16988_v29  ;;  %v2204_v52 = vcombine.high %v2202_v12, %v2202_v12  ;;  %v14927_v31 = vld.sshfl [vmem:[#allocation2 + $0x174] sm:$0x3 pattern:$0x76325410] }
 0x242   : > { %2694 = vst [vmem:[#allocation2 + $0xe8] sm:$0xf] %v2693_v32  ;;  %v2696_v42 = vsel %vm16907_vm5, %v2518_v61, %v2695_v34  ;;  %v2486_v17 = vsel %vm16879_vm9, %v2478_v46, %v2485_v25  ;;  %v2493_v10 = vor.u32 %v2491_v13, %v2490_v44  ;;  %v2494_v50 = vrot.slane %v2490_v44, 4 }
 0x243   : > { %2697 = vst [vmem:[#allocation2 + $0xec] sm:$0x7] %v2696_v42  ;;  %v2681_v23 = vsel %vm16889_vm10, %v2477_v59, %v2680_v58  ;;  %v2684_v49 = vsel %vm16907_vm5, %v2486_v17, %v2683_v37  ;;  %v1306_v28 = vmax.f32 %v16303_v60, %v1193_v56  ;;  %v17012_v19 = vcombine.high %v16991_v22, %v16991_v22  ;;  %v17022_v60 = vld [vmem:[%s20530_s2] ss:$0 sm:$0xff] }
 0x244   : > { %v2502_v36 = vsel %vm16879_vm9, %v2494_v50, %v2501_v48  ;;  %2682 = vst [vmem:[#allocation2 + $0xd8] sm:$0xf] %v2681_v23  ;;  %2685 = vst [vmem:[#allocation2 + $0xdc] sm:$0x7] %v2684_v49  ;;  %v2687_v7 = vsel %vm16889_vm10, %v2493_v10, %v2686_v30  ;;  %v2362_v34 = vrot.slane %v2203_v33, %v16483_v11  ;;  %v1201_v17 = vpop.permute.xlu0 %1200 }
 0x245   : > { %2688 = vst [vmem:[#allocation2 + $0xe0] sm:$0xf] %v2687_v7  ;;  %v2690_v13 = vsel %vm16907_vm5, %v2502_v36, %v2689_v39  ;;  %v2363_v48 = vcombine.low %v2202_v12, %v2204_v52  ;;  %v6981_v53 = vcombine.low %v17008_v45, %v16991_v22  ;;  %v1385_v56 = vadd.f32 %v17022_v60, %v1306_v28  ;;  %v1195_v12 = vpop.permute.xlu1 %1194  ;;  %v2710_v36 = vld [vmem:[#allocation2 + $0x100] sm:$0xf] }
 0x246   : > { %2691 = vst [vmem:[#allocation2 + $0xe4] sm:$0x7] %v2690_v13  ;;  %v6982_v1 = vcombine.low %v17012_v19, %v14927_v31  ;;  %v1301_v14 = vmax.f32 %v16308_v62, %v1183_v57  ;;  %v1304_v58 = vmax.f32 %v16315_v47, %v1189_v43  ;;  %v2544_v59 = vshrl.u32 %v2362_v34, 16 }
 0x247   : > { %v2370_v37 = vrot.slane %v2363_v48, %v16483_v11  ;;  %v2547_v46 = vshll.u32 %v2362_v34, 16  ;;  %v6989_v25 = vrot.slane %v6981_v53, %v16483_v11  ;;  %v1457_v44 = vmax.f32 %v1385_v56, 0.0 }
 0x248   : > { %v6996_v61 = vrot.slane %v6982_v1, %v16483_v11  ;;  %v1380_v32 = vadd.f32 %v17022_v60, %v1301_v14  ;;  %v17033_v30 = vadd.f32 %v17022_v60, %v1304_v58  ;;  %v2546_v42 = vrot.slane %v2544_v59, 7 }
 0x249   : > { %v2552_v39 = vshrl.u32 %v2370_v37, 16  ;;  %v2555_v62 = vshll.u32 %v2370_v37, 16  ;;  %v17037_v47 = vcombine.high %v16933_v20, %v16933_v20  ;;  %v6964_v23 = vcombine.low %v16937_v8, %v16948_v38 }
 0x24a   : > { %v6997_v10 = vcombine.low %v6989_v25, %v6996_v61  ;;  %v1452_v50 = vmax.f32 %v1380_v32, 0.0  ;;  %v1455_v57 = vmax.f32 %v17033_v30, 0.0  ;;  %v17042_v49 = vor.u32 %v2547_v46, %v2546_v42  ;;  %v1191_v61 = vpop.permute.xlu1 %1190 }
 0x24b   : > { %v17044_v33 = vrot.slane %v2552_v39, 7  ;;  %v6965_v52 = vcombine.low %v16933_v20, %v17037_v47  ;;  %v1307_v43 = vmax.f32 %v16322_v0, %v1195_v12  ;;  %v6972_v13 = vrot.slane %v6964_v23, %v16483_v11  ;;  %v1197_v39 = vpop.permute.xlu0 %1196 }
 0x24c   : > { %7059 = vrot.lane.b32.xlu0 %v6997_v10, %s15740_s30  ;;  %v1511_v7 = vpack.c.bf16 %v1452_v50, %v1451_v9  ;;  %v14768_v28 = vpack.c.bf16 %v1452_v50, %v1452_v50  ;;  %v1310_v38 = vmax.f32 %v16331_v26, %v1201_v17  ;;  %v11946_v9 = vcombine.low %v17037_v47, %v17008_v45 }
 0x24d   : > { %v2557_v34 = vor.u32 %v2555_v62, %v17044_v33  ;;  %v2558_v48 = vrot.slane %v17044_v33, 4  ;;  %v6979_v31 = vrot.slane %v6965_v52, %v16483_v11  ;;  %v1386_v53 = vadd.f32 %v17022_v60, %v1307_v43 }
 0x24e   : > { %v2178_v0 = vrot.slane %v1511_v7, %v16483_v11  ;;  %v2185_v56 = vrot.slane %v14768_v28, %v16483_v11  ;;  %v17061_v2 = vadd.f32 %v17022_v60, %v1310_v38  ;;  %v11947_v58 = vcombine.low %v16991_v22, %v17012_v19 }
 0x24f   : > { %v2711_v26 = vsel %vm16889_vm10, %v2557_v34, %v2710_v36  ;;  %v6980_v1 = vcombine.low %v6972_v13, %v6979_v31  ;;  %v1458_v14 = vmax.f32 %v1386_v53, 0.0  ;;  %v11954_v12 = vrot.slane %v11946_v9, %v16483_v11  ;;  %v17089_v53 = vld.sshfl [vmem:[#allocation2 + $0x154] sm:$0x13 pattern:$0x76325410] }
 0x250   : > { %2712 = vst [vmem:[#allocation2 + $0x100] sm:$0xf] %v2711_v26  ;;  %v2186_v37 = vcombine.high %v2178_v0, %v2178_v0  ;;  %v2187_v59 = vcombine.high %v2185_v56, %v2185_v56  ;;  %v2347_v46 = vrot.slane %v2185_v56, %v16483_v11  ;;  %v1461_v25 = vmax.f32 %v17061_v2, 0.0 }
 0x251   : > { %7057 = vrot.lane.b32.xlu0 %v6980_v1, %s15740_s30  ;;  %v1514_v32 = vpack.c.bf16 %v1458_v14, %v1457_v44  ;;  %v14771_v45 = vpack.c.bf16 %v1458_v14, %v1458_v14  ;;  %v11961_v42 = vrot.slane %v11947_v58, %v16483_v11  ;;  %v1305_v36 = vmax.f32 %v16336_v63, %v1191_v61  ;;  %v2698_v61 = vld [vmem:[#allocation2 + $0xf0] sm:$0xf] }
 0x252   : > { %v2333_v62 = vcombine.low %v2178_v0, %v2186_v37  ;;  %v2348_v17 = vcombine.low %v2187_v59, %v16988_v29  ;;  %v2528_v10 = vshrl.u32 %v2347_v46, 16  ;;  %v2531_v50 = vshll.u32 %v2347_v46, 16 }
 0x253   : > { %v2229_v23 = vrot.slane %v1514_v32, %v16483_v11  ;;  %v17077_v52 = vrot.slane %v14771_v45, %v16483_v11  ;;  %v11962_v43 = vcombine.low %v11954_v12, %v11961_v42  ;;  %v1308_v13 = vmax.f32 %v16343_v35, %v1197_v39  ;;  %v2704_v32 = vld [vmem:[#allocation2 + $0xf8] sm:$0xf] }
 0x254   : > { %v2340_v44 = vrot.slane %v2333_v62, %v16483_v11  ;;  %v2355_v7 = vrot.slane %v2348_v17, %v16483_v11  ;;  %v2530_v28 = vrot.slane %v2528_v10, 7  ;;  %v1384_v31 = vadd.f32 %v17022_v60, %v1305_v36  ;;  %v2701_v62 = vld [vmem:[#allocation2 + $0xf4] sm:$0x7]  ;;  %v2707_v17 = vld [vmem:[#allocation2 + $0xfc] sm:$0x7] }
 0x255   : > { %v2237_v38 = vcombine.high %v2229_v23, %v2229_v23  ;;  %v2238_v29 = vcombine.high %v17077_v52, %v17077_v52  ;;  %v2407_v34 = vrot.slane %v17077_v52, %v16483_v11  ;;  %12039 = vrot.lane.b32.xlu0 %v11962_v43, %s15740_s30  ;;  %v17092_v46 = vadd.f32 %v17022_v60, %v1308_v13 }
 0x256   : > { %v2520_v63 = vshrl.u32 %v2340_v44, 16  ;;  %v2523_v0 = vshll.u32 %v2340_v44, 16  ;;  %v2533_v56 = vor.u32 %v2531_v50, %v2530_v28  ;;  %v2536_v9 = vshrl.u32 %v2355_v7, 16 }
 0x257   : > { %v2539_v26 = vshll.u32 %v2355_v7, 16  ;;  %v2393_v1 = vcombine.low %v2229_v23, %v2237_v38  ;;  %v2592_v35 = vshrl.u32 %v2407_v34, 16  ;;  %v2595_v14 = vshll.u32 %v2407_v34, 16 }
 0x258   : > { %v2522_v58 = vrot.slane %v2520_v63, 7  ;;  %v2538_v37 = vrot.slane %v2536_v9, 7  ;;  %v1456_v59 = vmax.f32 %v1384_v31, 0.0  ;;  %v8017_v42 = vcombine.high %v16870_v41, %v16870_v41 }
 0x259   : > { %v2400_v45 = vrot.slane %v2393_v1, %v16483_v11  ;;  %v2594_v12 = vrot.slane %v2592_v35, 7  ;;  %v8033_v39 = vcombine.high %v17089_v53, %v17089_v53  ;;  %v1459_v9 = vmax.f32 %v17092_v46, 0.0  ;;  %v2725_v35 = vld [vmem:[#allocation2 + $0x114] sm:$0x7] }
 0x25a   : > { %v2525_v10 = vor.u32 %v2523_v0, %v2522_v58  ;;  %v2526_v50 = vrot.slane %v2522_v58, 4  ;;  %v2541_v23 = vor.u32 %v2539_v26, %v2538_v37  ;;  %v2542_v43 = vrot.slane %v2538_v37, 4 }
 0x25b   : > { %v2584_v36 = vshrl.u32 %v2400_v45, 16  ;;  %v2587_v44 = vshll.u32 %v2400_v45, 16  ;;  %v2597_v7 = vor.u32 %v2595_v14, %v2594_v12  ;;  %v1513_v28 = vpack.c.bf16 %v1456_v59, %v1455_v57 }
 0x25c   : > { %v2534_v13 = vsel %vm16879_vm9, %v2526_v50, %v2533_v56  ;;  %v2550_v38 = vsel %vm16879_vm9, %v2542_v43, %v17042_v49  ;;  %v2699_v34 = vsel %vm16889_vm10, %v2525_v10, %v2698_v61  ;;  %v2705_v31 = vsel %vm16889_vm10, %v2541_v23, %v2704_v32  ;;  %v2722_v56 = vld [vmem:[#allocation2 + $0x110] sm:$0xf] }
 0x25d   : > { %2700 = vst [vmem:[#allocation2 + $0xf0] sm:$0xf] %v2699_v34  ;;  %v2702_v63 = vsel %vm16907_vm5, %v2534_v13, %v2701_v62  ;;  %2706 = vst [vmem:[#allocation2 + $0xf8] sm:$0xf] %v2705_v31  ;;  %v2708_v30 = vsel %vm16907_vm5, %v2550_v38, %v2707_v17  ;;  %v2586_v57 = vrot.slane %v2584_v36, 7  ;;  %v14770_v0 = vpack.c.bf16 %v1456_v59, %v1456_v59 }
 0x25e   : > { %2703 = vst [vmem:[#allocation2 + $0xf4] sm:$0x7] %v2702_v63  ;;  %2709 = vst [vmem:[#allocation2 + $0xfc] sm:$0x7] %v2708_v30  ;;  %v2212_v49 = vrot.slane %v1513_v28, %v16483_v11  ;;  %v8254_v26 = vshrl.u32 %v16870_v41, 16  ;;  %v8260_v1 = vshll.u32 %v8017_v42, 16 }
 0x25f   : > { %v2589_v14 = vor.u32 %v2587_v44, %v2586_v57  ;;  %v2590_v58 = vrot.slane %v2586_v57, 4  ;;  %v2219_v37 = vrot.slane %v14770_v0, %v16483_v11  ;;  %v8265_v61 = vshrl.u32 %v16740_v55, 16 }
 0x260   : > { %v2220_v32 = vcombine.high %v2212_v49, %v2212_v49  ;;  %v2377_v59 = vrot.slane %v2212_v49, %v16483_v11  ;;  %v8256_v45 = vrot.slane %v8254_v26, 6  ;;  %v8262_v12 = vrot.slane %v8260_v1, 7 }
 0x261   : > { %v2598_v62 = vsel %vm16879_vm9, %v2590_v58, %v2597_v7  ;;  %v2723_v17 = vsel %vm16889_vm10, %v2589_v14, %v2722_v56  ;;  %v2221_v41 = vcombine.high %v2219_v37, %v2219_v37  ;;  %v8267_v42 = vrot.slane %v8265_v61, 6  ;;  %v2713_v56 = vld [vmem:[#allocation2 + $0x104] sm:$0x7] }
 0x262   : > { %2724 = vst [vmem:[#allocation2 + $0x110] sm:$0xf] %v2723_v17  ;;  %v2726_v10 = vsel %vm16907_vm5, %v2598_v62, %v2725_v35  ;;  %v2378_v50 = vcombine.low %v2220_v32, %v2219_v37  ;;  %v2560_v23 = vshrl.u32 %v2377_v59, 16  ;;  %v2563_v43 = vshll.u32 %v2377_v59, 16  ;;  %v1632_v59 = vld [vmem:[#allocation2 + $0x128] sm:$0x1] }
 0x263   : > { %2727 = vst [vmem:[#allocation2 + $0x114] sm:$0x7] %v2726_v10  ;;  %v2392_v36 = vrot.slane %v2221_v41, %v16483_v11  ;;  %v8257_v44 = vor.u32 %v8256_v45, %v16899_v27  ;;  %v8268_v28 = vshll.u32 %v16740_v55, 16  ;;  %v8274_v7 = vshll.u32 %v16758_v40, 16  ;;  %v1203_v45 = vpop.permute.xlu1 %1202  ;;  %v2716_v62 = vld [vmem:[#allocation2 + $0x108] sm:$0xf] }
 0x264   : > { %v2385_v13 = vrot.slane %v2378_v50, %v16483_v11  ;;  %v2562_v38 = vrot.slane %v2560_v23, 7  ;;  %v8278_v34 = vshrl.u32 %v16758_v40, 16  ;;  %v8284_v31 = vshll.u32 %v17089_v53, 16 }
 0x265   : > { %v2576_v63 = vshrl.u32 %v2392_v36, 16  ;;  %v2579_v30 = vshll.u32 %v2392_v36, 16  ;;  %v8258_v57 = vrot.slane %v8257_v44, 2  ;;  %v8270_v0 = vrot.slane %v8268_v28, 7 }
 0x266   : > { %v2565_v49 = vor.u32 %v2563_v43, %v2562_v38  ;;  %v2568_v26 = vshrl.u32 %v2385_v13, 16  ;;  %v2571_v1 = vshll.u32 %v2385_v13, 16  ;;  %v8276_v27 = vrot.slane %v8274_v7, 7  ;;  %v1209_v7 = vpop.permute.xlu0 %1208 }
 0x267   : > { %v2578_v35 = vrot.slane %v2576_v63, 7  ;;  %v8263_v55 = vsel %vm16733_vm15, %v8258_v57, %v8262_v12  ;;  %v8271_v14 = vor.u32 %v8270_v0, %v8267_v42  ;;  %v8280_v58 = vrot.slane %v8278_v34, 6  ;;  %v2719_v42 = vld [vmem:[#allocation2 + $0x10c] sm:$0x7]  ;;  %v20739_v0 = vld [vmem:[#allocation38_spill] sm:$0xff] }
 0x268   : > { %v2566_v40 = vsel %vm16879_vm9, %v2558_v48, %v2565_v49  ;;  %v2570_v37 = vrot.slane %v2568_v26, 7  ;;  %v8286_v61 = vrot.slane %v8284_v31, 7  ;;  %v8288_v32 = vshrl.u32 %v17089_v53, 16 }
 0x269   : > { %v2581_v17 = vor.u32 %v2579_v30, %v2578_v35  ;;  %v2714_v41 = vsel %vm16907_vm5, %v2566_v40, %v2713_v56  ;;  %v8272_v10 = vrot.slane %v8271_v14, 2  ;;  %v8281_v12 = vor.u32 %v8280_v58, %v8276_v27  ;;  %v14969_v13 = vld.sshfl [vmem:[#allocation2 + $0x15c] sm:$0x13 pattern:$0x76325410] }
 0x26a   : > { %v2573_v50 = vor.u32 %v2571_v1, %v2570_v37  ;;  %v2574_v23 = vrot.slane %v2570_v37, 4  ;;  %2715 = vst [vmem:[#allocation2 + $0x104] sm:$0x7] %v2714_v41  ;;  %v8290_v33 = vrot.slane %v8288_v32, 6  ;;  %v8294_v48 = vshll.u32 %v8033_v39, 16 }
 0x26b   : > { %v8277_v43 = vsel %vm16733_vm15, %v8272_v10, %v8276_v27  ;;  %v8282_v36 = vrot.slane %v8281_v12, 2  ;;  %v1633_v44 = vsel %vm16261_vm6, 0, %v1632_v59  ;;  %v1311_v28 = vmax.f32 %v16348_v5, %v1203_v45 }
 0x26c   : > { %v2582_v38 = vsel %vm16879_vm9, %v2574_v23, %v2581_v17  ;;  %v2717_v34 = vsel %vm16889_vm10, %v2573_v50, %v2716_v62  ;;  %v8291_v31 = vor.u32 %v8290_v33, %v8286_v61  ;;  %v8296_v53 = vrot.slane %v8294_v48, 7  ;;  %1634 = vst [vmem:[#allocation2 + $0x128] sm:$0x1] %v1633_v44 }
 0x26d   : > { %2718 = vst [vmem:[#allocation2 + $0x108] sm:$0xf] %v2717_v34  ;;  %v2720_v39 = vsel %vm16907_vm5, %v2582_v38, %v2719_v42  ;;  %v8287_v63 = vsel %vm16733_vm15, %v8282_v36, %v8286_v61  ;;  %v8604_v30 = vcombine.low %v8263_v55, %v8277_v43  ;;  %v1390_v5 = vadd.f32 %v17022_v60, %v1311_v28 }
 0x26e   : > { %2721 = vst [vmem:[#allocation2 + $0x10c] sm:$0x7] %v2720_v39  ;;  %v8292_v57 = vrot.slane %v8291_v31, 2  ;;  %v1314_v56 = vmax.f32 %v20739_v0, %v1209_v7  ;;  %v8049_v49 = vcombine.high %v14969_v13, %v14969_v13  ;;  %v8299_v26 = vshrl.u32 %v16896_v21, 16 }
 0x26f   : > { %v8612_v1 = vrot.slane %v8604_v30, %v16483_v11  ;;  %v1462_v27 = vmax.f32 %v1390_v5, 0.0  ;;  %v8302_v35 = vshll.u32 %v16896_v21, 16  ;;  %v8308_v14 = vshll.u32 %v16923_v51, 16 }
 0x270   : > { %v8297_v58 = vsel %vm16733_vm15, %v8292_v57, %v8296_v53  ;;  %v17167_v55 = vadd.f32 %v17022_v60, %v1314_v56  ;;  %v8301_v40 = vrot.slane %v8299_v26, 6  ;;  %v8312_v37 = vshrl.u32 %v16923_v51, 16  ;;  %v1626_v26 = vld [vmem:[#allocation2 + $0x118] sm:$0x1] }
 0x271   : > { %v8605_v61 = vcombine.low %v8287_v63, %v8297_v58  ;;  %v1516_v32 = vpack.c.bf16 %v1462_v27, %v1461_v25  ;;  %v14773_v59 = vpack.c.bf16 %v1462_v27, %v1462_v27  ;;  %v8304_v45 = vrot.slane %v8302_v35, 7  ;;  %v1629_v58 = vld [vmem:[#allocation2 + $0x120] sm:$0x1] }
 0x272   : > { %v1465_v62 = vmax.f32 %v17167_v55, 0.0  ;;  %v8310_v21 = vrot.slane %v8308_v14, 7  ;;  %v8314_v17 = vrot.slane %v8312_v37, 6  ;;  %v8318_v41 = vshll.u32 %v14969_v13, 16 }
 0x273   : > { %v8619_v10 = vrot.slane %v8605_v61, %v16483_v11  ;;  %v2263_v12 = vrot.slane %v1516_v32, %v16483_v11  ;;  %v2270_v42 = vrot.slane %v14773_v59, %v16483_v11  ;;  %v8305_v50 = vor.u32 %v8304_v45, %v8301_v40  ;;  %v1199_v59 = vpop.permute.xlu1 %1198  ;;  %v1205_v45 = vpop.permute.xlu0 %1204 }
 0x274   : > { %v8315_v23 = vor.u32 %v8314_v17, %v8310_v21  ;;  %v8320_v51 = vrot.slane %v8318_v41, 7  ;;  %v8322_v33 = vshrl.u32 %v14969_v13, 16  ;;  %v8328_v48 = vshll.u32 %v8049_v49, 16 }
 0x275   : > { %v8620_v2 = vcombine.low %v8612_v1, %v8619_v10  ;;  %v2271_v25 = vcombine.high %v2263_v12, %v2263_v12  ;;  %v2272_v43 = vcombine.high %v2270_v42, %v2270_v42  ;;  %v2437_v36 = vrot.slane %v2263_v12, %v16483_v11  ;;  %v1696_v12 = vld [vmem:[#allocation2 + $0x164] sm:$0x4] }
 0x276   : > { %v8306_v44 = vrot.slane %v8305_v50, 2  ;;  %v8316_v28 = vrot.slane %v8315_v23, 2  ;;  %v8324_v7 = vrot.slane %v8322_v33, 6  ;;  %v8330_v38 = vrot.slane %v8328_v48, 7 }
 0x277   : > { %8727 = vrot.lane.b32.xlu0 %v8620_v2, %s15738_s27  ;;  %v2438_v34 = vcombine.low %v2271_v25, %v2270_v42  ;;  %v2452_v31 = vrot.slane %v2272_v43, %v16483_v11  ;;  %v2624_v53 = vshrl.u32 %v2437_v36, 16  ;;  %v2627_v39 = vshll.u32 %v2437_v36, 16  ;;  %v20740_v2 = vld [vmem:[#allocation39_spill] sm:$0xff]  ;;  %v20741_v43 = vld [vmem:[#allocation40_spill] sm:$0xff] }
 0x278   : > { %v8311_v13 = vsel %vm16733_vm15, %v8306_v44, %v8310_v21  ;;  %v8321_v63 = vsel %vm16733_vm15, %v8316_v28, %v8320_v51  ;;  %v8325_v30 = vor.u32 %v8324_v7, %v8320_v51  ;;  %v8333_v5 = vshrl.u32 %v16903_v6, 16  ;;  %v2740_v51 = vld [vmem:[#allocation2 + $0x128] sm:$0xf]  ;;  %v2743_v44 = vld [vmem:[#allocation2 + $0x12c] sm:$0x7] }
 0x279   : > { %v2445_v57 = vrot.slane %v2438_v34, %v16483_v11  ;;  %v2626_v0 = vrot.slane %v2624_v53, 7  ;;  %v2640_v56 = vshrl.u32 %v2452_v31, 16  ;;  %v2643_v49 = vshll.u32 %v2452_v31, 16 }
 0x27a   : > { %v8326_v1 = vrot.slane %v8325_v30, 2  ;;  %v8335_v27 = vrot.slane %v8333_v5, 6  ;;  %v8336_v35 = vshll.u32 %v16903_v6, 16  ;;  %v8342_v14 = vshll.u32 %v16937_v8, 16 }
 0x27b   : > { %v17187_v40 = vor.u32 %v2627_v39, %v2626_v0  ;;  %v2632_v37 = vshrl.u32 %v2445_v57, 16  ;;  %v2635_v61 = vshll.u32 %v2445_v57, 16  ;;  %v2642_v32 = vrot.slane %v2640_v56, 7 }
 0x27c   : > { %v8331_v21 = vsel %vm16733_vm15, %v8326_v1, %v8330_v38  ;;  %v8338_v17 = vrot.slane %v8336_v35, 7  ;;  %v8344_v41 = vrot.slane %v8342_v14, 7  ;;  %v8621_v10 = vcombine.low %v8311_v13, %v8321_v63 }
 0x27d   : > { %v2634_v42 = vrot.slane %v2632_v37, 7  ;;  %v2645_v50 = vor.u32 %v2643_v49, %v2642_v32  ;;  %v1627_v6 = vsel %vm16261_vm6, 0, %v1626_v26  ;;  %v1630_v23 = vsel %vm16261_vm6, 0, %v1629_v58  ;;  %v1217_v26 = vpop.permute.xlu0 %1216 }
 0x27e   : > { %v8339_v33 = vor.u32 %v8338_v17, %v8335_v27  ;;  %v8629_v48 = vrot.slane %v8621_v10, %v16483_v11  ;;  %1628 = vst [vmem:[#allocation2 + $0x118] sm:$0x1] %v1627_v6  ;;  %1631 = vst [vmem:[#allocation2 + $0x120] sm:$0x1] %v1630_v23  ;;  %v1309_v25 = vmax.f32 %v20740_v2, %v1199_v59  ;;  %v1697_v34 = vsel %vm16144_vm3, 0, %v1696_v12  ;;  %v20744_v10 = vld [vmem:[#allocation42_spill] sm:$0xff] }
 0x27f   : > { %v1312_v36 = vmax.f32 %v20741_v43, %v1205_v45  ;;  %v2637_v28 = vor.u32 %v2635_v61, %v2634_v42  ;;  %v2638_v7 = vrot.slane %v2634_v42, 4  ;;  %1698 = vst [vmem:[#allocation2 + $0x164] sm:$0x4] %v1697_v34  ;;  %v13294_v13 = vshrl.u32 %v16937_v8, 16  ;;  %v1211_v8 = vpop.permute.xlu1 %1210  ;;  %v20743_v45 = vld [vmem:[#allocation41_spill] sm:$0xff] }
 0x280   : > { %v8340_v31 = vrot.slane %v8339_v33, 2  ;;  %v1388_v53 = vadd.f32 %v17022_v60, %v1309_v25  ;;  %v13315_v5 = vshrl.u32 %v16933_v20, 16  ;;  %v13318_v37 = vshll.u32 %v16933_v20, 16 }
 0x281   : > { %v17202_v39 = vadd.f32 %v17022_v60, %v1312_v36  ;;  %v2646_v63 = vsel %vm16879_vm9, %v2638_v7, %v2645_v50  ;;  %v2741_v30 = vsel %vm16889_vm10, %v2637_v28, %v2740_v51  ;;  %v13296_v27 = vrot.slane %v13294_v13, 6 }
 0x282   : > { %2742 = vst [vmem:[#allocation2 + $0x128] sm:$0xf] %v2741_v30  ;;  %v2744_v57 = vsel %vm16907_vm5, %v2646_v63, %v2743_v44  ;;  %v17214_v0 = vsel %vm16733_vm15, %v8340_v31, %v8344_v41  ;;  %v1460_v56 = vmax.f32 %v1388_v53, 0.0  ;;  %v13317_v35 = vrot.slane %v13315_v5, 6 }
 0x283   : > { %v1463_v49 = vmax.f32 %v17202_v39, 0.0  ;;  %2745 = vst [vmem:[#allocation2 + $0x12c] sm:$0x7] %v2744_v57  ;;  %v8622_v1 = vcombine.low %v8331_v21, %v17214_v0  ;;  %v13324_v61 = vshll.u32 %v17037_v47, 16  ;;  %v13297_v59 = vor.u32 %v13296_v27, %v8344_v41 }
 0x284   : > { %v1515_v14 = vpack.c.bf16 %v1460_v56, %v1459_v9  ;;  %v14772_v58 = vpack.c.bf16 %v1460_v56, %v1460_v56  ;;  %v1315_v17 = vmax.f32 %v20743_v45, %v1211_v8  ;;  %v1318_v12 = vmax.f32 %v20744_v10, %v1217_v26 }
 0x285   : > { %v8636_v32 = vrot.slane %v8622_v1, %v16483_v11  ;;  %v13320_v50 = vrot.slane %v13318_v37, 7  ;;  %v17227_v6 = vrot.slane %v13324_v61, 7  ;;  %v13298_v23 = vrot.slane %v13297_v59, 2  ;;  %v2728_v37 = vld [vmem:[#allocation2 + $0x118] sm:$0xf] }
 0x286   : > { %v2246_v42 = vrot.slane %v1515_v14, %v16483_v11  ;;  %v2253_v21 = vrot.slane %v14772_v58, %v16483_v11  ;;  %v15161_v9 = vld.sshfl [vmem:[#allocation2 + $0x164] sm:$0x13 pattern:$0x76325410]  ;;  %v1394_v20 = vadd.f32 %v17022_v60, %v1315_v17  ;;  %v17231_v51 = vadd.f32 %v17022_v60, %v1318_v12  ;;  %v2731_v59 = vld [vmem:[#allocation2 + $0x11c] sm:$0x7] }
 0x287   : > { %v8637_v46 = vcombine.low %v8629_v48, %v8636_v32  ;;  %v13031_v25 = vcombine.high %v15161_v9, %v15161_v9  ;;  %v13300_v43 = vshll.u32 %v15161_v9, 16  ;;  %v13304_v36 = vshrl.u32 %v15161_v9, 16 }
 0x288   : > { %v2254_v41 = vcombine.high %v2246_v42, %v2246_v42  ;;  %v2255_v33 = vcombine.high %v2253_v21, %v2253_v21  ;;  %v2408_v2 = vcombine.low %v2238_v29, %v2246_v42  ;;  %v13321_v44 = vor.u32 %v13320_v50, %v13317_v35  ;;  %v2734_v42 = vld [vmem:[#allocation2 + $0x120] sm:$0xf] }
 0x289   : > { %8729 = vrot.lane.b32.xlu0 %v8637_v46, %s15738_s27  ;;  %v1466_v48 = vmax.f32 %v1394_v20, 0.0  ;;  %v13310_v31 = vshll.u32 %v13031_v25, 16  ;;  %v13302_v53 = vrot.slane %v13300_v43, 7  ;;  %v13306_v13 = vrot.slane %v13304_v36, 6  ;;  %v1213_v20 = vpop.permute.xlu0 %1212 }
 0x28a   : > { %v2415_v28 = vrot.slane %v2408_v2, %v16483_v11  ;;  %v2422_v7 = vrot.slane %v2254_v41, %v16483_v11  ;;  %v2423_v34 = vcombine.low %v2253_v21, %v2255_v33  ;;  %v13322_v63 = vrot.slane %v13321_v44, 2  ;;  %v2737_v41 = vld [vmem:[#allocation2 + $0x124] sm:$0x7] }
 0x28b   : > { %v1518_v52 = vpack.c.bf16 %v1466_v48, %v1465_v62  ;;  %v17244_v8 = vsel %vm16733_vm15, %v13298_v23, %v13302_v53  ;;  %v13307_v26 = vor.u32 %v13306_v13, %v13302_v53  ;;  %v13312_v1 = vrot.slane %v13310_v31, 7  ;;  %v1699_v23 = vld [vmem:[#allocation2 + $0x16c] sm:$0x4] }
 0x28c   : > { %v2430_v29 = vrot.slane %v2423_v34, %v16483_v11  ;;  %v2600_v30 = vshrl.u32 %v2415_v28, 16  ;;  %v2603_v5 = vshll.u32 %v2415_v28, 16  ;;  %v2608_v57 = vshrl.u32 %v2422_v7, 16 }
 0x28d   : > { %v2611_v56 = vshll.u32 %v2422_v7, 16  ;;  %v13308_v61 = vrot.slane %v13307_v26, 2  ;;  %v13327_v55 = vsel %vm16733_vm15, %v13322_v63, %v17227_v6  ;;  %v13603_v62 = vcombine.low %v17214_v0, %v17244_v8  ;;  %v1207_v0 = vpop.permute.xlu1 %1206  ;;  %v1702_v7 = vld [vmem:[#allocation2 + $0x174] sm:$0x4] }
 0x28e   : > { %v2602_v27 = vrot.slane %v2600_v30, 7  ;;  %v2610_v35 = vrot.slane %v2608_v57, 7  ;;  %v2616_v14 = vshrl.u32 %v2430_v29, 16  ;;  %v2619_v58 = vshll.u32 %v2430_v29, 16 }
 0x28f   : > { %v14775_v32 = vpack.c.bf16 %v1466_v48, %v1466_v48  ;;  %v17253_v21 = vsel %vm16733_vm15, %v13308_v61, %v13312_v1  ;;  %v13611_v50 = vrot.slane %v13603_v62, %v16483_v11  ;;  %v17257_v46 = vrot.slane %v1518_v52, %v16483_v11  ;;  %v17277_v63 = vld.sshfl [vmem:[#allocation2 + $0x178] sm:$0x33 pattern:$0x76325410]  ;;  %v1225_v62 = vpop.permute.xlu0 %1224 }
 0x290   : > { %v2605_v45 = vor.u32 %v2603_v5, %v2602_v27  ;;  %v2606_v17 = vrot.slane %v2602_v27, 4  ;;  %v2613_v10 = vor.u32 %v2611_v56, %v2610_v35  ;;  %v2618_v12 = vrot.slane %v2616_v14, 7  ;;  %v17283_v5 = vld.sshfl [vmem:[#allocation2 + $0x180] sm:$0x33 pattern:$0x76325410] }
 0x291   : > { %v2786_v9 = vrot.slane %v14775_v32, %v16483_v11  ;;  %v13604_v44 = vcombine.low %v17253_v21, %v13327_v55  ;;  %v2787_v48 = vcombine.high %v17257_v46, %v17257_v46  ;;  %v1469_v53 = vmax.f32 %v17231_v51, 0.0  ;;  %v17294_v61 = vld.sshfl [vmem:[#allocation2 + $0x17c] sm:$0x3 pattern:$0x76325410]  ;;  %v1219_v55 = vpop.permute.xlu1 %1218 }
 0x292   : > { %v2614_v33 = vsel %vm16879_vm9, %v2606_v17, %v2613_v10  ;;  %v2621_v2 = vor.u32 %v2619_v58, %v2618_v12  ;;  %v2622_v25 = vrot.slane %v2618_v12, 4  ;;  %v2729_v43 = vsel %vm16889_vm10, %v2605_v45, %v2728_v37  ;;  %v20745_v58 = vld [vmem:[#allocation43_spill] sm:$0xff] }
 0x293   : > { %2730 = vst [vmem:[#allocation2 + $0x118] sm:$0xf] %v2729_v43  ;;  %v2732_v36 = vsel %vm16907_vm5, %v2614_v33, %v2731_v59  ;;  %v2788_v28 = vcombine.high %v2786_v9, %v2786_v9  ;;  %v1700_v13 = vsel %vm16144_vm3, 0, %v1699_v23  ;;  %v13618_v29 = vrot.slane %v13604_v44, %v16483_v11  ;;  %v20747_v23 = vld [vmem:[#allocation45_spill] sm:$0xff] }
 0x294   : > { %v2630_v34 = vsel %vm16879_vm9, %v2622_v25, %v17187_v40  ;;  %2733 = vst [vmem:[#allocation2 + $0x11c] sm:$0x7] %v2732_v36  ;;  %v2735_v31 = vsel %vm16889_vm10, %v2621_v2, %v2734_v42  ;;  %v2937_v30 = vrot.slane %v2787_v48, %v16483_v11  ;;  %1701 = vst [vmem:[#allocation2 + $0x16c] sm:$0x4] %v1700_v13  ;;  %v1703_v57 = vsel %vm16144_vm3, 0, %v1702_v7 }
 0x295   : > { %2736 = vst [vmem:[#allocation2 + $0x120] sm:$0xf] %v2735_v31  ;;  %v2738_v52 = vsel %vm16907_vm5, %v2630_v34, %v2737_v41  ;;  %v2938_v40 = vcombine.low %v2786_v9, %v2788_v28  ;;  %v8401_v56 = vshrl.u32 %v16991_v22, 16  ;;  %v8404_v26 = vshll.u32 %v16991_v22, 16  ;;  %1704 = vst [vmem:[#allocation2 + $0x174] sm:$0x4] %v1703_v57 }
 0x296   : > { %2739 = vst [vmem:[#allocation2 + $0x124] sm:$0x7] %v2738_v52  ;;  %v8410_v1 = vshll.u32 %v17012_v19, 16  ;;  %v13619_v27 = vcombine.low %v13611_v50, %v13618_v29  ;;  %3116 = vst.msk [vmem:[#allocation2 + $0x7c] sm:$0x3] %vm2087_vm7, %v2937_v30  ;;  %v8414_v14 = vshrl.u32 %v17012_v19, 16  ;;  %v1313_v37 = vmax.f32 %v20745_v58, %v1207_v0 }
 0x297   : > { %v2945_v35 = vrot.slane %v2938_v40, %v16483_v11  ;;  %v8403_v32 = vrot.slane %v8401_v56, 6  ;;  %v8406_v59 = vrot.slane %v8404_v26, 7  ;;  %v20746_v22 = vld [vmem:[#allocation44_spill] sm:$0xff]  ;;  %v17304_v19 = vcombine.high %v17277_v63, %v17277_v63 }
 0x298   : > { %v17296_v45 = vrot.slane %v8410_v1, 7  ;;  %v1316_v17 = vmax.f32 %v20746_v22, %v1213_v20  ;;  %13711 = vrot.lane.b32.xlu0 %v13619_v27, %s15738_s27  ;;  %v8416_v10 = vrot.slane %v8414_v14, 6  ;;  %v1392_v12 = vadd.f32 %v17022_v60, %v1313_v37  ;;  %v20748_v20 = vld [vmem:[#allocation46_spill] sm:$0xff] }
 0x299   : > { %3117 = vst.msk [vmem:[#allocation2 + $0x80] sm:$0xf] %vm1535_vm8, %v2945_v35  ;;  %v6999_v42 = vcombine.low %v17294_v61, %v17283_v5  ;;  %v8407_v50 = vor.u32 %v8406_v59, %v8403_v32  ;;  %v1319_v0 = vmax.f32 %v20747_v23, %v1219_v55  ;;  %v1322_v41 = vmax.f32 %v20748_v20, %v1225_v62 }
 0x29a   : > { %v17309_v9 = vadd.f32 %v17022_v60, %v1316_v17  ;;  %v8417_v33 = vor.u32 %v8416_v10, %v17296_v45  ;;  %v1464_v2 = vmax.f32 %v1392_v12, 0.0  ;;  %v6998_v25 = vcombine.low %v17277_v63, %v17304_v19 }
 0x29b   : > { %v17317_v43 = vrot.slane %v6999_v42, %v16483_v11  ;;  %v14973_v36 = vld.sshfl [vmem:[#allocation2 + $0x16c] sm:$0x13 pattern:$0x76325410]  ;;  %v8408_v44 = vrot.slane %v8407_v50, 2  ;;  %v1398_v28 = vadd.f32 %v17022_v60, %v1319_v0  ;;  %v17322_v7 = vadd.f32 %v17022_v60, %v1322_v41 }
 0x29c   : > { %v1467_v48 = vmax.f32 %v17309_v9, 0.0  ;;  %v8081_v34 = vcombine.high %v14973_v36, %v14973_v36  ;;  %v8386_v31 = vshll.u32 %v14973_v36, 16  ;;  %v8390_v13 = vshrl.u32 %v14973_v36, 16  ;;  %v17415_v9 = vld [vmem:[%s20530_s2] ss:$0 sm:$0xff] }
 0x29d   : > { %v8418_v52 = vrot.slane %v8417_v33, 2  ;;  %v14975_v29 = vld.sshfl [vmem:[#allocation2 + $0x174] sm:$0x13 pattern:$0x76325410]  ;;  %v8413_v30 = vsel %vm16733_vm15, %v8408_v44, %v17296_v45  ;;  %v1517_v40 = vpack.c.bf16 %v1464_v2, %v1463_v49  ;;  %v14774_v57 = vpack.c.bf16 %v1464_v2, %v1464_v2 }
 0x29e   : > { %v17330_v56 = vrot.slane %v6998_v25, %v16483_v11  ;;  %v8097_v26 = vcombine.high %v14975_v29, %v14975_v29  ;;  %v17332_v1 = vrot.slane %v8386_v31, 7  ;;  %v8392_v27 = vrot.slane %v8390_v13, 6  ;;  %v17347_v33 = vld.sshfl [vmem:[#allocation2 + $0x188] sm:$0x33 pattern:$0x76325410] }
 0x29f   : > { %v8396_v35 = vshll.u32 %v8081_v34, 16  ;;  %v8420_v14 = vshll.u32 %v14975_v29, 16  ;;  %v8424_v58 = vshrl.u32 %v14975_v29, 16  ;;  %v2762_v37 = vrot.slane %v1517_v40, %v16483_v11  ;;  %v1221_v34 = vpop.permute.xlu0 %1220 }
 0x2a0   : > { %v2769_v55 = vrot.slane %v14774_v57, %v16483_v11  ;;  %v8393_v62 = vor.u32 %v8392_v27, %v17332_v1  ;;  %v8430_v39 = vshll.u32 %v8097_v26, 16  ;;  %v7014_v49 = vcombine.low %v17330_v56, %v17317_v43  ;;  %v20749_v26 = vld [vmem:[#allocation47_spill] sm:$0xff] }
 0x2a1   : > { %v8398_v32 = vrot.slane %v8396_v35, 7  ;;  %v17339_v59 = vrot.slane %v8420_v14, 7  ;;  %v8426_v45 = vrot.slane %v8424_v58, 6  ;;  %v2770_v22 = vcombine.high %v2762_v37, %v2762_v37  ;;  %v20750_v35 = vld [vmem:[#allocation48_spill] sm:$0xff] }
 0x2a2   : > { %v2771_v17 = vcombine.high %v2769_v55, %v2769_v55  ;;  %v8394_v10 = vrot.slane %v8393_v62, 2  ;;  %v8432_v12 = vrot.slane %v8430_v39, 7  ;;  %v2922_v42 = vrot.slane %v2769_v55, %v16483_v11 }
 0x2a3   : > { %v1470_v50 = vmax.f32 %v1398_v28, 0.0  ;;  %v8423_v23 = vsel %vm16733_vm15, %v8418_v52, %v17339_v59  ;;  %v8427_v0 = vor.u32 %v8426_v45, %v17339_v59  ;;  %v2908_v20 = vcombine.low %v2762_v37, %v2770_v22  ;;  %v1215_v28 = vpop.permute.xlu1 %1214 }
 0x2a4   : > { %v2923_v41 = vcombine.low %v2771_v17, %v17257_v46  ;;  %v17351_v2 = vsel %vm16733_vm15, %v8394_v10, %v8398_v32  ;;  %3114 = vst.msk [vmem:[#allocation2 + $0x74] sm:$0x3] %vm2087_vm7, %v2922_v42  ;;  %v1473_v44 = vmax.f32 %v17322_v7, 0.0  ;;  %v17366_v51 = vcombine.high %v17283_v5, %v17283_v5 }
 0x2a5   : > { %v1520_v25 = vpack.c.bf16 %v1470_v50, %v1469_v53  ;;  %v14777_v36 = vpack.c.bf16 %v1470_v50, %v1470_v50  ;;  %v8428_v31 = vrot.slane %v8427_v0, 2  ;;  %v8655_v13 = vcombine.low %v17351_v2, %v8413_v30  ;;  %v14931_v32 = vld.sshfl [vmem:[#allocation2 + $0x184] sm:$0x3 pattern:$0x76325410] }
 0x2a6   : > { %v2915_v46 = vrot.slane %v2908_v20, %v16483_v11  ;;  %v2930_v52 = vrot.slane %v2923_v41, %v16483_v11  ;;  %v17370_v53 = vcombine.high %v17347_v33, %v17347_v33  ;;  %v1317_v27 = vmax.f32 %v20749_v26, %v1215_v28  ;;  %v15117_v10 = vld.sshfl [vmem:[#allocation2 + $0x174] sm:$0x3 pattern:$0x76325410]  ;;  %v20751_v26 = vld [vmem:[#allocation49_spill] sm:$0xff] }
 0x2a7   : > { %v2813_v29 = vrot.slane %v1520_v25, %v16483_v11  ;;  %v17362_v40 = vrot.slane %v14777_v36, %v16483_v11  ;;  %v17374_v30 = vsel %vm16733_vm15, %v8428_v31, %v8432_v12  ;;  %v8663_v57 = vrot.slane %v8655_v13, %v16483_v11  ;;  %v1227_v0 = vpop.permute.xlu1 %1226  ;;  %v1233_v36 = vpop.permute.xlu0 %1232  ;;  %v14972_v28 = vld.sshfl [vmem:[#allocation2 + $0x168] sm:$0x33 pattern:$0x76325410] }
 0x2a8   : > { %3113 = vst.msk [vmem:[#allocation2 + $0x70] sm:$0xf] %vm1535_vm8, %v2915_v46  ;;  %3115 = vst.msk [vmem:[#allocation2 + $0x78] sm:$0xf] %vm1535_vm8, %v2930_v52  ;;  %v1320_v14 = vmax.f32 %v20750_v35, %v1221_v34  ;;  %v8656_v58 = vcombine.low %v8423_v23, %v17374_v30  ;;  %v7015_v39 = vcombine.low %v17366_v51, %v14931_v32  ;;  %v8367_v32 = vshrl.u32 %v14972_v28, 16 }
 0x2a9   : > { %v2821_v37 = vcombine.high %v2813_v29, %v2813_v29  ;;  %v2822_v55 = vcombine.high %v17362_v40, %v17362_v40  ;;  %v2982_v62 = vrot.slane %v17362_v40, %v16483_v11  ;;  %v7016_v45 = vcombine.low %v17347_v33, %v17370_v53 }
 0x2aa   : > { %v1396_v22 = vadd.f32 %v17022_v60, %v1317_v27  ;;  %v17391_v17 = vadd.f32 %v17022_v60, %v1320_v14  ;;  %v8670_v12 = vrot.slane %v8656_v58, %v16483_v11  ;;  %v11963_v50 = vcombine.low %v15117_v10, %v17277_v63  ;;  %v20752_v14 = vld [vmem:[#allocation17_spill] sm:$0xff] }
 0x2ab   : > { %v2968_v42 = vcombine.low %v2813_v29, %v2821_v37  ;;  %3122 = vst.msk [vmem:[#allocation2 + $0x94] sm:$0x3] %vm2087_vm7, %v2982_v62  ;;  %v11964_v23 = vcombine.low %v17304_v19, %v17294_v61  ;;  %v7023_v20 = vrot.slane %v7015_v39, %v16483_v11  ;;  %v7030_v41 = vrot.slane %v7016_v45, %v16483_v11 }
 0x2ac   : > { %v1468_v25 = vmax.f32 %v1396_v22, 0.0  ;;  %v1471_v60 = vmax.f32 %v17391_v17, 0.0  ;;  %v8671_v34 = vcombine.low %v8663_v57, %v8670_v12  ;;  %v11971_v13 = vrot.slane %v11963_v50, %v16483_v11 }
 0x2ad   : > { %v2975_v31 = vrot.slane %v2968_v42, %v16483_v11  ;;  %v11978_v46 = vrot.slane %v11964_v23, %v16483_v11  ;;  %v7031_v52 = vcombine.low %v7023_v20, %v7030_v41  ;;  %v1323_v27 = vmax.f32 %v20751_v26, %v1227_v0  ;;  %v1223_v41 = vpop.permute.xlu1 %1222 }
 0x2ae   : > { %v1519_v61 = vpack.c.bf16 %v1468_v25, %v1467_v48  ;;  %v14776_v29 = vpack.c.bf16 %v1468_v25, %v1468_v25  ;;  %8733 = vrot.lane.b32.xlu0 %v8671_v34, %s15738_s27  ;;  %v1326_v57 = vmax.f32 %v20752_v14, %v1233_v36  ;;  %v8073_v58 = vcombine.high %v14972_v28, %v14972_v28 }
 0x2af   : > { %3121 = vst.msk [vmem:[#allocation2 + $0x90] sm:$0xf] %vm1535_vm8, %v2975_v31  ;;  %v11979_v35 = vcombine.low %v11971_v13, %v11978_v46  ;;  %v1402_v48 = vadd.f32 %v17415_v9, %v1323_v27  ;;  %v8370_v45 = vshll.u32 %v14972_v28, 16  ;;  %v8369_v0 = vrot.slane %v8367_v32, 6  ;;  %v1229_v31 = vpop.permute.xlu0 %1228 }
 0x2b0   : > { %v2796_v37 = vrot.slane %v1519_v61, %v16483_v11  ;;  %v2803_v62 = vrot.slane %v14776_v29, %v16483_v11  ;;  %v17419_v39 = vadd.f32 %v17415_v9, %v1326_v57  ;;  %v8376_v22 = vshll.u32 %v8073_v58, 16  ;;  %v20753_v29 = vld [vmem:[#allocation5_spill] sm:$0xff]  ;;  %v15164_v57 = vld.sshfl [vmem:[#allocation2 + $0x170] sm:$0x33 pattern:$0x76325410] }
 0x2b1   : > { %v1474_v50 = vmax.f32 %v1402_v48, 0.0  ;;  %v8372_v20 = vrot.slane %v8370_v45, 7  ;;  %v8380_v61 = vshrl.u32 %v8073_v58, 16  ;;  %v1321_v26 = vmax.f32 %v20753_v29, %v1223_v41 }
 0x2b2   : > { %v2804_v10 = vcombine.high %v2796_v37, %v2796_v37  ;;  %v2805_v12 = vcombine.high %v2803_v62, %v2803_v62  ;;  %v2952_v42 = vrot.slane %v2796_v37, %v16483_v11  ;;  %7061 = vrot.lane.b32.xlu0 %v7014_v49, %s15740_s30  ;;  %v1477_v23 = vmax.f32 %v17419_v39, 0.0 }
 0x2b3   : > { %v1522_v28 = vpack.c.bf16 %v1474_v50, %v1473_v44  ;;  %v14779_v34 = vpack.c.bf16 %v1474_v50, %v1474_v50  ;;  %v8373_v13 = vor.u32 %v8372_v20, %v8369_v0  ;;  %v8378_v46 = vrot.slane %v8376_v22, 7  ;;  %v20754_v44 = vld [vmem:[#allocation21_spill] sm:$0xff] }
 0x2b4   : > { %v2953_v25 = vcombine.low %v2804_v10, %v2803_v62  ;;  %v2967_v36 = vrot.slane %v2805_v12, %v16483_v11  ;;  %3118 = vst.msk [vmem:[#allocation2 + $0x84] sm:$0x3] %vm2087_vm7, %v2952_v42  ;;  %v8382_v7 = vrot.slane %v8380_v61, 6  ;;  %v1324_v14 = vmax.f32 %v20754_v44, %v1229_v31  ;;  %v1241_v61 = vpop.permute.xlu0 %1240  ;;  %v20755_v44 = vld [vmem:[#allocation23_spill] sm:$0xff] }
 0x2b5   : > { %v2847_v56 = vrot.slane %v1522_v28, %v16483_v11  ;;  %v2854_v49 = vrot.slane %v14779_v34, %v16483_v11  ;;  %v8374_v27 = vrot.slane %v8373_v13, 2  ;;  %v8638_v48 = vcombine.low %v17244_v8, %v17253_v21 }
 0x2b6   : > { %v2960_v43 = vrot.slane %v2953_v25, %v16483_v11  ;;  %3120 = vst.msk [vmem:[#allocation2 + $0x8c] sm:$0x3] %vm2087_vm7, %v2967_v36  ;;  %7063 = vrot.lane.b32.xlu0 %v7031_v52, %s15740_s30  ;;  %v8383_v45 = vor.u32 %v8382_v7, %v8378_v46  ;;  %v1400_v52 = vadd.f32 %v17415_v9, %v1321_v26  ;;  %v13328_v20 = vshrl.u32 %v17037_v47, 16 }
 0x2b7   : > { %v2855_v58 = vcombine.high %v2847_v56, %v2847_v56  ;;  %v2856_v37 = vcombine.high %v2854_v49, %v2854_v49  ;;  %v3012_v62 = vrot.slane %v2847_v56, %v16483_v11  ;;  %v8379_v32 = vsel %vm16733_vm15, %v8374_v27, %v8378_v46  ;;  %v1235_v46 = vpop.permute.xlu1 %1234 }
 0x2b8   : > { %3119 = vst.msk [vmem:[#allocation2 + $0x88] sm:$0xf] %vm1535_vm8, %v2960_v43  ;;  %v17446_v22 = vadd.f32 %v17415_v9, %v1324_v14  ;;  %v8646_v42 = vrot.slane %v8638_v48, %v16483_v11  ;;  %v13055_v50 = vcombine.high %v15164_v57, %v15164_v57  ;;  %v8384_v8 = vrot.slane %v8383_v45, 2 }
 0x2b9   : > { %v3013_v10 = vcombine.low %v2855_v58, %v2854_v49  ;;  %v3027_v12 = vrot.slane %v2856_v37, %v16483_v11  ;;  %3126 = vst.msk [vmem:[#allocation2 + $0xa4] sm:$0x3] %vm2087_vm7, %v3012_v62  ;;  %v1472_v21 = vmax.f32 %v1400_v52, 0.0  ;;  %v13349_v25 = vshrl.u32 %v15164_v57, 16 }
 0x2ba   : > { %12041 = vrot.lane.b32.xlu0 %v11979_v35, %s15740_s30  ;;  %v1475_v0 = vmax.f32 %v17446_v22, 0.0  ;;  %v13352_v36 = vshll.u32 %v15164_v57, 16  ;;  %v13358_v28 = vshll.u32 %v13055_v50, 16  ;;  %v8389_v34 = vsel %vm16733_vm15, %v8384_v8, %v17332_v1  ;;  %v20756_v57 = vld [vmem:[#allocation6_spill] sm:$0xff] }
 0x2bb   : > { %v3020_v41 = vrot.slane %v3013_v10, %v16483_v11  ;;  %3128 = vst.msk [vmem:[#allocation2 + $0xac] sm:$0x3] %vm2087_vm7, %v3027_v12  ;;  %v1521_v35 = vpack.c.bf16 %v1472_v21, %v1471_v60  ;;  %v14778_v31 = vpack.c.bf16 %v1472_v21, %v1472_v21  ;;  %v13330_v13 = vrot.slane %v13328_v20, 6 }
 0x2bc   : > { %v8639_v47 = vcombine.low %v8379_v32, %v8389_v34  ;;  %v13351_v43 = vrot.slane %v13349_v25, 6  ;;  %v13354_v56 = vrot.slane %v13352_v36, 7  ;;  %v13360_v49 = vrot.slane %v13358_v28, 7  ;;  %v1231_v36 = vpop.permute.xlu1 %1230 }
 0x2bd   : > { %3127 = vst.msk [vmem:[#allocation2 + $0xa8] sm:$0xf] %vm1535_vm8, %v3020_v41  ;;  %v2830_v29 = vrot.slane %v1521_v35, %v16483_v11  ;;  %v2837_v26 = vrot.slane %v14778_v31, %v16483_v11  ;;  %v13331_v27 = vor.u32 %v13330_v13, %v17227_v6  ;;  %v13362_v7 = vshrl.u32 %v13055_v50, 16  ;;  %v1237_v31 = vpop.permute.xlu0 %1236 }
 0x2be   : > { %v8653_v17 = vrot.slane %v8639_v47, %v16483_v11  ;;  %v13355_v60 = vor.u32 %v13354_v56, %v13351_v43  ;;  %v1327_v14 = vmax.f32 %v20755_v44, %v1235_v46  ;;  %v1330_v58 = vmax.f32 %v20756_v57, %v1241_v61  ;;  %v17472_v12 = vld.sshfl [vmem:[#allocation2 + $0x190] sm:$0x33 pattern:$0x76325410] }
 0x2bf   : > { %v2838_v37 = vcombine.high %v2830_v29, %v2830_v29  ;;  %v2839_v62 = vcombine.high %v2837_v26, %v2837_v26  ;;  %v2983_v48 = vcombine.low %v2822_v55, %v2830_v29  ;;  %v13332_v32 = vrot.slane %v13331_v27, 2  ;;  %v14933_v25 = vld.sshfl [vmem:[#allocation2 + $0x18c] sm:$0x3 pattern:$0x76325410] }
 0x2c0   : > { %v8654_v45 = vcombine.low %v8646_v42, %v8653_v17  ;;  %v13356_v52 = vrot.slane %v13355_v60, 2  ;;  %v13364_v10 = vrot.slane %v13362_v7, 6  ;;  %v1406_v6 = vadd.f32 %v17415_v9, %v1327_v14  ;;  %v14935_v43 = vld.sshfl [vmem:[#allocation2 + $0x194] sm:$0x3 pattern:$0x76325410] }
 0x2c1   : > { %v2990_v50 = vrot.slane %v2983_v48, %v16483_v11  ;;  %v2997_v8 = vrot.slane %v2838_v37, %v16483_v11  ;;  %v2998_v21 = vcombine.low %v2837_v26, %v2839_v62  ;;  %v13337_v20 = vsel %vm16733_vm15, %v13332_v32, %v17332_v1  ;;  %v20757_v26 = vld [vmem:[#allocation7_spill] sm:$0xff] }
 0x2c2   : > { %8731 = vrot.lane.b32.xlu0 %v8654_v45, %s15738_s27  ;;  %v13361_v40 = vsel %vm16733_vm15, %v13356_v52, %v13360_v49  ;;  %v13365_v55 = vor.u32 %v13364_v10, %v13360_v49  ;;  %v13620_v42 = vcombine.low %v13337_v20, %v17351_v2  ;;  %v1478_v41 = vmax.f32 %v1406_v6, 0.0  ;;  %v1705_v2 = vld [vmem:[#allocation2 + $0x17c] sm:$0x4] }
 0x2c3   : > { %v3005_v28 = vrot.slane %v2998_v21, %v16483_v11  ;;  %3123 = vst.msk [vmem:[#allocation2 + $0x98] sm:$0xf] %vm1535_vm8, %v2990_v50  ;;  %v17487_v34 = vadd.f32 %v17415_v9, %v1330_v58  ;;  %v17491_v1 = vcombine.high %v17472_v12, %v17472_v12  ;;  %v7032_v35 = vcombine.low %v14933_v25, %v17472_v12 }
 0x2c4   : > { %3124 = vst.msk [vmem:[#allocation2 + $0x9c] sm:$0x3] %vm2087_vm7, %v2997_v8  ;;  %v13366_v13 = vrot.slane %v13365_v55, 2  ;;  %v13628_v46 = vrot.slane %v13620_v42, %v16483_v11  ;;  %v1524_v61 = vpack.c.bf16 %v1478_v41, %v1477_v23  ;;  %v14781_v47 = vpack.c.bf16 %v1478_v41, %v1478_v41  ;;  %v20758_v23 = vld [vmem:[#allocation25_spill] sm:$0xff] }
 0x2c5   : > { %3125 = vst.msk [vmem:[#allocation2 + $0xa0] sm:$0xf] %vm1535_vm8, %v3005_v28  ;;  %v1481_v56 = vmax.f32 %v17487_v34, 0.0  ;;  %v7033_v49 = vcombine.low %v17491_v1, %v14935_v43  ;;  %v7040_v29 = vrot.slane %v7032_v35, %v16483_v11  ;;  %v1325_v27 = vmax.f32 %v20757_v26, %v1231_v36 }
 0x2c6   : > { %v13371_v7 = vsel %vm16733_vm15, %v13366_v13, %v17339_v59  ;;  %v2881_v17 = vrot.slane %v1524_v61, %v16483_v11  ;;  %v2888_v39 = vrot.slane %v14781_v47, %v16483_v11  ;;  %v1328_v60 = vmax.f32 %v20758_v23, %v1237_v31 }
 0x2c7   : > { %v13621_v44 = vcombine.low %v13361_v40, %v13371_v7  ;;  %v7047_v14 = vrot.slane %v7033_v49, %v16483_v11  ;;  %v1404_v57 = vadd.f32 %v17415_v9, %v1325_v27  ;;  %v1706_v58 = vsel %vm16144_vm3, 0, %v1705_v2 }
 0x2c8   : > { %v2889_v37 = vcombine.high %v2881_v17, %v2881_v17  ;;  %v2890_v62 = vcombine.high %v2888_v39, %v2888_v39  ;;  %v17513_v48 = vadd.f32 %v17415_v9, %v1328_v60  ;;  %1707 = vst [vmem:[#allocation2 + $0x17c] sm:$0x4] %v1706_v58  ;;  %v8435_v59 = vshrl.u32 %v17277_v63, 16 }
 0x2c9   : > { %v13635_v32 = vrot.slane %v13621_v44, %v16483_v11  ;;  %v7048_v45 = vcombine.low %v7040_v29, %v7047_v14  ;;  %v1476_v52 = vmax.f32 %v1404_v57, 0.0  ;;  %v8438_v10 = vshll.u32 %v17277_v63, 16  ;;  %v1562_v44 = vld [vmem:[#allocation2 + $0x8] sm:$0x1] }
 0x2ca   : > { %v3057_v6 = vrot.slane %v2889_v37, %v16483_v11  ;;  %v3058_v50 = vcombine.low %v2888_v39, %v2890_v62  ;;  %v1479_v8 = vmax.f32 %v17513_v48, 0.0  ;;  %v8437_v21 = vrot.slane %v8435_v59, 6  ;;  %v1243_v62 = vpop.permute.xlu1 %1242  ;;  %v1249_v59 = vpop.permute.xlu0 %1248 }
 0x2cb   : > { %v13636_v20 = vcombine.low %v13628_v46, %v13635_v32  ;;  %v1523_v40 = vpack.c.bf16 %v1476_v52, %v1475_v0  ;;  %v14780_v55 = vpack.c.bf16 %v1476_v52, %v1476_v52  ;;  %v8440_v42 = vrot.slane %v8438_v10, 7  ;;  %v1544_v10 = vld [vmem:[#allocation2 + $0x6c] sm:$0x7] }
 0x2cc   : > { %v3065_v41 = vrot.slane %v3058_v50, %v16483_v11  ;;  %3132 = vst.msk [vmem:[#allocation2 + $0xbc] sm:$0x3] %vm2087_vm7, %v3057_v6  ;;  %v8444_v25 = vshll.u32 %v17304_v19, 16  ;;  %v8448_v63 = vshrl.u32 %v17304_v19, 16  ;;  %v8469_v36 = vshrl.u32 %v17283_v5, 16 }
 0x2cd   : > { %13713 = vrot.lane.b32.xlu0 %v13636_v20, %s15738_s27  ;;  %v2864_v28 = vrot.slane %v1523_v40, %v16483_v11  ;;  %v2871_v35 = vrot.slane %v14780_v55, %v16483_v11  ;;  %v8441_v22 = vor.u32 %v8440_v42, %v8437_v21  ;;  %v8472_v0 = vshll.u32 %v17283_v5, 16  ;;  %v1708_v6 = vld [vmem:[#allocation2 + $0x184] sm:$0x4] }
 0x2ce   : > { %3133 = vst.msk [vmem:[#allocation2 + $0xc0] sm:$0xf] %vm1535_vm8, %v3065_v41  ;;  %v8446_v31 = vrot.slane %v8444_v25, 7  ;;  %v8450_v2 = vrot.slane %v8448_v63, 6  ;;  %v8471_v13 = vrot.slane %v8469_v36, 6  ;;  %v8478_v46 = vshll.u32 %v17366_v51, 16 }
 0x2cf   : > { %v2872_v61 = vcombine.high %v2864_v28, %v2864_v28  ;;  %v2873_v19 = vcombine.high %v2871_v35, %v2871_v35  ;;  %v3042_v47 = vrot.slane %v2871_v35, %v16483_v11  ;;  %v14977_v43 = vld.sshfl [vmem:[#allocation2 + $0x17c] sm:$0x13 pattern:$0x76325410]  ;;  %v8442_v49 = vrot.slane %v8441_v22, 2  ;;  %v20759_v41 = vld [vmem:[#allocation9_spill] sm:$0xff] }
 0x2d0   : > { %v8113_v29 = vcombine.high %v14977_v43, %v14977_v43  ;;  %v8451_v26 = vor.u32 %v8450_v2, %v8446_v31  ;;  %v8454_v27 = vshll.u32 %v14977_v43, 16  ;;  %v8458_v7 = vshrl.u32 %v14977_v43, 16  ;;  %v20760_v63 = vld [vmem:[#allocation8_spill] sm:$0xff] }
 0x2d1   : > { %7065 = vrot.lane.b32.xlu0 %v7048_v45, %s15740_s30  ;;  %v3028_v5 = vcombine.low %v2864_v28, %v2872_v61  ;;  %v3043_v39 = vcombine.low %v2873_v19, %v2881_v17  ;;  %3130 = vst.msk [vmem:[#allocation2 + $0xb4] sm:$0x3] %vm2087_vm7, %v3042_v47  ;;  %v17538_v23 = vsel %vm16733_vm15, %v8442_v49, %v8446_v31  ;;  %v8474_v60 = vrot.slane %v8472_v0, 7  ;;  %v1711_v28 = vld [vmem:[#allocation2 + $0x18c] sm:$0x4] }
 0x2d2   : > { %v8452_v14 = vrot.slane %v8451_v26, 2  ;;  %v8456_v57 = vrot.slane %v8454_v27, 7  ;;  %v8460_v58 = vrot.slane %v8458_v7, 6  ;;  %v8464_v37 = vshll.u32 %v8113_v29, 16 }
 0x2d3   : > { %v3035_v32 = vrot.slane %v3028_v5, %v16483_v11  ;;  %v3050_v45 = vrot.slane %v3043_v39, %v16483_v11  ;;  %v8475_v52 = vor.u32 %v8474_v60, %v8471_v13  ;;  %v17542_v17 = vrot.slane %v8478_v46, 7  ;;  %v1239_v5 = vpop.permute.xlu1 %1238 }
 0x2d4   : > { %v17546_v50 = vsel %vm16733_vm15, %v8452_v14, %v8456_v57  ;;  %v8461_v21 = vor.u32 %v8460_v58, %v8456_v57  ;;  %v8466_v20 = vrot.slane %v8464_v37, 7  ;;  %v1563_v40 = vsel %vm16261_vm6, 0, %v1562_v44  ;;  %v17588_v37 = vld.sshfl [vmem:[#allocation2 + $0x70] sm:$0x33 pattern:$0x76325410] }
 0x2d5   : > { %3129 = vst.msk [vmem:[#allocation2 + $0xb0] sm:$0xf] %vm1535_vm8, %v3035_v32  ;;  %3131 = vst.msk [vmem:[#allocation2 + $0xb8] sm:$0xf] %vm1535_vm8, %v3050_v45  ;;  %v8476_v55 = vrot.slane %v8475_v52, 2  ;;  %v8672_v42 = vcombine.low %v17538_v23, %v17546_v50  ;;  %v1331_v25 = vmax.f32 %v20759_v41, %v1243_v62  ;;  %v1334_v36 = vmax.f32 %v20760_v63, %v1249_v59  ;;  %v1245_v59 = vpop.permute.xlu0 %1244  ;;  %v20761_v52 = vld [vmem:[#allocation10_spill] sm:$0xff] }
 0x2d6   : > { %1564 = vst [vmem:[#allocation2 + $0x8] sm:$0x1] %v1563_v40  ;;  %v8462_v35 = vrot.slane %v8461_v21, 2  ;;  %v1545_v22 = vsel %vm16907_vm5, 0, %v1544_v10  ;;  %v1709_v0 = vsel %vm16144_vm3, 0, %v1708_v6  ;;  %v15741_v61 = vmov 0  }
 0x2d7   : > { %v8481_v31 = vsel %vm16733_vm15, %v8476_v55, %v17542_v17  ;;  %v8680_v2 = vrot.slane %v8672_v42, %v16483_v11  ;;  %v1410_v13 = vadd.f32 %v17415_v9, %v1331_v25  ;;  %v17566_v46 = vadd.f32 %v17415_v9, %v1334_v36  ;;  %1536 = vst.msk [vmem:[#allocation2] sm:$0xf] %vm1535_vm8, %v15741_v61 }
 0x2d8   : > { %1543 = vst.msk [vmem:[#allocation2 + $0x68] sm:$0xf] %vm1535_vm8, %v15741_v61  ;;  %1546 = vst [vmem:[#allocation2 + $0x6c] sm:$0x7] %v1545_v22  ;;  %v17574_v19 = vsel %vm16733_vm15, %v8462_v35, %v8466_v20  ;;  %v1712_v47 = vsel %vm16144_vm3, 0, %v1711_v28  ;;  %v8482_v43 = vshrl.u32 %v17366_v51, 16  ;;  %v1329_v10 = vmax.f32 %v20761_v52, %v1239_v5 }
 0x2d9   : > { %1548 = vst.msk [vmem:[#allocation2 + $0x130] sm:$0xf] %vm1535_vm8, %v15741_v61  ;;  %1552 = vst.msk [vmem:[#allocation2 + $0x198] sm:$0xf] %vm1535_vm8, %v15741_v61  ;;  %v8503_v49 = vshrl.u32 %v17347_v33, 16  ;;  %v8673_v29 = vcombine.low %v17574_v19, %v8481_v31  ;;  %v1482_v26 = vmax.f32 %v1410_v13, 0.0  ;;  %v17605_v41 = vcombine.high %v17588_v37, %v17588_v37 }
 0x2da   : > { %1710 = vst [vmem:[#allocation2 + $0x184] sm:$0x4] %v1709_v0  ;;  %v1485_v27 = vmax.f32 %v17566_v46, 0.0  ;;  %1713 = vst [vmem:[#allocation2 + $0x18c] sm:$0x4] %v1712_v47  ;;  %v8506_v7 = vshll.u32 %v17347_v33, 16  ;;  %v1408_v55 = vadd.f32 %v17415_v9, %v1329_v10 }
 0x2db   : > { %v8484_v39 = vrot.slane %v8482_v43, 6  ;;  %v8505_v60 = vrot.slane %v8503_v49, 6  ;;  %v8512_v44 = vshll.u32 %v17370_v53, 16  ;;  %v8516_v14 = vshrl.u32 %v17370_v53, 16 }
 0x2dc   : > { %v8687_v57 = vrot.slane %v8673_v29, %v16483_v11  ;;  %v1526_v51 = vpack.c.bf16 %v1482_v26, %v1481_v56  ;;  %v14783_v58 = vpack.c.bf16 %v1482_v26, %v1482_v26  ;;  %v8508_v62 = vrot.slane %v8506_v7, 7 }
 0x2dd   : > { %v8485_v32 = vor.u32 %v8484_v39, %v17542_v17  ;;  %v17591_v33 = vrot.slane %v8512_v44, 7  ;;  %v8518_v45 = vrot.slane %v8516_v14, 6  ;;  %v20762_v17 = vld [vmem:[#allocation11_spill] sm:$0xff]  ;;  %v8550_v46 = vshrl.u32 %v17491_v1, 16 }
 0x2de   : > { %v8688_v6 = vcombine.low %v8680_v2, %v8687_v57  ;;  %v3153_v53 = vrot.slane %v1526_v51, %v16483_v11  ;;  %v17596_v21 = vrot.slane %v14783_v58, %v16483_v11  ;;  %v8509_v34 = vor.u32 %v8508_v62, %v8505_v60  ;;  %v17622_v39 = vld.sshfl [vmem:[#allocation2 + $0x78] sm:$0x33 pattern:$0x76325410] }
 0x2df   : > { %v1641_v56 = vld [vmem:[#allocation2 + $0x6c] sm:$0x4]  ;;  %v17598_v20 = vld.sshfl [vmem:[#allocation2 + $0x68] sm:$0x33 pattern:$0x76325410]  ;;  %v8519_v40 = vor.u32 %v8518_v45, %v17591_v33  ;;  %v1332_v42 = vmax.f32 %v20762_v17, %v1245_v59 }
 0x2e0   : > { %8735 = vrot.lane.b32.xlu0 %v8688_v6, %s15738_s27  ;;  %v3161_v25 = vcombine.high %v3153_v53, %v3153_v53  ;;  %v3162_v63 = vcombine.high %v17596_v21, %v17596_v21  ;;  %v3313_v36 = vrot.slane %v17596_v21, %v16483_v11  ;;  %v1642_v28 = vsel %vm16144_vm3, 0, %v1641_v56  ;;  %v14817_v35 = vld.sshfl [vmem:[#allocation2 + $0x6c] sm:$0x3 pattern:$0x76325410] }
 0x2e1   : > { %1643 = vst [vmem:[#allocation2 + $0x6c] sm:$0x4] %v1642_v28  ;;  %v17616_v22 = vcombine.high %v17598_v20, %v17598_v20  ;;  %v4397_v0 = vcombine.low %v14817_v35, %v17588_v37  ;;  %v14979_v31 = vld.sshfl [vmem:[#allocation2 + $0x184] sm:$0x13 pattern:$0x76325410] }
 0x2e2   : > { %v8486_v2 = vrot.slane %v8485_v32, 2  ;;  %v8510_v13 = vrot.slane %v8509_v34, 2  ;;  %v3299_v61 = vcombine.low %v3153_v53, %v3161_v25  ;;  %v3488_v47 = vshrl.u32 %v3313_v36, 16  ;;  %v3696_v35 = vld [vmem:[#allocation2 + $0x8] sm:$0xf] }
 0x2e3   : > { %v3491_v43 = vshll.u32 %v3313_v36, 16  ;;  %v8129_v49 = vcombine.high %v14979_v31, %v14979_v31  ;;  %v4396_v29 = vcombine.low %v17598_v20, %v17616_v22  ;;  %v4411_v26 = vrot.slane %v4397_v0, %v16483_v11  ;;  %v17625_v14 = vld.sshfl [vmem:[#allocation2 + $0x18c] sm:$0x13 pattern:$0x76325410] }
 0x2e4   : > { %v8488_v7 = vshll.u32 %v14979_v31, 16  ;;  %v8492_v5 = vshrl.u32 %v14979_v31, 16  ;;  %v3306_v60 = vrot.slane %v3299_v61, %v16483_v11  ;;  %v3490_v44 = vrot.slane %v3488_v47, 7 }
 0x2e5   : > { %v8498_v57 = vshll.u32 %v8129_v49, 16  ;;  %v8515_v51 = vsel %vm16733_vm15, %v8510_v13, %v17591_v33  ;;  %v4404_v58 = vrot.slane %v4396_v29, %v16483_v11  ;;  %v8520_v32 = vrot.slane %v8519_v40, 2  ;;  %v14819_v28 = vld.sshfl [vmem:[#allocation2 + $0x74] sm:$0x3 pattern:$0x76325410] }
 0x2e6   : > { %v8490_v62 = vrot.slane %v8488_v7, 7  ;;  %v8494_v59 = vrot.slane %v8492_v5, 6  ;;  %v3480_v45 = vshrl.u32 %v3306_v60, 16  ;;  %v3483_v52 = vshll.u32 %v3306_v60, 16  ;;  %v3699_v13 = vld [vmem:[#allocation2 + $0xc] sm:$0x7] }
 0x2e7   : > { %v3493_v10 = vor.u32 %v3491_v43, %v3490_v44  ;;  %v8500_v6 = vrot.slane %v8498_v57, 7  ;;  %v4412_v53 = vcombine.low %v4404_v58, %v4411_v26  ;;  %v8522_v17 = vshll.u32 %v17625_v14, 16 }
 0x2e8   : > { %v8491_v34 = vsel %vm16733_vm15, %v8486_v2, %v8490_v62  ;;  %v8495_v56 = vor.u32 %v8494_v59, %v8490_v62  ;;  %v3482_v25 = vrot.slane %v3480_v45, 7  ;;  %v1480_v36 = vmax.f32 %v1408_v55, 0.0  ;;  %v1571_v62 = vld [vmem:[#allocation2 + $0x20] sm:$0x1] }
 0x2e9   : > { %v17635_v33 = vadd.f32 %v17415_v9, %v1332_v42  ;;  %v17639_v40 = vcombine.high %v17622_v39, %v17622_v39  ;;  %4549 = vrot.lane.b32.xlu1 %v4412_v53, %s15740_s30  ;;  %v17642_v31 = vrot.slane %v8522_v17, 7  ;;  %v4413_v2 = vcombine.low %v17605_v41, %v14819_v28  ;;  %v1251_v53 = vpop.permute.xlu1 %1250 }
 0x2ea   : > { %v8496_v0 = vrot.slane %v8495_v56, 2  ;;  %v3485_v61 = vor.u32 %v3483_v52, %v3482_v25  ;;  %v3486_v47 = vrot.slane %v3482_v25, 4  ;;  %v1525_v55 = vpack.c.bf16 %v1480_v36, %v1479_v8  ;;  %v1714_v52 = vld [vmem:[#allocation2 + $0x194] sm:$0x4] }
 0x2eb   : > { %v14782_v42 = vpack.c.bf16 %v1480_v36, %v1480_v36  ;;  %v8525_v49 = vsel %vm16733_vm15, %v8520_v32, %v17642_v31  ;;  %v1483_v29 = vmax.f32 %v17635_v33, 0.0  ;;  %v4414_v26 = vcombine.low %v17622_v39, %v17639_v40  ;;  %v17668_v56 = vld.sshfl [vmem:[#allocation2 + $0x80] sm:$0x33 pattern:$0x76325410] }
 0x2ec   : > { %v8501_v43 = vsel %vm16733_vm15, %v8496_v0, %v8500_v6  ;;  %v3494_v7 = vsel %vm16879_vm9, %v3486_v47, %v3493_v10  ;;  %v3697_v48 = vsel %vm16889_vm10, %v3485_v61, %v3696_v35  ;;  %v8690_v5 = vcombine.low %v8515_v51, %v8525_v49  ;;  %v20764_v47 = vld [vmem:[#allocation12_spill] sm:$0xff] }
 0x2ed   : > { %v8689_v8 = vcombine.low %v8491_v34, %v8501_v43  ;;  %3698 = vst [vmem:[#allocation2 + $0x8] sm:$0xf] %v3697_v48  ;;  %v3700_v60 = vsel %vm16907_vm5, %v3494_v7, %v3699_v13  ;;  %v2898_v44 = vrot.slane %v1525_v55, %v16483_v11  ;;  %v2905_v57 = vrot.slane %v14782_v42, %v16483_v11  ;;  %v1257_v34 = vpop.permute.xlu0 %1256  ;;  %v20763_v13 = vld [vmem:[#allocation29_spill] sm:$0xff] }
 0x2ee   : > { %v4421_v58 = vrot.slane %v4413_v2, %v16483_v11  ;;  %3701 = vst [vmem:[#allocation2 + $0xc] sm:$0x7] %v3700_v60  ;;  %v8704_v32 = vrot.slane %v8690_v5, %v16483_v11  ;;  %v4428_v45 = vrot.slane %v4414_v26, %v16483_v11  ;;  %v1572_v36 = vsel %vm16261_vm6, 0, %v1571_v62 }
 0x2ef   : > { %v8697_v59 = vrot.slane %v8689_v8, %v16483_v11  ;;  %v2906_v51 = vcombine.high %v2898_v44, %v2898_v44  ;;  %v2907_v10 = vcombine.high %v2905_v57, %v2905_v57  ;;  %v3072_v6 = vrot.slane %v2898_v44, %v16483_v11  ;;  %1573 = vst [vmem:[#allocation2 + $0x20] sm:$0x1] %v1572_v36  ;;  %v14823_v2 = vld.sshfl [vmem:[#allocation2 + $0x84] sm:$0x3 pattern:$0x76325410] }
 0x2f0   : > { %v4429_v25 = vcombine.low %v4421_v58, %v4428_v45  ;;  %v13637_v0 = vcombine.low %v17374_v30, %v17538_v23  ;;  %v1335_v61 = vmax.f32 %v20763_v13, %v1251_v53  ;;  %v1338_v55 = vmax.f32 %v20764_v47, %v1257_v34  ;;  %v14821_v42 = vld.sshfl [vmem:[#allocation2 + $0x7c] sm:$0x3 pattern:$0x76325410] }
 0x2f1   : > { %v8705_v17 = vcombine.low %v8697_v59, %v8704_v32  ;;  %v3073_v28 = vcombine.low %v2906_v51, %v2905_v57  ;;  %v3087_v35 = vrot.slane %v2907_v10, %v16483_v11  ;;  %3134 = vst.msk [vmem:[#allocation2 + $0xc4] sm:$0x3] %vm2087_vm7, %v3072_v6  ;;  %v17682_v43 = vcombine.high %v17668_v56, %v17668_v56 }
 0x2f2   : > { %4551 = vrot.lane.b32.xlu1 %v4429_v25, %s15740_s30  ;;  %v1715_v49 = vsel %vm16144_vm3, 0, %v1714_v52  ;;  %v13645_v23 = vrot.slane %v13637_v0, %v16483_v11  ;;  %v4430_v26 = vcombine.low %v14821_v42, %v17668_v56  ;;  %v1414_v7 = vadd.f32 %v17415_v9, %v1335_v61 }
 0x2f3   : > { %8737 = vrot.lane.b32.xlu0 %v8705_v17, %s15738_s27  ;;  %v3080_v30 = vrot.slane %v3073_v28, %v16483_v11  ;;  %3136 = vst.msk [vmem:[#allocation2 + $0xcc] sm:$0x3] %vm2087_vm7, %v3087_v35  ;;  %1716 = vst [vmem:[#allocation2 + $0x194] sm:$0x4] %v1715_v49  ;;  %v17692_v48 = vadd.f32 %v17415_v9, %v1338_v55  ;;  %v4431_v8 = vcombine.low %v17682_v43, %v14823_v2  ;;  %vm4576_vm7 = vcmask 523520  }
 0x2f4   : > { %v8145_v5 = vcombine.high %v17625_v14, %v17625_v14  ;;  %v4438_v60 = vrot.slane %v4430_v26, %v16483_v11  ;;  %v8526_v44 = vshrl.u32 %v17625_v14, 16  ;;  %v8537_v57 = vshrl.u32 %v17472_v12, 16 }
 0x2f5   : > { %3135 = vst.msk [vmem:[#allocation2 + $0xc8] sm:$0xf] %vm1535_vm8, %v3080_v30  ;;  %v1486_v58 = vmax.f32 %v1414_v7, 0.0  ;;  %v1489_v62 = vmax.f32 %v17692_v48, 0.0  ;;  %v4445_v59 = vrot.slane %v4431_v8, %v16483_v11  ;;  %v8540_v51 = vshll.u32 %v17472_v12, 16 }
 0x2f6   : > { %v8532_v32 = vshll.u32 %v8145_v5, 16  ;;  %v8528_v45 = vrot.slane %v8526_v44, 6  ;;  %v8539_v52 = vrot.slane %v8537_v57, 6  ;;  %v13638_v10 = vcombine.low %v17546_v50, %v17574_v19 }
 0x2f7   : > { %v1528_v6 = vpack.c.bf16 %v1486_v58, %v1485_v27  ;;  %v14785_v53 = vpack.c.bf16 %v1486_v58, %v1486_v58  ;;  %v4446_v14 = vcombine.low %v4438_v60, %v4445_v59  ;;  %v8542_v25 = vrot.slane %v8540_v51, 7 }
 0x2f8   : > { %v8529_v34 = vor.u32 %v8528_v45, %v17642_v31  ;;  %v8534_v17 = vrot.slane %v8532_v32, 7  ;;  %v8546_v36 = vshll.u32 %v17491_v1, 16  ;;  %v13652_v28 = vrot.slane %v13638_v10, %v16483_v11  ;;  %v1565_v45 = vld [vmem:[#allocation2 + $0x10] sm:$0x1] }
 0x2f9   : > { %v3187_v35 = vrot.slane %v1528_v6, %v16483_v11  ;;  %v3194_v12 = vrot.slane %v14785_v53, %v16483_v11  ;;  %4553 = vrot.lane.b32.xlu1 %v4446_v14, %s15740_s30  ;;  %v8543_v0 = vor.u32 %v8542_v25, %v8539_v52  ;;  %v8552_v49 = vrot.slane %v8550_v46, 6  ;;  %v1568_v53 = vld [vmem:[#allocation2 + $0x18] sm:$0x1] }
 0x2fa   : > { %v14983_v50 = vld.sshfl [vmem:[#allocation2 + $0x194] sm:$0x13 pattern:$0x76325410]  ;;  %v8530_v27 = vrot.slane %v8529_v34, 2  ;;  %v8548_v2 = vrot.slane %v8546_v36, 7  ;;  %v13653_v31 = vcombine.low %v13645_v23, %v13652_v28  ;;  %v1247_v36 = vpop.permute.xlu1 %1246  ;;  %v1253_v28 = vpop.permute.xlu0 %1252 }
 0x2fb   : > { %v8161_v19 = vcombine.high %v14983_v50, %v14983_v50  ;;  %v3195_v13 = vcombine.high %v3187_v35, %v3187_v35  ;;  %v3196_v61 = vcombine.high %v3194_v12, %v3194_v12  ;;  %v3343_v47 = vrot.slane %v3187_v35, %v16483_v11 }
 0x2fc   : > { %v8535_v55 = vsel %vm16733_vm15, %v8530_v27, %v8534_v17  ;;  %v8544_v42 = vrot.slane %v8543_v0, 2  ;;  %v8556_v30 = vshll.u32 %v14983_v50, 16  ;;  %13715 = vrot.lane.b32.xlu0 %v13653_v31, %s15738_s27  ;;  %v8553_v5 = vor.u32 %v8552_v49, %v8548_v2  ;;  %v14865_v27 = vld.sshfl [vmem:[#allocation2 + $0x6c] sm:$0x13 pattern:$0x76325410] }
 0x2fd   : > { %v3344_v26 = vcombine.low %v3195_v13, %v3194_v12  ;;  %v3358_v1 = vrot.slane %v3196_v61, %v16483_v11  ;;  %v3520_v7 = vshrl.u32 %v3343_v47, 16  ;;  %v3523_v8 = vshll.u32 %v3343_v47, 16  ;;  %v3714_v13 = vld [vmem:[#allocation2 + $0x20] sm:$0xf]  ;;  %v20765_v47 = vld [vmem:[#allocation13_spill] sm:$0xff] }
 0x2fe   : > { %v8549_v23 = vsel %vm16733_vm15, %v8544_v42, %v8548_v2  ;;  %v8558_v60 = vrot.slane %v8556_v30, 7  ;;  %v8560_v44 = vshrl.u32 %v14983_v50, 16  ;;  %v8554_v52 = vrot.slane %v8553_v5, 2  ;;  %v20766_v42 = vld [vmem:[#allocation14_spill] sm:$0xff] }
 0x2ff   : > { %v3351_v57 = vrot.slane %v3344_v26, %v16483_v11  ;;  %v3522_v58 = vrot.slane %v3520_v7, 7  ;;  %v3536_v59 = vshrl.u32 %v3358_v1, 16  ;;  %v3539_v32 = vshll.u32 %v3358_v1, 16  ;;  %v3717_v26 = vld [vmem:[#allocation2 + $0x24] sm:$0x7] }
 0x300   : > { %v8562_v51 = vrot.slane %v8560_v44, 6  ;;  %v8566_v10 = vshll.u32 %v8161_v19, 16  ;;  %v8706_v6 = vcombine.low %v8535_v55, %v8549_v23  ;;  %v8559_v35 = vsel %vm16733_vm15, %v8554_v52, %v8558_v60  ;;  %v17747_v52 = vld.sshfl [vmem:[#allocation2 + $0xd0] sm:$0x33 pattern:$0x76325410] }
 0x301   : > { %v17723_v14 = vor.u32 %v3523_v8, %v3522_v58  ;;  %v3528_v34 = vshrl.u32 %v3351_v57, 16  ;;  %v3531_v17 = vshll.u32 %v3351_v57, 16  ;;  %v3538_v25 = vrot.slane %v3536_v59, 7 }
 0x302   : > { %v8563_v12 = vor.u32 %v8562_v51, %v8558_v60  ;;  %v8568_v50 = vrot.slane %v8566_v10, 7  ;;  %v8714_v46 = vrot.slane %v8706_v6, %v16483_v11  ;;  %v1566_v19 = vsel %vm16261_vm6, 0, %v1565_v45 }
 0x303   : > { %v3530_v0 = vrot.slane %v3528_v34, 7  ;;  %v3541_v2 = vor.u32 %v3539_v32, %v3538_v25  ;;  %v1569_v31 = vsel %vm16261_vm6, 0, %v1568_v53  ;;  %1567 = vst [vmem:[#allocation2 + $0x10] sm:$0x1] %v1566_v19  ;;  %v1333_v55 = vmax.f32 %v20765_v47, %v1247_v36 }
 0x304   : > { %v8564_v61 = vrot.slane %v8563_v12, 2  ;;  %1570 = vst [vmem:[#allocation2 + $0x18] sm:$0x1] %v1569_v31  ;;  %v1336_v49 = vmax.f32 %v20766_v42, %v1253_v28  ;;  %v5494_v30 = vcombine.high %v14865_v27, %v14865_v27  ;;  %v5672_v8 = vshrl.u32 %v17598_v20, 16 }
 0x305   : > { %v3533_v1 = vor.u32 %v3531_v17, %v3530_v0  ;;  %v3534_v7 = vrot.slane %v3530_v0, 4  ;;  %v5675_v23 = vshll.u32 %v17598_v20, 16  ;;  %v1412_v60 = vadd.f32 %v17415_v9, %v1333_v55 }
 0x306   : > { %v8569_v5 = vsel %vm16733_vm15, %v8564_v61, %v8568_v50  ;;  %v17740_v44 = vadd.f32 %v17415_v9, %v1336_v49  ;;  %v5681_v57 = vshll.u32 %v17616_v22, 16  ;;  %v5674_v45 = vrot.slane %v5672_v8, 6  ;;  %v17770_v49 = vld.sshfl [vmem:[#allocation2 + $0xd4] sm:$0x13 pattern:$0x76325410] }
 0x307   : > { %v3542_v58 = vsel %vm16879_vm9, %v3534_v7, %v3541_v2  ;;  %v3715_v59 = vsel %vm16889_vm10, %v3533_v1, %v3714_v13  ;;  %v8707_v32 = vcombine.low %v8559_v35, %v8569_v5  ;;  %v1484_v51 = vmax.f32 %v1412_v60, 0.0 }
 0x308   : > { %3716 = vst [vmem:[#allocation2 + $0x20] sm:$0xf] %v3715_v59  ;;  %v3718_v20 = vsel %vm16907_vm5, %v3542_v58, %v3717_v26  ;;  %v1487_v9 = vmax.f32 %v17740_v44, 0.0  ;;  %v5677_v10 = vrot.slane %v5675_v23, 7  ;;  %v5683_v53 = vrot.slane %v5681_v57, 7 }
 0x309   : > { %3719 = vst [vmem:[#allocation2 + $0x24] sm:$0x7] %v3718_v20  ;;  %v8721_v6 = vrot.slane %v8707_v32, %v16483_v11  ;;  %v5685_v34 = vshrl.u32 %v17616_v22, 16  ;;  %v5691_v17 = vshll.u32 %v14865_v27, 16  ;;  %v1527_v25 = vpack.c.bf16 %v1484_v51, %v1483_v29 }
 0x30a   : > { %v14784_v36 = vpack.c.bf16 %v1484_v51, %v1484_v51  ;;  %v5678_v28 = vor.u32 %v5677_v10, %v5674_v45  ;;  %v5695_v35 = vshrl.u32 %v14865_v27, 16  ;;  %v17758_v2 = vcombine.high %v17747_v52, %v17747_v52  ;;  %v17777_v57 = vld.sshfl [vmem:[#allocation2 + $0xd8] sm:$0x33 pattern:$0x76325410] }
 0x30b   : > { %v8722_v12 = vcombine.low %v8714_v46, %v8721_v6  ;;  %v5687_v50 = vrot.slane %v5685_v34, 6  ;;  %v5693_v0 = vrot.slane %v5691_v17, 7  ;;  %v3170_v19 = vrot.slane %v1527_v25, %v16483_v11 }
 0x30c   : > { %v3177_v31 = vrot.slane %v14784_v36, %v16483_v11  ;;  %v5679_v13 = vrot.slane %v5678_v28, 2  ;;  %v5697_v22 = vrot.slane %v5695_v35, 6  ;;  %v5701_v29 = vshll.u32 %v5494_v30, 16  ;;  %v3702_v28 = vld [vmem:[#allocation2 + $0x10] sm:$0xf] }
 0x30d   : > { %8739 = vrot.lane.b32.xlu0 %v8722_v12, %s15738_s27  ;;  %v5688_v33 = vor.u32 %v5687_v50, %v5683_v53  ;;  %v5706_v61 = vshrl.u32 %v17588_v37, 16  ;;  %v5709_v46 = vshll.u32 %v17588_v37, 16  ;;  %v3178_v27 = vcombine.high %v3170_v19, %v3170_v19 }
 0x30e   : > { %v3179_v47 = vcombine.high %v3177_v31, %v3177_v31  ;;  %v3314_v55 = vcombine.low %v3162_v63, %v3170_v19  ;;  %v5684_v42 = vsel %vm16733_vm15, %v5679_v13, %v5683_v53  ;;  %v5698_v1 = vor.u32 %v5697_v22, %v5693_v0  ;;  %v3705_v19 = vld [vmem:[#allocation2 + $0x14] sm:$0x7] }
 0x30f   : > { %v5689_v26 = vrot.slane %v5688_v33, 2  ;;  %v5703_v7 = vrot.slane %v5701_v29, 7  ;;  %v5708_v8 = vrot.slane %v5706_v61, 6  ;;  %v3328_v23 = vrot.slane %v3178_v27, %v16483_v11  ;;  %v3708_v29 = vld [vmem:[#allocation2 + $0x18] sm:$0xf] }
 0x310   : > { %v3321_v30 = vrot.slane %v3314_v55, %v16483_v11  ;;  %v3329_v37 = vcombine.low %v3177_v31, %v3179_v47  ;;  %v5711_v5 = vrot.slane %v5709_v46, 7  ;;  %v5699_v21 = vrot.slane %v5698_v1, 2  ;;  %v3711_v55 = vld [vmem:[#allocation2 + $0x1c] sm:$0x7] }
 0x311   : > { %v5694_v60 = vsel %vm16733_vm15, %v5689_v26, %v5693_v0  ;;  %v5715_v63 = vshll.u32 %v17605_v41, 16  ;;  %v7148_v58 = vcombine.high %v17770_v49, %v17770_v49  ;;  %v3504_v20 = vshrl.u32 %v3328_v23, 16 }
 0x312   : > { %v3336_v59 = vrot.slane %v3329_v37, %v16483_v11  ;;  %v3496_v32 = vshrl.u32 %v3321_v30, 16  ;;  %v3499_v45 = vshll.u32 %v3321_v30, 16  ;;  %v3507_v51 = vshll.u32 %v3328_v23, 16 }
 0x313   : > { %v5704_v10 = vsel %vm16733_vm15, %v5699_v21, %v5703_v7  ;;  %v5712_v6 = vor.u32 %v5711_v5, %v5708_v8  ;;  %v17784_v53 = vrot.slane %v5715_v63, 7  ;;  %v3506_v17 = vrot.slane %v3504_v20, 7 }
 0x314   : > { %v3498_v34 = vrot.slane %v3496_v32, 7  ;;  %v3512_v25 = vshrl.u32 %v3336_v59, 16  ;;  %v3515_v36 = vshll.u32 %v3336_v59, 16  ;;  %v6079_v12 = vcombine.low %v5684_v42, %v5694_v60 }
 0x315   : > { %v5713_v35 = vrot.slane %v5712_v6, 2  ;;  %v17788_v50 = vcombine.high %v17777_v57, %v17777_v57  ;;  %v7326_v0 = vshrl.u32 %v17747_v52, 16  ;;  %v3509_v22 = vor.u32 %v3507_v51, %v3506_v17  ;;  %v1580_v6 = vld [vmem:[#allocation2 + $0x38] sm:$0x1] }
 0x316   : > { %v3501_v31 = vor.u32 %v3499_v45, %v3498_v34  ;;  %v3502_v13 = vrot.slane %v3498_v34, 4  ;;  %v3514_v33 = vrot.slane %v3512_v25, 7  ;;  %v6087_v46 = vrot.slane %v6079_v12, %v16483_v11  ;;  %v14824_v34 = vld.sshfl [vmem:[#allocation2 + $0x88] sm:$0x33 pattern:$0x76325410]  ;;  %v1259_v12 = vpop.permute.xlu1 %1258 }
 0x317   : > { %v5718_v61 = vsel %vm16733_vm15, %v5713_v35, %v17784_v53  ;;  %v7328_v27 = vrot.slane %v7326_v0, 6  ;;  %v7329_v47 = vshll.u32 %v17747_v52, 16  ;;  %v7335_v37 = vshll.u32 %v17758_v2, 16 }
 0x318   : > { %v3510_v42 = vsel %vm16879_vm9, %v3502_v13, %v3509_v22  ;;  %v3517_v26 = vor.u32 %v3515_v36, %v3514_v33  ;;  %v3518_v1 = vrot.slane %v3514_v33, 4  ;;  %v3703_v7 = vsel %vm16889_vm10, %v3501_v31, %v3702_v28  ;;  %v14825_v17 = vld.sshfl [vmem:[#allocation2 + $0x8c] sm:$0x3 pattern:$0x76325410]  ;;  %v1265_v33 = vpop.permute.xlu0 %1264 }
 0x319   : > { %3704 = vst [vmem:[#allocation2 + $0x10] sm:$0xf] %v3703_v7  ;;  %v3706_v8 = vsel %vm16907_vm5, %v3510_v42, %v3705_v19  ;;  %v6080_v30 = vcombine.low %v5704_v10, %v5718_v61  ;;  %v7331_v23 = vrot.slane %v7329_v47, 7  ;;  %v7339_v60 = vshrl.u32 %v17758_v2, 16  ;;  %v20768_v7 = vld [vmem:[#allocation33_spill] sm:$0xff] }
 0x31a   : > { %v3526_v52 = vsel %vm16879_vm9, %v3518_v1, %v17723_v14  ;;  %3707 = vst [vmem:[#allocation2 + $0x14] sm:$0x7] %v3706_v8  ;;  %v3709_v5 = vsel %vm16889_vm10, %v3517_v26, %v3708_v29  ;;  %v7345_v21 = vshll.u32 %v17770_v49, 16  ;;  %v7337_v45 = vrot.slane %v7335_v37, 7 }
 0x31b   : > { %3710 = vst [vmem:[#allocation2 + $0x18] sm:$0xf] %v3709_v5  ;;  %v3712_v63 = vsel %vm16907_vm5, %v3526_v52, %v3711_v55  ;;  %v6094_v59 = vrot.slane %v6080_v30, %v16483_v11  ;;  %v7332_v32 = vor.u32 %v7331_v23, %v7328_v27  ;;  %v7341_v20 = vrot.slane %v7339_v60, 6  ;;  %v20767_v55 = vld [vmem:[#allocation15_spill] sm:$0xff]  ;;  %v17834_v60 = vld [vmem:[%s20530_s2] ss:$0 sm:$0xff] }
 0x31c   : > { %3713 = vst [vmem:[#allocation2 + $0x1c] sm:$0x7] %v3712_v63  ;;  %v7347_v51 = vrot.slane %v7345_v21, 7  ;;  %v7349_v14 = vshrl.u32 %v17770_v49, 16  ;;  %v7355_v10 = vshll.u32 %v7148_v58, 16  ;;  %v7360_v28 = vshrl.u32 %v17777_v57, 16 }
 0x31d   : > { %v6095_v25 = vcombine.low %v6087_v46, %v6094_v59  ;;  %v7333_v36 = vrot.slane %v7332_v32, 2  ;;  %v7363_v35 = vshll.u32 %v17777_v57, 16  ;;  %v14941_v0 = vld.sshfl [vmem:[#allocation2 + $0xe4] sm:$0x13 pattern:$0x76325410]  ;;  %v7342_v19 = vor.u32 %v7341_v20, %v7337_v45 }
 0x31e   : > { %v7351_v31 = vrot.slane %v7349_v14, 6  ;;  %v7357_v13 = vrot.slane %v7355_v10, 7  ;;  %v7369_v22 = vshll.u32 %v17788_v50, 16  ;;  %v7362_v58 = vrot.slane %v7360_v28, 6 }
 0x31f   : > { %6232 = vrot.lane.b32.xlu1 %v6095_v25, %s15738_s27  ;;  %v7338_v49 = vsel %vm16733_vm15, %v7333_v36, %v7337_v45  ;;  %v7365_v29 = vrot.slane %v7363_v35, 7  ;;  %v1581_v61 = vsel %vm16261_vm6, 0, %v1580_v6  ;;  %v7343_v46 = vrot.slane %v7342_v19, 2 }
 0x320   : > { %v7352_v27 = vor.u32 %v7351_v31, %v7347_v51  ;;  %v17822_v47 = vrot.slane %v7369_v22, 7  ;;  %1582 = vst [vmem:[#allocation2 + $0x38] sm:$0x1] %v1581_v61  ;;  %v1339_v42 = vmax.f32 %v20767_v55, %v1259_v12  ;;  %v1342_v8 = vmax.f32 %v20768_v7, %v1265_v33 }
 0x321   : > { %v17825_v26 = vld.sshfl [vmem:[#allocation2 + $0x90] sm:$0x33 pattern:$0x76325410]  ;;  %v7366_v1 = vor.u32 %v7365_v29, %v7362_v58  ;;  %v4283_v30 = vcombine.high %v14824_v34, %v14824_v34  ;;  %v7348_v52 = vsel %vm16733_vm15, %v7343_v46, %v7347_v51  ;;  %v7180_v63 = vcombine.high %v14941_v0, %v14941_v0 }
 0x322   : > { %v4448_v23 = vcombine.low %v14825_v17, %v17825_v26  ;;  %v14942_v37 = vld.sshfl [vmem:[#allocation2 + $0xe8] sm:$0x33 pattern:$0x76325410]  ;;  %v7353_v5 = vrot.slane %v7352_v27, 2  ;;  %v1418_v21 = vadd.f32 %v17834_v60, %v1339_v42  ;;  %v7733_v32 = vcombine.low %v7338_v49, %v7348_v52 }
 0x323   : > { %v7367_v59 = vrot.slane %v7366_v1, 2  ;;  %v17838_v45 = vadd.f32 %v17834_v60, %v1342_v8  ;;  %v4447_v20 = vcombine.low %v14824_v34, %v4283_v30  ;;  %v14943_v14 = vld.sshfl [vmem:[#allocation2 + $0xec] sm:$0x13 pattern:$0x76325410]  ;;  %v7188_v17 = vcombine.high %v14942_v37, %v14942_v37 }
 0x324   : > { %v7358_v10 = vsel %vm16733_vm15, %v7353_v5, %v7357_v13  ;;  %v1490_v51 = vmax.f32 %v1418_v21, 0.0  ;;  %v4462_v6 = vrot.slane %v4448_v23, %v16483_v11  ;;  %v7741_v36 = vrot.slane %v7733_v32, %v16483_v11 }
 0x325   : > { %v7372_v25 = vsel %vm16733_vm15, %v7367_v59, %v17822_v47  ;;  %v1493_v28 = vmax.f32 %v17838_v45, 0.0  ;;  %v4455_v35 = vrot.slane %v4447_v20, %v16483_v11  ;;  %v7196_v31 = vcombine.high %v14943_v14, %v14943_v14 }
 0x326   : > { %v7734_v12 = vcombine.low %v7358_v10, %v7372_v25  ;;  %v1530_v34 = vpack.c.bf16 %v1490_v51, %v1489_v62  ;;  %v14787_v19 = vpack.c.bf16 %v1490_v51, %v1490_v51  ;;  %v7413_v22 = vshll.u32 %v14941_v0, 16 }
 0x327   : > { %v4463_v13 = vcombine.low %v4455_v35, %v4462_v6  ;;  %v7417_v33 = vshrl.u32 %v14941_v0, 16  ;;  %v7423_v49 = vshll.u32 %v7180_v63, 16  ;;  %v7428_v46 = vshrl.u32 %v14942_v37, 16  ;;  %v1574_v35 = vld [vmem:[#allocation2 + $0x28] sm:$0x1] }
 0x328   : > { %v7748_v58 = vrot.slane %v7734_v12, %v16483_v11  ;;  %v17853_v29 = vrot.slane %v1530_v34, %v16483_v11  ;;  %v3228_v61 = vrot.slane %v14787_v19, %v16483_v11  ;;  %v17857_v27 = vrot.slane %v7413_v22, 7 }
 0x329   : > { %4555 = vrot.lane.b32.xlu1 %v4463_v13, %s15740_s30  ;;  %v7419_v48 = vrot.slane %v7417_v33, 6  ;;  %v7425_v62 = vrot.slane %v7423_v49, 7  ;;  %v7431_v55 = vshll.u32 %v14942_v37, 16  ;;  %v7430_v7 = vrot.slane %v7428_v46, 6  ;;  %v1577_v49 = vld [vmem:[#allocation2 + $0x30] sm:$0x1] }
 0x32a   : > { %v7749_v42 = vcombine.low %v7741_v36, %v7748_v58  ;;  %v3229_v0 = vcombine.high %v17853_v29, %v17853_v29  ;;  %v3230_v1 = vcombine.high %v3228_v61, %v3228_v61  ;;  %v7437_v23 = vshll.u32 %v7188_v17, 16  ;;  %v1255_v58 = vpop.permute.xlu1 %1254 }
 0x32b   : > { %v7420_v8 = vor.u32 %v7419_v48, %v17857_v27  ;;  %v7433_v30 = vrot.slane %v7431_v55, 7  ;;  %v7441_v52 = vshrl.u32 %v7188_v17, 16  ;;  %v7447_v63 = vshll.u32 %v14943_v14, 16 }
 0x32c   : > { %7886 = vrot.lane.b32.xlu0 %v7749_v42, %s15737_s26  ;;  %v3388_v5 = vrot.slane %v3229_v0, %v16483_v11  ;;  %v3389_v21 = vcombine.low %v3228_v61, %v3230_v1  ;;  %v7451_v59 = vshrl.u32 %v14943_v14, 16  ;;  %v7439_v20 = vrot.slane %v7437_v23, 7  ;;  %v1261_v42 = vpop.permute.xlu0 %1260 }
 0x32d   : > { %v7421_v32 = vrot.slane %v7420_v8, 2  ;;  %v7434_v37 = vor.u32 %v7433_v30, %v7430_v7  ;;  %v7443_v10 = vrot.slane %v7441_v52, 6  ;;  %v7449_v36 = vrot.slane %v7447_v63, 7  ;;  %v1644_v8 = vld [vmem:[#allocation2 + $0x74] sm:$0x4] }
 0x32e   : > { %v3396_v51 = vrot.slane %v3389_v21, %v16483_v11  ;;  %v3568_v6 = vshrl.u32 %v3388_v5, 16  ;;  %v3571_v25 = vshll.u32 %v3388_v5, 16  ;;  %v7453_v19 = vrot.slane %v7451_v59, 6  ;;  %v3732_v30 = vld [vmem:[#allocation2 + $0x38] sm:$0xf]  ;;  %v20769_v21 = vld [vmem:[#allocation16_spill] sm:$0xff]  ;;  %v17916_v44 = vpop.permute.xlu1 %1266 }
 0x32f   : > { %v7426_v17 = vsel %vm16733_vm15, %v7421_v32, %v7425_v62  ;;  %v7435_v12 = vrot.slane %v7434_v37, 2  ;;  %v7444_v34 = vor.u32 %v7443_v10, %v7439_v20  ;;  %v7457_v14 = vshll.u32 %v7196_v31, 16  ;;  %v1647_v31 = vld [vmem:[#allocation2 + $0x7c] sm:$0x4] }
 0x330   : > { %v3570_v13 = vrot.slane %v3568_v6, 7  ;;  %v3576_v22 = vshrl.u32 %v3396_v51, 16  ;;  %v3579_v33 = vshll.u32 %v3396_v51, 16  ;;  %v7454_v48 = vor.u32 %v7453_v19, %v7449_v36 }
 0x331   : > { %v7440_v61 = vsel %vm16733_vm15, %v7435_v12, %v7439_v20  ;;  %v7445_v46 = vrot.slane %v7444_v34, 2  ;;  %v1575_v55 = vsel %vm16261_vm6, 0, %v1574_v35  ;;  %v7459_v1 = vrot.slane %v7457_v14, 7  ;;  %v20770_v20 = vld [vmem:[#allocation18_spill] sm:$0xff] }
 0x332   : > { %v17871_v0 = vor.u32 %v3571_v25, %v3570_v13  ;;  %v17873_v62 = vrot.slane %v3576_v22, 7  ;;  %v7767_v7 = vcombine.low %v7426_v17, %v7440_v61  ;;  %1576 = vst [vmem:[#allocation2 + $0x28] sm:$0x1] %v1575_v55  ;;  %v7455_v52 = vrot.slane %v7454_v48, 2 }
 0x333   : > { %v7450_v23 = vsel %vm16733_vm15, %v7445_v46, %v7449_v36  ;;  %v1578_v5 = vsel %vm16261_vm6, 0, %v1577_v49  ;;  %v1337_v63 = vmax.f32 %v20769_v21, %v1255_v58  ;;  %v1340_v10 = vmax.f32 %v20770_v20, %v1261_v42  ;;  %v17897_v19 = vld.sshfl [vmem:[#allocation2 + $0xdc] sm:$0x13 pattern:$0x76325410] }
 0x334   : > { %v3581_v59 = vor.u32 %v3579_v33, %v17873_v62  ;;  %v3582_v32 = vrot.slane %v17873_v62, 4  ;;  %v7775_v37 = vrot.slane %v7767_v7, %v16483_v11  ;;  %1579 = vst [vmem:[#allocation2 + $0x30] sm:$0x1] %v1578_v5  ;;  %v7460_v51 = vsel %vm16733_vm15, %v7455_v52, %v7459_v1 }
 0x335   : > { %v1416_v6 = vadd.f32 %v17834_v60, %v1337_v63  ;;  %v1645_v25 = vsel %vm16144_vm3, 0, %v1644_v8  ;;  %v1648_v36 = vsel %vm16144_vm3, 0, %v1647_v31  ;;  %v7768_v17 = vcombine.low %v7450_v23, %v7460_v51  ;;  %v17907_v1 = vld.sshfl [vmem:[#allocation2 + $0xe0] sm:$0x33 pattern:$0x76325410] }
 0x336   : > { %v3733_v35 = vsel %vm16889_vm10, %v3581_v59, %v3732_v30  ;;  %v17894_v12 = vadd.f32 %v17834_v60, %v1340_v10  ;;  %1646 = vst [vmem:[#allocation2 + $0x74] sm:$0x4] %v1645_v25  ;;  %1649 = vst [vmem:[#allocation2 + $0x7c] sm:$0x4] %v1648_v36  ;;  %v5719_v34 = vshrl.u32 %v17605_v41, 16  ;;  %v5740_v22 = vshrl.u32 %v17622_v39, 16 }
 0x337   : > { %3734 = vst [vmem:[#allocation2 + $0x38] sm:$0xf] %v3733_v35  ;;  %v1488_v13 = vmax.f32 %v1416_v6, 0.0  ;;  %v5743_v33 = vshll.u32 %v17622_v39, 16  ;;  %v5749_v14 = vshll.u32 %v17639_v40, 16  ;;  %v7782_v49 = vrot.slane %v7768_v17, %v16483_v11  ;;  %v20771_v36 = vld [vmem:[#allocation19_spill] sm:$0xff] }
 0x338   : > { %v1491_v58 = vmax.f32 %v17894_v12, 0.0  ;;  %v5721_v61 = vrot.slane %v5719_v34, 6  ;;  %v5753_v46 = vshrl.u32 %v17639_v40, 16  ;;  %v5742_v55 = vrot.slane %v5740_v22, 6 }
 0x339   : > { %v1529_v41 = vpack.c.bf16 %v1488_v13, %v1487_v9  ;;  %v14786_v48 = vpack.c.bf16 %v1488_v13, %v1488_v13  ;;  %v5745_v42 = vrot.slane %v5743_v33, 7  ;;  %v7783_v7 = vcombine.low %v7775_v37, %v7782_v49 }
 0x33a   : > { %v5722_v39 = vor.u32 %v5721_v61, %v17784_v53  ;;  %v17910_v8 = vrot.slane %v5749_v14, 7  ;;  %v5755_v31 = vrot.slane %v5753_v46, 6  ;;  %v7164_v40 = vcombine.high %v17897_v19, %v17897_v19 }
 0x33b   : > { %v3204_v30 = vrot.slane %v1529_v41, %v16483_v11  ;;  %v3211_v23 = vrot.slane %v14786_v48, %v16483_v11  ;;  %v5746_v52 = vor.u32 %v5745_v42, %v5742_v55  ;;  %7890 = vrot.lane.b32.xlu0 %v7783_v7, %s15737_s26  ;;  %v17922_v53 = vcombine.high %v17907_v1, %v17907_v1 }
 0x33c   : > { %v5723_v9 = vrot.slane %v5722_v39, 2  ;;  %v5756_v5 = vor.u32 %v5755_v31, %v17910_v8  ;;  %v7373_v21 = vshrl.u32 %v17788_v50, 16  ;;  %v1343_v35 = vmax.f32 %v20771_v36, %v17916_v44 }
 0x33d   : > { %v3212_v63 = vcombine.high %v3204_v30, %v3204_v30  ;;  %v3213_v59 = vcombine.high %v3211_v23, %v3211_v23  ;;  %v3373_v37 = vrot.slane %v3211_v23, %v16483_v11  ;;  %v14867_v20 = vld.sshfl [vmem:[#allocation2 + $0x74] sm:$0x13 pattern:$0x76325410]  ;;  %v5747_v10 = vrot.slane %v5746_v52, 2 }
 0x33e   : > { %v5510_v51 = vcombine.high %v14867_v20, %v14867_v20  ;;  %v5725_v6 = vshll.u32 %v14867_v20, 16  ;;  %v5729_v25 = vshrl.u32 %v14867_v20, 16  ;;  %v17929_v33 = vld.sshfl [vmem:[#allocation2 + $0x7c] sm:$0x13 pattern:$0x76325410] }
 0x33f   : > { %v3359_v17 = vcombine.low %v3204_v30, %v3212_v63  ;;  %v3374_v34 = vcombine.low %v3213_v59, %v17853_v29  ;;  %v3552_v13 = vshrl.u32 %v3373_v37, 16  ;;  %v3555_v22 = vshll.u32 %v3373_v37, 16 }
 0x340   : > { %v5727_v50 = vrot.slane %v5725_v6, 7  ;;  %v5731_v14 = vrot.slane %v5729_v25, 6  ;;  %v5735_v49 = vshll.u32 %v5510_v51, 16  ;;  %v5752_v61 = vsel %vm16733_vm15, %v5747_v10, %v17910_v8  ;;  %v3726_v6 = vld [vmem:[#allocation2 + $0x30] sm:$0xf] }
 0x341   : > { %v3366_v46 = vrot.slane %v3359_v17, %v16483_v11  ;;  %v3381_v41 = vrot.slane %v3374_v34, %v16483_v11  ;;  %v3554_v48 = vrot.slane %v3552_v13, 7  ;;  %v5757_v55 = vrot.slane %v5756_v5, 2 }
 0x342   : > { %v5728_v29 = vsel %vm16733_vm15, %v5723_v9, %v5727_v50  ;;  %v5732_v42 = vor.u32 %v5731_v14, %v5727_v50  ;;  %v5737_v7 = vrot.slane %v5735_v49, 7  ;;  %v5759_v39 = vshll.u32 %v17929_v33, 16  ;;  %v3720_v9 = vld [vmem:[#allocation2 + $0x28] sm:$0xf] }
 0x343   : > { %v3544_v31 = vshrl.u32 %v3366_v46, 16  ;;  %v3547_v30 = vshll.u32 %v3366_v46, 16  ;;  %v3557_v23 = vor.u32 %v3555_v22, %v3554_v48  ;;  %v3560_v52 = vshrl.u32 %v3381_v41, 16  ;;  %v3723_v22 = vld [vmem:[#allocation2 + $0x2c] sm:$0x7] }
 0x344   : > { %v3563_v63 = vshll.u32 %v3381_v41, 16  ;;  %v5733_v59 = vrot.slane %v5732_v42, 2  ;;  %v17939_v8 = vrot.slane %v5759_v39, 7  ;;  %v7375_v37 = vrot.slane %v7373_v21, 6  ;;  %v3729_v21 = vld [vmem:[#allocation2 + $0x34] sm:$0x7] }
 0x345   : > { %v3546_v20 = vrot.slane %v3544_v31, 7  ;;  %v3562_v10 = vrot.slane %v3560_v52, 7  ;;  %v7379_v5 = vshll.u32 %v17897_v19, 16  ;;  %v7383_v51 = vshrl.u32 %v17897_v19, 16 }
 0x346   : > { %v5738_v25 = vsel %vm16733_vm15, %v5733_v59, %v5737_v7  ;;  %v5762_v17 = vsel %vm16733_vm15, %v5757_v55, %v17939_v8  ;;  %v7376_v34 = vor.u32 %v7375_v37, %v17822_v47  ;;  %v7389_v13 = vshll.u32 %v7164_v40, 16  ;;  %v1273_v59 = vpop.permute.xlu0 %1272 }
 0x347   : > { %v3549_v50 = vor.u32 %v3547_v30, %v3546_v20  ;;  %v3550_v14 = vrot.slane %v3546_v20, 4  ;;  %v3565_v49 = vor.u32 %v3563_v63, %v3562_v10  ;;  %v3566_v46 = vrot.slane %v3562_v10, 4  ;;  %v1586_v30 = vld [vmem:[#allocation2 + $0x48] sm:$0x1] }
 0x348   : > { %v6096_v41 = vcombine.low %v5728_v29, %v5738_v25  ;;  %v6097_v19 = vcombine.low %v5752_v61, %v5762_v17  ;;  %v7377_v48 = vrot.slane %v7376_v34, 2  ;;  %v7381_v42 = vrot.slane %v7379_v5, 7 }
 0x349   : > { %v3558_v7 = vsel %vm16879_vm9, %v3550_v14, %v3557_v23  ;;  %v3574_v55 = vsel %vm16879_vm9, %v3566_v46, %v17871_v0  ;;  %v3721_v47 = vsel %vm16889_vm10, %v3549_v50, %v3720_v9  ;;  %v3727_v40 = vsel %vm16889_vm10, %v3565_v49, %v3726_v6  ;;  %v1650_v9 = vld [vmem:[#allocation2 + $0x84] sm:$0x4] }
 0x34a   : > { %3722 = vst [vmem:[#allocation2 + $0x28] sm:$0xf] %v3721_v47  ;;  %v3724_v29 = vsel %vm16907_vm5, %v3558_v7, %v3723_v22  ;;  %3728 = vst [vmem:[#allocation2 + $0x30] sm:$0xf] %v3727_v40  ;;  %v3730_v61 = vsel %vm16907_vm5, %v3574_v55, %v3729_v21  ;;  %v6104_v39 = vrot.slane %v6096_v41, %v16483_v11  ;;  %v7385_v23 = vrot.slane %v7383_v51, 6  ;;  %v20772_v21 = vld [vmem:[#allocation22_spill] sm:$0xff] }
 0x34b   : > { %v6111_v31 = vrot.slane %v6097_v19, %v16483_v11  ;;  %3725 = vst [vmem:[#allocation2 + $0x2c] sm:$0x7] %v3724_v29  ;;  %3731 = vst [vmem:[#allocation2 + $0x34] sm:$0x7] %v3730_v61  ;;  %v7382_v0 = vsel %vm16733_vm15, %v7377_v48, %v7381_v42  ;;  %v7391_v52 = vrot.slane %v7389_v13, 7  ;;  %v7394_v63 = vshrl.u32 %v17907_v1, 16 }
 0x34c   : > { %v7397_v20 = vshll.u32 %v17907_v1, 16  ;;  %v7403_v10 = vshll.u32 %v17922_v53, 16  ;;  %v7407_v5 = vshrl.u32 %v17922_v53, 16  ;;  %v7386_v6 = vor.u32 %v7385_v23, %v7381_v42 }
 0x34d   : > { %v6112_v37 = vcombine.low %v6104_v39, %v6111_v31  ;;  %v7396_v25 = vrot.slane %v7394_v63, 6  ;;  %v1587_v17 = vsel %vm16261_vm6, 0, %v1586_v30  ;;  %v1422_v51 = vadd.f32 %v17834_v60, %v1343_v35 }
 0x34e   : > { %v7399_v34 = vrot.slane %v7397_v20, 7  ;;  %v7405_v13 = vrot.slane %v7403_v10, 7  ;;  %v7409_v22 = vrot.slane %v7407_v5, 6  ;;  %1588 = vst [vmem:[#allocation2 + $0x48] sm:$0x1] %v1587_v17  ;;  %v1346_v50 = vmax.f32 %v20772_v21, %v1273_v59 }
 0x34f   : > { %6234 = vrot.lane.b32.xlu1 %v6112_v37, %s15738_s27  ;;  %v7387_v14 = vrot.slane %v7386_v6, 2  ;;  %v1494_v49 = vmax.f32 %v1422_v51, 0.0  ;;  %v1651_v46 = vsel %vm16144_vm3, 0, %v1650_v9  ;;  %v5526_v41 = vcombine.high %v17929_v33, %v17929_v33 }
 0x350   : > { %v7400_v19 = vor.u32 %v7399_v34, %v7396_v25  ;;  %v7410_v44 = vor.u32 %v7409_v22, %v7405_v13  ;;  %v17983_v36 = vadd.f32 %v17834_v60, %v1346_v50  ;;  %1652 = vst [vmem:[#allocation2 + $0x84] sm:$0x4] %v1651_v46  ;;  %v5763_v35 = vshrl.u32 %v17929_v33, 16 }
 0x351   : > { %v7392_v48 = vsel %vm16733_vm15, %v7387_v14, %v7391_v52  ;;  %v1532_v42 = vpack.c.bf16 %v1494_v49, %v1493_v28  ;;  %v14789_v7 = vpack.c.bf16 %v1494_v49, %v1494_v49  ;;  %v5769_v55 = vshll.u32 %v5526_v41, 16  ;;  %v15106_v46 = vld.sshfl [vmem:[#allocation2 + $0x148] sm:$0x33 pattern:$0x76325410] }
 0x352   : > { %v7401_v47 = vrot.slane %v7400_v19, 2  ;;  %v7411_v40 = vrot.slane %v7410_v44, 2  ;;  %v7750_v29 = vcombine.low %v7382_v0, %v7392_v48  ;;  %v1497_v61 = vmax.f32 %v17983_v36, 0.0 }
 0x353   : > { %v3255_v39 = vrot.slane %v1532_v42, %v16483_v11  ;;  %v17993_v31 = vrot.slane %v14789_v7, %v16483_v11  ;;  %v5765_v30 = vrot.slane %v5763_v35, 6  ;;  %v5771_v33 = vrot.slane %v5769_v55, 7  ;;  %v15104_v35 = vld.sshfl [vmem:[#allocation2 + $0x140] sm:$0x33 pattern:$0x76325410] }
 0x354   : > { %v7406_v23 = vsel %vm16733_vm15, %v7401_v47, %v7405_v13  ;;  %v7416_v45 = vsel %vm16733_vm15, %v7411_v40, %v17857_v27  ;;  %v7758_v28 = vrot.slane %v7750_v29, %v16483_v11  ;;  %v5774_v0 = vshrl.u32 %v17668_v56, 16  ;;  %v15105_v48 = vld.sshfl [vmem:[#allocation2 + $0x144] sm:$0x3 pattern:$0x76325410] }
 0x355   : > { %v7751_v52 = vcombine.low %v7406_v23, %v7416_v45  ;;  %v3263_v63 = vcombine.high %v3255_v39, %v3255_v39  ;;  %v3264_v59 = vcombine.high %v17993_v31, %v17993_v31  ;;  %v3433_v37 = vrot.slane %v17993_v31, %v16483_v11  ;;  %v1583_v40 = vld [vmem:[#allocation2 + $0x40] sm:$0x1] }
 0x356   : > { %v5766_v20 = vor.u32 %v5765_v30, %v17939_v8  ;;  %v5776_v10 = vrot.slane %v5774_v0, 6  ;;  %v5777_v5 = vshll.u32 %v17668_v56, 16  ;;  %v5783_v9 = vshll.u32 %v17682_v43, 16  ;;  %v1263_v0 = vpop.permute.xlu1 %1262 }
 0x357   : > { %v7765_v27 = vrot.slane %v7751_v52, %v16483_v11  ;;  %v3419_v6 = vcombine.low %v3255_v39, %v3263_v63  ;;  %v3616_v25 = vshrl.u32 %v3433_v37, 16  ;;  %v3619_v17 = vshll.u32 %v3433_v37, 16  ;;  %v14871_v51 = vld.sshfl [vmem:[#allocation2 + $0x84] sm:$0x13 pattern:$0x76325410] }
 0x358   : > { %v5542_v34 = vcombine.high %v14871_v51, %v14871_v51  ;;  %v5767_v13 = vrot.slane %v5766_v20, 2  ;;  %v5779_v22 = vrot.slane %v5777_v5, 7  ;;  %v5785_v21 = vrot.slane %v5783_v9, 7  ;;  %v3744_v52 = vld [vmem:[#allocation2 + $0x48] sm:$0xf] }
 0x359   : > { %v7766_v50 = vcombine.low %v7758_v28, %v7765_v27  ;;  %v3426_v14 = vrot.slane %v3419_v6, %v16483_v11  ;;  %v3618_v49 = vrot.slane %v3616_v25, 7  ;;  %v5787_v8 = vshrl.u32 %v17682_v43, 16  ;;  %v3747_v63 = vld [vmem:[#allocation2 + $0x4c] sm:$0x7] }
 0x35a   : > { %v5772_v56 = vsel %vm16733_vm15, %v5767_v13, %v5771_v33  ;;  %v5780_v41 = vor.u32 %v5779_v22, %v5776_v10  ;;  %v5793_v19 = vshll.u32 %v14871_v51, 16  ;;  %v5797_v44 = vshrl.u32 %v14871_v51, 16  ;;  %v20773_v22 = vld [vmem:[#allocation20_spill] sm:$0xff] }
 0x35b   : > { %7888 = vrot.lane.b32.xlu0 %v7766_v50, %s15737_s26  ;;  %v3608_v42 = vshrl.u32 %v3426_v14, 16  ;;  %v3611_v7 = vshll.u32 %v3426_v14, 16  ;;  %v3621_v55 = vor.u32 %v3619_v17, %v3618_v49  ;;  %v5789_v47 = vrot.slane %v5787_v8, 6  ;;  %v1269_v14 = vpop.permute.xlu0 %1268 }
 0x35c   : > { %v5781_v29 = vrot.slane %v5780_v41, 2  ;;  %v5795_v39 = vrot.slane %v5793_v19, 7  ;;  %v5799_v30 = vrot.slane %v5797_v44, 6  ;;  %v5803_v43 = vshll.u32 %v5542_v34, 16 }
 0x35d   : > { %v3610_v23 = vrot.slane %v3608_v42, 7  ;;  %v5790_v45 = vor.u32 %v5789_v47, %v5785_v21  ;;  %v11705_v28 = vcombine.high %v15104_v35, %v15104_v35  ;;  %v11879_v33 = vcombine.low %v15105_v48, %v15106_v46  ;;  %v18019_v17 = vld.sshfl [vmem:[#allocation2 + $0x98] sm:$0x33 pattern:$0x76325410] }
 0x35e   : > { %v5786_v37 = vsel %vm16733_vm15, %v5781_v29, %v5785_v21  ;;  %v5800_v20 = vor.u32 %v5799_v30, %v5795_v39  ;;  %v5805_v10 = vrot.slane %v5803_v43, 7  ;;  %v1584_v5 = vsel %vm16261_vm6, 0, %v1583_v40  ;;  %v18023_v21 = vld.sshfl [vmem:[#allocation2 + $0xf0] sm:$0x33 pattern:$0x76325410] }
 0x35f   : > { %v3613_v9 = vor.u32 %v3611_v7, %v3610_v23  ;;  %v3614_v27 = vrot.slane %v3610_v23, 4  ;;  %v5791_v6 = vrot.slane %v5790_v45, 2  ;;  %v6113_v25 = vcombine.low %v5772_v56, %v5786_v37  ;;  %1585 = vst [vmem:[#allocation2 + $0x40] sm:$0x1] %v1584_v5 }
 0x360   : > { %v5801_v51 = vrot.slane %v5800_v20, 2  ;;  %v11878_v34 = vcombine.low %v15104_v35, %v11705_v28  ;;  %v11893_v13 = vrot.slane %v11879_v33, %v16483_v11  ;;  %v1341_v50 = vmax.f32 %v20773_v22, %v1263_v0  ;;  %v14945_v41 = vld.sshfl [vmem:[#allocation2 + $0xf4] sm:$0x13 pattern:$0x76325410] }
 0x361   : > { %v3622_v49 = vsel %vm16879_vm9, %v3614_v27, %v3621_v55  ;;  %v3745_v8 = vsel %vm16889_vm10, %v3613_v9, %v3744_v52  ;;  %v5796_v46 = vsel %vm16733_vm15, %v5791_v6, %v5795_v39  ;;  %v6121_v56 = vrot.slane %v6113_v25, %v16483_v11  ;;  %v18038_v42 = vld.sshfl [vmem:[#allocation2 + $0x94] sm:$0x3 pattern:$0x76325410]  ;;  %v20774_v55 = vld [vmem:[#allocation24_spill] sm:$0xff] }
 0x362   : > { %3746 = vst [vmem:[#allocation2 + $0x48] sm:$0xf] %v3745_v8  ;;  %v3748_v19 = vsel %vm16907_vm5, %v3622_v49, %v3747_v63  ;;  %v5806_v44 = vsel %vm16733_vm15, %v5801_v51, %v5805_v10  ;;  %v11886_v35 = vrot.slane %v11878_v34, %v16483_v11  ;;  %v1420_v48 = vadd.f32 %v17834_v60, %v1341_v50  ;;  %v18047_v39 = vld.sshfl [vmem:[#allocation2 + $0xf8] sm:$0x33 pattern:$0x76325410] }
 0x363   : > { %3749 = vst [vmem:[#allocation2 + $0x4c] sm:$0x7] %v3748_v19  ;;  %v6114_v7 = vcombine.low %v5796_v46, %v5806_v44  ;;  %v1344_v47 = vmax.f32 %v20774_v55, %v1269_v14  ;;  %v18043_v40 = vcombine.high %v17825_v26, %v17825_v26  ;;  %v9438_v29 = vcombine.low %v18038_v42, %v18019_v17 }
 0x364   : > { %v11894_v30 = vcombine.low %v11886_v35, %v11893_v13  ;;  %v1492_v43 = vmax.f32 %v1420_v48, 0.0  ;;  %v18051_v23 = vcombine.high %v18023_v21, %v18023_v21  ;;  %v7212_v45 = vcombine.high %v14945_v41, %v14945_v41 }
 0x365   : > { %v6128_v28 = vrot.slane %v6114_v7, %v16483_v11  ;;  %v18055_v33 = vadd.f32 %v17834_v60, %v1344_v47  ;;  %v9437_v0 = vcombine.low %v17825_v26, %v18043_v40  ;;  %v9452_v52 = vrot.slane %v9438_v29, %v16483_v11 }
 0x366   : > { %12031 = vrot.lane.b32.xlu0 %v11894_v30, %s15740_s30  ;;  %v1531_v63 = vpack.c.bf16 %v1492_v43, %v1491_v58  ;;  %v14788_v37 = vpack.c.bf16 %v1492_v43, %v1492_v43  ;;  %v18065_v20 = vcombine.high %v18047_v39, %v18047_v39  ;;  %v7462_v10 = vshrl.u32 %v18023_v21, 16 }
 0x367   : > { %v6129_v5 = vcombine.low %v6121_v56, %v6128_v28  ;;  %v1495_v9 = vmax.f32 %v18055_v33, 0.0  ;;  %v9445_v27 = vrot.slane %v9437_v0, %v16483_v11  ;;  %v7465_v26 = vshll.u32 %v18023_v21, 16 }
 0x368   : > { %v3238_v6 = vrot.slane %v1531_v63, %v16483_v11  ;;  %v3245_v25 = vrot.slane %v14788_v37, %v16483_v11  ;;  %v7464_v12 = vrot.slane %v7462_v10, 6  ;;  %v7471_v58 = vshll.u32 %v18051_v23, 16 }
 0x369   : > { %6236 = vrot.lane.b32.xlu1 %v6129_v5, %s15738_s27  ;;  %v9453_v51 = vcombine.low %v9445_v27, %v9452_v52  ;;  %v7467_v34 = vrot.slane %v7465_v26, 7  ;;  %v7475_v13 = vshrl.u32 %v18051_v23, 16  ;;  %v7481_v22 = vshll.u32 %v14945_v41, 16  ;;  %v3735_v27 = vld [vmem:[#allocation2 + $0x3c] sm:$0x7] }
 0x36a   : > { %v3246_v50 = vcombine.high %v3238_v6, %v3238_v6  ;;  %v3247_v14 = vcombine.high %v3245_v25, %v3245_v25  ;;  %v3403_v49 = vrot.slane %v3238_v6, %v16483_v11  ;;  %v7473_v8 = vrot.slane %v7471_v58, 7 }
 0x36b   : > { %v7468_v46 = vor.u32 %v7467_v34, %v7464_v12  ;;  %v7477_v56 = vrot.slane %v7475_v13, 6  ;;  %v7483_v19 = vrot.slane %v7481_v22, 7  ;;  %v7485_v44 = vshrl.u32 %v14945_v41, 16 }
 0x36c   : > { %v3404_v35 = vcombine.low %v3246_v50, %v3245_v25  ;;  %v3418_v48 = vrot.slane %v3247_v14, %v16483_v11  ;;  %v3584_v7 = vshrl.u32 %v3403_v49, 16  ;;  %v3587_v55 = vshll.u32 %v3403_v49, 16  ;;  %v1595_v49 = vld [vmem:[#allocation2 + $0x60] sm:$0x1] }
 0x36d   : > { %9545 = vrot.lane.b32.xlu1 %v9453_v51, %s15740_s30  ;;  %v7469_v47 = vrot.slane %v7468_v46, 2  ;;  %v7478_v29 = vor.u32 %v7477_v56, %v7473_v8  ;;  %v7487_v30 = vrot.slane %v7485_v44, 6  ;;  %v7491_v43 = vshll.u32 %v7212_v45, 16  ;;  %v3738_v46 = vld [vmem:[#allocation2 + $0x40] sm:$0xf] }
 0x36e   : > { %v3411_v28 = vrot.slane %v3404_v35, %v16483_v11  ;;  %v3586_v0 = vrot.slane %v3584_v7, 7  ;;  %v3600_v52 = vshrl.u32 %v3418_v48, 16  ;;  %v3603_v63 = vshll.u32 %v3418_v48, 16  ;;  %v3741_v48 = vld [vmem:[#allocation2 + $0x44] sm:$0x7] }
 0x36f   : > { %v7474_v37 = vsel %vm16733_vm15, %v7469_v47, %v7473_v8  ;;  %v7479_v41 = vrot.slane %v7478_v29, 2  ;;  %v7488_v10 = vor.u32 %v7487_v30, %v7483_v19  ;;  %v7493_v5 = vrot.slane %v7491_v43, 7  ;;  %v1275_v8 = vpop.permute.xlu1 %1274  ;;  %v14947_v43 = vld.sshfl [vmem:[#allocation2 + $0xfc] sm:$0x13 pattern:$0x76325410] }
 0x370   : > { %v3589_v26 = vor.u32 %v3587_v55, %v3586_v0  ;;  %v3592_v6 = vshrl.u32 %v3411_v28, 16  ;;  %v3595_v25 = vshll.u32 %v3411_v28, 16  ;;  %v3602_v12 = vrot.slane %v3600_v52, 7 }
 0x371   : > { %v7484_v58 = vsel %vm16733_vm15, %v7479_v41, %v7483_v19  ;;  %v7489_v45 = vrot.slane %v7488_v10, 2  ;;  %v7496_v51 = vshrl.u32 %v18047_v39, 16  ;;  %v7499_v34 = vshll.u32 %v18047_v39, 16 }
 0x372   : > { %v3590_v13 = vsel %vm16879_vm9, %v3582_v32, %v3589_v26  ;;  %v3594_v22 = vrot.slane %v3592_v6, 7  ;;  %v3605_v50 = vor.u32 %v3603_v63, %v3602_v12  ;;  %v7505_v14 = vshll.u32 %v18065_v20, 16  ;;  %v18105_v63 = vld.sshfl [vmem:[#allocation2 + $0x100] sm:$0x33 pattern:$0x76325410] }
 0x373   : > { %v3736_v56 = vsel %vm16907_vm5, %v3590_v13, %v3735_v27  ;;  %v7494_v19 = vsel %vm16733_vm15, %v7489_v45, %v7493_v5  ;;  %v7498_v44 = vrot.slane %v7496_v51, 6  ;;  %v7501_v35 = vrot.slane %v7499_v34, 7  ;;  %v14889_v10 = vld.sshfl [vmem:[#allocation2 + $0xd4] sm:$0x3 pattern:$0x76325410] }
 0x374   : > { %v3597_v62 = vor.u32 %v3595_v25, %v3594_v22  ;;  %v3598_v7 = vrot.slane %v3594_v22, 4  ;;  %3737 = vst [vmem:[#allocation2 + $0x3c] sm:$0x7] %v3736_v56  ;;  %v18095_v32 = vrot.slane %v7505_v14, 7  ;;  %v7784_v55 = vcombine.low %v7474_v37, %v7484_v58 }
 0x375   : > { %v7502_v47 = vor.u32 %v7501_v35, %v7498_v44  ;;  %v1596_v29 = vsel %vm16261_vm6, 0, %v1595_v49  ;;  %v1347_v30 = vmax.f32 %v16720_v4, %v1275_v8  ;;  %v15689_v5 = vld.sshfl [vmem:[#allocation2 + $0xd0] sm:$0x33 pattern:$0x76325410]  ;;  %v6498_v26 = vcombine.low %v14889_v10, %v17777_v57  ;;  %v7050_v8 = vpop.permute.xlu0 %7049 }
 0x376   : > { %v3606_v28 = vsel %vm16879_vm9, %v3598_v7, %v3605_v50  ;;  %v3739_v0 = vsel %vm16889_vm10, %v3597_v62, %v3738_v46  ;;  %v7792_v52 = vrot.slane %v7784_v55, %v16483_v11  ;;  %1597 = vst [vmem:[#allocation2 + $0x60] sm:$0x1] %v1596_v29  ;;  %v6497_v27 = vcombine.low %v15689_v5, %v17758_v2  ;;  %v18149_v5 = vld.sshfl [vmem:[#allocation2 + $0x104] sm:$0x13 pattern:$0x76325410] }
 0x377   : > { %3740 = vst [vmem:[#allocation2 + $0x40] sm:$0xf] %v3739_v0  ;;  %v3742_v37 = vsel %vm16907_vm5, %v3606_v28, %v3741_v48  ;;  %v7503_v41 = vrot.slane %v7502_v47, 2  ;;  %v1426_v4 = vadd.f32 %v17834_v60, %v1347_v30  ;;  %v18114_v6 = vcombine.high %v18019_v17, %v18019_v17 }
 0x378   : > { %3743 = vst [vmem:[#allocation2 + $0x44] sm:$0x7] %v3742_v37  ;;  %v4464_v25 = vcombine.low %v18043_v40, %v18038_v42  ;;  %v7228_v12 = vcombine.high %v14947_v43, %v14947_v43  ;;  %v6505_v51 = vrot.slane %v6497_v27, %v16483_v11  ;;  %v18126_v2 = vcombine.high %v18105_v63, %v18105_v63 }
 0x379   : > { %v18121_v58 = vsel %vm16733_vm15, %v7503_v41, %v18095_v32  ;;  %v1498_v45 = vmax.f32 %v1426_v4, 0.0  ;;  %v6512_v34 = vrot.slane %v6498_v26, %v16483_v11  ;;  %v4465_v42 = vcombine.low %v18019_v17, %v18114_v6 }
 0x37a   : > { %v7785_v57 = vcombine.low %v7494_v19, %v18121_v58  ;;  %v4472_v40 = vrot.slane %v4464_v25, %v16483_v11  ;;  %v7509_v50 = vshrl.u32 %v18065_v20, 16  ;;  %v7515_v14 = vshll.u32 %v14947_v43, 16 }
 0x37b   : > { %v1534_v13 = vpack.c.bf16 %v1498_v45, %v1497_v61  ;;  %v14791_v22 = vpack.c.bf16 %v1498_v45, %v1498_v45  ;;  %v6513_v46 = vcombine.low %v6505_v51, %v6512_v34  ;;  %v4479_v56 = vrot.slane %v4465_v42, %v16483_v11 }
 0x37c   : > { %v7799_v49 = vrot.slane %v7785_v57, %v16483_v11  ;;  %v7519_v19 = vshrl.u32 %v14947_v43, 16  ;;  %v7511_v48 = vrot.slane %v7509_v50, 6  ;;  %v7517_v62 = vrot.slane %v7515_v14, 7 }
 0x37d   : > { %v3289_v44 = vrot.slane %v1534_v13, %v16483_v11  ;;  %v3296_v35 = vrot.slane %v14791_v22, %v16483_v11  ;;  %6659 = vst.msk [vmem:[#allocation3 + $0x8] sm:$0xff] %vm4158_vm1, %v6513_v46  ;;  %v4480_v36 = vcombine.low %v4472_v40, %v4479_v56  ;;  %v7525_v20 = vshll.u32 %v7228_v12, 16  ;;  %v1589_v22 = vld [vmem:[#allocation2 + $0x50] sm:$0x1]  ;;  %v1592_v46 = vld [vmem:[#allocation2 + $0x58] sm:$0x1] }
 0x37e   : > { %v7800_v7 = vcombine.low %v7792_v52, %v7799_v49  ;;  %v7521_v61 = vrot.slane %v7519_v19, 6  ;;  %7076 = vst.msk [vmem:[#allocation3 + $0x8] sm:$0xff] %vm4576_vm7, %v7050_v8  ;;  %v7512_v30 = vor.u32 %v7511_v48, %v18095_v32  ;;  %v7530_v0 = vshrl.u32 %v18105_v63, 16  ;;  %v1271_v48 = vpop.permute.xlu1 %1270 }
 0x37f   : > { %v3297_v55 = vcombine.high %v3289_v44, %v3289_v44  ;;  %v3298_v47 = vcombine.high %v3296_v35, %v3296_v35  ;;  %v3463_v29 = vrot.slane %v3289_v44, %v16483_v11  ;;  %4557 = vrot.lane.b32.xlu1 %v4480_v36, %s15740_s30  ;;  %v7527_v28 = vrot.slane %v7525_v20, 7 }
 0x380   : > { %7892 = vrot.lane.b32.xlu0 %v7800_v7, %s15737_s26  ;;  %v7522_v43 = vor.u32 %v7521_v61, %v7517_v62  ;;  %v7533_v52 = vshll.u32 %v18105_v63, 16  ;;  %v7513_v27 = vrot.slane %v7512_v30, 2  ;;  %v7532_v32 = vrot.slane %v7530_v0, 6 }
 0x381   : > { %v3464_v37 = vcombine.low %v3297_v55, %v3296_v35  ;;  %v3478_v41 = vrot.slane %v3298_v47, %v16483_v11  ;;  %v3648_v4 = vshrl.u32 %v3463_v29, 16  ;;  %v3651_v10 = vshll.u32 %v3463_v29, 16  ;;  %v18169_v55 = vld.sshfl [vmem:[#allocation2 + $0xa8] sm:$0x33 pattern:$0x76325410] }
 0x382   : > { %v7523_v26 = vrot.slane %v7522_v43, 2  ;;  %v7535_v25 = vrot.slane %v7533_v52, 7  ;;  %v18154_v34 = vsel %vm16733_vm15, %v7513_v27, %v7517_v62  ;;  %v7539_v13 = vshll.u32 %v18126_v2, 16  ;;  %v3765_v62 = vld [vmem:[#allocation2 + $0x64] sm:$0x7] }
 0x383   : > { %v3471_v12 = vrot.slane %v3464_v37, %v16483_v11  ;;  %v3650_v45 = vrot.slane %v3648_v4, 7  ;;  %v3664_v51 = vshrl.u32 %v3478_v41, 16  ;;  %v3667_v57 = vshll.u32 %v3478_v41, 16  ;;  %v3762_v47 = vld [vmem:[#allocation2 + $0x60] sm:$0xf] }
 0x384   : > { %v18158_v42 = vsel %vm16733_vm15, %v7523_v26, %v7527_v28  ;;  %v7536_v40 = vor.u32 %v7535_v25, %v7532_v32  ;;  %v7541_v19 = vrot.slane %v7539_v13, 7  ;;  %v7543_v44 = vshrl.u32 %v18126_v2, 16  ;;  %v14891_v41 = vld.sshfl [vmem:[#allocation2 + $0xdc] sm:$0x3 pattern:$0x76325410] }
 0x385   : > { %v18161_v50 = vor.u32 %v3651_v10, %v3650_v45  ;;  %v3656_v14 = vshrl.u32 %v3471_v12, 16  ;;  %v3659_v49 = vshll.u32 %v3471_v12, 16  ;;  %v3666_v8 = vrot.slane %v3664_v51, 7 }
 0x386   : > { %v7537_v56 = vrot.slane %v7536_v40, 2  ;;  %v7549_v35 = vshll.u32 %v18149_v5, 16  ;;  %v7801_v61 = vcombine.low %v18154_v34, %v18158_v42  ;;  %v1590_v20 = vsel %vm16261_vm6, 0, %v1589_v22 }
 0x387   : > { %v3658_v7 = vrot.slane %v3656_v14, 7  ;;  %v3669_v36 = vor.u32 %v3667_v57, %v3666_v8  ;;  %v7545_v30 = vrot.slane %v7543_v44, 6  ;;  %1591 = vst [vmem:[#allocation2 + $0x50] sm:$0x1] %v1590_v20  ;;  %v1593_v43 = vsel %vm16261_vm6, 0, %v1592_v46 }
 0x388   : > { %v7542_v29 = vsel %vm16733_vm15, %v7537_v56, %v7541_v19  ;;  %v18173_v2 = vrot.slane %v7549_v35, 7  ;;  %v18178_v52 = vrot.slane %v7801_v61, %v16483_v11  ;;  %1594 = vst [vmem:[#allocation2 + $0x58] sm:$0x1] %v1593_v43  ;;  %v1345_v37 = vmax.f32 %v16750_v18, %v1271_v48  ;;  %v7052_v61 = vpop.permute.xlu0 %7051 }
 0x389   : > { %v3661_v28 = vor.u32 %v3659_v49, %v3658_v7  ;;  %v3662_v0 = vrot.slane %v3658_v7, 4  ;;  %v7546_v4 = vor.u32 %v7545_v30, %v7541_v19  ;;  %v15690_v10 = vld.sshfl [vmem:[#allocation2 + $0xd8] sm:$0x33 pattern:$0x76325410]  ;;  %v6515_v26 = vcombine.low %v17907_v1, %v17922_v53 }
 0x38a   : > { %v6339_v27 = vcombine.high %v15690_v10, %v15690_v10  ;;  %v18183_v32 = vld.sshfl [vmem:[#allocation2 + $0xa4] sm:$0x3 pattern:$0x76325410]  ;;  %v18187_v25 = vcombine.high %v18169_v55, %v18169_v55  ;;  %v1424_v18 = vadd.f32 %v17834_v60, %v1345_v37  ;;  %v12766_v8 = vcombine.low %v18121_v58, %v18154_v34 }
 0x38b   : > { %v3670_v12 = vsel %vm16879_vm9, %v3662_v0, %v3669_v36  ;;  %v3763_v45 = vsel %vm16889_vm10, %v3661_v28, %v3762_v47  ;;  %v9471_v51 = vcombine.low %v18183_v32, %v18169_v55  ;;  %v14894_v57 = vld.sshfl [vmem:[#allocation2 + $0xe8] sm:$0x33 pattern:$0x76325410]  ;;  %v7547_v53 = vrot.slane %v7546_v4, 2 }
 0x38c   : > { %3764 = vst [vmem:[#allocation2 + $0x60] sm:$0xf] %v3763_v45  ;;  %v3766_v1 = vsel %vm16907_vm5, %v3670_v12, %v3765_v62  ;;  %v6514_v40 = vcombine.low %v6339_v27, %v14891_v41  ;;  %v6529_v13 = vrot.slane %v6515_v26, %v16483_v11  ;;  %v18199_v22 = vld.sshfl [vmem:[#allocation2 + $0xac] sm:$0x3 pattern:$0x76325410]  ;;  %v12767_v44 = vcombine.low %v18158_v42, %v7542_v29 }
 0x38d   : > { %3767 = vst [vmem:[#allocation2 + $0x64] sm:$0x7] %v3766_v1  ;;  %v1496_v14 = vmax.f32 %v1424_v18, 0.0  ;;  %v9472_v49 = vcombine.low %v18187_v25, %v18199_v22  ;;  %v9479_v60 = vrot.slane %v9471_v51, %v16483_v11  ;;  %v18209_v56 = vsel %vm16733_vm15, %v7547_v53, %v18173_v2 }
 0x38e   : > { %v14893_v46 = vld.sshfl [vmem:[#allocation2 + $0xe4] sm:$0x3 pattern:$0x76325410]  ;;  %v6522_v19 = vrot.slane %v6514_v40, %v16483_v11  ;;  %v6369_v48 = vcombine.high %v14894_v57, %v14894_v57  ;;  %v7802_v62 = vcombine.low %v7542_v29, %v18209_v56  ;;  %v12774_v47 = vrot.slane %v12766_v8, %v16483_v11 }
 0x38f   : > { %v14895_v35 = vld.sshfl [vmem:[#allocation2 + $0xec] sm:$0x3 pattern:$0x76325410]  ;;  %v1533_v7 = vpack.c.bf16 %v1496_v14, %v1495_v9  ;;  %v14790_v36 = vpack.c.bf16 %v1496_v14, %v1496_v14  ;;  %v9486_v58 = vrot.slane %v9472_v49, %v16483_v11  ;;  %v12781_v30 = vrot.slane %v12767_v44, %v16483_v11  ;;  %v7054_v14 = vpop.permute.xlu0 %7053 }
 0x390   : > { %v18217_v34 = vld.sshfl [vmem:[#allocation2 + $0xa0] sm:$0x33 pattern:$0x76325410]  ;;  %v6530_v20 = vcombine.low %v6522_v19, %v6529_v13  ;;  %v6531_v43 = vcombine.low %v14893_v46, %v14894_v57  ;;  %v7816_v42 = vrot.slane %v7802_v62, %v16483_v11  ;;  %v6532_v41 = vcombine.low %v6369_v48, %v14895_v35 }
 0x391   : > { %v3272_v28 = vrot.slane %v1533_v7, %v16483_v11  ;;  %v3279_v29 = vrot.slane %v14790_v36, %v16483_v11  ;;  %v9487_v33 = vcombine.low %v9479_v60, %v9486_v58  ;;  %v18224_v9 = vld.sshfl [vmem:[#allocation2 + $0x9c] sm:$0x3 pattern:$0x76325410]  ;;  %v12782_v37 = vcombine.low %v12774_v47, %v12781_v30  ;;  %v3750_v30 = vld [vmem:[#allocation2 + $0x50] sm:$0xf] }
 0x392   : > { %v15141_v0 = vld.sshfl [vmem:[#allocation2 + $0x10c] sm:$0x13 pattern:$0x76325410]  ;;  %6660 = vst.msk [vmem:[#allocation3 + $0x28] sm:$0xff] %vm4158_vm1, %v6530_v20  ;;  %v6539_v4 = vrot.slane %v6531_v43, %v16483_v11  ;;  %v18230_v10 = vcombine.high %v18217_v34, %v18217_v34  ;;  %v7817_v26 = vcombine.low %v18178_v52, %v7816_v42  ;;  %v6546_v57 = vrot.slane %v6532_v41, %v16483_v11 }
 0x393   : > { %v15142_v27 = vld.sshfl [vmem:[#allocation2 + $0x110] sm:$0x33 pattern:$0x76325410]  ;;  %v3280_v12 = vcombine.high %v3272_v28, %v3272_v28  ;;  %v3281_v45 = vcombine.high %v3279_v29, %v3279_v29  ;;  %v3434_v18 = vcombine.low %v3264_v59, %v3272_v28  ;;  %7077 = vst.msk [vmem:[#allocation3 + $0x28] sm:$0xff] %vm4576_vm7, %v7052_v61  ;;  %9549 = vrot.lane.b32.xlu1 %v9487_v33, %s15740_s30  ;;  %v12531_v7 = vshll.u32 %v15141_v0, 16 }
 0x394   : > { %v18238_v51 = vld.sshfl [vmem:[#allocation2 + $0x114] sm:$0x13 pattern:$0x76325410]  ;;  %v4481_v1 = vcombine.low %v18224_v9, %v18217_v34  ;;  %v4482_v52 = vcombine.low %v18230_v10, %v18183_v32  ;;  %v12226_v53 = vcombine.high %v15141_v0, %v15141_v0  ;;  %7894 = vrot.lane.b32.xlu0 %v7817_v26, %s15737_s26  ;;  %v12234_v13 = vcombine.high %v15142_v27, %v15142_v27 }
 0x395   : > { %v3441_v31 = vrot.slane %v3434_v18, %v16483_v11  ;;  %v3448_v59 = vrot.slane %v3280_v12, %v16483_v11  ;;  %v3449_v40 = vcombine.low %v3279_v29, %v3281_v45  ;;  %v6547_v49 = vcombine.low %v6539_v4, %v6546_v57  ;;  %v3753_v33 = vld [vmem:[#allocation2 + $0x54] sm:$0x7]  ;;  %v3756_v12 = vld [vmem:[#allocation2 + $0x58] sm:$0xf] }
 0x396   : > { %v4489_v60 = vrot.slane %v4481_v1, %v16483_v11  ;;  %v4496_v8 = vrot.slane %v4482_v52, %v16483_v11  ;;  %v12242_v46 = vcombine.high %v18238_v51, %v18238_v51  ;;  %v12535_v36 = vshrl.u32 %v15141_v0, 16  ;;  %v3759_v1 = vld [vmem:[#allocation2 + $0x5c] sm:$0x7] }
 0x397   : > { %v3456_v32 = vrot.slane %v3449_v40, %v16483_v11  ;;  %v3624_v19 = vshrl.u32 %v3441_v31, 16  ;;  %v3627_v44 = vshll.u32 %v3441_v31, 16  ;;  %v3632_v35 = vshrl.u32 %v3448_v59, 16  ;;  %6661 = vst.msk [vmem:[#allocation3 + $0x48] sm:$0xff] %vm4158_vm1, %v6547_v49 }
 0x398   : > { %v3635_v48 = vshll.u32 %v3448_v59, 16  ;;  %v4497_v62 = vcombine.low %v4489_v60, %v4496_v8  ;;  %12874 = vrot.lane.b32.xlu0 %v12782_v37, %s15737_s26  ;;  %7078 = vst.msk [vmem:[#allocation3 + $0x48] sm:$0xff] %vm4576_vm7, %v7054_v14  ;;  %v18257_v43 = vrot.slane %v12531_v7, 7  ;;  %v12537_v42 = vrot.slane %v12535_v36, 6 }
 0x399   : > { %v3626_v58 = vrot.slane %v3624_v19, 7  ;;  %v3634_v61 = vrot.slane %v3632_v35, 7  ;;  %v3640_v20 = vshrl.u32 %v3456_v32, 16  ;;  %v3643_v47 = vshll.u32 %v3456_v32, 16 }
 0x39a   : > { %4559 = vrot.lane.b32.xlu1 %v4497_v62, %s15740_s30  ;;  %v12541_v28 = vshll.u32 %v12226_v53, 16  ;;  %v12546_v29 = vshrl.u32 %v15142_v27, 16  ;;  %v12538_v45 = vor.u32 %v12537_v42, %v18257_v43  ;;  %v12549_v57 = vshll.u32 %v15142_v27, 16 }
 0x39b   : > { %v3629_v41 = vor.u32 %v3627_v44, %v3626_v58  ;;  %v3630_v4 = vrot.slane %v3626_v58, 4  ;;  %v3637_v0 = vor.u32 %v3635_v48, %v3634_v61  ;;  %v3642_v26 = vrot.slane %v3640_v20, 7  ;;  %v18278_v7 = vld.sshfl [vmem:[#allocation2 + $0x108] sm:$0x33 pattern:$0x76325410] }
 0x39c   : > { %v12543_v18 = vrot.slane %v12541_v28, 7  ;;  %v12548_v37 = vrot.slane %v12546_v29, 6  ;;  %v12539_v14 = vrot.slane %v12538_v45, 2  ;;  %v12551_v49 = vrot.slane %v12549_v57, 7 }
 0x39d   : > { %v3638_v52 = vsel %vm16879_vm9, %v3630_v4, %v3637_v0  ;;  %v3645_v31 = vor.u32 %v3643_v47, %v3642_v26  ;;  %v3646_v59 = vrot.slane %v3642_v26, 4  ;;  %v3751_v53 = vsel %vm16889_vm10, %v3629_v41, %v3750_v30  ;;  %v14872_v4 = vld.sshfl [vmem:[#allocation2 + $0x88] sm:$0x33 pattern:$0x76325410] }
 0x39e   : > { %3752 = vst [vmem:[#allocation2 + $0x50] sm:$0xf] %v3751_v53  ;;  %v3754_v40 = vsel %vm16907_vm5, %v3638_v52, %v3753_v33  ;;  %v12555_v60 = vshll.u32 %v12234_v13, 16  ;;  %v12559_v32 = vshrl.u32 %v12234_v13, 16  ;;  %v12565_v19 = vshll.u32 %v18238_v51, 16 }
 0x39f   : > { %v3654_v27 = vsel %vm16879_vm9, %v3646_v59, %v18161_v50  ;;  %3755 = vst [vmem:[#allocation2 + $0x54] sm:$0x7] %v3754_v40  ;;  %v3757_v8 = vsel %vm16889_vm10, %v3645_v31, %v3756_v12  ;;  %v18276_v35 = vsel %vm16733_vm15, %v12539_v14, %v12543_v18  ;;  %v12552_v48 = vor.u32 %v12551_v49, %v12548_v37  ;;  %v1653_v18 = vld [vmem:[#allocation2 + $0x8c] sm:$0x4] }
 0x3a0   : > { %3758 = vst [vmem:[#allocation2 + $0x58] sm:$0xf] %v3757_v8  ;;  %v3760_v44 = vsel %vm16907_vm5, %v3654_v27, %v3759_v1  ;;  %v12557_v62 = vrot.slane %v12555_v60, 7  ;;  %v12561_v3 = vrot.slane %v12559_v32, 6  ;;  %v12567_v50 = vrot.slane %v12565_v19, 7 }
 0x3a1   : > { %3761 = vst [vmem:[#allocation2 + $0x5c] sm:$0x7] %v3760_v44  ;;  %v12569_v16 = vshrl.u32 %v18238_v51, 16  ;;  %v12575_v13 = vshll.u32 %v12242_v46, 16  ;;  %v12553_v36 = vrot.slane %v12552_v48, 2  ;;  %v9454_v58 = vcombine.low %v18114_v6, %v18224_v9 }
 0x3a2   : > { %v9455_v61 = vcombine.low %v18217_v34, %v18230_v10  ;;  %v7244_v20 = vcombine.high %v18149_v5, %v18149_v5  ;;  %v12562_v47 = vor.u32 %v12561_v3, %v12557_v62  ;;  %v18289_v28 = vcombine.high %v18278_v7, %v18278_v7  ;;  %v14874_v52 = vld.sshfl [vmem:[#allocation2 + $0x90] sm:$0x33 pattern:$0x76325410] }
 0x3a3   : > { %v12571_v30 = vrot.slane %v12569_v16, 6  ;;  %v12577_v42 = vrot.slane %v12575_v13, 7  ;;  %v18293_v51 = vsel %vm16733_vm15, %v12553_v36, %v12557_v62  ;;  %v9462_v46 = vrot.slane %v9454_v58, %v16483_v11 }
 0x3a4   : > { %v9469_v9 = vrot.slane %v9455_v61, %v16483_v11  ;;  %v7553_v34 = vshrl.u32 %v18149_v5, 16  ;;  %v12563_v10 = vrot.slane %v12562_v47, 2  ;;  %v12800_v33 = vcombine.low %v18276_v35, %v18293_v51 }
 0x3a5   : > { %v12572_v29 = vor.u32 %v12571_v30, %v12567_v50  ;;  %v7559_v41 = vshll.u32 %v7244_v20, 16  ;;  %v7564_v12 = vshrl.u32 %v18278_v7, 16  ;;  %v7567_v45 = vshll.u32 %v18278_v7, 16 }
 0x3a6   : > { %v9470_v0 = vcombine.low %v9462_v46, %v9469_v9  ;;  %v7555_v26 = vrot.slane %v7553_v34, 6  ;;  %v18304_v37 = vsel %vm16733_vm15, %v12563_v10, %v12567_v50  ;;  %v12808_v5 = vrot.slane %v12800_v33, %v16483_v11  ;;  %v18326_v34 = vpop.permute.xlu0 %8723 }
 0x3a7   : > { %v12573_v57 = vrot.slane %v12572_v29, 2  ;;  %v7561_v1 = vrot.slane %v7559_v41, 7  ;;  %v7566_v59 = vrot.slane %v7564_v12, 6  ;;  %v7569_v53 = vrot.slane %v7567_v45, 7 }
 0x3a8   : > { %9547 = vrot.lane.b32.xlu1 %v9470_v0, %s15740_s30  ;;  %v7556_v31 = vor.u32 %v7555_v26, %v18173_v2  ;;  %v7573_v40 = vshll.u32 %v18289_v28, 16  ;;  %v7577_v49 = vshrl.u32 %v18289_v28, 16  ;;  %v1654_v60 = vsel %vm16144_vm3, 0, %v1653_v18 }
 0x3a9   : > { %v18312_v14 = vsel %vm16733_vm15, %v12573_v57, %v12577_v42  ;;  %v5550_v27 = vcombine.high %v14872_v4, %v14872_v4  ;;  %v7570_v19 = vor.u32 %v7569_v53, %v7566_v59  ;;  %1655 = vst [vmem:[#allocation2 + $0x8c] sm:$0x4] %v1654_v60  ;;  %v18319_v48 = vcombine.high %v14874_v52, %v14874_v52 }
 0x3aa   : > { %v12801_v8 = vcombine.low %v18304_v37, %v18312_v14  ;;  %v7557_v32 = vrot.slane %v7556_v31, 2  ;;  %v7575_v2 = vrot.slane %v7573_v40, 7  ;;  %v7579_v44 = vrot.slane %v7577_v49, 6 }
 0x3ab   : > { %v5808_v62 = vshrl.u32 %v14872_v4, 16  ;;  %v5811_v3 = vshll.u32 %v14872_v4, 16  ;;  %v7571_v13 = vrot.slane %v7570_v19, 2  ;;  %v5817_v36 = vshll.u32 %v5550_v27, 16 }
 0x3ac   : > { %v12815_v50 = vrot.slane %v12801_v8, %v16483_v11  ;;  %v7562_v16 = vsel %vm16733_vm15, %v7557_v32, %v7561_v1  ;;  %v7580_v58 = vor.u32 %v7579_v44, %v7575_v2  ;;  %v5821_v47 = vshrl.u32 %v5550_v27, 16  ;;  %v14897_v49 = vld.sshfl [vmem:[#allocation2 + $0xf4] sm:$0x3 pattern:$0x76325410] }
 0x3ad   : > { %v5810_v61 = vrot.slane %v5808_v62, 6  ;;  %v5813_v20 = vrot.slane %v5811_v3, 7  ;;  %v7576_v42 = vsel %vm16733_vm15, %v7571_v13, %v7575_v2  ;;  %v5819_v46 = vrot.slane %v5817_v36, 7  ;;  %v18339_v2 = vpop.permute.xlu0 %8725 }
 0x3ae   : > { %v12816_v30 = vcombine.low %v12808_v5, %v12815_v50  ;;  %v5842_v9 = vshrl.u32 %v14874_v52, 16  ;;  %v7581_v10 = vrot.slane %v7580_v58, 2  ;;  %v7818_v29 = vcombine.low %v7562_v16, %v7576_v42  ;;  %v1656_v50 = vld [vmem:[#allocation2 + $0x94] sm:$0x4] }
 0x3af   : > { %v5814_v33 = vor.u32 %v5813_v20, %v5810_v61  ;;  %v5823_v41 = vrot.slane %v5821_v47, 6  ;;  %v5845_v0 = vshll.u32 %v14874_v52, 16  ;;  %v5851_v26 = vshll.u32 %v18319_v48, 16 }
 0x3b0   : > { %12878 = vrot.lane.b32.xlu0 %v12816_v30, %s15737_s26  ;;  %v5844_v4 = vrot.slane %v5842_v9, 6  ;;  %v12783_v12 = vcombine.low %v18209_v56, %v7562_v16  ;;  %v7586_v45 = vsel %vm16733_vm15, %v7581_v10, %v18257_v43  ;;  %v7826_v18 = vrot.slane %v7818_v29, %v16483_v11  ;;  %v14873_v57 = vld.sshfl [vmem:[#allocation2 + $0x8c] sm:$0x13 pattern:$0x76325410] }
 0x3b1   : > { %v5815_v5 = vrot.slane %v5814_v33, 2  ;;  %v5824_v1 = vor.u32 %v5823_v41, %v5819_v46  ;;  %v7819_v31 = vcombine.low %v7586_v45, %v18276_v35  ;;  %v5558_v59 = vcombine.high %v14873_v57, %v14873_v57 }
 0x3b2   : > { %v5827_v53 = vshll.u32 %v14873_v57, 16  ;;  %v5831_v40 = vshrl.u32 %v14873_v57, 16  ;;  %v5847_v56 = vrot.slane %v5845_v0, 7  ;;  %v5853_v27 = vrot.slane %v5851_v26, 7 }
 0x3b3   : > { %v5820_v52 = vsel %vm16733_vm15, %v5815_v5, %v5819_v46  ;;  %v5825_v60 = vrot.slane %v5824_v1, 2  ;;  %v7833_v8 = vrot.slane %v7819_v31, %v16483_v11  ;;  %v5837_v19 = vshll.u32 %v5558_v59, 16  ;;  %v14954_v46 = vld.sshfl [vmem:[#allocation2 + $0x118] sm:$0x33 pattern:$0x76325410] }
 0x3b4   : > { %v5829_v43 = vrot.slane %v5827_v53, 7  ;;  %v5833_v32 = vrot.slane %v5831_v40, 6  ;;  %v5848_v44 = vor.u32 %v5847_v56, %v5844_v4  ;;  %v12784_v62 = vcombine.low %v7576_v42, %v7586_v45  ;;  %v7056_v45 = vpop.permute.xlu0 %7055  ;;  %v18367_v1 = vld.sshfl [vmem:[#allocation2 + $0xfc] sm:$0x3 pattern:$0x76325410] }
 0x3b5   : > { %v12791_v35 = vrot.slane %v12783_v12, %v16483_v11  ;;  %v6548_v3 = vcombine.low %v18023_v21, %v18051_v23  ;;  %v7834_v16 = vcombine.low %v7826_v18, %v7833_v8  ;;  %v5839_v58 = vrot.slane %v5837_v19, 7  ;;  %v15088_v12 = vld.sshfl [vmem:[#allocation2 + $0xf8] sm:$0x33 pattern:$0x76325410] }
 0x3b6   : > { %v5830_v13 = vsel %vm16733_vm15, %v5825_v60, %v5829_v43  ;;  %v5834_v36 = vor.u32 %v5833_v32, %v5829_v43  ;;  %v5849_v61 = vrot.slane %v5848_v44, 2  ;;  %v12798_v47 = vrot.slane %v12784_v62, %v16483_v11 }
 0x3b7   : > { %v6130_v20 = vcombine.low %v5820_v52, %v5830_v13  ;;  %v6549_v30 = vcombine.low %v14897_v49, %v18047_v39  ;;  %7896 = vrot.lane.b32.xlu0 %v7834_v16, %s15737_s26  ;;  %v6556_v9 = vrot.slane %v6548_v3, %v16483_v11  ;;  %v1657_v21 = vsel %vm16144_vm3, 0, %v1656_v50 }
 0x3b8   : > { %v5835_v42 = vrot.slane %v5834_v36, 2  ;;  %v10802_v23 = vshrl.u32 %v18319_v48, 16  ;;  %v18355_v10 = vsel %vm16733_vm15, %v5849_v61, %v5853_v27  ;;  %v12799_v33 = vcombine.low %v12791_v35, %v12798_v47  ;;  %1658 = vst [vmem:[#allocation2 + $0x94] sm:$0x4] %v1657_v21 }
 0x3b9   : > { %v6138_v29 = vrot.slane %v6130_v20, %v16483_v11  ;;  %v6563_v39 = vrot.slane %v6549_v30, %v16483_v11  ;;  %v10823_v0 = vshrl.u32 %v18019_v17, 16  ;;  %v10826_v26 = vshll.u32 %v18019_v17, 16  ;;  %v18380_v35 = vld.sshfl [vmem:[#allocation2 + $0xb0] sm:$0x33 pattern:$0x76325410] }
 0x3ba   : > { %v5840_v41 = vsel %vm16733_vm15, %v5835_v42, %v5839_v58  ;;  %v10804_v4 = vrot.slane %v10802_v23, 6  ;;  %v10832_v57 = vshll.u32 %v18114_v6, 16  ;;  %v18365_v5 = vcombine.high %v14954_v46, %v14954_v46  ;;  %v14957_v20 = vld.sshfl [vmem:[#allocation2 + $0x124] sm:$0x13 pattern:$0x76325410] }
 0x3bb   : > { %v6131_v48 = vcombine.low %v5840_v41, %v18355_v10  ;;  %v6564_v18 = vcombine.low %v6556_v9, %v6563_v39  ;;  %12876 = vrot.lane.b32.xlu0 %v12799_v33, %s15737_s26  ;;  %v10825_v59 = vrot.slane %v10823_v0, 6  ;;  %v10828_v53 = vrot.slane %v10826_v26, 7  ;;  %v14958_v42 = vld.sshfl [vmem:[#allocation2 + $0x128] sm:$0x33 pattern:$0x76325410] }
 0x3bc   : > { %v10805_v31 = vor.u32 %v10804_v4, %v5853_v27  ;;  %v7632_v40 = vshrl.u32 %v14954_v46, 16  ;;  %v18372_v17 = vrot.slane %v10832_v57, 7  ;;  %v7635_v52 = vshll.u32 %v14954_v46, 16 }
 0x3bd   : > { %v6145_v49 = vrot.slane %v6131_v48, %v16483_v11  ;;  %6662 = vst.msk [vmem:[#allocation3 + $0x68] sm:$0xff] %vm4158_vm1, %v6564_v18  ;;  %v7641_v60 = vshll.u32 %v18365_v5, 16  ;;  %v10829_v8 = vor.u32 %v10828_v53, %v10825_v59  ;;  %v7835_v27 = vcombine.low %v18293_v51, %v18304_v37  ;;  %v14959_v39 = vld.sshfl [vmem:[#allocation2 + $0x12c] sm:$0x13 pattern:$0x76325410] }
 0x3be   : > { %7079 = vst.msk [vmem:[#allocation3 + $0x68] sm:$0xff] %vm4576_vm7, %v7056_v45  ;;  %v10806_v56 = vrot.slane %v10805_v31, 2  ;;  %v7634_v43 = vrot.slane %v7632_v40, 6  ;;  %v7637_v19 = vrot.slane %v7635_v52, 7  ;;  %v11365_v62 = vcombine.high %v15088_v12, %v15088_v12  ;;  %v12038_v45 = vpop.permute.xlu0 %12037 }
 0x3bf   : > { %v6146_v32 = vcombine.low %v6138_v29, %v6145_v49  ;;  %v18378_v44 = vrot.slane %v7641_v60, 7  ;;  %v15065_v3 = vld.sshfl [vmem:[#allocation2 + $0x94] sm:$0x13 pattern:$0x76325410]  ;;  %v10830_v50 = vrot.slane %v10829_v8, 2  ;;  %v7843_v16 = vrot.slane %v7835_v27, %v16483_v11 }
 0x3c0   : > { %v11530_v13 = vcombine.low %v18367_v1, %v18105_v63  ;;  %v4498_v36 = vcombine.low %v18169_v55, %v18187_v25  ;;  %v10539_v51 = vcombine.high %v15065_v3, %v15065_v3  ;;  %v10808_v37 = vshll.u32 %v15065_v3, 16 }
 0x3c1   : > { %6238 = vrot.lane.b32.xlu1 %v6146_v32, %s15738_s27  ;;  %v10812_v58 = vshrl.u32 %v15065_v3, 16  ;;  %v7638_v61 = vor.u32 %v7637_v19, %v7634_v43  ;;  %v10835_v47 = vsel %vm16733_vm15, %v10830_v50, %v18372_v17  ;;  %v11529_v30 = vcombine.low %v15088_v12, %v11365_v62 }
 0x3c2   : > { %v11544_v46 = vrot.slane %v11530_v13, %v16483_v11  ;;  %v4499_v63 = vcombine.low %v18199_v22, %v18380_v35  ;;  %v10810_v9 = vrot.slane %v10808_v37, 7  ;;  %v10818_v25 = vshll.u32 %v10539_v51, 16  ;;  %v14903_v51 = vld.sshfl [vmem:[#allocation2 + $0x10c] sm:$0x3 pattern:$0x76325410] }
 0x3c3   : > { %v10814_v55 = vrot.slane %v10812_v58, 6  ;;  %v7639_v21 = vrot.slane %v7638_v61, 2  ;;  %v11537_v23 = vrot.slane %v11529_v30, %v16483_v11  ;;  %v18396_v29 = vrot.slane %v4498_v36, %v16483_v11  ;;  %v18427_v30 = vld.sshfl [vmem:[#allocation2 + $0x104] sm:$0x3 pattern:$0x76325410] }
 0x3c4   : > { %v18399_v33 = vrot.slane %v4499_v63, %v16483_v11  ;;  %v7308_v41 = vcombine.high %v14957_v20, %v14957_v20  ;;  %v18403_v4 = vsel %vm16733_vm15, %v10806_v56, %v10810_v9  ;;  %v10820_v0 = vrot.slane %v10818_v25, 7 }
 0x3c5   : > { %v10815_v22 = vor.u32 %v10814_v55, %v10810_v9  ;;  %v7644_v26 = vsel %vm16733_vm15, %v7639_v21, %v18378_v44  ;;  %v11111_v12 = vcombine.low %v18355_v10, %v18403_v4  ;;  %v11545_v18 = vcombine.low %v11537_v23, %v11544_v46  ;;  %v14876_v46 = vld.sshfl [vmem:[#allocation2 + $0x98] sm:$0x33 pattern:$0x76325410]  ;;  %v1659_v9 = vld [vmem:[#allocation2 + $0x9c] sm:$0x4] }
 0x3c6   : > { %v7836_v48 = vcombine.low %v18312_v14, %v7644_v26  ;;  %v4514_v57 = vcombine.low %v18396_v29, %v18399_v33  ;;  %v7316_v59 = vcombine.high %v14958_v42, %v14958_v42  ;;  %v7324_v53 = vcombine.high %v14959_v39, %v14959_v39 }
 0x3c7   : > { %v10816_v31 = vrot.slane %v10815_v22, 2  ;;  %v7685_v40 = vshll.u32 %v14957_v20, 16  ;;  %v11119_v49 = vrot.slane %v11111_v12, %v16483_v11  ;;  %11643 = vst.msk [vmem:[#allocation3 + $0x78] sm:$0xff] %vm4158_vm1, %v11545_v18  ;;  %v7689_v60 = vshrl.u32 %v14957_v20, 16 }
 0x3c8   : > { %v7850_v52 = vrot.slane %v7836_v48, %v16483_v11  ;;  %v7695_v56 = vshll.u32 %v7308_v41, 16  ;;  %12061 = vst.msk [vmem:[#allocation3 + $0x78] sm:$0xff] %vm4576_vm7, %v12038_v45  ;;  %v7700_v8 = vshrl.u32 %v14958_v42, 16  ;;  %v7703_v43 = vshll.u32 %v14958_v42, 16 }
 0x3c9   : > { %v18418_v14 = vsel %vm16733_vm15, %v10816_v31, %v10820_v0  ;;  %v18421_v10 = vrot.slane %v7685_v40, 7  ;;  %v7691_v19 = vrot.slane %v7689_v60, 6  ;;  %v7709_v13 = vshll.u32 %v7316_v59, 16 }
 0x3ca   : > { %v11112_v27 = vcombine.low %v18418_v14, %v10835_v47  ;;  %v7851_v32 = vcombine.low %v7843_v16, %v7850_v52  ;;  %v7697_v62 = vrot.slane %v7695_v56, 7  ;;  %v7702_v3 = vrot.slane %v7700_v8, 6  ;;  %v14956_v52 = vld.sshfl [vmem:[#allocation2 + $0x120] sm:$0x33 pattern:$0x76325410] }
 0x3cb   : > { %v7705_v50 = vrot.slane %v7703_v43, 7  ;;  %v7713_v36 = vshrl.u32 %v7316_v59, 16  ;;  %v7692_v58 = vor.u32 %v7691_v19, %v18421_v10  ;;  %v7719_v61 = vshll.u32 %v14959_v39, 16  ;;  %v7060_v19 = vpop.permute.xlu0 %7059 }
 0x3cc   : > { %v11126_v37 = vrot.slane %v11112_v27, %v16483_v11  ;;  %7898 = vrot.lane.b32.xlu0 %v7851_v32, %s15737_s26  ;;  %v7723_v20 = vshrl.u32 %v14959_v39, 16  ;;  %v7711_v16 = vrot.slane %v7709_v13, 7  ;;  %v7729_v42 = vshll.u32 %v7324_v53, 16 }
 0x3cd   : > { %v7706_v47 = vor.u32 %v7705_v50, %v7702_v3  ;;  %v7715_v63 = vrot.slane %v7713_v36, 6  ;;  %v7693_v25 = vrot.slane %v7692_v58, 2  ;;  %v7721_v21 = vrot.slane %v7719_v61, 7 }
 0x3ce   : > { %v11127_v55 = vcombine.low %v11119_v49, %v11126_v37  ;;  %v7725_v23 = vrot.slane %v7723_v20, 6  ;;  %v7731_v41 = vrot.slane %v7729_v42, 7  ;;  %v6582_v22 = vcombine.low %v18427_v30, %v18278_v7  ;;  %v14955_v59 = vld.sshfl [vmem:[#allocation2 + $0x11c] sm:$0x13 pattern:$0x76325410] }
 0x3cf   : > { %v7707_v29 = vrot.slane %v7706_v47, 2  ;;  %v7716_v33 = vor.u32 %v7715_v63, %v7711_v16  ;;  %v7698_v39 = vsel %vm16733_vm15, %v7693_v25, %v7697_v62  ;;  %v6583_v26 = vcombine.low %v18289_v28, %v14903_v51  ;;  %v14900_v3 = vld.sshfl [vmem:[#allocation2 + $0x100] sm:$0x33 pattern:$0x76325410] }
 0x3d0   : > { %11219 = vrot.lane.b32.xlu1 %v11127_v55, %s15738_s27  ;;  %v7726_v0 = vor.u32 %v7725_v23, %v7721_v21  ;;  %v1660_v12 = vsel %vm16144_vm3, 0, %v1659_v9  ;;  %v6590_v18 = vrot.slane %v6582_v22, %v16483_v11  ;;  %v5582_v31 = vcombine.high %v14876_v46, %v14876_v46  ;;  %v15691_v42 = vld.sshfl [vmem:[#allocation2 + $0xf8] sm:$0x33 pattern:$0x76325410] }
 0x3d1   : > { %v7712_v48 = vsel %vm16733_vm15, %v7707_v29, %v7711_v16  ;;  %v7717_v45 = vrot.slane %v7716_v33, 2  ;;  %1661 = vst [vmem:[#allocation2 + $0x9c] sm:$0x4] %v1660_v12  ;;  %v6597_v49 = vrot.slane %v6583_v26, %v16483_v11  ;;  %v5876_v56 = vshrl.u32 %v14876_v46, 16 }
 0x3d2   : > { %v7727_v53 = vrot.slane %v7726_v0, 2  ;;  %v7869_v40 = vcombine.low %v7698_v39, %v7712_v48  ;;  %v5879_v8 = vshll.u32 %v14876_v46, 16  ;;  %v5885_v43 = vshll.u32 %v5582_v31, 16 }
 0x3d3   : > { %v7722_v60 = vsel %vm16733_vm15, %v7717_v45, %v7721_v21  ;;  %v6598_v62 = vcombine.low %v6590_v18, %v6597_v49  ;;  %v5878_v13 = vrot.slane %v5876_v56, 6  ;;  %v5889_v37 = vshrl.u32 %v5582_v31, 16 }
 0x3d4   : > { %4561 = vrot.lane.b32.xlu1 %v4514_v57, %s15740_s30  ;;  %v7732_v27 = vsel %vm16733_vm15, %v7727_v53, %v7731_v41  ;;  %v7877_v32 = vrot.slane %v7869_v40, %v16483_v11  ;;  %v5881_v36 = vrot.slane %v5879_v8, 7  ;;  %v5887_v51 = vrot.slane %v5885_v43, 7  ;;  %v18466_v43 = vld.sshfl [vmem:[#allocation2 + $0xb8] sm:$0x33 pattern:$0x76325410] }
 0x3d5   : > { %v7870_v50 = vcombine.low %v7722_v60, %v7732_v27  ;;  %6664 = vst.msk [vmem:[#allocation3 + $0xa8] sm:$0xff] %vm4158_vm1, %v6598_v62  ;;  %v7292_v58 = vcombine.high %v14955_v59, %v14955_v59  ;;  %v7300_v61 = vcombine.high %v14956_v52, %v14956_v52  ;;  %v7645_v46 = vshrl.u32 %v18365_v5, 16 }
 0x3d6   : > { %7081 = vst.msk [vmem:[#allocation3 + $0xa8] sm:$0xff] %vm4576_vm7, %v7060_v19  ;;  %v5882_v57 = vor.u32 %v5881_v36, %v5878_v13  ;;  %v7651_v47 = vshll.u32 %v14955_v59, 16  ;;  %v5891_v63 = vrot.slane %v5889_v37, 6  ;;  %v6399_v9 = vcombine.high %v15691_v42, %v15691_v42 }
 0x3d7   : > { %v7884_v20 = vrot.slane %v7870_v50, %v16483_v11  ;;  %v6414_v55 = vcombine.high %v14900_v3, %v14900_v3  ;;  %v7647_v29 = vrot.slane %v7645_v46, 6  ;;  %v7655_v22 = vshrl.u32 %v14955_v59, 16  ;;  %v14835_v50 = vld.sshfl [vmem:[#allocation2 + $0xb4] sm:$0x3 pattern:$0x76325410] }
 0x3d8   : > { %v18451_v16 = vld.sshfl [vmem:[#allocation2 + $0x9c] sm:$0x13 pattern:$0x76325410]  ;;  %v5883_v21 = vrot.slane %v5882_v57, 2  ;;  %v5892_v33 = vor.u32 %v5891_v63, %v5887_v51  ;;  %v7653_v41 = vrot.slane %v7651_v47, 7  ;;  %v6147_v0 = vcombine.low %v18403_v4, %v18418_v14 }
 0x3d9   : > { %v7885_v25 = vcombine.low %v7877_v32, %v7884_v20  ;;  %v5895_v23 = vshll.u32 %v18451_v16, 16  ;;  %v7648_v26 = vor.u32 %v7647_v29, %v18378_v44  ;;  %v7657_v48 = vrot.slane %v7655_v22, 6  ;;  %v18486_v57 = vld.sshfl [vmem:[#allocation2 + $0x78] sm:$0x33 pattern:$0x76325410] }
 0x3da   : > { %v5888_v5 = vsel %vm16733_vm15, %v5883_v21, %v5887_v51  ;;  %v5893_v12 = vrot.slane %v5892_v33, 2  ;;  %v7661_v45 = vshll.u32 %v7292_v58, 16  ;;  %v7666_v18 = vshrl.u32 %v14956_v52, 16  ;;  %v1662_v33 = vld [vmem:[#allocation2 + $0xa4] sm:$0x4] }
 0x3db   : > { %7902 = vrot.lane.b32.xlu0 %v7885_v25, %s15737_s26  ;;  %v18457_v39 = vrot.slane %v5895_v23, 7  ;;  %v6155_v31 = vrot.slane %v6147_v0, %v16483_v11  ;;  %v7649_v53 = vrot.slane %v7648_v26, 2  ;;  %v7669_v59 = vshll.u32 %v14956_v52, 16  ;;  %v7058_v25 = vpop.permute.xlu0 %7057 }
 0x3dc   : > { %v7675_v40 = vshll.u32 %v7300_v61, 16  ;;  %v7658_v60 = vor.u32 %v7657_v48, %v7653_v41  ;;  %v7663_v56 = vrot.slane %v7661_v45, 7  ;;  %v7668_v8 = vrot.slane %v7666_v18, 6 }
 0x3dd   : > { %v5898_v49 = vsel %vm16733_vm15, %v5893_v12, %v18457_v39  ;;  %v7654_v44 = vsel %vm16733_vm15, %v7649_v53, %v7653_v41  ;;  %v7671_v14 = vrot.slane %v7669_v59, 7  ;;  %v7679_v19 = vshrl.u32 %v7300_v61, 16  ;;  %v18480_v58 = vld.sshfl [vmem:[#allocation2 + $0x70] sm:$0x33 pattern:$0x76325410] }
 0x3de   : > { %v6148_v4 = vcombine.low %v5888_v5, %v5898_v49  ;;  %v7677_v27 = vrot.slane %v7675_v40, 7  ;;  %v7659_v32 = vrot.slane %v7658_v60, 2  ;;  %v6565_v52 = vcombine.low %v6399_v9, %v18367_v1  ;;  %v15009_v9 = vld.sshfl [vmem:[#allocation2 + $0x74] sm:$0x3 pattern:$0x76325410] }
 0x3df   : > { %v6566_v62 = vcombine.low %v14900_v3, %v6414_v55  ;;  %v7672_v36 = vor.u32 %v7671_v14, %v7668_v8  ;;  %v18474_v51 = vcombine.high %v18380_v35, %v18380_v35  ;;  %v18478_v37 = vcombine.high %v18466_v43, %v18466_v43  ;;  %v1665_v41 = vld [vmem:[#allocation2 + $0xac] sm:$0x4]  ;;  %v15692_v18 = vld.sshfl [vmem:[#allocation2 + $0x100] sm:$0x33 pattern:$0x76325410] }
 0x3e0   : > { %v6162_v13 = vrot.slane %v6148_v4, %v16483_v11  ;;  %v7664_v61 = vsel %vm16733_vm15, %v7659_v32, %v7663_v56  ;;  %v7681_v20 = vrot.slane %v7679_v19, 6  ;;  %v6573_v1 = vrot.slane %v6565_v52, %v16483_v11  ;;  %v15070_v53 = vld.sshfl [vmem:[#allocation2 + $0xa8] sm:$0x33 pattern:$0x76325410] }
 0x3e1   : > { %v6580_v3 = vrot.slane %v6566_v62, %v16483_v11  ;;  %v7673_v47 = vrot.slane %v7672_v36, 2  ;;  %v7852_v63 = vcombine.low %v7654_v44, %v7664_v61  ;;  %v4515_v42 = vcombine.low %v18474_v51, %v14835_v50  ;;  %v15128_v56 = vld.sshfl [vmem:[#allocation2 + $0xd8] sm:$0x33 pattern:$0x76325410] }
 0x3e2   : > { %v6163_v46 = vcombine.low %v6155_v31, %v6162_v13  ;;  %v7682_v55 = vor.u32 %v7681_v20, %v7677_v27  ;;  %v4516_v23 = vcombine.low %v18466_v43, %v18478_v37  ;;  %v18493_v29 = vcombine.high %v18480_v58, %v18480_v58  ;;  %v18521_v52 = vld.sshfl [vmem:[#allocation2 + $0xe0] sm:$0x33 pattern:$0x76325410] }
 0x3e3   : > { %v6581_v21 = vcombine.low %v6573_v1, %v6580_v3  ;;  %v7678_v22 = vsel %vm16733_vm15, %v7673_v47, %v7677_v27  ;;  %v7860_v5 = vrot.slane %v7852_v63, %v16483_v11  ;;  %v4523_v0 = vrot.slane %v4515_v42, %v16483_v11  ;;  %v18518_v27 = vld.sshfl [vmem:[#allocation2 + $0xdc] sm:$0x13 pattern:$0x76325410]  ;;  %v12040_v1 = vpop.permute.xlu0 %12039 }
 0x3e4   : > { %6240 = vrot.lane.b32.xlu1 %v6163_v46, %s15738_s27  ;;  %v9387_v26 = vcombine.low %v15009_v9, %v18486_v57  ;;  %v7683_v12 = vrot.slane %v7682_v55, 2  ;;  %v4530_v48 = vrot.slane %v4516_v23, %v16483_v11  ;;  %v9386_v45 = vcombine.low %v18480_v58, %v18493_v29  ;;  %v18532_v42 = vld.sshfl [vmem:[#allocation2 + $0xa0] sm:$0x33 pattern:$0x76325410] }
 0x3e5   : > { %6663 = vst.msk [vmem:[#allocation3 + $0x88] sm:$0xff] %vm4158_vm1, %v6581_v21  ;;  %v11380_v31 = vcombine.high %v15692_v18, %v15692_v18  ;;  %v11547_v40 = vcombine.low %v18278_v7, %v18289_v28  ;;  %v1663_v49 = vsel %vm16144_vm3, 0, %v1662_v33  ;;  %v1666_v60 = vsel %vm16144_vm3, 0, %v1665_v41 }
 0x3e6   : > { %7080 = vst.msk [vmem:[#allocation3 + $0x88] sm:$0xff] %vm4576_vm7, %v7058_v25  ;;  %v9401_v59 = vrot.slane %v9387_v26, %v16483_v11  ;;  %v7688_v8 = vsel %vm16733_vm15, %v7683_v12, %v18421_v10  ;;  %v4531_v4 = vcombine.low %v4523_v0, %v4530_v48  ;;  %v9394_v44 = vrot.slane %v9386_v45, %v16483_v11 }
 0x3e7   : > { %v11546_v14 = vcombine.low %v11380_v31, %v18427_v30  ;;  %1664 = vst [vmem:[#allocation2 + $0xa4] sm:$0x4] %v1663_v49  ;;  %1667 = vst [vmem:[#allocation2 + $0xac] sm:$0x4] %v1666_v60  ;;  %v7853_v7 = vcombine.low %v7678_v22, %v7688_v8  ;;  %v11561_v28 = vrot.slane %v11547_v40, %v16483_v11  ;;  %v10891_v19 = vshrl.u32 %v15070_v53, 16 }
 0x3e8   : > { %v10579_v32 = vcombine.high %v15070_v53, %v15070_v53  ;;  %4563 = vrot.lane.b32.xlu1 %v4531_v4, %s15740_s30  ;;  %v9402_v62 = vcombine.low %v9394_v44, %v9401_v59  ;;  %v10894_v50 = vshll.u32 %v15070_v53, 16  ;;  %v12122_v13 = vcombine.high %v15128_v56, %v15128_v56 }
 0x3e9   : > { %v11554_v10 = vrot.slane %v11546_v14, %v16483_v11  ;;  %v7867_v30 = vrot.slane %v7853_v7, %v16483_v11  ;;  %v10893_v36 = vrot.slane %v10891_v19, 6  ;;  %v12130_v47 = vcombine.high %v18518_v27, %v18518_v27 }
 0x3ea   : > { %v10900_v61 = vshll.u32 %v10579_v32, 16  ;;  %v10904_v20 = vshrl.u32 %v10579_v32, 16  ;;  %v10896_v46 = vrot.slane %v10894_v50, 7  ;;  %v18530_v63 = vcombine.high %v18521_v52, %v18521_v52 }
 0x3eb   : > { %v11562_v3 = vcombine.low %v11554_v10, %v11561_v28  ;;  %v7868_v9 = vcombine.low %v7860_v5, %v7867_v30  ;;  %v12308_v21 = vshrl.u32 %v15128_v56, 16  ;;  %v12311_v33 = vshll.u32 %v15128_v56, 16 }
 0x3ec   : > { %v10902_v55 = vrot.slane %v10900_v61, 7  ;;  %v10906_v25 = vrot.slane %v10904_v20, 6  ;;  %v10897_v23 = vor.u32 %v10896_v46, %v10893_v36  ;;  %v12317_v41 = vshll.u32 %v12122_v13, 16 }
 0x3ed   : > { %11644 = vst.msk [vmem:[#allocation3 + $0x98] sm:$0xff] %vm4158_vm1, %v11562_v3  ;;  %v12321_v22 = vshrl.u32 %v12122_v13, 16  ;;  %7900 = vrot.lane.b32.xlu0 %v7868_v9, %s15737_s26  ;;  %v12310_v12 = vrot.slane %v12308_v21, 6  ;;  %v12327_v48 = vshll.u32 %v18518_v27, 16  ;;  %v5590_v5 = vcombine.high %v18451_v16, %v18451_v16 }
 0x3ee   : > { %12062 = vst.msk [vmem:[#allocation3 + $0x98] sm:$0xff] %vm4576_vm7, %v12040_v1  ;;  %v15069_v0 = vld.sshfl [vmem:[#allocation2 + $0xa4] sm:$0x13 pattern:$0x76325410]  ;;  %v10907_v26 = vor.u32 %v10906_v25, %v10902_v55  ;;  %v18542_v59 = vcombine.high %v18532_v42, %v18532_v42  ;;  %v10898_v49 = vrot.slane %v10897_v23, 2 }
 0x3ef   : > { %v15071_v45 = vld.sshfl [vmem:[#allocation2 + $0xac] sm:$0x13 pattern:$0x76325410]  ;;  %v10571_v18 = vcombine.high %v15069_v0, %v15069_v0  ;;  %v10876_v31 = vshll.u32 %v15069_v0, 16  ;;  %v10880_v53 = vshrl.u32 %v15069_v0, 16 }
 0x3f0   : > { %v10587_v40 = vcombine.high %v15071_v45, %v15071_v45  ;;  %v10908_v60 = vrot.slane %v10907_v26, 2  ;;  %v10910_v56 = vshll.u32 %v15071_v45, 16  ;;  %v10914_v14 = vshrl.u32 %v15071_v45, 16 }
 0x3f1   : > { %v18544_v8 = vrot.slane %v10876_v31, 7  ;;  %v10882_v4 = vrot.slane %v10880_v53, 6  ;;  %v10886_v44 = vshll.u32 %v10571_v18, 16  ;;  %9539 = vrot.lane.b32.xlu0 %v9402_v62, %s15740_s30  ;;  %v18549_v7 = vsel %vm16733_vm15, %v10898_v49, %v10902_v55 }
 0x3f2   : > { %v10912_v28 = vrot.slane %v10910_v56, 7  ;;  %v10920_v32 = vshll.u32 %v10587_v40, 16  ;;  %v12313_v19 = vrot.slane %v12311_v33, 7  ;;  %v10916_v13 = vrot.slane %v10914_v14, 6 }
 0x3f3   : > { %v10883_v10 = vor.u32 %v10882_v4, %v18544_v8  ;;  %v10888_v50 = vrot.slane %v10886_v44, 7  ;;  %v12319_v30 = vrot.slane %v12317_v41, 7  ;;  %v12323_v1 = vrot.slane %v12321_v22, 6 }
 0x3f4   : > { %v18554_v36 = vsel %vm16733_vm15, %v10908_v60, %v10912_v28  ;;  %v10922_v61 = vrot.slane %v10920_v32, 7  ;;  %v12314_v20 = vor.u32 %v12313_v19, %v12310_v12  ;;  %v10917_v3 = vor.u32 %v10916_v13, %v10912_v28  ;;  %v15032_v14 = vld.sshfl [vmem:[#allocation2 + $0x8] sm:$0x33 pattern:$0x76325410] }
 0x3f5   : > { %v10884_v62 = vrot.slane %v10883_v10, 2  ;;  %v12329_v46 = vrot.slane %v12327_v48, 7  ;;  %v12331_v9 = vshrl.u32 %v18518_v27, 16  ;;  %v12324_v25 = vor.u32 %v12323_v1, %v12319_v30 }
 0x3f6   : > { %v12315_v55 = vrot.slane %v12314_v20, 2  ;;  %v12337_v21 = vshll.u32 %v12130_v47, 16  ;;  %v12342_v23 = vshrl.u32 %v18521_v52, 16  ;;  %v10918_v41 = vrot.slane %v10917_v3, 2 }
 0x3f7   : > { %v18560_v33 = vsel %vm16733_vm15, %v10884_v62, %v10888_v50  ;;  %v12333_v0 = vrot.slane %v12331_v9, 6  ;;  %v12345_v26 = vshll.u32 %v18521_v52, 16  ;;  %v12325_v27 = vrot.slane %v12324_v25, 2 }
 0x3f8   : > { %v11145_v22 = vcombine.low %v18560_v33, %v18549_v7  ;;  %v12320_v12 = vsel %vm16733_vm15, %v12315_v55, %v12319_v30  ;;  %v12339_v48 = vrot.slane %v12337_v21, 7  ;;  %v18569_v47 = vsel %vm16733_vm15, %v10918_v41, %v10922_v61  ;;  %v15033_v28 = vld.sshfl [vmem:[#allocation2 + $0xc] sm:$0x13 pattern:$0x76325410] }
 0x3f9   : > { %v12334_v45 = vor.u32 %v12333_v0, %v12329_v46  ;;  %v12344_v18 = vrot.slane %v12342_v23, 6  ;;  %v12347_v31 = vrot.slane %v12345_v26, 7  ;;  %v11146_v53 = vcombine.low %v18554_v36, %v18569_v47  ;;  %v15034_v1 = vld.sshfl [vmem:[#allocation2 + $0x10] sm:$0x33 pattern:$0x76325410] }
 0x3fa   : > { %v11153_v52 = vrot.slane %v11145_v22, %v16483_v11  ;;  %v12330_v40 = vsel %vm16733_vm15, %v12325_v27, %v12329_v46  ;;  %v12351_v49 = vshll.u32 %v18530_v63, 16  ;;  %v5899_v44 = vshrl.u32 %v18451_v16, 16 }
 0x3fb   : > { %v12335_v60 = vrot.slane %v12334_v45, 2  ;;  %v12348_v56 = vor.u32 %v12347_v31, %v12344_v18  ;;  %v12715_v4 = vcombine.low %v12320_v12, %v12330_v40  ;;  %v11160_v32 = vrot.slane %v11146_v53, %v16483_v11 }
 0x3fc   : > { %v18579_v19 = vrot.slane %v12351_v49, 7  ;;  %v5905_v10 = vshll.u32 %v5590_v5, 16  ;;  %v5910_v50 = vshrl.u32 %v18532_v42, 16  ;;  %v5901_v20 = vrot.slane %v5899_v44, 6 }
 0x3fd   : > { %v12340_v13 = vsel %vm16733_vm15, %v12335_v60, %v12339_v48  ;;  %v12349_v30 = vrot.slane %v12348_v56, 2  ;;  %v12723_v61 = vrot.slane %v12715_v4, %v16483_v11  ;;  %v11161_v62 = vcombine.low %v11153_v52, %v11160_v32 }
 0x3fe   : > { %v5907_v3 = vrot.slane %v5905_v10, 7  ;;  %v5912_v16 = vrot.slane %v5910_v50, 6  ;;  %v5913_v46 = vshll.u32 %v18532_v42, 16  ;;  %v5902_v5 = vor.u32 %v5901_v20, %v18457_v39 }
 0x3ff   : > { %v12354_v9 = vsel %vm16733_vm15, %v12349_v30, %v18579_v19  ;;  %v5919_v55 = vshll.u32 %v18542_v59, 16  ;;  %v5923_v25 = vshrl.u32 %v18542_v59, 16  ;;  %11223 = vrot.lane.b32.xlu1 %v11161_v62, %s15738_s27  ;;  %v9630_v41 = vcombine.high %v15032_v14, %v15032_v14 }
 0x400   : > { %v12716_v21 = vcombine.low %v12340_v13, %v12354_v9  ;;  %v5915_v23 = vrot.slane %v5913_v46, 7  ;;  %v9638_v0 = vcombine.high %v15033_v28, %v15033_v28  ;;  %v5903_v26 = vrot.slane %v5902_v5, 2 }
 0x401   : > { %v5921_v22 = vrot.slane %v5919_v55, 7  ;;  %v5925_v12 = vrot.slane %v5923_v25, 6  ;;  %v18593_v42 = vcombine.high %v15034_v1, %v15034_v1  ;;  %v9816_v45 = vshrl.u32 %v15032_v14, 16 }
 0x402   : > { %v12730_v27 = vrot.slane %v12716_v21, %v16483_v11  ;;  %v5916_v48 = vor.u32 %v5915_v23, %v5912_v16  ;;  %v9819_v18 = vshll.u32 %v15032_v14, 16  ;;  %v18598_v31 = vsel %vm16733_vm15, %v5903_v26, %v5907_v3  ;;  %v15152_v55 = vld.sshfl [vmem:[#allocation2 + $0x140] sm:$0x33 pattern:$0x76325410] }
 0x403   : > { %v5926_v59 = vor.u32 %v5925_v12, %v5921_v22  ;;  %v9825_v53 = vshll.u32 %v9630_v41, 16  ;;  %v9829_v52 = vshrl.u32 %v9630_v41, 16  ;;  %v9818_v60 = vrot.slane %v9816_v45, 6 }
 0x404   : > { %v12731_v40 = vcombine.low %v12723_v61, %v12730_v27  ;;  %v5917_v49 = vrot.slane %v5916_v48, 2  ;;  %v9821_v56 = vrot.slane %v9819_v18, 7  ;;  %v9835_v10 = vshll.u32 %v15033_v28, 16 }
 0x405   : > { %v5927_v4 = vrot.slane %v5926_v59, 2  ;;  %v9827_v44 = vrot.slane %v9825_v53, 7  ;;  %v9831_v32 = vrot.slane %v9829_v52, 6  ;;  %v9839_v13 = vshrl.u32 %v15033_v28, 16 }
 0x406   : > { %12868 = vrot.lane.b32.xlu0 %v12731_v40, %s15737_s26  ;;  %v5922_v14 = vsel %vm16733_vm15, %v5917_v49, %v5921_v22  ;;  %v9822_v50 = vor.u32 %v9821_v56, %v9818_v60  ;;  %v9845_v30 = vshll.u32 %v9638_v0, 16  ;;  %v9837_v3 = vrot.slane %v9835_v10, 7  ;;  %v15153_v41 = vld.sshfl [vmem:[#allocation2 + $0x144] sm:$0x13 pattern:$0x76325410] }
 0x407   : > { %v5932_v20 = vsel %vm16733_vm15, %v5927_v4, %v18544_v8  ;;  %v6164_v61 = vcombine.low %v18598_v31, %v5922_v14  ;;  %v9832_v62 = vor.u32 %v9831_v32, %v9827_v44  ;;  %v9841_v9 = vrot.slane %v9839_v13, 6  ;;  %v15154_v22 = vld.sshfl [vmem:[#allocation2 + $0x148] sm:$0x33 pattern:$0x76325410] }
 0x408   : > { %v6165_v16 = vcombine.low %v5932_v20, %v18560_v33  ;;  %v9823_v46 = vrot.slane %v9822_v50, 2  ;;  %v9847_v5 = vrot.slane %v9845_v30, 7  ;;  %v9850_v28 = vshrl.u32 %v15034_v1, 16 }
 0x409   : > { %v6172_v25 = vrot.slane %v6164_v61, %v16483_v11  ;;  %v18609_v21 = vrot.slane %v9832_v62, 2  ;;  %v9853_v23 = vshll.u32 %v15034_v1, 16  ;;  %v9842_v26 = vor.u32 %v9841_v9, %v9837_v3 }
 0x40a   : > { %v6179_v0 = vrot.slane %v6165_v16, %v16483_v11  ;;  %v18614_v8 = vsel %vm16733_vm15, %v9823_v46, %v9827_v44  ;;  %v9859_v33 = vshll.u32 %v18593_v42, 16  ;;  %v9852_v27 = vrot.slane %v9850_v28, 6 }
 0x40b   : > { %v9838_v12 = vsel %vm16733_vm15, %v18609_v21, %v9837_v3  ;;  %v9855_v48 = vrot.slane %v9853_v23, 7  ;;  %v10836_v45 = vshrl.u32 %v18114_v6, 16  ;;  %v9843_v18 = vrot.slane %v9842_v26, 2 }
 0x40c   : > { %v6180_v1 = vcombine.low %v6172_v25, %v6179_v0  ;;  %v18621_v59 = vrot.slane %v9859_v33, 7  ;;  %v10223_v53 = vcombine.low %v18614_v8, %v9838_v12  ;;  %v11129_v49 = vcombine.low %v5922_v14, %v5932_v20 }
 0x40d   : > { %v9856_v52 = vor.u32 %v9855_v48, %v9852_v27  ;;  %v10838_v40 = vrot.slane %v10836_v45, 6  ;;  %v12959_v60 = vcombine.high %v15152_v55, %v15152_v55  ;;  %v9848_v56 = vsel %vm16733_vm15, %v9843_v18, %v9847_v5  ;;  %v18640_v48 = vld.sshfl [vmem:[#allocation2 + $0xc0] sm:$0x33 pattern:$0x76325410] }
 0x40e   : > { %6242 = vrot.lane.b32.xlu1 %v6180_v1, %s15738_s27  ;;  %v10231_v4 = vrot.slane %v10223_v53, %v16483_v11  ;;  %v12967_v44 = vcombine.high %v15153_v41, %v15153_v41  ;;  %v18628_v32 = vcombine.high %v15154_v22, %v15154_v22  ;;  %v11143_v50 = vrot.slane %v11129_v49, %v16483_v11  ;;  %v14839_v53 = vld.sshfl [vmem:[#allocation2 + $0xc4] sm:$0x3 pattern:$0x76325410] }
 0x40f   : > { %v9857_v6 = vrot.slane %v9856_v52, 2  ;;  %v10839_v10 = vor.u32 %v10838_v40, %v18372_v17  ;;  %v13145_v13 = vshrl.u32 %v15152_v55, 16  ;;  %v13148_v30 = vshll.u32 %v15152_v55, 16  ;;  %v18642_v52 = vpop.permute.xlu0 %8727 }
 0x410   : > { %v13154_v61 = vshll.u32 %v12959_v60, 16  ;;  %v13158_v14 = vshrl.u32 %v12959_v60, 16  ;;  %v13164_v20 = vshll.u32 %v15153_v41, 16  ;;  %v13168_v46 = vshrl.u32 %v15153_v41, 16 }
 0x411   : > { %v9862_v62 = vsel %vm16733_vm15, %v9857_v6, %v18621_v59  ;;  %v10840_v3 = vrot.slane %v10839_v10, 2  ;;  %v13147_v16 = vrot.slane %v13145_v13, 6  ;;  %v13150_v5 = vrot.slane %v13148_v30, 7 }
 0x412   : > { %v10224_v9 = vcombine.low %v9848_v56, %v9862_v62  ;;  %v13156_v25 = vrot.slane %v13154_v61, 7  ;;  %v13160_v28 = vrot.slane %v13158_v14, 6  ;;  %v13166_v23 = vrot.slane %v13164_v20, 7 }
 0x413   : > { %v10845_v17 = vsel %vm16733_vm15, %v10840_v3, %v18457_v39  ;;  %v13170_v55 = vrot.slane %v13168_v46, 6  ;;  %v13174_v0 = vshll.u32 %v12967_v44, 16  ;;  %v13151_v12 = vor.u32 %v13150_v5, %v13147_v16  ;;  %v15057_v56 = vld.sshfl [vmem:[#allocation2 + $0x74] sm:$0x13 pattern:$0x76325410] }
 0x414   : > { %v10238_v26 = vrot.slane %v10224_v9, %v16483_v11  ;;  %v11128_v33 = vcombine.low %v10845_v17, %v18598_v31  ;;  %v13161_v27 = vor.u32 %v13160_v28, %v13156_v25  ;;  %v13179_v1 = vshrl.u32 %v15154_v22, 16  ;;  %v14837_v3 = vld.sshfl [vmem:[#allocation2 + $0xbc] sm:$0x3 pattern:$0x76325410] }
 0x415   : > { %v13171_v41 = vor.u32 %v13170_v55, %v13166_v23  ;;  %v13176_v45 = vrot.slane %v13174_v0, 7  ;;  %v13182_v18 = vshll.u32 %v15154_v22, 16  ;;  %v13152_v49 = vrot.slane %v13151_v12, 2 }
 0x416   : > { %v10239_v40 = vcombine.low %v10231_v4, %v10238_v26  ;;  %v11136_v39 = vrot.slane %v11128_v33, %v16483_v11  ;;  %v13162_v60 = vrot.slane %v13161_v27, 2  ;;  %v13181_v6 = vrot.slane %v13179_v1, 6 }
 0x417   : > { %v13172_v44 = vrot.slane %v13171_v41, 2  ;;  %v13184_v31 = vrot.slane %v13182_v18, 7  ;;  %v13188_v10 = vshll.u32 %v18628_v32, 16  ;;  %v13157_v22 = vsel %vm16733_vm15, %v13152_v49, %v13156_v25 }
 0x418   : > { %10376 = vrot.lane.b32.xlu0 %v10239_v40, %s15737_s26  ;;  %v11144_v13 = vcombine.low %v11136_v39, %v11143_v50  ;;  %v13167_v30 = vsel %vm16733_vm15, %v13162_v60, %v13166_v23  ;;  %v18653_v4 = vcombine.high %v18640_v48, %v18640_v48  ;;  %v4532_v50 = vcombine.low %v14837_v3, %v18640_v48  ;;  %v18669_v23 = vpop.permute.xlu0 %8729 }
 0x419   : > { %v13177_v61 = vsel %vm16733_vm15, %v13172_v44, %v13176_v45  ;;  %v13185_v14 = vor.u32 %v13184_v31, %v13181_v6  ;;  %v18657_v20 = vrot.slane %v13188_v10, 7  ;;  %v13552_v62 = vcombine.low %v13157_v22, %v13167_v30 }
 0x41a   : > { %11221 = vrot.lane.b32.xlu1 %v11144_v13, %s15738_s27  ;;  %v4533_v16 = vcombine.low %v18653_v4, %v14839_v53  ;;  %v10475_v46 = vcombine.high %v15057_v56, %v15057_v56  ;;  %v18664_v9 = vcombine.high %v18486_v57, %v18486_v57  ;;  %v10653_v28 = vshrl.u32 %v18480_v58, 16 }
 0x41b   : > { %v13186_v5 = vrot.slane %v13185_v14, 2  ;;  %v13560_v25 = vrot.slane %v13552_v62, %v16483_v11  ;;  %v10656_v17 = vshll.u32 %v18480_v58, 16  ;;  %v4540_v55 = vrot.slane %v4532_v50, %v16483_v11 }
 0x41c   : > { %v4547_v0 = vrot.slane %v4533_v16, %v16483_v11  ;;  %v10662_v26 = vshll.u32 %v18493_v29, 16  ;;  %v10666_v33 = vshrl.u32 %v18493_v29, 16  ;;  %v10655_v27 = vrot.slane %v10653_v28, 6  ;;  %v18683_v14 = vpop.permute.xlu0 %13711 }
 0x41d   : > { %v13191_v12 = vsel %vm16733_vm15, %v13186_v5, %v18657_v20  ;;  %v10658_v41 = vrot.slane %v10656_v17, 7  ;;  %v10672_v45 = vshll.u32 %v15057_v56, 16  ;;  %v10676_v49 = vshrl.u32 %v15057_v56, 16  ;;  %20775 = vst [vmem:[#allocation27_spill] sm:$0xff] %v18683_v14 }
 0x41e   : > { %v13553_v1 = vcombine.low %v13177_v61, %v13191_v12  ;;  %v4548_v18 = vcombine.low %v4540_v55, %v4547_v0  ;;  %v10664_v58 = vrot.slane %v10662_v26, 7  ;;  %v10668_v53 = vrot.slane %v10666_v33, 6  ;;  %v18690_v28 = vld.sshfl [vmem:[#allocation2 + $0x150] sm:$0x33 pattern:$0x76325410] }
 0x41f   : > { %v10659_v40 = vor.u32 %v10658_v41, %v10655_v27  ;;  %v10674_v39 = vrot.slane %v10672_v45, 7  ;;  %v10682_v60 = vshll.u32 %v10475_v46, 16  ;;  %v10687_v6 = vshrl.u32 %v18486_v57, 16 }
 0x420   : > { %v13567_v44 = vrot.slane %v13553_v1, %v16483_v11  ;;  %4565 = vrot.lane.b32.xlu1 %v4548_v18, %s15740_s30  ;;  %v10669_v29 = vor.u32 %v10668_v53, %v10664_v58  ;;  %v10690_v31 = vshll.u32 %v18486_v57, 16  ;;  %v10678_v13 = vrot.slane %v10676_v49, 6  ;;  %v15107_v57 = vld.sshfl [vmem:[#allocation2 + $0x14c] sm:$0x3 pattern:$0x76325410] }
 0x421   : > { %v10660_v10 = vrot.slane %v10659_v40, 2  ;;  %v10684_v22 = vrot.slane %v10682_v60, 7  ;;  %v10696_v30 = vshll.u32 %v18664_v9, 16  ;;  %v10689_v56 = vrot.slane %v10687_v6, 6 }
 0x422   : > { %v13568_v61 = vcombine.low %v13560_v25, %v13567_v44  ;;  %v10670_v62 = vrot.slane %v10669_v29, 2  ;;  %v10692_v3 = vrot.slane %v10690_v31, 7  ;;  %v10679_v16 = vor.u32 %v10678_v13, %v10674_v39  ;;  %v18697_v26 = vld.sshfl [vmem:[#allocation2 + $0x110] sm:$0x33 pattern:$0x76325410]  ;;  %v18714_v29 = vpop.permute.xlu0 %8733 }
 0x423   : > { %v10665_v50 = vsel %vm16733_vm15, %v10660_v10, %v10664_v58  ;;  %v18687_v46 = vrot.slane %v10696_v30, 7  ;;  %v5978_v5 = vshrl.u32 %v18380_v35, 16  ;;  %v5981_v55 = vshll.u32 %v18380_v35, 16  ;;  %20776 = vst [vmem:[#allocation30_spill] sm:$0xff] %v18714_v29 }
 0x424   : > { %13705 = vrot.lane.b32.xlu0 %v13568_v61, %s15738_s27  ;;  %v10675_v25 = vsel %vm16733_vm15, %v10670_v62, %v10674_v39  ;;  %v10693_v17 = vor.u32 %v10692_v3, %v10689_v56  ;;  %v5987_v0 = vshll.u32 %v18474_v51, 16  ;;  %v10680_v33 = vrot.slane %v10679_v16, 2  ;;  %v18701_v45 = vld.sshfl [vmem:[#allocation2 + $0x118] sm:$0x33 pattern:$0x76325410] }
 0x425   : > { %v11060_v12 = vcombine.low %v10665_v50, %v10675_v25  ;;  %v5980_v27 = vrot.slane %v5978_v5, 6  ;;  %v6181_v41 = vcombine.low %v18549_v7, %v18554_v36  ;;  %v5983_v18 = vrot.slane %v5981_v55, 7  ;;  %v15693_v53 = vld.sshfl [vmem:[#allocation2 + $0x148] sm:$0x33 pattern:$0x76325410] }
 0x426   : > { %v10694_v1 = vrot.slane %v10693_v17, 2  ;;  %v5989_v58 = vrot.slane %v5987_v0, 7  ;;  %v11720_v40 = vcombine.high %v15693_v53, %v15693_v53  ;;  %v1668_v39 = vld [vmem:[#allocation2 + $0xb4] sm:$0x4]  ;;  %v10685_v35 = vsel %vm16733_vm15, %v10680_v33, %v10684_v22  ;;  %v1671_v7 = vld [vmem:[#allocation2 + $0xbc] sm:$0x4] }
 0x427   : > { %v11068_v49 = vrot.slane %v11060_v12, %v16483_v11  ;;  %v6189_v60 = vrot.slane %v6181_v41, %v16483_v11  ;;  %v18709_v44 = vcombine.high %v18690_v28, %v18690_v28  ;;  %v5984_v6 = vor.u32 %v5983_v18, %v5980_v27  ;;  %v18716_v10 = vld.sshfl [vmem:[#allocation2 + $0x114] sm:$0x3 pattern:$0x76325410] }
 0x428   : > { %v10699_v36 = vsel %vm16733_vm15, %v10694_v1, %v18687_v46  ;;  %v11895_v31 = vcombine.low %v11720_v40, %v15107_v57  ;;  %v18720_v13 = vcombine.high %v18697_v26, %v18697_v26  ;;  %v6600_v61 = vcombine.low %v18716_v10, %v18701_v45  ;;  %v18742_v27 = vld.sshfl [vmem:[#allocation2 + $0x80] sm:$0x33 pattern:$0x76325410]  ;;  %v7062_v40 = vpop.permute.xlu0 %7061 }
 0x429   : > { %v11061_v22 = vcombine.low %v10685_v35, %v10699_v36  ;;  %v11896_v30 = vcombine.low %v18690_v28, %v18709_v44  ;;  %v1669_v62 = vsel %vm16144_vm3, 0, %v1668_v39  ;;  %v5985_v56 = vrot.slane %v5984_v6, 2 }
 0x42a   : > { %v11903_v3 = vrot.slane %v11895_v31, %v16483_v11  ;;  %v6599_v50 = vcombine.low %v18697_v26, %v18720_v13  ;;  %1670 = vst [vmem:[#allocation2 + $0xb4] sm:$0x4] %v1669_v62  ;;  %v1672_v16 = vsel %vm16144_vm3, 0, %v1671_v7  ;;  %v6614_v25 = vrot.slane %v6600_v61, %v16483_v11 }
 0x42b   : > { %v11075_v5 = vrot.slane %v11061_v22, %v16483_v11  ;;  %v11910_v57 = vrot.slane %v11896_v30, %v16483_v11  ;;  %1673 = vst [vmem:[#allocation2 + $0xbc] sm:$0x4] %v1672_v16  ;;  %v5991_v17 = vshrl.u32 %v18474_v51, 16  ;;  %v5990_v55 = vsel %vm16733_vm15, %v5985_v56, %v5989_v58 }
 0x42c   : > { %v6607_v0 = vrot.slane %v6599_v50, %v16483_v11  ;;  %v6012_v33 = vshrl.u32 %v18466_v43, 16  ;;  %v6015_v12 = vshll.u32 %v18466_v43, 16  ;;  %v6182_v1 = vcombine.low %v18569_v47, %v5990_v55  ;;  %v15011_v31 = vld.sshfl [vmem:[#allocation2 + $0x7c] sm:$0x3 pattern:$0x76325410] }
 0x42d   : > { %v11076_v41 = vcombine.low %v11068_v49, %v11075_v5  ;;  %v11911_v18 = vcombine.low %v11903_v3, %v11910_v57  ;;  %v5993_v53 = vrot.slane %v5991_v17, 6  ;;  %v6021_v7 = vshll.u32 %v18478_v37, 16  ;;  %v18755_v61 = vld.sshfl [vmem:[#allocation2 + $0x120] sm:$0x33 pattern:$0x76325410] }
 0x42e   : > { %v6615_v39 = vcombine.low %v6607_v0, %v6614_v25  ;;  %v6014_v35 = vrot.slane %v6012_v33, 6  ;;  %v6017_v51 = vrot.slane %v6015_v12, 7  ;;  %v6196_v36 = vrot.slane %v6182_v1, %v16483_v11  ;;  %v14907_v12 = vld.sshfl [vmem:[#allocation2 + $0x11c] sm:$0x3 pattern:$0x76325410] }
 0x42f   : > { %11213 = vrot.lane.b32.xlu0 %v11076_v41, %s15738_s27  ;;  %v5994_v6 = vor.u32 %v5993_v53, %v5989_v58  ;;  %v6025_v43 = vshrl.u32 %v18478_v37, 16  ;;  %v18751_v49 = vcombine.high %v18742_v27, %v18742_v27  ;;  %v6023_v22 = vrot.slane %v6021_v7, 7 }
 0x430   : > { %6665 = vst.msk [vmem:[#allocation3 + $0xc8] sm:$0xff] %vm4158_vm1, %v6615_v39  ;;  %v6018_v47 = vor.u32 %v6017_v51, %v6014_v35  ;;  %v9403_v30 = vcombine.low %v18664_v9, %v15011_v31  ;;  %v18759_v62 = vcombine.high %v18701_v45, %v18701_v45  ;;  %v6197_v58 = vcombine.low %v6189_v60, %v6196_v36  ;;  %v1674_v39 = vld [vmem:[#allocation2 + $0xc4] sm:$0x4]  ;;  %v7064_v36 = vpop.permute.xlu0 %7063 }
 0x431   : > { %7082 = vst.msk [vmem:[#allocation3 + $0xc8] sm:$0xff] %vm4576_vm7, %v7062_v40  ;;  %v14883_v37 = vld.sshfl [vmem:[#allocation2 + $0xb4] sm:$0x13 pattern:$0x76325410]  ;;  %v5995_v56 = vrot.slane %v5994_v6, 2  ;;  %v9404_v50 = vcombine.low %v18742_v27, %v18751_v49  ;;  %v18770_v40 = vcombine.high %v18755_v61, %v18755_v61 }
 0x432   : > { %v6027_v3 = vrot.slane %v6025_v43, 6  ;;  %v14885_v16 = vld.sshfl [vmem:[#allocation2 + $0xbc] sm:$0x13 pattern:$0x76325410]  ;;  %v5638_v5 = vcombine.high %v14883_v37, %v14883_v37  ;;  %v5997_v57 = vshll.u32 %v14883_v37, 16  ;;  %v9411_v17 = vrot.slane %v9403_v30, %v16483_v11  ;;  %6244 = vrot.lane.b32.xlu1 %v6197_v58, %s15738_s27 }
 0x433   : > { %v6001_v25 = vshrl.u32 %v14883_v37, 16  ;;  %12033 = vrot.lane.b32.xlu0 %v11911_v18, %s15740_s30  ;;  %v6019_v55 = vrot.slane %v6018_v47, 2  ;;  %v6031_v0 = vshll.u32 %v14885_v16, 16  ;;  %v9418_v33 = vrot.slane %v9404_v50, %v16483_v11  ;;  %20777 = vst [vmem:[#allocation34_spill] sm:$0xff] %v18770_v40 }
 0x434   : > { %v6028_v60 = vor.u32 %v6027_v3, %v6023_v22  ;;  %v5999_v41 = vrot.slane %v5997_v57, 7  ;;  %v6007_v53 = vshll.u32 %v5638_v5, 16  ;;  %v6616_v47 = vcombine.low %v18759_v62, %v14907_v12  ;;  %v15131_v57 = vld.sshfl [vmem:[#allocation2 + $0xe4] sm:$0x13 pattern:$0x76325410] }
 0x435   : > { %v6003_v1 = vrot.slane %v6001_v25, 6  ;;  %v6024_v35 = vsel %vm16733_vm15, %v6019_v55, %v6023_v22  ;;  %v6033_v7 = vrot.slane %v6031_v0, 7  ;;  %v9419_v18 = vcombine.low %v9411_v17, %v9418_v33 }
 0x436   : > { %v6029_v51 = vrot.slane %v6028_v60, 2  ;;  %v6000_v6 = vsel %vm16733_vm15, %v5995_v56, %v5999_v41  ;;  %v6009_v31 = vrot.slane %v6007_v53, 7  ;;  %v6617_v58 = vcombine.low %v18755_v61, %v18770_v40 }
 0x437   : > { %v6004_v43 = vor.u32 %v6003_v1, %v5999_v41  ;;  %9541 = vrot.lane.b32.xlu0 %v9419_v18, %s15740_s30  ;;  %v1675_v22 = vsel %vm16144_vm3, 0, %v1674_v39  ;;  %v5654_v37 = vcombine.high %v14885_v16, %v14885_v16  ;;  %v6624_v56 = vrot.slane %v6616_v47, %v16483_v11  ;;  %v18792_v1 = vld.sshfl [vmem:[#allocation2 + $0xe8] sm:$0x33 pattern:$0x76325410] }
 0x438   : > { %v6034_v30 = vsel %vm16733_vm15, %v6029_v51, %v6033_v7  ;;  %1676 = vst [vmem:[#allocation2 + $0xc4] sm:$0x4] %v1675_v22  ;;  %v6035_v5 = vshrl.u32 %v14885_v16, 16  ;;  %v6631_v25 = vrot.slane %v6617_v58, %v16483_v11  ;;  %v6046_v55 = vshrl.u32 %v18640_v48, 16  ;;  %v18794_v51 = vpop.permute.xlu0 %12041 }
 0x439   : > { %v6005_v3 = vrot.slane %v6004_v43, 2  ;;  %v6199_v50 = vcombine.low %v6024_v35, %v6034_v30  ;;  %v6041_v17 = vshll.u32 %v5654_v37, 16  ;;  %v6049_v60 = vshll.u32 %v18640_v48, 16 }
 0x43a   : > { %v6037_v12 = vrot.slane %v6035_v5, 6  ;;  %v6055_v41 = vshll.u32 %v18653_v4, 16  ;;  %v6632_v16 = vcombine.low %v6624_v56, %v6631_v25  ;;  %v6048_v35 = vrot.slane %v6046_v55, 6 }
 0x43b   : > { %v6010_v0 = vsel %vm16733_vm15, %v6005_v3, %v6009_v31  ;;  %v6213_v33 = vrot.slane %v6199_v50, %v16483_v11  ;;  %v6043_v39 = vrot.slane %v6041_v17, 7  ;;  %v15093_v18 = vld.sshfl [vmem:[#allocation2 + $0x10c] sm:$0x3 pattern:$0x76325410]  ;;  %v6051_v47 = vrot.slane %v6049_v60, 7 }
 0x43c   : > { %v6198_v53 = vcombine.low %v6000_v6, %v6010_v0  ;;  %v6038_v43 = vor.u32 %v6037_v12, %v6033_v7  ;;  %v6057_v48 = vrot.slane %v6055_v41, 7  ;;  %v6059_v30 = vshrl.u32 %v18653_v4, 16  ;;  %6666 = vst.msk [vmem:[#allocation3 + $0xe8] sm:$0xff] %vm4158_vm1, %v6632_v16  ;;  %v18808_v16 = vpop.permute.xlu0 %8731 }
 0x43d   : > { %v12146_v58 = vcombine.high %v15131_v57, %v15131_v57  ;;  %v12154_v22 = vcombine.high %v18792_v1, %v18792_v1  ;;  %v12355_v6 = vshrl.u32 %v18530_v63, 16  ;;  %7083 = vst.msk [vmem:[#allocation3 + $0xe8] sm:$0xff] %vm4576_vm7, %v7064_v36  ;;  %v6052_v3 = vor.u32 %v6051_v47, %v6048_v35  ;;  %20778 = vst [vmem:[#allocation31_spill] sm:$0xff] %v18808_v16 }
 0x43e   : > { %v6206_v31 = vrot.slane %v6198_v53, %v16483_v11  ;;  %v6039_v37 = vrot.slane %v6038_v43, 2  ;;  %v6061_v50 = vrot.slane %v6059_v30, 6  ;;  %v12361_v7 = vshll.u32 %v15131_v57, 16 }
 0x43f   : > { %v14887_v5 = vld.sshfl [vmem:[#allocation2 + $0xc4] sm:$0x13 pattern:$0x76325410]  ;;  %v12357_v25 = vrot.slane %v12355_v6, 6  ;;  %v12365_v4 = vshrl.u32 %v15131_v57, 16  ;;  %v11563_v17 = vcombine.low %v15093_v18, %v18697_v26 }
 0x440   : > { %v6214_v56 = vcombine.low %v6206_v31, %v6213_v33  ;;  %v5670_v55 = vcombine.high %v14887_v5, %v14887_v5  ;;  %v6044_v60 = vsel %vm16733_vm15, %v6039_v37, %v6043_v39  ;;  %v6053_v0 = vrot.slane %v6052_v3, 2  ;;  %v18812_v35 = vld.sshfl [vmem:[#allocation2 + $0xec] sm:$0x13 pattern:$0x76325410] }
 0x441   : > { %v6062_v12 = vor.u32 %v6061_v50, %v6057_v48  ;;  %v6065_v63 = vshll.u32 %v14887_v5, 16  ;;  %v6069_v36 = vshrl.u32 %v14887_v5, 16  ;;  %v12358_v41 = vor.u32 %v12357_v25, %v18579_v19 }
 0x442   : > { %6246 = vrot.lane.b32.xlu1 %v6214_v56, %s15738_s27  ;;  %v12363_v53 = vrot.slane %v12361_v7, 7  ;;  %v6058_v57 = vsel %vm16733_vm15, %v6053_v0, %v6057_v48  ;;  %v6075_v26 = vshll.u32 %v5670_v55, 16  ;;  %v12367_v18 = vrot.slane %v12365_v4, 6  ;;  %v1540_v55 = vld [vmem:[#allocation2 + $0x4] sm:$0x7] }
 0x443   : > { %v6063_v33 = vrot.slane %v6062_v12, 2  ;;  %v6067_v39 = vrot.slane %v6065_v63, 7  ;;  %v6071_v43 = vrot.slane %v6069_v36, 6  ;;  %v6215_v47 = vcombine.low %v6044_v60, %v6058_v57  ;;  %v1559_v63 = vld [vmem:[#allocation2] sm:$0x1]  ;;  %v18822_v36 = vpop.permute.xlu0 %13713 }
 0x444   : > { %v12359_v30 = vrot.slane %v12358_v41, 2  ;;  %v6077_v31 = vrot.slane %v6075_v26, 7  ;;  %v12368_v6 = vor.u32 %v12367_v18, %v12363_v53  ;;  %v12371_v37 = vshll.u32 %v12146_v58, 16  ;;  %20779 = vst [vmem:[#allocation35_spill] sm:$0xff] %v18822_v36 }
 0x445   : > { %v12376_v19 = vshrl.u32 %v18792_v1, 16  ;;  %v6068_v3 = vsel %vm16733_vm15, %v6063_v33, %v6067_v39  ;;  %v6072_v50 = vor.u32 %v6071_v43, %v6067_v39  ;;  %v6223_v48 = vrot.slane %v6215_v47, %v16483_v11  ;;  %v15035_v26 = vld.sshfl [vmem:[#allocation2 + $0x14] sm:$0x13 pattern:$0x76325410] }
 0x446   : > { %v12364_v7 = vsel %vm16733_vm15, %v12359_v30, %v12363_v53  ;;  %v12369_v56 = vrot.slane %v12368_v6, 2  ;;  %v12373_v5 = vrot.slane %v12371_v37, 7  ;;  %v12379_v4 = vshll.u32 %v18792_v1, 16 }
 0x447   : > { %v12378_v25 = vrot.slane %v12376_v19, 6  ;;  %v6073_v60 = vrot.slane %v6072_v50, 2  ;;  %v12385_v0 = vshll.u32 %v12154_v22, 16  ;;  %v12389_v58 = vshrl.u32 %v12154_v22, 16 }
 0x448   : > { %v12395_v12 = vshll.u32 %v18812_v35, 16  ;;  %v12374_v41 = vsel %vm16733_vm15, %v12369_v56, %v12373_v5  ;;  %v12381_v57 = vrot.slane %v12379_v4, 7  ;;  %v11564_v53 = vcombine.low %v18720_v13, %v18716_v10  ;;  %v18834_v37 = vld.sshfl [vmem:[#allocation2 + $0x18] sm:$0x33 pattern:$0x76325410] }
 0x449   : > { %v11571_v33 = vrot.slane %v11563_v17, %v16483_v11  ;;  %v6078_v1 = vsel %vm16733_vm15, %v6073_v60, %v6077_v31  ;;  %v12387_v18 = vrot.slane %v12385_v0, 7  ;;  %v12391_v22 = vrot.slane %v12389_v58, 6  ;;  %v18852_v58 = vld.sshfl [vmem:[#allocation2 + $0x1c] sm:$0x13 pattern:$0x76325410] }
 0x44a   : > { %v18831_v39 = vrot.slane %v12395_v12, 7  ;;  %v6216_v43 = vcombine.low %v6068_v3, %v6078_v1  ;;  %v12382_v47 = vor.u32 %v12381_v57, %v12378_v25  ;;  %v12732_v30 = vcombine.low %v12364_v7, %v12374_v41  ;;  %v15120_v41 = vld.sshfl [vmem:[#allocation2 + $0x180] sm:$0x33 pattern:$0x76325410] }
 0x44b   : > { %v11578_v6 = vrot.slane %v11564_v53, %v16483_v11  ;;  %v12392_v19 = vor.u32 %v12391_v22, %v12387_v18  ;;  %v1541_v10 = vsel %vm16907_vm5, 0, %v1540_v55  ;;  %v1560_v13 = vsel %vm16261_vm6, 0, %v1559_v63  ;;  %v18847_v55 = vpop.permute.xlu0 %7065  ;;  %v18854_v57 = vld.sshfl [vmem:[#allocation2 + $0x188] sm:$0x33 pattern:$0x76325410] }
 0x44c   : > { %v9654_v17 = vcombine.high %v15035_v26, %v15035_v26  ;;  %v6230_v31 = vrot.slane %v6216_v43, %v16483_v11  ;;  %v12383_v50 = vrot.slane %v12382_v47, 2  ;;  %v12740_v56 = vrot.slane %v12732_v30, %v16483_v11  ;;  %1542 = vst [vmem:[#allocation2 + $0x4] sm:$0x7] %v1541_v10  ;;  %1561 = vst [vmem:[#allocation2] sm:$0x1] %v1560_v13 }
 0x44d   : > { %v11579_v3 = vcombine.low %v11571_v33, %v11578_v6  ;;  %v12393_v7 = vrot.slane %v12392_v19, 2  ;;  %v18844_v5 = vcombine.high %v18834_v37, %v18834_v37  ;;  %v9863_v25 = vshrl.u32 %v18593_v42, 16 }
 0x44e   : > { %v9869_v4 = vshll.u32 %v15035_v26, 16  ;;  %v6231_v60 = vcombine.low %v6223_v48, %v6230_v31  ;;  %v12388_v0 = vsel %vm16733_vm15, %v12383_v50, %v12387_v18  ;;  %v9873_v12 = vshrl.u32 %v15035_v26, 16 }
 0x44f   : > { %11645 = vst.msk [vmem:[#allocation3 + $0xb8] sm:$0xff] %vm4158_vm1, %v11579_v3  ;;  %v9879_v63 = vshll.u32 %v9654_v17, 16  ;;  %v12398_v42 = vsel %vm16733_vm15, %v12393_v7, %v18831_v39  ;;  %v9865_v48 = vrot.slane %v9863_v25, 6  ;;  %v9884_v33 = vshrl.u32 %v18834_v37, 16  ;;  %v18875_v25 = vpop.permute.xlu0 %8735 }
 0x450   : > { %12063 = vst.msk [vmem:[#allocation3 + $0xb8] sm:$0xff] %vm4576_vm7, %v18794_v51  ;;  %v18861_v53 = vrot.slane %v9869_v4, 7  ;;  %6248 = vrot.lane.b32.xlu1 %v6231_v60, %s15738_s27  ;;  %v12733_v1 = vcombine.low %v12388_v0, %v12398_v42  ;;  %v9875_v26 = vrot.slane %v9873_v12, 6  ;;  %v9887_v22 = vshll.u32 %v18834_v37, 16  ;;  %20780 = vst [vmem:[#allocation32_spill] sm:$0xff] %v18875_v25 }
 0x451   : > { %v9881_v18 = vrot.slane %v9879_v63, 7  ;;  %v9866_v43 = vor.u32 %v9865_v48, %v18621_v59  ;;  %v9886_v47 = vrot.slane %v9884_v33, 6  ;;  %v9893_v30 = vshll.u32 %v18844_v5, 16 }
 0x452   : > { %v9897_v6 = vshrl.u32 %v18844_v5, 16  ;;  %v12747_v51 = vrot.slane %v12733_v1, %v16483_v11  ;;  %v9876_v19 = vor.u32 %v9875_v26, %v18861_v53  ;;  %v9889_v10 = vrot.slane %v9887_v22, 7  ;;  %v15121_v17 = vld.sshfl [vmem:[#allocation2 + $0x184] sm:$0x3 pattern:$0x76325410] }
 0x453   : > { %v9903_v13 = vshll.u32 %v18852_v58, 16  ;;  %v18872_v31 = vld.sshfl [vmem:[#allocation2] sm:$0x33 pattern:$0x76325410]  ;;  %v9867_v50 = vrot.slane %v9866_v43, 2  ;;  %v11825_v7 = vcombine.high %v15120_v41, %v15120_v41  ;;  %v11981_v59 = vcombine.low %v15121_v17, %v18854_v57  ;;  %v18889_v43 = vpop.permute.xlu1 %4549 }
 0x454   : > { %v9895_v3 = vrot.slane %v9893_v30, 7  ;;  %v12748_v4 = vcombine.low %v12740_v56, %v12747_v51  ;;  %v14841_v60 = vld.sshfl [vmem:[#allocation2 + $0x4] sm:$0x13 pattern:$0x76325410]  ;;  %v18879_v0 = vcombine.high %v18872_v31, %v18872_v31  ;;  %v4834_v12 = vshrl.u32 %v18872_v31, 16 }
 0x455   : > { %v4837_v63 = vshll.u32 %v18872_v31, 16  ;;  %v4649_v42 = vcombine.high %v14841_v60, %v14841_v60  ;;  %v4853_v48 = vshll.u32 %v14841_v60, 16  ;;  %v4857_v33 = vshrl.u32 %v14841_v60, 16 }
 0x456   : > { %v9872_v1 = vsel %vm16733_vm15, %v9867_v50, %v18861_v53  ;;  %12870 = vrot.lane.b32.xlu0 %v12748_v4, %s15737_s26  ;;  %v4836_v57 = vrot.slane %v4834_v12, 6  ;;  %v4843_v26 = vshll.u32 %v18879_v0, 16  ;;  %v4847_v22 = vshrl.u32 %v18879_v0, 16 }
 0x457   : > { %v4839_v56 = vrot.slane %v4837_v63, 7  ;;  %v4855_v30 = vrot.slane %v4853_v48, 7  ;;  %v4859_v51 = vrot.slane %v4857_v33, 6  ;;  %v4863_v17 = vshll.u32 %v4649_v42, 16  ;;  %v18895_v63 = vpop.permute.xlu0 %8737 }
 0x458   : > { %v9877_v38 = vrot.slane %v9876_v19, 2  ;;  %v4845_v60 = vrot.slane %v4843_v26, 7  ;;  %v4849_v24 = vrot.slane %v4847_v22, 6  ;;  %v9890_v25 = vor.u32 %v9889_v10, %v9886_v47  ;;  %20781 = vst [vmem:[#allocation36_spill] sm:$0xff] %v18895_v63 }
 0x459   : > { %v4840_v54 = vor.u32 %v4839_v56, %v4836_v57  ;;  %v4860_v36 = vor.u32 %v4859_v51, %v4855_v30  ;;  %v4865_v50 = vrot.slane %v4863_v17, 7  ;;  %v9899_v12 = vrot.slane %v9897_v6, 6  ;;  %v15155_v47 = vld.sshfl [vmem:[#allocation2 + $0x14c] sm:$0x13 pattern:$0x76325410] }
 0x45a   : > { %v18893_v4 = vsel %vm16733_vm15, %v9877_v38, %v9881_v18  ;;  %v4850_v14 = vor.u32 %v4849_v24, %v4845_v60  ;;  %v9891_v16 = vrot.slane %v9890_v25, 2  ;;  %v18897_v48 = vrot.slane %v9903_v13, 7  ;;  %v18907_v24 = vpop.permute.xlu1 %4551 }
 0x45b   : > { %v4841_v29 = vrot.slane %v4840_v54, 2  ;;  %v4861_v42 = vrot.slane %v4860_v36, 2  ;;  %v9900_v19 = vor.u32 %v9899_v12, %v9895_v3  ;;  %v10240_v33 = vcombine.low %v9872_v1, %v18893_v4 }
 0x45c   : > { %v11980_v57 = vcombine.low %v15120_v41, %v11825_v7  ;;  %v4851_v56 = vrot.slane %v4850_v14, 2  ;;  %v18904_v38 = vsel %vm16733_vm15, %v9891_v16, %v9895_v3  ;;  %v11995_v54 = vrot.slane %v11981_v59, %v16483_v11  ;;  %v15590_v3 = vld [vmem:[%s20531_s3 + $0x100] ss:$8 sps:$4 sm:$0xff]   ;;  %v15592_v7 = vld [vmem:[%s20531_s3 + $0x104] ss:$8 sps:$4 sm:$0xff]  }
 0x45d   : > { %v4846_v10 = vsel %vm16733_vm15, %v4841_v29, %v4845_v60  ;;  %v4866_v36 = vsel %vm16733_vm15, %v4861_v42, %v4865_v50  ;;  %v9901_v18 = vrot.slane %v9900_v19, 2  ;;  %v10248_v6 = vrot.slane %v10240_v33, %v16483_v11  ;;  %v14843_v60 = vld.sshfl [vmem:[#allocation2 + $0xc] sm:$0x13 pattern:$0x76325410]  ;;  %14296 = vmatprep.subr.bf16.mxu0 %v15592_v7 }
 0x45e   : > { %v11988_v41 = vrot.slane %v11980_v57, %v16483_v11  ;;  %v4856_v29 = vsel %vm16733_vm15, %v4851_v56, %v4855_v30  ;;  %v5242_v14 = vcombine.low %v4866_v36, %v18614_v8  ;;  %v12983_v13 = vcombine.high %v15155_v47, %v15155_v47  ;;  %v18928_v8 = vpop.permute.xlu0 %13715  ;;  %v18933_v30 = vld.sshfl [vmem:[#allocation2 + $0x154] sm:$0x13 pattern:$0x76325410]  ;;  %14297 = vmatpush1.bf16.msra.mxu0 %v15590_v3  ;;  %v18942_v36 = vpop.permute.xlu1 %4553 }
 0x45f   : > { %v13192_v16 = vshrl.u32 %v18628_v32, 16  ;;  %v5241_v59 = vcombine.low %v4846_v10, %v4856_v29  ;;  %v18926_v25 = vsel %vm16733_vm15, %v9901_v18, %v18897_v48  ;;  %v13198_v26 = vshll.u32 %v15155_v47, 16 }
 0x460   : > { %v11996_v1 = vcombine.low %v11988_v41, %v11995_v54  ;;  %v5256_v32 = vrot.slane %v5242_v14, %v16483_v11  ;;  %v10241_v22 = vcombine.low %v18904_v38, %v18926_v25  ;;  %v13202_v17 = vshrl.u32 %v15155_v47, 16  ;;  %v18940_v54 = vld.sshfl [vmem:[#allocation2 + $0x10] sm:$0x33 pattern:$0x76325410] }
 0x461   : > { %v13194_v51 = vrot.slane %v13192_v16, 6  ;;  %v5249_v50 = vrot.slane %v5241_v59, %v16483_v11  ;;  %v13200_v12 = vrot.slane %v13198_v26, 7  ;;  %v13208_v42 = vshll.u32 %v12983_v13, 16 }
 0x462   : > { %v13213_v19 = vshrl.u32 %v18690_v28, 16  ;;  %v10255_v33 = vrot.slane %v10241_v22, %v16483_v11  ;;  %v13204_v10 = vrot.slane %v13202_v17, 6  ;;  %v13216_v56 = vshll.u32 %v18690_v28, 16  ;;  %v18948_v26 = vpop.permute.xlu0 %8739 }
 0x463   : > { %v13195_v57 = vor.u32 %v13194_v51, %v18657_v20  ;;  %v5257_v47 = vcombine.low %v5249_v50, %v5256_v32  ;;  %v13210_v18 = vrot.slane %v13208_v42, 7  ;;  %v13222_v29 = vshll.u32 %v18709_v44, 16  ;;  %v15593_v42 = vld [vmem:[%s20531_s3 + $0x110] ss:$8 sps:$4 sm:$0xff]  }
 0x464   : > { %v13215_v41 = vrot.slane %v13213_v19, 6  ;;  %v10256_v14 = vcombine.low %v10248_v6, %v10255_v33  ;;  %v13205_v16 = vor.u32 %v13204_v10, %v13200_v12  ;;  %v13218_v3 = vrot.slane %v13216_v56, 7  ;;  %v18964_v10 = vpop.permute.xlu1 %6232  ;;  %v15595_v56 = vld [vmem:[%s20531_s3 + $0x114] ss:$8 sps:$4 sm:$0xff]  }
 0x465   : > { %v13196_v13 = vrot.slane %v13195_v57, 2  ;;  %5394 = vrot.lane.b32.xlu1 %v5257_v47, %s15737_s26  ;;  %v13224_v7 = vrot.slane %v13222_v29, 7  ;;  %v13226_v20 = vshrl.u32 %v18709_v44, 16  ;;  %v13232_v28 = vshll.u32 %v18933_v30, 16  ;;  %20782 = vst [vmem:[#allocation38_spill] sm:$0xff] %v18964_v10  ;;  %14298 = vmatprep.subr.bf16.mxu0 %v15595_v56 }
 0x466   : > { %v4665_v59 = vcombine.high %v14843_v60, %v14843_v60  ;;  %10378 = vrot.lane.b32.xlu0 %v10256_v14, %s15737_s26  ;;  %v13206_v22 = vrot.slane %v13205_v16, 2  ;;  %v13219_v6 = vor.u32 %v13218_v3, %v13215_v41  ;;  %v18955_v51 = vcombine.high %v18940_v54, %v18940_v54  ;;  %v15059_v14 = vld.sshfl [vmem:[#allocation2 + $0x7c] sm:$0x13 pattern:$0x76325410]  ;;  %14299 = vmatpush1.bf16.msra.mxu0 %v15593_v42 }
 0x467   : > { %v13201_v32 = vsel %vm16733_vm15, %v13196_v13, %v13200_v12  ;;  %v13228_v17 = vrot.slane %v13226_v20, 6  ;;  %v18957_v50 = vrot.slane %v13232_v28, 7  ;;  %v4887_v44 = vshll.u32 %v14843_v60, 16 }
 0x468   : > { %v13211_v19 = vsel %vm16733_vm15, %v13206_v22, %v13210_v18  ;;  %v13220_v33 = vrot.slane %v13219_v6, 2  ;;  %v4891_v57 = vshrl.u32 %v14843_v60, 16  ;;  %v4897_v12 = vshll.u32 %v4665_v59, 16  ;;  %v18975_v59 = vpop.permute.xlu0 %7886 }
 0x469   : > { %12043 = vrot.lane.b32.xlu1 %v11996_v1, %s15740_s30  ;;  %v13229_v47 = vor.u32 %v13228_v17, %v13224_v7  ;;  %v13569_v41 = vcombine.low %v13201_v32, %v13211_v19  ;;  %v4889_v29 = vrot.slane %v4887_v44, 7  ;;  %v4902_v60 = vshrl.u32 %v18940_v54, 16  ;;  %v15596_v1 = vld [vmem:[%s20531_s3 + $0x120] ss:$8 sps:$4 sm:$0xff]  }
 0x46a   : > { %v13225_v13 = vsel %vm16733_vm15, %v13220_v33, %v13224_v7  ;;  %v4893_v16 = vrot.slane %v4891_v57, 6  ;;  %v4899_v18 = vrot.slane %v4897_v12, 7  ;;  %v4905_v28 = vshll.u32 %v18940_v54, 16  ;;  %v15598_v7 = vld [vmem:[%s20531_s3 + $0x124] ss:$8 sps:$4 sm:$0xff]  }
 0x46b   : > { %v13230_v3 = vrot.slane %v13229_v47, 2  ;;  %v13577_v20 = vrot.slane %v13569_v41, %v16483_v11  ;;  %v4904_v22 = vrot.slane %v4902_v60, 6  ;;  %v4911_v6 = vshll.u32 %v18955_v51, 16  ;;  %14300 = vmatprep.subr.bf16.mxu0 %v15598_v7  ;;  %v18988_v47 = vpop.permute.xlu1 %4555 }
 0x46c   : > { %v4894_v32 = vor.u32 %v4893_v16, %v4889_v29  ;;  %v4915_v17 = vshrl.u32 %v18955_v51, 16  ;;  %v4907_v19 = vrot.slane %v4905_v28, 7  ;;  %v10491_v42 = vcombine.high %v15059_v14, %v15059_v14  ;;  %20783 = vst [vmem:[#allocation39_spill] sm:$0xff] %v18988_v47  ;;  %14301 = vmatpush1.bf16.msra.mxu0 %v15596_v1  ;;  %v18999_v63 = vpop.permute.xlu0 %7890 }
 0x46d   : > { %v13235_v44 = vsel %vm16733_vm15, %v13230_v3, %v18957_v50  ;;  %v4913_v12 = vrot.slane %v4911_v6, 7  ;;  %v4890_v41 = vsel %vm16733_vm15, %v18609_v21, %v4889_v29  ;;  %v10700_v60 = vshrl.u32 %v18664_v9, 16  ;;  %v15599_v21 = vld [vmem:[%s20531_s3 + $0x130] ss:$8 sps:$4 sm:$0xff]  }
 0x46e   : > { %v13570_v33 = vcombine.low %v13225_v13, %v13235_v44  ;;  %v4895_v57 = vrot.slane %v4894_v32, 2  ;;  %v4917_v56 = vrot.slane %v4915_v17, 6  ;;  %v4908_v16 = vor.u32 %v4907_v19, %v4904_v22  ;;  %v18997_v17 = vld.sshfl [vmem:[#allocation2 + $0x84] sm:$0x13 pattern:$0x76325410] }
 0x46f   : > { %v10706_v10 = vshll.u32 %v15059_v14, 16  ;;  %v10710_v7 = vshrl.u32 %v15059_v14, 16  ;;  %20784 = vst [vmem:[#allocation40_spill] sm:$0xff] %v18997_v17  ;;  %v10702_v44 = vrot.slane %v10700_v60, 6  ;;  %v10716_v22 = vshll.u32 %v10491_v42, 16 }
 0x470   : > { %v13584_v3 = vrot.slane %v13570_v33, %v16483_v11  ;;  %v4900_v28 = vsel %vm16733_vm15, %v4895_v57, %v4899_v18  ;;  %v4918_v13 = vor.u32 %v4917_v56, %v4913_v12  ;;  %v4909_v32 = vrot.slane %v4908_v16, 2  ;;  %v15601_v14 = vld [vmem:[%s20531_s3 + $0x134] ss:$8 sps:$4 sm:$0xff]  }
 0x471   : > { %v5258_v6 = vcombine.low %v4890_v41, %v4900_v28  ;;  %v10708_v47 = vrot.slane %v10706_v10, 7  ;;  %v10712_v1 = vrot.slane %v10710_v7, 6  ;;  %v10703_v10 = vor.u32 %v10702_v44, %v18687_v46  ;;  %v14910_v57 = vld.sshfl [vmem:[#allocation2 + $0x128] sm:$0x33 pattern:$0x76325410]  ;;  %14302 = vmatprep.subr.bf16.mxu0 %v15601_v14 }
 0x472   : > { %v13585_v9 = vcombine.low %v13577_v20, %v13584_v3  ;;  %v4919_v29 = vrot.slane %v4918_v13, 2  ;;  %v4914_v18 = vsel %vm16733_vm15, %v4909_v32, %v4913_v12  ;;  %v10721_v33 = vshrl.u32 %v18742_v27, 16  ;;  %v14909_v16 = vld.sshfl [vmem:[#allocation2 + $0x124] sm:$0x3 pattern:$0x76325410]  ;;  %v19017_v12 = vpop.permute.xlu1 %6234  ;;  %14303 = vmatpush1.bf16.msra.mxu0 %v15599_v21 }
 0x473   : > { %v5266_v19 = vrot.slane %v5258_v6, %v16483_v11  ;;  %v10713_v42 = vor.u32 %v10712_v1, %v10708_v47  ;;  %v10718_v56 = vrot.slane %v10716_v22, 7  ;;  %v10724_v41 = vshll.u32 %v18742_v27, 16  ;;  %v14911_v60 = vld.sshfl [vmem:[#allocation2 + $0x12c] sm:$0x3 pattern:$0x76325410] }
 0x474   : > { %13707 = vrot.lane.b32.xlu0 %v13585_v9, %s15738_s27  ;;  %v4924_v20 = vsel %vm16733_vm15, %v4919_v29, %v18861_v53  ;;  %20785 = vst [vmem:[#allocation41_spill] sm:$0xff] %v19017_v12  ;;  %v10704_v46 = vrot.slane %v10703_v10, 2  ;;  %v10723_v28 = vrot.slane %v10721_v33, 6  ;;  %v10730_v13 = vshll.u32 %v18751_v49, 16  ;;  %v15602_v53 = vld [vmem:[%s20531_s3 + $0x4] ss:$8 sps:$4 sm:$0xff]  }
 0x475   : > { %v5259_v3 = vcombine.low %v4914_v18, %v4924_v20  ;;  %v15024_v7 = vld.sshfl [vmem:[#allocation2 + $0xb0] sm:$0x33 pattern:$0x76325410]  ;;  %v10714_v32 = vrot.slane %v10713_v42, 2  ;;  %v10726_v6 = vrot.slane %v10724_v41, 7  ;;  %v6489_v14 = vcombine.high %v14910_v57, %v14910_v57  ;;  %v19030_v18 = vpop.permute.xlu0 %7888  ;;  %14173 = vmatprep.subr.bf16.mxu1 %v15602_v53 }
 0x476   : > { %v10734_v27 = vshrl.u32 %v18751_v49, 16  ;;  %v10740_v44 = vshll.u32 %v18997_v17, 16  ;;  %v19025_v9 = vld.sshfl [vmem:[#allocation2 + $0x158] sm:$0x33 pattern:$0x76325410]  ;;  %v10709_v1 = vsel %vm16733_vm15, %v10704_v46, %v10708_v47 }
 0x477   : > { %v5273_v29 = vrot.slane %v5259_v3, %v16483_v11  ;;  %v10732_v22 = vrot.slane %v10730_v13, 7  ;;  %v15026_v21 = vld.sshfl [vmem:[#allocation2 + $0xb8] sm:$0x33 pattern:$0x76325410]  ;;  %v10719_v10 = vsel %vm16733_vm15, %v10714_v32, %v10718_v56  ;;  %v10727_v33 = vor.u32 %v10726_v6, %v10723_v28  ;;  %v19044_v6 = vpop.permute.xlu1 %6236 }
 0x478   : > { %v10736_v49 = vrot.slane %v10734_v27, 6  ;;  %v19034_v20 = vrot.slane %v10740_v44, 7  ;;  %v15025_v42 = vld.sshfl [vmem:[#allocation2 + $0xb4] sm:$0x3 pattern:$0x76325410]  ;;  %v19036_v12 = vcombine.low %v10709_v1, %v10719_v10  ;;  %v6633_v3 = vcombine.low %v14909_v16, %v14910_v57 }
 0x479   : > { %v5274_v41 = vcombine.low %v5266_v19, %v5273_v29  ;;  %v6634_v17 = vcombine.low %v6489_v14, %v14911_v60  ;;  %v15604_v47 = vld [vmem:[%s20531_s3 + $0x140] ss:$8 sps:$4 sm:$0xff]   ;;  %v15606_v46 = vld [vmem:[%s20531_s3 + $0x144] ss:$8 sps:$4 sm:$0xff]   ;;  %v10728_v13 = vrot.slane %v10727_v33, 2  ;;  %v9333_v28 = vcombine.high %v15024_v7, %v15024_v7  ;;  %20786 = vst [vmem:[#allocation42_spill] sm:$0xff] %v19044_v6 }
 0x47a   : > { %v10737_v56 = vor.u32 %v10736_v49, %v10732_v22  ;;  %v9489_v53 = vcombine.low %v15025_v42, %v15026_v21  ;;  %v15109_v32 = vld.sshfl [vmem:[#allocation2 + $0x154] sm:$0x3 pattern:$0x76325410]  ;;  %v11085_v19 = vrot.slane %v19036_v12, %v16483_v11  ;;  %v6641_v57 = vrot.slane %v6633_v3, %v16483_v11  ;;  %14304 = vmatprep.subr.bf16.mxu0 %v15606_v46  ;;  %v19064_v49 = vpop.permute.xlu0 %12031 }
 0x47b   : > { %5396 = vrot.lane.b32.xlu1 %v5274_v41, %s15737_s26  ;;  %v6648_v16 = vrot.slane %v6634_v17, %v16483_v11  ;;  %v19053_v60 = vcombine.high %v19025_v9, %v19025_v9  ;;  %v10733_v27 = vsel %vm16733_vm15, %v10728_v13, %v10732_v22  ;;  %v9488_v29 = vcombine.low %v15024_v7, %v9333_v28  ;;  %v15111_v14 = vld.sshfl [vmem:[#allocation2 + $0x15c] sm:$0x3 pattern:$0x76325410] }
 0x47c   : > { %v10738_v44 = vrot.slane %v10737_v56, 2  ;;  %v9503_v1 = vrot.slane %v9489_v53, %v16483_v11  ;;  %v11912_v12 = vcombine.low %v15109_v32, %v19025_v9  ;;  %v4697_v17 = vcombine.high %v18852_v58, %v18852_v58  ;;  %v19062_v33 = vld.sshfl [vmem:[#allocation2 + $0x88] sm:$0x33 pattern:$0x76325410]  ;;  %14305 = vmatpush1.bf16.msra.mxu0 %v15604_v47 }
 0x47d   : > { %v6649_v21 = vcombine.low %v6641_v57, %v6648_v16  ;;  %v11913_v10 = vcombine.low %v19053_v60, %v15111_v14  ;;  %v9496_v22 = vrot.slane %v9488_v29, %v16483_v11  ;;  %v4959_v42 = vshrl.u32 %v18852_v58, 16  ;;  %v15013_v3 = vld.sshfl [vmem:[#allocation2 + $0x84] sm:$0x3 pattern:$0x76325410] }
 0x47e   : > { %v10743_v7 = vsel %vm16733_vm15, %v10738_v44, %v19034_v20  ;;  %v5275_v41 = vcombine.low %v18893_v4, %v18904_v38  ;;  %v19073_v46 = vld.sshfl [vmem:[#allocation2 + $0x8] sm:$0x33 pattern:$0x76325410]  ;;  %v11920_v56 = vrot.slane %v11912_v12, %v16483_v11  ;;  %v4965_v28 = vshll.u32 %v4697_v17, 16 }
 0x47f   : > { %v11078_v13 = vcombine.low %v10733_v27, %v10743_v7  ;;  %6667 = vst.msk [vmem:[#allocation3 + $0x108] sm:$0xff] %vm4158_vm1, %v6649_v21  ;;  %v11927_v47 = vrot.slane %v11913_v10, %v16483_v11  ;;  %v15015_v53 = vld.sshfl [vmem:[#allocation2 + $0x8c] sm:$0x3 pattern:$0x76325410]  ;;  %v9504_v58 = vcombine.low %v9496_v22, %v9503_v1  ;;  %v4961_v57 = vrot.slane %v4959_v42, 6  ;;  %v19087_v27 = vpop.permute.xlu1 %9545 }
 0x480   : > { %v14793_v32 = vld.sshfl [vmem:[#allocation2 + $0x4] sm:$0x3 pattern:$0x76325410]  ;;  %7084 = vst.msk [vmem:[#allocation3 + $0x108] sm:$0xff] %vm4576_vm7, %v18847_v55  ;;  %v19081_v4 = vrot.slane %v5275_v41, %v16483_v11  ;;  %v19085_v38 = vcombine.high %v19062_v33, %v19062_v33  ;;  %v4967_v14 = vrot.slane %v4965_v28, 7  ;;  %v9420_v21 = vcombine.low %v15013_v3, %v19062_v33 }
 0x481   : > { %v15145_v16 = vld.sshfl [vmem:[#allocation2 + $0x11c] sm:$0x13 pattern:$0x76325410]  ;;  %v11092_v44 = vrot.slane %v11078_v13, %v16483_v11  ;;  %v11928_v29 = vcombine.low %v11920_v56, %v11927_v47  ;;  %v15607_v55 = vld [vmem:[%s20531_s3] ss:$8 sps:$4 sm:$0xff]   ;;  %9551 = vrot.lane.b32.xlu1 %v9504_v58, %s15740_s30  ;;  %v4962_v12 = vor.u32 %v18897_v48, %v4961_v57  ;;  %v3996_v17 = vcombine.low %v18872_v31, %v18879_v0  ;;  %v19111_v56 = vpop.permute.xlu0 %7892 }
 0x482   : > { %v15608_v1 = vld [vmem:[%s20531_s3 + $0x14] ss:$8 sps:$4 sm:$0xff]   ;;  %v9421_v10 = vcombine.low %v19085_v38, %v15015_v53  ;;  %v3997_v7 = vcombine.low %v14793_v32, %v19073_v46  ;;  %v15610_v22 = vld [vmem:[%s20531_s3 + $0x150] ss:$8 sps:$4 sm:$0xff]   ;;  %v9428_v3 = vrot.slane %v9420_v21, %v16483_v11  ;;  %v12258_v13 = vcombine.high %v15145_v16, %v15145_v16  ;;  %14174 = vmatpush1.bf16.msra.mxu1 %v15607_v55 }
 0x483   : > { %v15612_v42 = vld [vmem:[%s20531_s3 + $0x154] ss:$8 sps:$4 sm:$0xff]   ;;  %v11093_v41 = vcombine.low %v11085_v19, %v11092_v44  ;;  %v12580_v48 = vshrl.u32 %v18701_v45, 16  ;;  %v4963_v31 = vrot.slane %v4962_v12, 2  ;;  %v4004_v47 = vrot.slane %v3996_v17, %v16483_v11  ;;  %14175 = vmatprep.subr.bf16.mxu1 %v15608_v1  ;;  %v19124_v12 = vpop.permute.xlu1 %4557 }
 0x484   : > { %v9435_v0 = vrot.slane %v9421_v10, %v16483_v11  ;;  %v4011_v28 = vrot.slane %v3997_v7, %v16483_v11  ;;  %14306 = vmatprep.subr.bf16.mxu0 %v15612_v42  ;;  %v12583_v53 = vshll.u32 %v18701_v45, 16  ;;  %v12589_v32 = vshll.u32 %v18759_v62, 16  ;;  %v15134_v7 = vld.sshfl [vmem:[#allocation2 + $0xf0] sm:$0x33 pattern:$0x76325410] }
 0x485   : > { %11215 = vrot.lane.b32.xlu0 %v11093_v41, %s15738_s27  ;;  %v12582_v19 = vrot.slane %v12580_v48, 6  ;;  %v12593_v58 = vshrl.u32 %v18759_v62, 16  ;;  %14307 = vmatpush1.bf16.msra.mxu0 %v15610_v22  ;;  %v19122_v57 = vsel %vm16733_vm15, %v4963_v31, %v4967_v14  ;;  %v12599_v55 = vshll.u32 %v15145_v16, 16 }
 0x486   : > { %v9436_v44 = vcombine.low %v9428_v3, %v9435_v0  ;;  %v4012_v21 = vcombine.low %v4004_v47, %v4011_v28  ;;  %v5276_v1 = vcombine.low %v18926_v25, %v19122_v57  ;;  %v12585_v10 = vrot.slane %v12583_v53, 7  ;;  %v19135_v31 = vld.sshfl [vmem:[#allocation2 + $0xf4] sm:$0x13 pattern:$0x76325410]  ;;  %v19137_v0 = vpop.permute.xlu0 %7894 }
 0x487   : > { %v12591_v17 = vrot.slane %v12589_v32, 7  ;;  %v12595_v45 = vrot.slane %v12593_v58, 6  ;;  %v12601_v62 = vrot.slane %v12599_v55, 7  ;;  %v12603_v22 = vshrl.u32 %v15145_v16, 16  ;;  %v19145_v55 = vpop.permute.xlu1 %9549 }
 0x488   : > { %4159 = vst.msk [vmem:[#allocation3] sm:$0xff] %vm4158_vm1, %v4012_v21  ;;  %v12609_v42 = vshll.u32 %v12258_v13, 16  ;;  %v12614_v14 = vshrl.u32 %v18755_v61, 16  ;;  %v5290_v41 = vrot.slane %v5276_v1, %v16483_v11  ;;  %v12586_v3 = vor.u32 %v12585_v10, %v12582_v19  ;;  %v15613_v1 = vld [vmem:[%s20531_s3 + $0x10] ss:$8 sps:$4 sm:$0xff]  }
 0x489   : > { %12035 = vrot.lane.b32.xlu0 %v11928_v29, %s15740_s30  ;;  %4577 = vst.msk [vmem:[#allocation3] sm:$0xff] %vm4576_vm7, %v18889_v43  ;;  %v12596_v25 = vor.u32 %v12595_v45, %v12591_v17  ;;  %v12617_v48 = vshll.u32 %v18755_v61, 16  ;;  %v12605_v47 = vrot.slane %v12603_v22, 6  ;;  %v12623_v28 = vshll.u32 %v18770_v40, 16  ;;  %14176 = vmatpush1.bf16.msra.mxu1 %v15613_v1 }
 0x48a   : > { %v12611_v16 = vrot.slane %v12609_v42, 7  ;;  %v12616_v13 = vrot.slane %v12614_v14, 6  ;;  %v5291_v29 = vcombine.low %v19081_v4, %v5290_v41  ;;  %v12587_v53 = vrot.slane %v12586_v3, 2  ;;  %v15614_v4 = vld [vmem:[%s20531_s3 + $0x24] ss:$8 sps:$4 sm:$0xff]  }
 0x48b   : > { %v12597_v32 = vrot.slane %v12596_v25, 2  ;;  %v12619_v58 = vrot.slane %v12617_v48, 7  ;;  %v12606_v21 = vor.u32 %v12605_v47, %v12601_v62  ;;  %v19141_v43 = vrot.slane %v12623_v28, 7  ;;  %v15616_v14 = vld [vmem:[%s20531_s3 + $0x160] ss:$8 sps:$4 sm:$0xff]   ;;  %14177 = vmatprep.subr.bf16.mxu1 %v15614_v4 }
 0x48c   : > { %v12162_v61 = vcombine.high %v18812_v35, %v18812_v35  ;;  %v12170_v19 = vcombine.high %v15134_v7, %v15134_v7  ;;  %5398 = vrot.lane.b32.xlu1 %v5291_v29, %s15737_s26  ;;  %v12592_v10 = vsel %vm16733_vm15, %v12587_v53, %v12591_v17  ;;  %v12399_v42 = vshrl.u32 %v18812_v35, 16  ;;  %v15618_v41 = vld [vmem:[%s20531_s3 + $0x164] ss:$8 sps:$4 sm:$0xff]   ;;  %v19168_v35 = vpop.permute.xlu0 %12874 }
 0x48d   : > { %20787 = vst [vmem:[#allocation43_spill] sm:$0xff] %v19141_v43  ;;  %9543 = vrot.lane.b32.xlu0 %v9436_v44, %s15740_s30  ;;  %v12602_v45 = vsel %vm16733_vm15, %v12597_v32, %v12601_v62  ;;  %v12620_v22 = vor.u32 %v12619_v58, %v12616_v13  ;;  %v12607_v3 = vrot.slane %v12606_v21, 2  ;;  %v12178_v44 = vcombine.high %v19135_v31, %v19135_v31  ;;  %v14795_v1 = vld.sshfl [vmem:[#allocation2 + $0xc] sm:$0x3 pattern:$0x76325410] }
 0x48e   : > { %v12817_v25 = vcombine.low %v12592_v10, %v12602_v45  ;;  %v12405_v17 = vshll.u32 %v12162_v61, 16  ;;  %v12401_v62 = vrot.slane %v12399_v42, 6  ;;  %v12410_v47 = vshrl.u32 %v15134_v7, 16  ;;  %14308 = vmatprep.subr.bf16.mxu0 %v15618_v41  ;;  %v19182_v41 = vpop.permute.xlu1 %4559 }
 0x48f   : > { %v12621_v48 = vrot.slane %v12620_v22, 2  ;;  %v12413_v13 = vshll.u32 %v15134_v7, 16  ;;  %v12612_v28 = vsel %vm16733_vm15, %v12607_v3, %v12611_v16  ;;  %v12419_v32 = vshll.u32 %v12170_v19, 16  ;;  %14309 = vmatpush1.bf16.msra.mxu0 %v15616_v14 }
 0x490   : > { %v12825_v29 = vrot.slane %v12817_v25, %v16483_v11  ;;  %v12407_v53 = vrot.slane %v12405_v17, 7  ;;  %v12402_v21 = vor.u32 %v12401_v62, %v18831_v39  ;;  %v12412_v61 = vrot.slane %v12410_v47, 6  ;;  %v19178_v16 = vld.sshfl [vmem:[#allocation2 + $0x20] sm:$0x33 pattern:$0x76325410] }
 0x491   : > { %v12626_v58 = vsel %vm16733_vm15, %v12621_v48, %v19141_v43  ;;  %v12415_v7 = vrot.slane %v12413_v13, 7  ;;  %v12421_v4 = vrot.slane %v12419_v32, 7  ;;  %v12423_v45 = vshrl.u32 %v12170_v19, 16  ;;  %v15631_v43 = vld [vmem:[%s20531_s3 + $0x40] ss:$8 sps:$4 sm:$0xff]  }
 0x492   : > { %v12818_v10 = vcombine.low %v12612_v28, %v12626_v58  ;;  %v12429_v22 = vshll.u32 %v19135_v31, 16  ;;  %v19180_v42 = vld.sshfl [vmem:[#allocation2 + $0x24] sm:$0x13 pattern:$0x76325410]  ;;  %v12403_v14 = vrot.slane %v12402_v21, 2  ;;  %v3838_v19 = vcombine.high %v19073_v46, %v19073_v46  ;;  %v19192_v21 = vpop.permute.xlu0 %12878 }
 0x493   : > { %v12416_v3 = vor.u32 %v12415_v7, %v12412_v61  ;;  %v12433_v25 = vshrl.u32 %v19135_v31, 16  ;;  %v12439_v17 = vshll.u32 %v12178_v44, 16  ;;  %v12425_v48 = vrot.slane %v12423_v45, 6  ;;  %v15619_v46 = vld [vmem:[%s20531_s3 + $0x20] ss:$8 sps:$4 sm:$0xff]  }
 0x494   : > { %v12832_v39 = vrot.slane %v12818_v10, %v16483_v11  ;;  %v12431_v62 = vrot.slane %v12429_v22, 7  ;;  %v19188_v47 = vld.sshfl [vmem:[#allocation2 + $0x28] sm:$0x33 pattern:$0x76325410]  ;;  %v12408_v13 = vsel %vm16733_vm15, %v12403_v14, %v12407_v53  ;;  %v4013_v44 = vcombine.low %v3838_v19, %v14795_v1  ;;  %14178 = vmatpush1.bf16.msra.mxu1 %v15619_v46 }
 0x495   : > { %v12417_v28 = vrot.slane %v12416_v3, 2  ;;  %v12435_v32 = vrot.slane %v12433_v25, 6  ;;  %v12441_v58 = vrot.slane %v12439_v17, 7  ;;  %v12426_v31 = vor.u32 %v12425_v48, %v12421_v4  ;;  %v15620_v10 = vld [vmem:[%s20531_s3 + $0x34] ss:$8 sps:$4 sm:$0xff]   ;;  %v19219_v25 = vpop.permute.xlu1 %9547 }
 0x496   : > { %v12833_v61 = vcombine.low %v12825_v29, %v12832_v39  ;;  %v4014_v7 = vcombine.low %v18940_v54, %v18955_v51  ;;  %v15622_v53 = vld [vmem:[%s20531_s3 + $0x170] ss:$8 sps:$4 sm:$0xff]   ;;  %v19209_v1 = vcombine.high %v19178_v16, %v19178_v16  ;;  %v4713_v54 = vcombine.high %v19180_v42, %v19180_v42  ;;  %v15624_v51 = vld [vmem:[%s20531_s3 + $0x174] ss:$8 sps:$4 sm:$0xff]   ;;  %14179 = vmatprep.subr.bf16.mxu1 %v15620_v10 }
 0x497   : > { %v12422_v29 = vsel %vm16733_vm15, %v12417_v28, %v12421_v4  ;;  %v12436_v45 = vor.u32 %v12435_v32, %v12431_v62  ;;  %v12427_v22 = vrot.slane %v12426_v31, 2  ;;  %v4021_v3 = vrot.slane %v4013_v44, %v16483_v11  ;;  %14310 = vmatprep.subr.bf16.mxu0 %v15624_v51  ;;  %v15625_v31 = vld [vmem:[%s20531_s3 + $0x30] ss:$8 sps:$4 sm:$0xff]   ;;  %v15626_v44 = vld [vmem:[%s20531_s3 + $0x44] ss:$8 sps:$4 sm:$0xff]  }
 0x498   : > { %12880 = vrot.lane.b32.xlu1 %v12833_v61, %s15737_s26  ;;  %v12749_v14 = vcombine.low %v12408_v13, %v12422_v29  ;;  %v4028_v4 = vrot.slane %v4014_v7, %v16483_v11  ;;  %v19223_v39 = vcombine.high %v19188_v47, %v19188_v47  ;;  %v4970_v48 = vshrl.u32 %v19178_v16, 16  ;;  %14311 = vmatpush1.bf16.msra.mxu0 %v15622_v53  ;;  %v19240_v29 = vpop.permute.xlu0 %7896 }
 0x499   : > { %v12437_v17 = vrot.slane %v12436_v45, 2  ;;  %v4973_v19 = vshll.u32 %v19178_v16, 16  ;;  %v12432_v13 = vsel %vm16733_vm15, %v12427_v22, %v12431_v62  ;;  %v4979_v61 = vshll.u32 %v19209_v1, 16  ;;  %v15628_v45 = vld [vmem:[%s20531_s3 + $0x180] ss:$8 sps:$4 sm:$0xff]   ;;  %14180 = vmatpush1.bf16.msra.mxu1 %v15625_v31  ;;  %v19256_v31 = vpop.permute.xlu1 %6238 }
 0x49a   : > { %v12757_v28 = vrot.slane %v12749_v14, %v16483_v11  ;;  %v4029_v32 = vcombine.low %v4021_v3, %v4028_v4  ;;  %v4972_v46 = vrot.slane %v4970_v48, 6  ;;  %v4983_v62 = vshrl.u32 %v19209_v1, 16  ;;  %v14797_v3 = vld.sshfl [vmem:[#allocation2 + $0x14] sm:$0x3 pattern:$0x76325410]  ;;  %14181 = vmatprep.subr.bf16.mxu1 %v15626_v44 }
 0x49b   : > { %v12442_v7 = vsel %vm16733_vm15, %v12437_v17, %v12441_v58  ;;  %v4975_v10 = vrot.slane %v4973_v19, 7  ;;  %v4981_v53 = vrot.slane %v4979_v61, 7  ;;  %v4989_v22 = vshll.u32 %v19180_v42, 16  ;;  %v15630_v4 = vld [vmem:[%s20531_s3 + $0x184] ss:$8 sps:$4 sm:$0xff]   ;;  %20788 = vst [vmem:[#allocation44_spill] sm:$0xff] %v19256_v31 }
 0x49c   : > { %v12750_v51 = vcombine.low %v12432_v13, %v12442_v7  ;;  %4160 = vst.msk [vmem:[#allocation3 + $0x20] sm:$0xff] %vm4158_vm1, %v4029_v32  ;;  %v4993_v14 = vshrl.u32 %v19180_v42, 16  ;;  %v14799_v58 = vld.sshfl [vmem:[#allocation2 + $0x1c] sm:$0x3 pattern:$0x76325410]  ;;  %14312 = vmatprep.subr.bf16.mxu0 %v15630_v4 }
 0x49d   : > { %4578 = vst.msk [vmem:[#allocation3 + $0x20] sm:$0xff] %vm4576_vm7, %v18907_v24  ;;  %v4976_v17 = vor.u32 %v4975_v10, %v4972_v46  ;;  %v4985_v48 = vrot.slane %v4983_v62, 6  ;;  %v4999_v19 = vshll.u32 %v4713_v54, 16  ;;  %v5004_v13 = vshrl.u32 %v19188_v47, 16  ;;  %14313 = vmatpush1.bf16.msra.mxu0 %v15628_v45  ;;  %v15632_v44 = vld [vmem:[%s20531_s3 + $0x54] ss:$8 sps:$4 sm:$0xff]   ;;  %14182 = vmatpush1.bf16.msra.mxu1 %v15631_v43 }
 0x49e   : > { %v12764_v32 = vrot.slane %v12750_v51, %v16483_v11  ;;  %v4991_v61 = vrot.slane %v4989_v22, 7  ;;  %v4995_v42 = vrot.slane %v4993_v14, 6  ;;  %v5007_v7 = vshll.u32 %v19188_v47, 16  ;;  %14183 = vmatprep.subr.bf16.mxu1 %v15632_v44 }
 0x49f   : > { %v4977_v24 = vrot.slane %v4976_v17, 2  ;;  %v4986_v46 = vor.u32 %v4985_v48, %v4981_v53  ;;  %v5001_v10 = vrot.slane %v4999_v19, 7  ;;  %v5006_v54 = vrot.slane %v5004_v13, 6  ;;  %v19271_v19 = vpop.permute.xlu0 %12876 }
 0x4a0   : > { %v12765_v62 = vcombine.low %v12757_v28, %v12764_v32  ;;  %v4996_v51 = vor.u32 %v4995_v42, %v4991_v61  ;;  %v5009_v22 = vrot.slane %v5007_v7, 7  ;;  %v5013_v14 = vshll.u32 %v19223_v39, 16  ;;  %v14851_v31 = vld.sshfl [vmem:[#allocation2 + $0x2c] sm:$0x13 pattern:$0x76325410] }
 0x4a1   : > { %v4982_v4 = vsel %vm16733_vm15, %v4977_v24, %v4981_v53  ;;  %v4987_v40 = vrot.slane %v4986_v46, 2  ;;  %v4030_v17 = vcombine.low %v14797_v3, %v18834_v37  ;;  %v4031_v48 = vcombine.low %v18844_v5, %v14799_v58  ;;  %v19269_v45 = vld.sshfl [vmem:[#allocation2 + $0x30] sm:$0x33 pattern:$0x76325410] }
 0x4a2   : > { %12872 = vrot.lane.b32.xlu0 %v12765_v62, %s15737_s26  ;;  %v4997_v28 = vrot.slane %v4996_v51, 2  ;;  %v5010_v13 = vor.u32 %v5009_v22, %v5006_v54  ;;  %v5015_v32 = vrot.slane %v5013_v14, 7  ;;  %v10257_v43 = vcombine.low %v19122_v57, %v4982_v4  ;;  %v15634_v53 = vld [vmem:[%s20531_s3 + $0x190] ss:$8 sps:$4 sm:$0xff]   ;;  %v15636_v37 = vld [vmem:[%s20531_s3 + $0x194] ss:$8 sps:$4 sm:$0xff]   ;;  %v19288_v54 = vpop.permute.xlu1 %11219 }
 0x4a3   : > { %v4992_v5 = vsel %vm16733_vm15, %v4987_v40, %v4991_v61  ;;  %v4038_v3 = vrot.slane %v4030_v17, %v16483_v11  ;;  %v4045_v58 = vrot.slane %v4031_v48, %v16483_v11  ;;  %v4729_v42 = vcombine.high %v14851_v31, %v14851_v31  ;;  %20789 = vst [vmem:[#allocation45_spill] sm:$0xff] %v19288_v54  ;;  %v15638_v17 = vld [vmem:[%s20531_s3 + $0x64] ss:$8 sps:$4 sm:$0xff]  }
 0x4a4   : > { %v5002_v7 = vsel %vm16733_vm15, %v4997_v28, %v5001_v10  ;;  %v5011_v57 = vrot.slane %v5010_v13, 2  ;;  %v5292_v24 = vcombine.low %v4982_v4, %v4992_v5  ;;  %v10265_v46 = vrot.slane %v10257_v43, %v16483_v11  ;;  %14314 = vmatprep.subr.bf16.mxu0 %v15636_v37  ;;  %v15637_v4 = vld [vmem:[%s20531_s3 + $0x50] ss:$8 sps:$4 sm:$0xff]   ;;  %v19311_v37 = vpop.permute.xlu0 %7898 }
 0x4a5   : > { %v10258_v44 = vcombine.low %v4992_v5, %v5002_v7  ;;  %v4046_v62 = vcombine.low %v4038_v3, %v4045_v58  ;;  %v19292_v40 = vcombine.high %v19269_v45, %v19269_v45  ;;  %v5017_v61 = vshrl.u32 %v19223_v39, 16  ;;  %14315 = vmatpush1.bf16.msra.mxu0 %v15634_v53  ;;  %v19309_v13 = vld.sshfl [vmem:[#allocation2 + $0x34] sm:$0x13 pattern:$0x76325410]  ;;  %14184 = vmatpush1.bf16.msra.mxu1 %v15637_v4 }
 0x4a6   : > { %v19297_v51 = vsel %vm16733_vm15, %v5011_v57, %v5015_v32  ;;  %v5300_v10 = vrot.slane %v5292_v24, %v16483_v11  ;;  %v5023_v22 = vshll.u32 %v14851_v31, 16  ;;  %v5027_v14 = vshrl.u32 %v14851_v31, 16  ;;  %14185 = vmatprep.subr.bf16.mxu1 %v15638_v17  ;;  %v19324_v54 = vpop.permute.xlu1 %4561  ;;  %v15642_v4 = vld [vmem:[%s20531_s3 + $0x1a4] ss:$8 sps:$4 sm:$0xff]  }
 0x4a7   : > { %v5293_v48 = vcombine.low %v5002_v7, %v19297_v51  ;;  %v10272_v28 = vrot.slane %v10258_v44, %v16483_v11  ;;  %4161 = vst.msk [vmem:[#allocation3 + $0x40] sm:$0xff] %vm4158_vm1, %v4046_v62  ;;  %v5019_v43 = vrot.slane %v5017_v61, 6  ;;  %v5033_v53 = vshll.u32 %v4729_v42, 16  ;;  %v15640_v42 = vld [vmem:[%s20531_s3 + $0x1a0] ss:$8 sps:$4 sm:$0xff]   ;;  %20790 = vst [vmem:[#allocation46_spill] sm:$0xff] %v19324_v54  ;;  %14316 = vmatprep.subr.bf16.mxu0 %v15642_v4 }
 0x4a8   : > { %4579 = vst.msk [vmem:[#allocation3 + $0x40] sm:$0xff] %vm4576_vm7, %v18942_v36  ;;  %v5025_v31 = vrot.slane %v5023_v22, 7  ;;  %v5029_v5 = vrot.slane %v5027_v14, 6  ;;  %v5038_v3 = vshrl.u32 %v19269_v45, 16  ;;  %v5041_v58 = vshll.u32 %v19269_v45, 16 }
 0x4a9   : > { %v19317_v7 = vld.sshfl [vmem:[#allocation2 + $0x15c] sm:$0x13 pattern:$0x76325410]  ;;  %v5307_v57 = vrot.slane %v5293_v48, %v16483_v11  ;;  %v10273_v24 = vcombine.low %v10265_v46, %v10272_v28  ;;  %v5020_v44 = vor.u32 %v5019_v43, %v5015_v32  ;;  %v5035_v62 = vrot.slane %v5033_v53, 7  ;;  %14317 = vmatpush1.bf16.msra.mxu0 %v15640_v42 }
 0x4aa   : > { %v5030_v36 = vor.u32 %v5029_v5, %v5025_v31  ;;  %v5040_v61 = vrot.slane %v5038_v3, 6  ;;  %v5043_v22 = vrot.slane %v5041_v58, 7  ;;  %v5047_v14 = vshll.u32 %v19292_v40, 16 }
 0x4ab   : > { %v5308_v48 = vcombine.low %v5300_v10, %v5307_v57  ;;  %10380 = vrot.lane.b32.xlu0 %v10273_v24, %s15737_s26  ;;  %v5021_v32 = vrot.slane %v5020_v44, 2  ;;  %v5051_v46 = vshrl.u32 %v19292_v40, 16  ;;  %v5057_v17 = vshll.u32 %v19309_v13, 16  ;;  %v7903_v24 = vpop.permute.xlu0 %7902 }
 0x4ac   : > { %v5031_v28 = vrot.slane %v5030_v36, 2  ;;  %v5044_v43 = vor.u32 %v5043_v22, %v5040_v61  ;;  %v5049_v53 = vrot.slane %v5047_v14, 7  ;;  %v12999_v5 = vcombine.high %v18933_v30, %v18933_v30 }
 0x4ad   : > { %5400 = vrot.lane.b32.xlu1 %v5308_v48, %s15737_s26  ;;  %v19337_v3 = vsel %vm16733_vm15, %v5021_v32, %v5025_v31  ;;  %v5053_v10 = vrot.slane %v5051_v46, 6  ;;  %v19339_v58 = vrot.slane %v5057_v17, 7  ;;  %v13015_v57 = vcombine.high %v19317_v7, %v19317_v7  ;;  %v19357_v17 = vpop.permute.xlu1 %6240 }
 0x4ae   : > { %v19345_v44 = vsel %vm16733_vm15, %v5031_v28, %v5035_v62  ;;  %v5045_v36 = vrot.slane %v5044_v43, 2  ;;  %v13236_v61 = vshrl.u32 %v18933_v30, 16  ;;  %v13242_v22 = vshll.u32 %v12999_v5, 16  ;;  %20791 = vst [vmem:[#allocation47_spill] sm:$0xff] %v19357_v17  ;;  %v15643_v30 = vld [vmem:[%s20531_s3 + $0x60] ss:$8 sps:$4 sm:$0xff]  }
 0x4af   : > { %v5054_v14 = vor.u32 %v5053_v10, %v5049_v53  ;;  %v5309_v31 = vcombine.low %v19337_v3, %v19345_v44  ;;  %v13247_v4 = vshrl.u32 %v19025_v9, 16  ;;  %v13250_v48 = vshll.u32 %v19025_v9, 16  ;;  %14186 = vmatpush1.bf16.msra.mxu1 %v15643_v30 }
 0x4b0   : > { %v19354_v32 = vsel %vm16733_vm15, %v5045_v36, %v5049_v53  ;;  %v13238_v42 = vrot.slane %v13236_v61, 6  ;;  %v13244_v46 = vrot.slane %v13242_v22, 7  ;;  %v13256_v62 = vshll.u32 %v19053_v60, 16  ;;  %v15644_v53 = vld [vmem:[%s20531_s3 + $0x74] ss:$8 sps:$4 sm:$0xff]  }
 0x4b1   : > { %v5055_v28 = vrot.slane %v5054_v14, 2  ;;  %v19363_v43 = vrot.slane %v5309_v31, %v16483_v11  ;;  %v13249_v5 = vrot.slane %v13247_v4, 6  ;;  %v13252_v9 = vrot.slane %v13250_v48, 7  ;;  %v15646_v14 = vld [vmem:[%s20531_s3 + $0x1b0] ss:$8 sps:$4 sm:$0xff]   ;;  %14187 = vmatprep.subr.bf16.mxu1 %v15644_v53 }
 0x4b2   : > { %v13239_v10 = vor.u32 %v13238_v42, %v18957_v50  ;;  %v13258_v36 = vrot.slane %v13256_v62, 7  ;;  %v13260_v61 = vshrl.u32 %v19053_v60, 16  ;;  %v13266_v22 = vshll.u32 %v19317_v7, 16  ;;  %v7901_v50 = vpop.permute.xlu0 %7900  ;;  %v15648_v60 = vld [vmem:[%s20531_s3 + $0x1b4] ss:$8 sps:$4 sm:$0xff]  }
 0x4b3   : > { %v19377_v31 = vsel %vm16733_vm15, %v5055_v28, %v19339_v58  ;;  %v13253_v4 = vor.u32 %v13252_v9, %v13249_v5  ;;  %v13270_v48 = vshrl.u32 %v19317_v7, 16  ;;  %v19380_v17 = vshll.u32 %v13015_v57, 16  ;;  %14318 = vmatprep.subr.bf16.mxu0 %v15648_v60  ;;  %v19395_v53 = vld.sshfl [vmem:[#allocation2 + $0x8c] sm:$0x13 pattern:$0x76325410] }
 0x4b4   : > { %v5310_v42 = vcombine.low %v19354_v32, %v19377_v31  ;;  %v13240_v62 = vrot.slane %v13239_v10, 2  ;;  %v13262_v30 = vrot.slane %v13260_v61, 6  ;;  %v19387_v54 = vrot.slane %v13266_v22, 7  ;;  %14319 = vmatpush1.bf16.msra.mxu0 %v15646_v14  ;;  %v15654_v61 = vld [vmem:[%s20531_s3 + $0x1c4] ss:$8 sps:$4 sm:$0xff]  }
 0x4b5   : > { %v13254_v28 = vrot.slane %v13253_v4, 2  ;;  %v13272_v6 = vrot.slane %v13270_v48, 6  ;;  %v13278_v5 = vrot.slane %v19380_v17, 7  ;;  %vm5421_vm8 = vcmask 785920   ;;  %14320 = vmatprep.subr.bf16.mxu0 %v15654_v61 }
 0x4b6   : > { %v5324_v7 = vrot.slane %v5310_v42, %v16483_v11  ;;  %v13245_v57 = vsel %vm16733_vm15, %v13240_v62, %v13244_v46  ;;  %v13263_v9 = vor.u32 %v13262_v30, %v13258_v36  ;;  %7913 = vst.msk [vmem:[#allocation3 + $0x8] sm:$0xff] %vm5421_vm8, %v18975_v59  ;;  %7915 = vst.msk [vmem:[#allocation3 + $0x48] sm:$0xff] %vm5421_vm8, %v18999_v63  ;;  %v19417_v63 = vpop.permute.xlu1 %4563  ;;  %v10755_v4 = vshrl.u32 %v19062_v33, 16 }
 0x4b7   : > { %7914 = vst.msk [vmem:[#allocation3 + $0x28] sm:$0xff] %vm5421_vm8, %v19030_v18  ;;  %7916 = vst.msk [vmem:[#allocation3 + $0x68] sm:$0xff] %vm5421_vm8, %v19111_v56  ;;  %v13259_v59 = vsel %vm16733_vm15, %v13254_v28, %v13258_v36  ;;  %v13273_v18 = vor.u32 %v13272_v6, %v19387_v54  ;;  %v10274_v56 = vcombine.low %v19297_v51, %v19337_v3  ;;  %v20793_v6 = vld [vmem:[#allocation27_spill] sm:$0xff]  ;;  %v15652_v36 = vld [vmem:[%s20531_s3 + $0x1c0] ss:$8 sps:$4 sm:$0xff]   ;;  %v10764_v42 = vshll.u32 %v19085_v38, 16 }
 0x4b8   : > { %7917 = vst.msk [vmem:[#allocation3 + $0x88] sm:$0xff] %vm5421_vm8, %v19137_v0  ;;  %12898 = vst.msk [vmem:[#allocation3 + $0x78] sm:$0xff] %vm5421_vm8, %v19168_v35  ;;  %v10275_v0 = vcombine.low %v19345_v44, %v19354_v32  ;;  %v20792_v35 = vld [vmem:[#allocation31_spill] sm:$0xff]  ;;  %v10523_v44 = vcombine.high %v19395_v53, %v19395_v53  ;;  %v15650_v32 = vld [vmem:[%s20531_s3 + $0x84] ss:$8 sps:$4 sm:$0xff]   ;;  %v10757_v30 = vrot.slane %v10755_v4, 6  ;;  %14321 = vmatpush1.bf16.msra.mxu0 %v15652_v36 }
 0x4b9   : > { %12900 = vst.msk [vmem:[#allocation3 + $0xb8] sm:$0xff] %vm5421_vm8, %v19192_v21  ;;  %7918 = vst.msk [vmem:[#allocation3 + $0xa8] sm:$0xff] %vm5421_vm8, %v19240_v29  ;;  %v20795_v21 = vld [vmem:[#allocation35_spill] sm:$0xff]  ;;  %v13264_v29 = vrot.slane %v13263_v9, 2  ;;  %v10282_v3 = vrot.slane %v10274_v56, %v16483_v11  ;;  %v10009_v4 = vshrl.u32 %v19309_v13, 16 }
 0x4ba   : > { %12899 = vst.msk [vmem:[#allocation3 + $0x98] sm:$0xff] %vm5421_vm8, %v19271_v19  ;;  %7919 = vst.msk [vmem:[#allocation3 + $0xc8] sm:$0xff] %vm5421_vm8, %v19311_v37  ;;  %v13586_v19 = vcombine.low %v13245_v57, %v13259_v59  ;;  %v13274_v37 = vrot.slane %v13273_v18, 2  ;;  %v19480_v62 = vpop.permute.xlu1 %11223  ;;  %v10766_v59 = vrot.slane %v10764_v42, 7  ;;  %v10778_v18 = vshrl.u32 %v19395_v53, 16 }
 0x4bb   : > { %7921 = vst.msk [vmem:[#allocation3 + $0x108] sm:$0xff] %vm5421_vm8, %v7903_v24  ;;  %7920 = vst.msk [vmem:[#allocation3 + $0xe8] sm:$0xff] %vm5421_vm8, %v7901_v50  ;;  %v10289_v24 = vrot.slane %v10275_v0, %v16483_v11  ;;  %v13269_v46 = vsel %vm16733_vm15, %v13264_v29, %v19387_v54  ;;  %v10758_v54 = vshll.u32 %v19062_v33, 16  ;;  %v15655_v33 = vld [vmem:[%s20531_s3 + $0x80] ss:$8 sps:$4 sm:$0xff]  }
 0x4bc   : > { %8750 = vst.msk [vmem:[#allocation3 + $0x8] sm:$0xff] %vm6259_vm11, %v18326_v34  ;;  %8752 = vst.msk [vmem:[#allocation3 + $0x48] sm:$0xff] %vm6259_vm11, %v18642_v52  ;;  %v20794_v34 = vld [vmem:[#allocation30_spill] sm:$0xff]  ;;  %v20796_v52 = vld [vmem:[#allocation32_spill] sm:$0xff]  ;;  %v13594_v17 = vrot.slane %v13586_v19, %v16483_v11  ;;  %v13279_v22 = vsel %vm16733_vm15, %v13274_v37, %v13278_v5  ;;  %v10774_v5 = vshll.u32 %v19395_v53, 16  ;;  %v4047_v53 = vcombine.low %v19178_v16, %v19209_v1 }
 0x4bd   : > { %8751 = vst.msk [vmem:[#allocation3 + $0x28] sm:$0xff] %vm6259_vm11, %v18339_v2  ;;  %8753 = vst.msk [vmem:[#allocation3 + $0x68] sm:$0xff] %vm6259_vm11, %v18669_v23  ;;  %v20797_v2 = vld [vmem:[#allocation36_spill] sm:$0xff]  ;;  %v5325_v23 = vcombine.low %v19363_v43, %v5324_v7  ;;  %v10290_v14 = vcombine.low %v10282_v3, %v10289_v24  ;;  %v13587_v48 = vcombine.low %v13269_v46, %v13279_v22  ;;  %v10760_v28 = vrot.slane %v10758_v54, 7  ;;  %v15658_v29 = vld [vmem:[%s20531_s3 + $0x1d0] ss:$8 sps:$4 sm:$0xff]   ;;  %v19502_v3 = vpop.permute.xlu0 %9539 }
 0x4be   : > { %8754 = vst.msk [vmem:[#allocation3 + $0x88] sm:$0xff] %vm6259_vm11, %v20792_v35  ;;  %13735 = vst.msk [vmem:[#allocation3 + $0x78] sm:$0xff] %vm6259_vm11, %v20793_v6  ;;  %v10768_v7 = vshrl.u32 %v19085_v38, 16  ;;  %v15656_v35 = vld [vmem:[%s20531_s3 + $0x94] ss:$8 sps:$4 sm:$0xff]   ;;  %v19516_v46 = vpop.permute.xlu1 %6242 }
 0x4bf   : > { %13737 = vst.msk [vmem:[#allocation3 + $0xb8] sm:$0xff] %vm6259_vm11, %v18928_v8  ;;  %8755 = vst.msk [vmem:[#allocation3 + $0xa8] sm:$0xff] %vm6259_vm11, %v20794_v34  ;;  %v20798_v8 = vld [vmem:[#allocation40_spill] sm:$0xff]  ;;  %5402 = vrot.lane.b32.xlu1 %v5325_v23, %s15737_s26  ;;  %v13601_v57 = vrot.slane %v13587_v48, %v16483_v11  ;;  %v10761_v6 = vor.u32 %v10760_v28, %v10757_v30  ;;  %v15660_v24 = vld [vmem:[%s20531_s3 + $0x1d4] ss:$8 sps:$4 sm:$0xff]  }
 0x4c0   : > { %13736 = vst.msk [vmem:[#allocation3 + $0x98] sm:$0xff] %vm6259_vm11, %v20795_v21  ;;  %8756 = vst.msk [vmem:[#allocation3 + $0xc8] sm:$0xff] %vm6259_vm11, %v20796_v52  ;;  %v10507_v51 = vcombine.high %v20798_v8, %v20798_v8  ;;  %v10744_v43 = vshrl.u32 %v20798_v8, 16  ;;  %v10770_v34 = vrot.slane %v10768_v7, 6  ;;  %v10776_v21 = vrot.slane %v10774_v5, 7  ;;  %14322 = vmatprep.subr.bf16.mxu0 %v15660_v24 }
 0x4c1   : > { %8758 = vst.msk [vmem:[#allocation3 + $0x108] sm:$0xff] %vm6259_vm11, %v18948_v26  ;;  %8757 = vst.msk [vmem:[#allocation3 + $0xe8] sm:$0xff] %vm6259_vm11, %v20797_v2  ;;  %v15649_v26 = vld [vmem:[%s20531_s3 + $0x70] ss:$8 sps:$4 sm:$0xff]   ;;  %v10784_v52 = vshll.u32 %v10523_v44, 16  ;;  %v13602_v2 = vcombine.low %v13594_v17, %v13601_v57  ;;  %v10762_v19 = vrot.slane %v10761_v6, 2  ;;  %14323 = vmatpush1.bf16.msra.mxu0 %v15658_v29 }
 0x4c2   : > { %v10750_v10 = vshll.u32 %v10507_v51, 16  ;;  %14188 = vmatpush1.bf16.msra.mxu1 %v15649_v26  ;;  %v10746_v50 = vrot.slane %v10744_v43, 6  ;;  %v14801_v56 = vld.sshfl [vmem:[#allocation2 + $0x24] sm:$0x3 pattern:$0x76325410]  ;;  %v10771_v8 = vor.u32 %v10770_v34, %v10766_v59  ;;  %v4055_v26 = vrot.slane %v4047_v53, %v16483_v11  ;;  %v19550_v53 = vpop.permute.xlu1 %11221 }
 0x4c3   : > { %14189 = vmatprep.subr.bf16.mxu1 %v15650_v32  ;;  %10382 = vrot.lane.b32.xlu1 %v10290_v14, %s15737_s26  ;;  %v19491_v0 = vld.sshfl [vmem:[#allocation2 + $0x38] sm:$0x33 pattern:$0x76325410]  ;;  %v13742_v38 = vld [vmem:[#allocation3 + $0x8] sm:$0xff]  ;;  %v10786_v51 = vrot.slane %v10784_v52, 7  ;;  %v4048_v37 = vcombine.low %v14801_v56, %v19188_v47  ;;  %v9718_v32 = vcombine.high %v19309_v13, %v19309_v13  ;;  %v10767_v43 = vsel %vm16733_vm15, %v10762_v19, %v10766_v59 }
 0x4c4   : > { %v10752_v60 = vrot.slane %v10750_v10, 7  ;;  %v10747_v9 = vor.u32 %v10746_v50, %v19034_v20  ;;  %14205 = vmatprep.mubr.bf16.mxu1 %v13742_v38  ;;  %v10780_v20 = vrot.slane %v10778_v18, 6  ;;  %v15661_v16 = vld [vmem:[%s20531_s3 + $0x90] ss:$8 sps:$4 sm:$0xff]   ;;  %13709 = vrot.lane.b32.xlu0 %v13602_v2, %s15738_s27  ;;  %v15662_v17 = vld [vmem:[%s20531_s3 + $0xa4] ss:$8 sps:$4 sm:$0xff]   ;;  %v19526_v61 = vcombine.high %v19491_v0, %v19491_v0 }
 0x4c5   : > { %v10772_v10 = vrot.slane %v10771_v8, 2  ;;  %v4062_v36 = vrot.slane %v4048_v37, %v16483_v11  ;;  %v10015_v54 = vshll.u32 %v9718_v32, 16  ;;  %v10020_v42 = vshrl.u32 %v19491_v0, 16  ;;  %v15664_v57 = vld [vmem:[%s20531_s3 + $0x1e0] ss:$8 sps:$4 sm:$0xff]   ;;  %v20799_v34 = vld [vmem:[#allocation39_spill] sm:$0xff] }
 0x4c6   : > { %14190 = vmatpush1.bf16.msra.mxu1 %v15655_v33  ;;  %v10748_v23 = vrot.slane %v10747_v9, 2  ;;  %v10781_v44 = vor.u32 %v10780_v20, %v10776_v21  ;;  %v10023_v30 = vshll.u32 %v19491_v0, 16  ;;  %v10011_v5 = vrot.slane %v10009_v4, 6  ;;  %v15666_v6 = vld [vmem:[%s20531_s3 + $0x1e4] ss:$8 sps:$4 sm:$0xff]  }
 0x4c7   : > { %14191 = vmatprep.subr.bf16.mxu1 %v15656_v35  ;;  %v10777_v48 = vsel %vm16733_vm15, %v10772_v10, %v10776_v21  ;;  %v4063_v50 = vcombine.low %v4055_v26, %v4062_v36  ;;  %v10017_v33 = vrot.slane %v10015_v54, 7  ;;  %v15080_v13 = vld.sshfl [vmem:[#allocation2 + $0xd8] sm:$0x33 pattern:$0x76325410]  ;;  %v10022_v59 = vrot.slane %v10020_v42, 6  ;;  %v19541_v35 = vpop.permute.xlu0 %12868  ;;  %14324 = vmatprep.subr.bf16.mxu0 %v15666_v6 }
 0x4c8   : > { %v10753_v1 = vsel %vm16733_vm15, %v10748_v23, %v10752_v60  ;;  %v10782_v22 = vrot.slane %v10781_v44, 2  ;;  %v15045_v60 = vld.sshfl [vmem:[#allocation2 + $0x3c] sm:$0x13 pattern:$0x76325410]  ;;  %v10025_v18 = vrot.slane %v10023_v30, 7  ;;  %v10012_v21 = vor.u32 %v10011_v5, %v19339_v58  ;;  %14325 = vmatpush1.bf16.msra.mxu0 %v15664_v57 }
 0x4c9   : > { %v11094_v14 = vcombine.low %v10753_v1, %v10767_v43  ;;  %4162 = vst.msk [vmem:[#allocation3 + $0x60] sm:$0xff] %vm4158_vm1, %v4063_v50  ;;  %v10029_v56 = vshll.u32 %v19526_v61, 16  ;;  %v15081_v38 = vld.sshfl [vmem:[#allocation2 + $0xdc] sm:$0x3 pattern:$0x76325410]  ;;  %v4761_v23 = vcombine.high %v15045_v60, %v15045_v60 }
 0x4ca   : > { %14192 = vmatpush1.bf16.msra.mxu1 %v15661_v16  ;;  %v10787_v28 = vsel %vm16733_vm15, %v10782_v22, %v10786_v51  ;;  %4580 = vst.msk [vmem:[#allocation3 + $0x60] sm:$0xff] %vm4576_vm7, %v20799_v34  ;;  %v10033_v52 = vshrl.u32 %v19526_v61, 16  ;;  %v10039_v2 = vshll.u32 %v15045_v60, 16  ;;  %v10026_v19 = vor.u32 %v10025_v18, %v10022_v59  ;;  %v15667_v4 = vld [vmem:[%s20531_s3 + $0xa0] ss:$8 sps:$4 sm:$0xff]   ;;  %v19579_v59 = vpop.permute.xlu1 %4565 }
 0x4cb   : > { %14193 = vmatprep.subr.bf16.mxu1 %v15662_v17  ;;  %v11102_v7 = vrot.slane %v11094_v14, %v16483_v11  ;;  %v11095_v9 = vcombine.low %v10777_v48, %v10787_v28  ;;  %v15082_v20 = vld.sshfl [vmem:[#allocation2 + $0xe0] sm:$0x33 pattern:$0x76325410]  ;;  %v10031_v8 = vrot.slane %v10029_v56, 7  ;;  %v5095_v51 = vshrl.u32 %v15045_v60, 16  ;;  %v19569_v28 = vpop.permute.xlu0 %10376 }
 0x4cc   : > { %v19553_v37 = vld.sshfl [vmem:[#allocation2 + $0x40] sm:$0x33 pattern:$0x76325410]  ;;  %v10013_v24 = vrot.slane %v10012_v21, 2  ;;  %v10035_v16 = vrot.slane %v10033_v52, 6  ;;  %v11305_v17 = vcombine.high %v15080_v13, %v15080_v13  ;;  %v11479_v14 = vcombine.low %v15081_v38, %v15082_v20 }
 0x4cd   : > { %v11109_v29 = vrot.slane %v11095_v9, %v16483_v11  ;;  %v10041_v1 = vrot.slane %v10039_v2, 7  ;;  %v5101_v44 = vshll.u32 %v4761_v23, 16  ;;  %v10027_v26 = vrot.slane %v10026_v19, 2  ;;  %v15668_v54 = vld [vmem:[%s20531_s3 + $0xb4] ss:$8 sps:$4 sm:$0xff]  }
 0x4ce   : > { %v5097_v32 = vrot.slane %v5095_v51, 6  ;;  %v14857_v43 = vld.sshfl [vmem:[#allocation2 + $0x44] sm:$0x13 pattern:$0x76325410]  ;;  %v10018_v10 = vsel %vm16733_vm15, %v10013_v24, %v10017_v33  ;;  %v10036_v36 = vor.u32 %v10035_v16, %v10031_v8  ;;  %v11478_v42 = vcombine.low %v15080_v13, %v11305_v17  ;;  %14194 = vmatpush1.bf16.msra.mxu1 %v15667_v4 }
 0x4cf   : > { %v11110_v58 = vcombine.low %v11102_v7, %v11109_v29  ;;  %v5103_v22 = vrot.slane %v5101_v44, 7  ;;  %v10032_v48 = vsel %vm16733_vm15, %v10027_v26, %v10031_v8  ;;  %v10291_v50 = vcombine.low %v19377_v31, %v10018_v10  ;;  %v19567_v30 = vld.sshfl [vmem:[#allocation2 + $0x48] sm:$0x33 pattern:$0x76325410]  ;;  %14195 = vmatprep.subr.bf16.mxu1 %v15668_v54  ;;  %v13706_v26 = vpop.permute.xlu0 %13705 }
 0x4d0   : > { %v5098_v60 = vor.u32 %v10041_v1, %v5097_v32  ;;  %v15670_v7 = vld [vmem:[%s20531_s3 + $0x1f0] ss:$8 sps:$4 sm:$0xff]   ;;  %v10037_v5 = vrot.slane %v10036_v36, 2  ;;  %v5326_v33 = vcombine.low %v10018_v10, %v10032_v48  ;;  %v11493_v57 = vrot.slane %v11479_v14, %v16483_v11  ;;  %v15672_v31 = vld [vmem:[%s20531_s3 + $0x1f4] ss:$8 sps:$4 sm:$0xff]   ;;  %v19610_v14 = vpop.permute.xlu1 %6244 }
 0x4d1   : > { %11217 = vrot.lane.b32.xlu0 %v11110_v58, %s15738_s27  ;;  %v19577_v9 = vcombine.high %v19553_v37, %v19553_v37  ;;  %v10299_v13 = vrot.slane %v10291_v50, %v16483_v11  ;;  %v11486_v56 = vrot.slane %v11478_v42, %v16483_v11  ;;  %v4777_v38 = vcombine.high %v14857_v43, %v14857_v43  ;;  %v15673_v32 = vld [vmem:[%s20531_s3 + $0xb0] ss:$8 sps:$4 sm:$0xff]   ;;  %v15674_v4 = vld [vmem:[%s20531_s3 + $0xc4] ss:$8 sps:$4 sm:$0xff]  }
 0x4d2   : > { %v5099_v18 = vrot.slane %v5098_v60, 2  ;;  %v10042_v6 = vsel %vm16733_vm15, %v10037_v5, %v10041_v1  ;;  %v5334_v34 = vrot.slane %v5326_v33, %v16483_v11  ;;  %v19591_v21 = vcombine.high %v19567_v30, %v19567_v30  ;;  %14326 = vmatprep.subr.bf16.mxu0 %v15672_v31  ;;  %v14993_v60 = vld.sshfl [vmem:[#allocation2 + $0x2c] sm:$0x3 pattern:$0x76325410]  ;;  %14196 = vmatpush1.bf16.msra.mxu1 %v15673_v32 }
 0x4d3   : > { %v5106_v52 = vshrl.u32 %v19553_v37, 16  ;;  %v10292_v2 = vcombine.low %v10032_v48, %v10042_v6  ;;  %v11494_v20 = vcombine.low %v11486_v56, %v11493_v57  ;;  %v5109_v29 = vshll.u32 %v19553_v37, 16  ;;  %14327 = vmatpush1.bf16.msra.mxu0 %v15670_v7  ;;  %14197 = vmatprep.subr.bf16.mxu1 %v15674_v4 }
 0x4d4   : > { %v19596_v23 = vsel %vm16733_vm15, %v5099_v18, %v5103_v22  ;;  %v5115_v51 = vshll.u32 %v19577_v9, 16  ;;  %v5119_v24 = vshrl.u32 %v19577_v9, 16  ;;  %v5125_v44 = vshll.u32 %v14857_v43, 16 }
 0x4d5   : > { %v5327_v19 = vcombine.low %v10042_v6, %v19596_v23  ;;  %v5108_v8 = vrot.slane %v5106_v52, 6  ;;  %v10306_v16 = vrot.slane %v10292_v2, %v16483_v11  ;;  %11640 = vst.msk [vmem:[#allocation3 + $0x18] sm:$0xff] %vm4158_vm1, %v11494_v20  ;;  %v5111_v1 = vrot.slane %v5109_v29, 7 }
 0x4d6   : > { %v5129_v58 = vshrl.u32 %v14857_v43, 16  ;;  %12058 = vst.msk [vmem:[#allocation3 + $0x18] sm:$0xff] %vm4576_vm7, %v19064_v49  ;;  %v5117_v10 = vrot.slane %v5115_v51, 7  ;;  %v5121_v36 = vrot.slane %v5119_v24, 6  ;;  %v5135_v22 = vshll.u32 %v4777_v38, 16  ;;  %v19632_v24 = vpop.permute.xlu1 %6246 }
 0x4d7   : > { %v5341_v17 = vrot.slane %v5327_v19, %v16483_v11  ;;  %v10307_v43 = vcombine.low %v10299_v13, %v10306_v16  ;;  %v5112_v54 = vor.u32 %v5111_v1, %v5108_v8  ;;  %v5127_v48 = vrot.slane %v5125_v44, 7  ;;  %12895 = vst.msk [vmem:[#allocation3 + $0x18] sm:$0xff] %vm5421_vm8, %v19541_v35  ;;  %v15049_v51 = vld.sshfl [vmem:[#allocation2 + $0x4c] sm:$0x13 pattern:$0x76325410] }
 0x4d8   : > { %v5131_v50 = vrot.slane %v5129_v58, 6  ;;  %v5122_v49 = vor.u32 %v5121_v36, %v5117_v10  ;;  %v5137_v7 = vrot.slane %v5135_v22, 7  ;;  %v5140_v5 = vshrl.u32 %v19567_v30, 16  ;;  %13732 = vst.msk [vmem:[#allocation3 + $0x18] sm:$0xff] %vm6259_vm11, %v13706_v26 }
 0x4d9   : > { %v5342_v42 = vcombine.low %v5334_v34, %v5341_v17  ;;  %10384 = vrot.lane.b32.xlu1 %v10307_v43, %s15737_s26  ;;  %v5113_v33 = vrot.slane %v5112_v54, 2  ;;  %v5143_v31 = vshll.u32 %v19567_v30, 16  ;;  %v5149_v13 = vshll.u32 %v19591_v21, 16 }
 0x4da   : > { %v5132_v57 = vor.u32 %v5131_v50, %v5127_v48  ;;  %v5123_v18 = vrot.slane %v5122_v49, 2  ;;  %v5142_v56 = vrot.slane %v5140_v5, 6  ;;  %v9038_v35 = vcombine.low %v19188_v47, %v19223_v39  ;;  %v19638_v58 = vld.sshfl [vmem:[#allocation2 + $0x50] sm:$0x33 pattern:$0x76325410] }
 0x4db   : > { %v9039_v38 = vcombine.low %v14993_v60, %v19269_v45  ;;  %v5118_v6 = vsel %vm16733_vm15, %v5113_v33, %v5117_v10  ;;  %v5145_v52 = vrot.slane %v5143_v31, 7  ;;  %v5151_v2 = vrot.slane %v5149_v13, 7  ;;  %v15676_v50 = vld [vmem:[%s20531_s3 + $0xc0] ss:$8 sps:$4 sm:$0xff]  }
 0x4dc   : > { %v5133_v34 = vrot.slane %v5132_v57, 2  ;;  %v5128_v20 = vsel %vm16733_vm15, %v5123_v18, %v5127_v48  ;;  %v9046_v29 = vrot.slane %v9038_v35, %v16483_v11  ;;  %v10308_v8 = vcombine.low %v19596_v23, %v5118_v6  ;;  %v19669_v18 = vld.sshfl [vmem:[#allocation2 + $0x44] sm:$0x3 pattern:$0x76325410]  ;;  %14198 = vmatpush1.bf16.msra.mxu1 %v15676_v50 }
 0x4dd   : > { %v9053_v19 = vrot.slane %v9039_v38, %v16483_v11  ;;  %5404 = vrot.lane.b32.xlu1 %v5342_v42, %s15737_s26  ;;  %v5146_v16 = vor.u32 %v5145_v52, %v5142_v56  ;;  %v5343_v1 = vcombine.low %v5118_v6, %v5128_v20  ;;  %v4064_v44 = vcombine.low %v19223_v39, %v14993_v60  ;;  %v15677_v60 = vld [vmem:[%s20531_s3 + $0xd4] ss:$8 sps:$4 sm:$0xff]   ;;  %v19671_v56 = vpop.permute.xlu1 %6248 }
 0x4de   : > { %v5138_v47 = vsel %vm16733_vm15, %v5133_v34, %v5137_v7  ;;  %v19641_v17 = vrot.slane %v10308_v8, %v16483_v11  ;;  %v4065_v23 = vcombine.low %v19269_v45, %v19292_v40  ;;  %v9766_v4 = vcombine.high %v15049_v51, %v15049_v51  ;;  %14199 = vmatprep.subr.bf16.mxu1 %v15677_v60  ;;  %v15680_v60 = vld [vmem:[%s20531_s3 + $0xe4] ss:$8 sps:$4 sm:$0xff]  }
 0x4df   : > { %v9054_v26 = vcombine.low %v9046_v29, %v9053_v19  ;;  %v10309_v32 = vcombine.low %v5128_v20, %v5138_v47  ;;  %v5147_v10 = vrot.slane %v5146_v16, 2  ;;  %v5351_v36 = vrot.slane %v5343_v1, %v16483_v11  ;;  %v13744_v43 = vld [vmem:[#allocation3 + $0x18] sm:$0xff]  ;;  %v19683_v1 = vld.sshfl [vmem:[#allocation2 + $0x54] sm:$0x13 pattern:$0x76325410] }
 0x4e0   : > { %v4072_v22 = vrot.slane %v4064_v44, %v16483_v11  ;;  %v4079_v54 = vrot.slane %v4065_v23, %v16483_v11  ;;  %v19654_v48 = vcombine.high %v19638_v58, %v19638_v58  ;;  %v10101_v45 = vshrl.u32 %v19591_v21, 16  ;;  %14328 = vmatprep.mubr.bf16.mxu0 %v13744_v43  ;;  %v14997_v19 = vld.sshfl [vmem:[#allocation2 + $0x3c] sm:$0x3 pattern:$0x76325410] }
 0x4e1   : > { %9152 = vst.msk [vmem:[#allocation3 + $0x70] sm:$0xff] %vm4158_vm1, %v9054_v26  ;;  %v19649_v39 = vrot.slane %v10309_v32, %v16483_v11  ;;  %v5152_v42 = vsel %vm16733_vm15, %v5147_v10, %v5151_v2  ;;  %v10107_v49 = vshll.u32 %v15049_v51, 16  ;;  %v10111_v7 = vshrl.u32 %v15049_v51, 16  ;;  %v5395_v50 = vpop.permute.xlu1 %5394 }
 0x4e2   : > { %9569 = vst.msk [vmem:[#allocation3 + $0x70] sm:$0xff] %vm4576_vm7, %v19087_v27  ;;  %v10117_v5 = vshll.u32 %v9766_v4, 16  ;;  %v5344_v33 = vcombine.low %v5138_v47, %v5152_v42  ;;  %v4080_v31 = vcombine.low %v4072_v22, %v4079_v54  ;;  %v10103_v13 = vrot.slane %v10101_v45, 6  ;;  %v15679_v45 = vld [vmem:[%s20531_s3 + $0xd0] ss:$8 sps:$4 sm:$0xff]  }
 0x4e3   : > { %v10324_v57 = vcombine.low %v19641_v17, %v19649_v39  ;;  %v10109_v35 = vrot.slane %v10107_v49, 7  ;;  %v10113_v38 = vrot.slane %v10111_v7, 6  ;;  %v10122_v34 = vshrl.u32 %v19638_v58, 16  ;;  %5422 = vst.msk [vmem:[#allocation3] sm:$0xff] %vm5421_vm8, %v5395_v50  ;;  %14200 = vmatpush1.bf16.msra.mxu1 %v15679_v45 }
 0x4e4   : > { %v10119_v6 = vrot.slane %v10117_v5, 7  ;;  %v5358_v27 = vrot.slane %v5344_v33, %v16483_v11  ;;  %4163 = vst.msk [vmem:[#allocation3 + $0x80] sm:$0xff] %vm4158_vm1, %v4080_v31  ;;  %v10104_v52 = vor.u32 %v10103_v13, %v5151_v2  ;;  %v10125_v20 = vshll.u32 %v19638_v58, 16  ;;  %14201 = vmatprep.subr.bf16.mxu1 %v15680_v60 }
 0x4e5   : > { %v10131_v29 = vshll.u32 %v19654_v48, 16  ;;  %4581 = vst.msk [vmem:[#allocation3 + $0x80] sm:$0xff] %vm4576_vm7, %v19124_v12  ;;  %v10114_v8 = vor.u32 %v10113_v38, %v10109_v35  ;;  %v10124_v51 = vrot.slane %v10122_v34, 6  ;;  %v9072_v47 = vcombine.low %v14997_v19, %v19553_v37  ;;  %v20800_v34 = vld [vmem:[#allocation38_spill] sm:$0xff] }
 0x4e6   : > { %v9073_v16 = vcombine.low %v19577_v9, %v19669_v18  ;;  %v5359_v44 = vcombine.low %v5351_v36, %v5358_v27  ;;  %v10105_v26 = vrot.slane %v10104_v52, 2  ;;  %v10127_v2 = vrot.slane %v10125_v20, 7  ;;  %v15168_v17 = vld.sshfl [vmem:[#allocation2 + $0x180] sm:$0x33 pattern:$0x76325410] }
 0x4e7   : > { %v10133_v32 = vrot.slane %v10131_v29, 7  ;;  %v10115_v23 = vrot.slane %v10114_v8, 2  ;;  %v9080_v10 = vrot.slane %v9072_v47, %v16483_v11  ;;  %v19687_v12 = vld.sshfl [vmem:[#allocation2 + $0x34] sm:$0x3 pattern:$0x76325410] }
 0x4e8   : > { %v9087_v22 = vrot.slane %v9073_v16, %v16483_v11  ;;  %v15169_v4 = vld.sshfl [vmem:[#allocation2 + $0x184] sm:$0x13 pattern:$0x76325410]  ;;  %5406 = vrot.lane.b32.xlu1 %v5359_v44, %s15737_s26  ;;  %v10110_v43 = vsel %vm16733_vm15, %v10105_v26, %v10109_v35  ;;  %v10128_v39 = vor.u32 %v10127_v2, %v10124_v51  ;;  %v5187_v36 = vshrl.u32 %v19654_v48, 16  ;;  %6260 = vst.msk [vmem:[#allocation3] sm:$0xff] %vm6259_vm11, %v20800_v34 }
 0x4e9   : > { %v5193_v54 = vshll.u32 %v19683_v1, 16  ;;  %v10120_v49 = vsel %vm16733_vm15, %v10115_v23, %v10119_v6  ;;  %v10325_v7 = vcombine.low %v5152_v42, %v10110_v43  ;;  %v15170_v33 = vld.sshfl [vmem:[#allocation2 + $0x188] sm:$0x33 pattern:$0x76325410]  ;;  %v4081_v38 = vcombine.low %v19687_v12, %v19491_v0 }
 0x4ea   : > { %v9088_v5 = vcombine.low %v9080_v10, %v9087_v22  ;;  %v10129_v31 = vrot.slane %v10128_v39, 2  ;;  %v5189_v13 = vrot.slane %v5187_v36, 6  ;;  %v4082_v42 = vcombine.low %v19526_v61, %v14997_v19 }
 0x4eb   : > { %v19703_v35 = vrot.slane %v5193_v54, 7  ;;  %v10333_v27 = vrot.slane %v10325_v7, %v16483_v11  ;;  %v13087_v6 = vcombine.high %v15168_v17, %v15168_v17  ;;  %v4089_v29 = vrot.slane %v4081_v38, %v16483_v11 }
 0x4ec   : > { %9154 = vst.msk [vmem:[#allocation3 + $0xb0] sm:$0xff] %vm4158_vm1, %v9088_v5  ;;  %10386 = vrot.lane.b32.xlu1 %v10324_v57, %s15737_s26  ;;  %v10134_v52 = vsel %vm16733_vm15, %v10129_v31, %v10133_v32  ;;  %v5190_v20 = vor.u32 %v10133_v32, %v5189_v13  ;;  %v13095_v8 = vcombine.high %v15169_v4, %v15169_v4  ;;  %v13417_v44 = vshrl.u32 %v15168_v17, 16 }
 0x4ed   : > { %9571 = vst.msk [vmem:[#allocation3 + $0xb0] sm:$0xff] %vm4576_vm7, %v19145_v55  ;;  %v10326_v51 = vcombine.low %v10120_v49, %v10134_v52  ;;  %v4096_v47 = vrot.slane %v4082_v42, %v16483_v11  ;;  %v19719_v16 = vcombine.high %v15170_v33, %v15170_v33  ;;  %v13420_v26 = vshll.u32 %v15168_v17, 16 }
 0x4ee   : > { %v19721_v19 = vrot.slane %v5190_v20, 2  ;;  %v13426_v57 = vshll.u32 %v13087_v6, 16  ;;  %v13430_v10 = vshrl.u32 %v13087_v6, 16  ;;  %v5360_v32 = vcombine.low %v10110_v43, %v10120_v49 }
 0x4ef   : > { %v10340_v2 = vrot.slane %v10326_v51, %v16483_v11  ;;  %v4097_v23 = vcombine.low %v4089_v29, %v4096_v47  ;;  %v13419_v22 = vrot.slane %v13417_v44, 6  ;;  %v13422_v39 = vrot.slane %v13420_v26, 7  ;;  %v19734_v6 = vld.sshfl [vmem:[#allocation2 + $0x58] sm:$0x33 pattern:$0x76325410] }
 0x4f0   : > { %v5196_v55 = vsel %vm16733_vm15, %v19721_v19, %v19703_v35  ;;  %v13428_v45 = vrot.slane %v13426_v57, 7  ;;  %v13432_v50 = vrot.slane %v13430_v10, 6  ;;  %v5368_v17 = vrot.slane %v5360_v32, %v16483_v11  ;;  %v19747_v57 = vld.sshfl [vmem:[#allocation2 + $0x5c] sm:$0x13 pattern:$0x76325410] }
 0x4f1   : > { %v10341_v36 = vcombine.low %v10333_v27, %v10340_v2  ;;  %v5361_v54 = vcombine.low %v10134_v52, %v5196_v55  ;;  %4164 = vst.msk [vmem:[#allocation3 + $0xa0] sm:$0xff] %vm4158_vm1, %v4097_v23  ;;  %v13423_v60 = vor.u32 %v13422_v39, %v13419_v22  ;;  %v13436_v7 = vshll.u32 %v15169_v4, 16  ;;  %v19739_v52 = vpop.permute.xlu1 %12043  ;;  %v15685_v55 = vld [vmem:[%s20531_s3 + $0xf0] ss:$8 sps:$4 sm:$0xff]  }
 0x4f2   : > { %4582 = vst.msk [vmem:[#allocation3 + $0xa0] sm:$0xff] %vm4576_vm7, %v19182_v41  ;;  %v13440_v5 = vshrl.u32 %v15169_v4, 16  ;;  %v13433_v49 = vor.u32 %v13432_v50, %v13428_v45  ;;  %v13446_v31 = vshll.u32 %v13095_v8, 16  ;;  %v13451_v13 = vshrl.u32 %v15170_v33, 16  ;;  %v15682_v41 = vld [vmem:[%s20531_s3 + $0xe0] ss:$8 sps:$4 sm:$0xff]  }
 0x4f3   : > { %10388 = vrot.lane.b32.xlu1 %v10341_v36, %s15737_s26  ;;  %v5375_v43 = vrot.slane %v5361_v54, %v16483_v11  ;;  %v13424_v38 = vrot.slane %v13423_v60, 2  ;;  %v13438_v34 = vrot.slane %v13436_v7, 7  ;;  %v13454_v42 = vshll.u32 %v15170_v33, 16  ;;  %v15683_v8 = vld [vmem:[%s20531_s3 + $0xf4] ss:$8 sps:$4 sm:$0xff]   ;;  %14202 = vmatpush1.bf16.msra.mxu1 %v15682_v41 }
 0x4f4   : > { %v13442_v27 = vrot.slane %v13440_v5, 6  ;;  %v13434_v20 = vrot.slane %v13433_v49, 2  ;;  %v13448_v29 = vrot.slane %v13446_v31, 7  ;;  %v13453_v51 = vrot.slane %v13451_v13, 6  ;;  %14203 = vmatprep.subr.bf16.mxu1 %v15683_v8 }
 0x4f5   : > { %v5376_v4 = vcombine.low %v5368_v17, %v5375_v43  ;;  %v13429_v47 = vsel %vm16733_vm15, %v13424_v38, %v13428_v45  ;;  %v13456_v44 = vrot.slane %v13454_v42, 7  ;;  %v13460_v26 = vshll.u32 %v19719_v16, 16  ;;  %v5397_v54 = vpop.permute.xlu1 %5396  ;;  %v19780_v38 = vld.sshfl [vmem:[#allocation2 + $0xb0] sm:$0x33 pattern:$0x76325410] }
 0x4f6   : > { %v13443_v33 = vor.u32 %v13442_v27, %v13438_v34  ;;  %v13439_v2 = vsel %vm16733_vm15, %v13434_v20, %v13438_v34  ;;  %v9056_v23 = vcombine.low %v19491_v0, %v19526_v61  ;;  %v4809_v10 = vcombine.high %v19683_v1, %v19683_v1  ;;  %5423 = vst.msk [vmem:[#allocation3 + $0x20] sm:$0xff] %vm5421_vm8, %v5397_v54  ;;  %v15694_v34 = vld [vmem:[%s20531_s3 + $0x104] ss:$8 sps:$4 sm:$0xff]  }
 0x4f7   : > { %5408 = vrot.lane.b32.xlu1 %v5376_v4, %s15737_s26  ;;  %v13457_v22 = vor.u32 %v13456_v44, %v13453_v51  ;;  %v19759_v39 = vrot.slane %v13460_v26, 7  ;;  %v13654_v36 = vcombine.low %v13429_v47, %v13439_v2  ;;  %v9055_v45 = vcombine.low %v19292_v40, %v19687_v12  ;;  %14204 = vmatpush1.bf16.msra.mxu1 %v15685_v55  ;;  %v20801_v40 = vld [vmem:[#allocation41_spill] sm:$0xff]  ;;  %v13741_v12 = vld [vmem:[#allocation3] sm:$0xff] }
 0x4f8   : > { %v13444_v32 = vrot.slane %v13443_v33, 2  ;;  %v9070_v50 = vrot.slane %v9056_v23, %v16483_v11  ;;  %v19766_v0 = vcombine.high %v19734_v6, %v19734_v6  ;;  %v4825_v61 = vcombine.high %v19747_v57, %v19747_v57  ;;  %6261 = vst.msk [vmem:[#allocation3 + $0x20] sm:$0xff] %vm6259_vm11, %v20801_v40  ;;  %15389 = vmatprep.subr.bf16.mxu1 %v15694_v34  ;;  %v19792_v47 = vld.sshfl [vmem:[#allocation2 + $0xb4] sm:$0x13 pattern:$0x76325410] }
 0x4f9   : > { %v13458_v60 = vrot.slane %v13457_v22, 2  ;;  %v13662_v7 = vrot.slane %v13654_v36, %v16483_v11  ;;  %v5197_v5 = vshrl.u32 %v19683_v1, 16  ;;  %v9063_v43 = vrot.slane %v9055_v45, %v16483_v11  ;;  %v19790_v4 = vpop.permute.xlu1 %9551  ;;  %v13746_v33 = vld [vmem:[#allocation3 + $0x28] sm:$0xff]  ;;  %v15697_v34 = vld [vmem:[%s20531_s3 + $0x110] ss:$8 sps:$4 sm:$0xff]  }
 0x4fa   : > { %v13449_v17 = vsel %vm16733_vm15, %v13444_v32, %v13448_v29  ;;  %v5203_v49 = vshll.u32 %v4809_v10, 16  ;;  %v5208_v31 = vshrl.u32 %v19734_v6, 16  ;;  %v5211_v13 = vshll.u32 %v19734_v6, 16  ;;  %14206 = vmatmul.mubr.bf16.vlgmr.msra.gmra.mrb[0].mxu1 %v13741_v12  ;;  %v15695_v10 = vld [vmem:[%s20531_s3 + $0x100] ss:$8 sps:$4 sm:$0xff]  }
 0x4fb   : > { %v13463_v1 = vsel %vm16733_vm15, %v13458_v60, %v19759_v39  ;;  %v5199_v27 = vrot.slane %v5197_v5, 6  ;;  %v5217_v42 = vshll.u32 %v19766_v0, 16  ;;  %v5221_v41 = vshrl.u32 %v19766_v0, 16  ;;  %14215 = vmatprep.mubr.bf16.mxu1 %v13746_v33  ;;  %15405 = vmatpush1.bf16.msra.mxu1 %v15695_v10  ;;  %v13750_v10 = vld [vmem:[#allocation3 + $0x48] sm:$0xff] }
 0x4fc   : > { %v13655_v20 = vcombine.low %v13449_v17, %v13463_v1  ;;  %v9071_v29 = vcombine.low %v9063_v43, %v9070_v50  ;;  %v5205_v51 = vrot.slane %v5203_v49, 7  ;;  %v5210_v8 = vrot.slane %v5208_v31, 6  ;;  %v19807_v17 = vld.sshfl [vmem:[#allocation2 + $0xb8] sm:$0x33 pattern:$0x76325410] }
 0x4fd   : > { %v5200_v44 = vor.u32 %v5199_v27, %v19703_v35  ;;  %v5213_v26 = vrot.slane %v5211_v13, 7  ;;  %v5219_v2 = vrot.slane %v5217_v42, 7  ;;  %v5223_v23 = vrot.slane %v5221_v41, 6  ;;  %v15696_v35 = vld [vmem:[%s20531_s3 + $0x114] ss:$8 sps:$4 sm:$0xff]  }
 0x4fe   : > { %v13669_v55 = vrot.slane %v13655_v20, %v16483_v11  ;;  %9153 = vst.msk [vmem:[#allocation3 + $0x90] sm:$0xff] %vm4158_vm1, %v9071_v29  ;;  %v5227_v32 = vshll.u32 %v19747_v57, 16  ;;  %v5231_v22 = vshrl.u32 %v19747_v57, 16  ;;  %v5237_v36 = vshll.u32 %v4825_v61, 16  ;;  %15390 = vmatprep.subr.bf16.mxu1 %v15696_v35  ;;  %v5399_v12 = vpop.permute.xlu1 %5398  ;;  %v20802_v41 = vld [vmem:[#allocation42_spill] sm:$0xff] }
 0x4ff   : > { %9570 = vst.msk [vmem:[#allocation3 + $0x90] sm:$0xff] %vm4576_vm7, %v19219_v25  ;;  %v5201_v54 = vrot.slane %v5200_v44, 2  ;;  %v5214_v45 = vor.u32 %v5213_v26, %v5210_v8  ;;  %v5224_v50 = vor.u32 %v5223_v23, %v5219_v2  ;;  %v10595_v60 = vcombine.high %v19780_v38, %v19780_v38  ;;  %v13745_v13 = vld [vmem:[#allocation3 + $0x20] sm:$0xff]  ;;  %15406 = vmatpush1.bf16.msra.mxu1 %v15697_v34 }
 0x500   : > { %v13670_v5 = vcombine.low %v13662_v7, %v13669_v55  ;;  %v5229_v40 = vrot.slane %v5227_v32, 7  ;;  %v5233_v57 = vrot.slane %v5231_v22, 6  ;;  %v5239_v61 = vrot.slane %v5237_v36, 7  ;;  %5424 = vst.msk [vmem:[#allocation3 + $0x40] sm:$0xff] %vm5421_vm8, %v5399_v12  ;;  %v15698_v20 = vld [vmem:[%s20531_s3 + $0x124] ss:$8 sps:$4 sm:$0xff]  }
 0x501   : > { %v5206_v43 = vsel %vm16733_vm15, %v5201_v54, %v5205_v51  ;;  %v5215_v49 = vrot.slane %v5214_v45, 2  ;;  %v5225_v31 = vrot.slane %v5224_v50, 2  ;;  %v10603_v25 = vcombine.high %v19792_v47, %v19792_v47  ;;  %6262 = vst.msk [vmem:[#allocation3 + $0x40] sm:$0xff] %vm6259_vm11, %v20802_v41  ;;  %15391 = vmatprep.subr.bf16.mxu1 %v15698_v20  ;;  %v15699_v36 = vld [vmem:[%s20531_s3 + $0x120] ss:$8 sps:$4 sm:$0xff]  }
 0x502   : > { %13717 = vrot.lane.b32.xlu1 %v13670_v5, %s15738_s27  ;;  %v5234_v7 = vor.u32 %v5233_v57, %v5229_v40  ;;  %v19822_v1 = vcombine.high %v19807_v17, %v19807_v17  ;;  %v10925_v27 = vshrl.u32 %v19780_v38, 16  ;;  %v10928_v42 = vshll.u32 %v19780_v38, 16  ;;  %14216 = vmatmul.mubr.bf16.gmra.mrb[4].mxu1 %v13745_v13  ;;  %v15123_v12 = vld.sshfl [vmem:[#allocation2 + $0x18c] sm:$0x3 pattern:$0x76325410] }
 0x503   : > { %v19833_v29 = vsel %vm16733_vm15, %v5215_v49, %v5219_v2  ;;  %v19837_v51 = vsel %vm16733_vm15, %v5225_v31, %v5229_v40  ;;  %v10934_v8 = vshll.u32 %v10595_v60, 16  ;;  %v10938_v33 = vshrl.u32 %v10595_v60, 16  ;;  %14225 = vmatprep.mubr.bf16.mxu1 %v13750_v10  ;;  %15407 = vmatpush1.bf16.msra.mxu1 %v15699_v36  ;;  %v15700_v60 = vld [vmem:[%s20531_s3 + $0x134] ss:$8 sps:$4 sm:$0xff]   ;;  %v15701_v41 = vld [vmem:[%s20531_s3 + $0x130] ss:$8 sps:$4 sm:$0xff]  }
 0x504   : > { %v5235_v44 = vrot.slane %v5234_v7, 2  ;;  %v5377_v38 = vcombine.low %v5206_v43, %v19833_v29  ;;  %v10927_v26 = vrot.slane %v10925_v27, 6  ;;  %v10930_v23 = vrot.slane %v10928_v42, 7  ;;  %15392 = vmatprep.subr.bf16.mxu1 %v15700_v60 }
 0x505   : > { %v10936_v55 = vrot.slane %v10934_v8, 7  ;;  %v10940_v32 = vrot.slane %v10938_v33, 6  ;;  %v10944_v22 = vshll.u32 %v19792_v47, 16  ;;  %v10948_v2 = vshrl.u32 %v19792_v47, 16 }
 0x506   : > { %v19847_v35 = vsel %vm16733_vm15, %v5235_v44, %v5239_v61  ;;  %v5385_v54 = vrot.slane %v5377_v38, %v16483_v11  ;;  %v10931_v45 = vor.u32 %v10930_v23, %v10927_v26  ;;  %v10954_v50 = vshll.u32 %v10603_v25, 16  ;;  %v19855_v43 = vld.sshfl [vmem:[#allocation2 + $0x190] sm:$0x33 pattern:$0x76325410] }
 0x507   : > { %v5378_v47 = vcombine.low %v19837_v51, %v19847_v35  ;;  %v10941_v5 = vor.u32 %v10940_v32, %v10936_v55  ;;  %v10946_v40 = vrot.slane %v10944_v22, 7  ;;  %v10950_v57 = vrot.slane %v10948_v2, 6  ;;  %15408 = vmatpush1.bf16.msra.mxu1 %v15701_v41  ;;  %v15702_v44 = vld.sshfl [vmem:[#allocation2 + $0x188] sm:$0x33 pattern:$0x76325410] }
 0x508   : > { %v10932_v61 = vrot.slane %v10931_v45, 2  ;;  %v10956_v49 = vrot.slane %v10954_v50, 7  ;;  %v10959_v31 = vshrl.u32 %v19807_v17, 16  ;;  %v10962_v25 = vshll.u32 %v19807_v17, 16  ;;  %v13749_v42 = vld [vmem:[#allocation3 + $0x40] sm:$0xff] }
 0x509   : > { %v5392_v13 = vrot.slane %v5378_v47, %v16483_v11  ;;  %v10942_v34 = vrot.slane %v10941_v5, 2  ;;  %v10951_v7 = vor.u32 %v10950_v57, %v10946_v40  ;;  %v10968_v27 = vshll.u32 %v19822_v1, 16  ;;  %v15703_v17 = vld [vmem:[%s20531_s3 + $0x144] ss:$8 sps:$4 sm:$0xff]  }
 0x50a   : > { %v10937_v20 = vsel %vm16733_vm15, %v10932_v61, %v10936_v55  ;;  %v10961_v8 = vrot.slane %v10959_v31, 6  ;;  %v10964_v33 = vrot.slane %v10962_v25, 7  ;;  %v11840_v38 = vcombine.high %v15702_v44, %v15702_v44  ;;  %15393 = vmatprep.subr.bf16.mxu1 %v15703_v17  ;;  %v19873_v22 = vld.sshfl [vmem:[#allocation2 + $0xc0] sm:$0x33 pattern:$0x76325410]  ;;  %14226 = vmatmul.mubr.bf16.gmra.mrb[8].mxu1 %v13749_v42 }
 0x50b   : > { %v5393_v26 = vcombine.low %v5385_v54, %v5392_v13  ;;  %v10947_v23 = vsel %vm16733_vm15, %v10942_v34, %v10946_v40  ;;  %v10952_v10 = vrot.slane %v10951_v7, 2  ;;  %v19871_v32 = vrot.slane %v10968_v27, 7  ;;  %v15147_v50 = vld.sshfl [vmem:[#allocation2 + $0x124] sm:$0x13 pattern:$0x76325410] }
 0x50c   : > { %v10965_v2 = vor.u32 %v10964_v33, %v10961_v8  ;;  %v11162_v55 = vcombine.low %v10937_v20, %v10947_v23  ;;  %v19877_v36 = vcombine.high %v19855_v43, %v19855_v43  ;;  %v11997_v45 = vcombine.low %v11840_v38, %v15123_v12  ;;  %v15704_v5 = vld.sshfl [vmem:[#allocation2 + $0xb8] sm:$0x33 pattern:$0x76325410]  ;;  %v13754_v61 = vld [vmem:[#allocation3 + $0x68] sm:$0xff] }
 0x50d   : > { %5410 = vrot.lane.b32.xlu1 %v5393_v26, %s15737_s26  ;;  %v10957_v54 = vsel %vm16733_vm15, %v10952_v10, %v10956_v49  ;;  %v4098_v60 = vcombine.low %v19553_v37, %v19577_v9  ;;  %v4099_v47 = vcombine.low %v19669_v18, %v19567_v30  ;;  %v9348_v40 = vcombine.high %v15704_v5, %v15704_v5  ;;  %v15148_v57 = vld.sshfl [vmem:[#allocation2 + $0x128] sm:$0x33 pattern:$0x76325410]  ;;  %v15706_v7 = vld [vmem:[%s20531_s3 + $0x154] ss:$8 sps:$4 sm:$0xff]  }
 0x50e   : > { %v10966_v31 = vrot.slane %v10965_v2, 2  ;;  %v11170_v12 = vrot.slane %v11162_v55, %v16483_v11  ;;  %v11998_v25 = vcombine.low %v19855_v43, %v19877_v36  ;;  %v12005_v13 = vrot.slane %v11997_v45, %v16483_v11  ;;  %v15027_v34 = vld.sshfl [vmem:[#allocation2 + $0xbc] sm:$0x3 pattern:$0x76325410]  ;;  %14235 = vmatprep.mubr.bf16.mxu1 %v13754_v61  ;;  %v20803_v26 = vld [vmem:[#allocation34_spill] sm:$0xff] }
 0x50f   : > { %v15705_v37 = vld [vmem:[%s20531_s3 + $0x140] ss:$8 sps:$4 sm:$0xff]   ;;  %v4106_v30 = vrot.slane %v4098_v60, %v16483_v11  ;;  %v4113_v9 = vrot.slane %v4099_v47, %v16483_v11  ;;  %v19897_v18 = vcombine.high %v19873_v22, %v19873_v22  ;;  %v9505_v49 = vcombine.low %v9348_v40, %v15027_v34  ;;  %v15707_v55 = vld [vmem:[%s20531_s3 + $0x150] ss:$8 sps:$4 sm:$0xff]   ;;  %v15708_v40 = vld [vmem:[%s20531_s3 + $0x164] ss:$8 sps:$4 sm:$0xff]  }
 0x510   : > { %15409 = vmatpush1.bf16.msra.mxu1 %v15705_v37  ;;  %v10971_v27 = vsel %vm16733_vm15, %v10966_v31, %v19871_v32  ;;  %v12012_v42 = vrot.slane %v11998_v25, %v16483_v11  ;;  %v12274_v41 = vcombine.high %v15147_v50, %v15147_v50  ;;  %v12282_v20 = vcombine.high %v15148_v57, %v15148_v57  ;;  %v19916_v60 = vld.sshfl [vmem:[#allocation2 + $0x12c] sm:$0x13 pattern:$0x76325410] }
 0x511   : > { %15394 = vmatprep.subr.bf16.mxu1 %v15706_v7  ;;  %v11163_v8 = vcombine.low %v10957_v54, %v10971_v27  ;;  %v4114_v33 = vcombine.low %v4106_v30, %v4113_v9  ;;  %v9506_v44 = vcombine.low %v19873_v22, %v19897_v18  ;;  %v9513_v38 = vrot.slane %v9505_v49, %v16483_v11  ;;  %v14811_v49 = vld.sshfl [vmem:[#allocation2 + $0x4c] sm:$0x3 pattern:$0x76325410]  ;;  %v20805_v7 = vld [vmem:[#allocation43_spill] sm:$0xff] }
 0x512   : > { %v12013_v17 = vcombine.low %v12005_v13, %v12012_v42  ;;  %v12627_v23 = vshrl.u32 %v20803_v26, 16  ;;  %v12633_v10 = vshll.u32 %v15147_v50, 16  ;;  %v12637_v2 = vshrl.u32 %v15147_v50, 16  ;;  %v20804_v50 = vld [vmem:[#allocation46_spill] sm:$0xff] }
 0x513   : > { %v11177_v45 = vrot.slane %v11163_v8, %v16483_v11  ;;  %4165 = vst.msk [vmem:[#allocation3 + $0xc0] sm:$0xff] %vm4158_vm1, %v4114_v33  ;;  %v9520_v54 = vrot.slane %v9506_v44, %v16483_v11  ;;  %v12643_v47 = vshll.u32 %v12274_v41, 16  ;;  %v12648_v5 = vshrl.u32 %v15148_v57, 16  ;;  %v15709_v44 = vld [vmem:[%s20531_s3 + $0x160] ss:$8 sps:$4 sm:$0xff]  }
 0x514   : > { %15410 = vmatpush1.bf16.msra.mxu1 %v15707_v55  ;;  %4583 = vst.msk [vmem:[#allocation3 + $0xc0] sm:$0xff] %vm4576_vm7, %v20804_v50  ;;  %v12629_v61 = vrot.slane %v12627_v23, 6  ;;  %v12635_v31 = vrot.slane %v12633_v10, 7  ;;  %v12639_v25 = vrot.slane %v12637_v2, 6  ;;  %v12651_v13 = vshll.u32 %v15148_v57, 16 }
 0x515   : > { %15395 = vmatprep.subr.bf16.mxu1 %v15708_v40  ;;  %v11178_v34 = vcombine.low %v11170_v12, %v11177_v45  ;;  %v9521_v37 = vcombine.low %v9513_v38, %v9520_v54  ;;  %v12645_v30 = vrot.slane %v12643_v47, 7  ;;  %v12650_v9 = vrot.slane %v12648_v5, 6  ;;  %v14984_v33 = vld.sshfl [vmem:[#allocation2 + $0x8] sm:$0x33 pattern:$0x76325410] }
 0x516   : > { %v12630_v27 = vor.u32 %v12629_v61, %v20805_v7  ;;  %v12640_v42 = vor.u32 %v12639_v25, %v12635_v31  ;;  %v12653_v41 = vrot.slane %v12651_v13, 7  ;;  %v12657_v8 = vshll.u32 %v12282_v20, 16  ;;  %v19931_v38 = vld.sshfl [vmem:[#allocation2 + $0x10] sm:$0x33 pattern:$0x76325410]  ;;  %v19944_v13 = vpop.permute.xlu1 %12880 }
 0x517   : > { %11225 = vrot.lane.b32.xlu1 %v11178_v34, %s15738_s27  ;;  %v12661_v26 = vshrl.u32 %v12282_v20, 16  ;;  %v12667_v57 = vshll.u32 %v19916_v60, 16  ;;  %v4116_v12 = vcombine.low %v19638_v58, %v19654_v48  ;;  %v15710_v23 = vld [vmem:[%s20531_s3 + $0x174] ss:$8 sps:$4 sm:$0xff]   ;;  %v4115_v20 = vcombine.low %v19591_v21, %v14811_v49  ;;  %v15711_v34 = vld [vmem:[%s20531_s3 + $0x170] ss:$8 sps:$4 sm:$0xff]  }
 0x518   : > { %15411 = vmatpush1.bf16.msra.mxu1 %v15709_v44  ;;  %v12631_v10 = vrot.slane %v12630_v27, 2  ;;  %v12641_v2 = vrot.slane %v12640_v42, 2  ;;  %v12654_v55 = vor.u32 %v12653_v41, %v12650_v9  ;;  %v12659_v45 = vrot.slane %v12657_v8, 7  ;;  %v15712_v41 = vld [vmem:[%s20531_s3 + $0x184] ss:$8 sps:$4 sm:$0xff]  }
 0x519   : > { %15396 = vmatprep.subr.bf16.mxu1 %v15710_v23  ;;  %v12663_v54 = vrot.slane %v12661_v26, 6  ;;  %v19936_v47 = vrot.slane %v12667_v57, 7  ;;  %v4130_v5 = vrot.slane %v4116_v12, %v16483_v11  ;;  %v15171_v40 = vld.sshfl [vmem:[#allocation2 + $0x18c] sm:$0x13 pattern:$0x76325410]  ;;  %v8814_v25 = vcombine.high %v14984_v33, %v14984_v33 }
 0x51a   : > { %v12636_v58 = vsel %vm16733_vm15, %v12631_v10, %v12635_v31  ;;  %v12646_v48 = vsel %vm16733_vm15, %v12641_v2, %v12645_v30  ;;  %v12655_v50 = vrot.slane %v12654_v55, 2  ;;  %v14985_v61 = vld.sshfl [vmem:[#allocation2 + $0xc] sm:$0x3 pattern:$0x76325410]  ;;  %v4123_v49 = vrot.slane %v4115_v20, %v16483_v11  ;;  %v11214_v20 = vpop.permute.xlu0 %11213 }
 0x51b   : > { %12045 = vrot.lane.b32.xlu1 %v12013_v17, %s15740_s30  ;;  %v12664_v21 = vor.u32 %v12663_v54, %v12659_v45  ;;  %v12834_v9 = vcombine.low %v12636_v58, %v12646_v48  ;;  %v8988_v31 = vcombine.low %v14985_v61, %v19931_v38  ;;  %v8987_v7 = vcombine.low %v14984_v33, %v8814_v25  ;;  %v19961_v12 = vld.sshfl [vmem:[#allocation2 + $0x194] sm:$0x13 pattern:$0x76325410] }
 0x51c   : > { %15412 = vmatpush1.bf16.msra.mxu1 %v15711_v34  ;;  %v12660_v30 = vsel %vm16733_vm15, %v12655_v50, %v12659_v45  ;;  %v13111_v27 = vcombine.high %v15171_v40, %v15171_v40  ;;  %v13464_v42 = vshrl.u32 %v19719_v16, 16  ;;  %v4131_v44 = vcombine.low %v4123_v49, %v4130_v5  ;;  %v15713_v16 = vld [vmem:[%s20531_s3 + $0x180] ss:$8 sps:$4 sm:$0xff]   ;;  %v15714_v5 = vld [vmem:[%s20531_s3 + $0x194] ss:$8 sps:$4 sm:$0xff]  }
 0x51d   : > { %15397 = vmatprep.subr.bf16.mxu1 %v15712_v41  ;;  %v12665_v8 = vrot.slane %v12664_v21, 2  ;;  %v12842_v17 = vrot.slane %v12834_v9, %v16483_v11  ;;  %v9002_v26 = vrot.slane %v8988_v31, %v16483_v11  ;;  %v8995_v57 = vrot.slane %v8987_v7, %v16483_v11  ;;  %v15075_v50 = vld.sshfl [vmem:[#allocation2 + $0xbc] sm:$0x13 pattern:$0x76325410] }
 0x51e   : > { %v13466_v23 = vrot.slane %v13464_v42, 6  ;;  %v13470_v33 = vshll.u32 %v15171_v40, 16  ;;  %v13474_v10 = vshrl.u32 %v15171_v40, 16  ;;  %4166 = vst.msk [vmem:[#allocation3 + $0xe0] sm:$0xff] %vm4158_vm1, %v4131_v44  ;;  %v13480_v55 = vshll.u32 %v13111_v27, 16 }
 0x51f   : > { %9553 = vrot.lane.b32.xlu1 %v9521_v37, %s15740_s30  ;;  %v12670_v2 = vsel %vm16733_vm15, %v12665_v8, %v19936_v47  ;;  %v13485_v45 = vshrl.u32 %v19855_v43, 16  ;;  %v13488_v54 = vshll.u32 %v19855_v43, 16  ;;  %4584 = vst.msk [vmem:[#allocation3 + $0xe0] sm:$0xff] %vm4576_vm7, %v19417_v63  ;;  %v9003_v37 = vcombine.low %v8995_v57, %v9002_v26  ;;  %v5401_v61 = vpop.permute.xlu1 %5400 }
 0x520   : > { %15413 = vmatpush1.bf16.msra.mxu1 %v15713_v16  ;;  %v12835_v40 = vcombine.low %v12660_v30, %v12670_v2  ;;  %v13467_v58 = vor.u32 %v13466_v23, %v19759_v39  ;;  %v13472_v48 = vrot.slane %v13470_v33, 7  ;;  %v13476_v25 = vrot.slane %v13474_v10, 6  ;;  %5425 = vst.msk [vmem:[#allocation3 + $0x60] sm:$0xff] %vm5421_vm8, %v5401_v61  ;;  %v20806_v30 = vld [vmem:[#allocation44_spill] sm:$0xff]  ;;  %v15715_v39 = vld [vmem:[%s20531_s3 + $0x190] ss:$8 sps:$4 sm:$0xff]   ;;  %v20003_v16 = vpop.permute.xlu0 %12033 }
 0x521   : > { %15398 = vmatprep.subr.bf16.mxu1 %v15714_v5  ;;  %v13482_v34 = vrot.slane %v13480_v55, 7  ;;  %v13487_v21 = vrot.slane %v13485_v45, 6  ;;  %v13490_v43 = vrot.slane %v13488_v54, 7  ;;  %9149 = vst.msk [vmem:[#allocation3 + $0x10] sm:$0xff] %vm4158_vm1, %v9003_v37  ;;  %v13494_v31 = vshll.u32 %v19877_v36, 16 }
 0x522   : > { %v12849_v9 = vrot.slane %v12835_v40, %v16483_v11  ;;  %v13468_v49 = vrot.slane %v13467_v58, 2  ;;  %v13498_v63 = vshrl.u32 %v19877_v36, 16  ;;  %6263 = vst.msk [vmem:[#allocation3 + $0x60] sm:$0xff] %vm6259_vm11, %v20806_v30  ;;  %v13477_v7 = vor.u32 %v13476_v25, %v13472_v48  ;;  %v15716_v36 = vld [vmem:[%s20531_s3 + $0x1a4] ss:$8 sps:$4 sm:$0xff]  }
 0x523   : > { %9566 = vst.msk [vmem:[#allocation3 + $0x10] sm:$0xff] %vm4576_vm7, %v19502_v3  ;;  %v13491_v27 = vor.u32 %v13490_v43, %v13487_v21  ;;  %v13504_v42 = vshll.u32 %v19961_v12, 16  ;;  %v10619_v41 = vcombine.high %v15075_v50, %v15075_v50  ;;  %v13496_v26 = vrot.slane %v13494_v31, 7  ;;  %v15718_v37 = vld [vmem:[%s20531_s3 + $0x1b4] ss:$8 sps:$4 sm:$0xff]  }
 0x524   : > { %15414 = vmatpush1.bf16.msra.mxu1 %v15715_v39  ;;  %v12850_v8 = vcombine.low %v12842_v17, %v12849_v9  ;;  %v13473_v44 = vsel %vm16733_vm15, %v13468_v49, %v13472_v48  ;;  %v13500_v57 = vrot.slane %v13498_v63, 6  ;;  %10403 = vst.msk [vmem:[#allocation3 + $0x10] sm:$0xff] %vm5421_vm8, %v19569_v28  ;;  %v13478_v3 = vrot.slane %v13477_v7, 2  ;;  %v15717_v28 = vld [vmem:[%s20531_s3 + $0x1a0] ss:$8 sps:$4 sm:$0xff]  }
 0x525   : > { %15399 = vmatprep.subr.bf16.mxu1 %v15716_v36  ;;  %v13492_v23 = vrot.slane %v13491_v27, 2  ;;  %v19999_v33 = vrot.slane %v13504_v42, 7  ;;  %v10972_v10 = vshrl.u32 %v19822_v1, 16  ;;  %11240 = vst.msk [vmem:[#allocation3 + $0x10] sm:$0xff] %vm6259_vm11, %v11214_v20  ;;  %v10978_v2 = vshll.u32 %v15075_v50, 16 }
 0x526   : > { %12882 = vrot.lane.b32.xlu1 %v12850_v8, %s15737_s26  ;;  %v13501_v17 = vor.u32 %v13500_v57, %v13496_v26  ;;  %v10982_v55 = vshrl.u32 %v15075_v50, 16  ;;  %v10988_v45 = vshll.u32 %v10619_v41, 16  ;;  %v13483_v54 = vsel %vm16733_vm15, %v13478_v3, %v13482_v34  ;;  %v20013_v20 = vld.sshfl [vmem:[#allocation2 + $0xc4] sm:$0x13 pattern:$0x76325410] }
 0x527   : > { %v13497_v1 = vsel %vm16733_vm15, %v13492_v23, %v13496_v26  ;;  %v10974_v5 = vrot.slane %v10972_v10, 6  ;;  %v10993_v40 = vshrl.u32 %v19873_v22, 16  ;;  %v13671_v48 = vcombine.low %v13473_v44, %v13483_v54  ;;  %v1553_v9 = vld [vmem:[#allocation2 + $0x19c] sm:$0x7]  ;;  %v20031_v44 = vpop.permute.xlu0 %9541  ;;  %v15719_v26 = vld [vmem:[%s20531_s3 + $0x1b0] ss:$8 sps:$4 sm:$0xff]  }
 0x528   : > { %15415 = vmatpush1.bf16.msra.mxu1 %v15717_v28  ;;  %v13502_v58 = vrot.slane %v13501_v17, 2  ;;  %v10980_v50 = vrot.slane %v10978_v2, 7  ;;  %v10984_v61 = vrot.slane %v10982_v55, 6  ;;  %v10990_v34 = vrot.slane %v10988_v45, 7  ;;  %v20810_v10 = vld [vmem:[#allocation45_spill] sm:$0xff] }
 0x529   : > { %15400 = vmatprep.subr.bf16.mxu1 %v15718_v37  ;;  %v10975_v25 = vor.u32 %v10974_v5, %v19871_v32  ;;  %v10995_v21 = vrot.slane %v10993_v40, 6  ;;  %v10996_v43 = vshll.u32 %v19873_v22, 16  ;;  %v15125_v49 = vld.sshfl [vmem:[#allocation2 + $0x194] sm:$0x3 pattern:$0x76325410]  ;;  %v13679_v30 = vrot.slane %v13671_v48, %v16483_v11 }
 0x52a   : > { %v13753_v31 = vld [vmem:[#allocation3 + $0x60] sm:$0xff]  ;;  %v13507_v63 = vsel %vm16733_vm15, %v13502_v58, %v19999_v33  ;;  %v10985_v39 = vor.u32 %v10984_v61, %v10980_v50  ;;  %v11002_v7 = vshll.u32 %v19897_v18, 16  ;;  %v20026_v27 = vld.sshfl [vmem:[#allocation2 + $0x198] sm:$0x33 pattern:$0x76325410] }
 0x52b   : > { %14236 = vmatmul.mubr.bf16.gmra.mrb[12].mxu1 %v13753_v31  ;;  %v13758_v32 = vld [vmem:[#allocation3 + $0x88] sm:$0xff]  ;;  %v13672_v42 = vcombine.low %v13497_v1, %v13507_v63  ;;  %v10976_v41 = vrot.slane %v10975_v25, 2  ;;  %v10998_v36 = vrot.slane %v10996_v43, 7  ;;  %v11006_v22 = vshrl.u32 %v19897_v18, 16  ;;  %v1549_v31 = vld [vmem:[#allocation2 + $0x134] sm:$0x7] }
 0x52c   : > { %v20029_v8 = vld.sshfl [vmem:[#allocation2 + $0xc8] sm:$0x33 pattern:$0x76325410]  ;;  %14245 = vmatprep.mubr.bf16.mxu1 %v13758_v32  ;;  %15416 = vmatpush1.bf16.msra.mxu1 %v15719_v26  ;;  %v10986_v57 = vrot.slane %v10985_v39, 2  ;;  %v11004_v3 = vrot.slane %v11002_v7, 7  ;;  %v20053_v48 = vcombine.high %v20026_v27, %v20026_v27  ;;  %v12014_v61 = vcombine.low %v15125_v49, %v20026_v27 }
 0x52d   : > { %v11012_v23 = vshll.u32 %v20013_v20, 16  ;;  %v1554_v17 = vsel %vm16907_vm5, 0, %v1553_v9  ;;  %v13743_v2 = vld [vmem:[#allocation3 + $0x10] sm:$0xff]  ;;  %v15720_v18 = vld [vmem:[%s20531_s3 + $0x1c4] ss:$8 sps:$4 sm:$0xff]   ;;  %v13686_v55 = vrot.slane %v13672_v42, %v16483_v11  ;;  %v10981_v45 = vsel %vm16733_vm15, %v10976_v41, %v10980_v50  ;;  %v20808_v63 = vld [vmem:[#allocation47_spill] sm:$0xff] }
 0x52e   : > { %15401 = vmatprep.subr.bf16.mxu1 %v15720_v18  ;;  %v10999_v28 = vor.u32 %v10998_v36, %v10995_v21  ;;  %v11008_v54 = vrot.slane %v11006_v22, 6  ;;  %1555 = vst [vmem:[#allocation2 + $0x19c] sm:$0x7] %v1554_v17  ;;  %14329 = vmatmul.mubr.bf16.vlgmr.msra.gmra.mrb[72].mxu0 %v13743_v2  ;;  %v10991_v37 = vsel %vm16733_vm15, %v10986_v57, %v10990_v34  ;;  %v15721_v34 = vld [vmem:[%s20531_s3 + $0x1c0] ss:$8 sps:$4 sm:$0xff]   ;;  %v20083_v17 = vpop.permute.xlu0 %12870 }
 0x52f   : > { %v15029_v1 = vld.sshfl [vmem:[#allocation2 + $0xc4] sm:$0x3 pattern:$0x76325410]  ;;  %v20049_v58 = vrot.slane %v11012_v23, 7  ;;  %v13687_v25 = vcombine.low %v13679_v30, %v13686_v55  ;;  %v20057_v9 = vcombine.low %v10981_v45, %v10991_v37  ;;  %v20065_v39 = vrot.slane %v12014_v61, %v16483_v11 }
 0x530   : > { %v20045_v5 = vld.sshfl [vmem:[#allocation2 + $0x54] sm:$0x3 pattern:$0x76325410]  ;;  %v11000_v21 = vrot.slane %v10999_v28, 2  ;;  %v11009_v43 = vor.u32 %v11008_v54, %v11004_v3  ;;  %15417 = vmatpush1.bf16.msra.mxu1 %v15721_v34  ;;  %v20069_v30 = vcombine.high %v20029_v8, %v20029_v8  ;;  %v9522_v7 = vcombine.low %v15029_v1, %v20029_v8 }
 0x531   : > { %v5403_v40 = vpop.permute.xlu1 %5402  ;;  %v14815_v50 = vld.sshfl [vmem:[#allocation2 + $0x5c] sm:$0x3 pattern:$0x76325410]  ;;  %v4132_v32 = vcombine.low %v20045_v5, %v19734_v6  ;;  %v1635_v42 = vld [vmem:[#allocation2 + $0x130] sm:$0x1]  ;;  %13719 = vrot.lane.b32.xlu1 %v13687_v25, %s15738_s27  ;;  %v11187_v26 = vrot.slane %v20057_v9, %v16483_v11 }
 0x532   : > { %5426 = vst.msk [vmem:[#allocation3 + $0x80] sm:$0xff] %vm5421_vm8, %v5403_v40  ;;  %v15031_v49 = vld.sshfl [vmem:[#allocation2 + $0xcc] sm:$0x3 pattern:$0x76325410]  ;;  %v11005_v36 = vsel %vm16733_vm15, %v11000_v21, %v11004_v3  ;;  %v11010_v22 = vrot.slane %v11009_v43, 2  ;;  %v4133_v57 = vcombine.low %v19766_v0, %v14815_v50  ;;  %v20087_v18 = vrot.slane %v9522_v7, %v16483_v11 }
 0x533   : > { %6264 = vst.msk [vmem:[#allocation3 + $0x80] sm:$0xff] %vm6259_vm11, %v20808_v63  ;;  %v15722_v41 = vld [vmem:[%s20531_s3 + $0x1d4] ss:$8 sps:$4 sm:$0xff]   ;;  %v9523_v2 = vcombine.low %v20069_v30, %v15031_v49  ;;  %v4140_v55 = vrot.slane %v4132_v32, %v16483_v11  ;;  %v1550_v3 = vsel %vm16907_vm5, 0, %v1549_v31  ;;  %v1636_v1 = vsel %vm16261_vm6, 0, %v1635_v42 }
 0x534   : > { %15402 = vmatprep.subr.bf16.mxu1 %v15722_v41  ;;  %v15084_v23 = vld.sshfl [vmem:[#allocation2 + $0xe8] sm:$0x33 pattern:$0x76325410]  ;;  %v11015_v0 = vsel %vm16733_vm15, %v11010_v22, %v20049_v58  ;;  %v4147_v28 = vrot.slane %v4133_v57, %v16483_v11  ;;  %1551 = vst [vmem:[#allocation2 + $0x134] sm:$0x7] %v1550_v3  ;;  %v12290_v40 = vcombine.high %v19916_v60, %v19916_v60 }
 0x535   : > { %v10383_v6 = vpop.permute.xlu1 %10382  ;;  %v15083_v45 = vld.sshfl [vmem:[#allocation2 + $0xe4] sm:$0x3 pattern:$0x76325410]  ;;  %v15723_v61 = vld [vmem:[%s20531_s3 + $0x1d0] ss:$8 sps:$4 sm:$0xff]   ;;  %v11180_v50 = vcombine.low %v11005_v36, %v11015_v0  ;;  %v20109_v43 = vrot.slane %v9523_v2, %v16483_v11  ;;  %v11335_v63 = vcombine.high %v15084_v23, %v15084_v23  ;;  %v10635_v49 = vcombine.high %v20013_v20, %v20013_v20 }
 0x536   : > { %10406 = vst.msk [vmem:[#allocation3 + $0x70] sm:$0xff] %vm5421_vm8, %v10383_v6  ;;  %v20101_v37 = vld.sshfl [vmem:[#allocation2 + $0x54] sm:$0x13 pattern:$0x76325410]  ;;  %15418 = vmatpush1.bf16.msra.mxu1 %v15723_v61  ;;  %v4148_v42 = vcombine.low %v4140_v55, %v4147_v28  ;;  %v12671_v41 = vshrl.u32 %v19916_v60, 16  ;;  %v20127_v60 = vpop.permute.xlu0 %10378 }
 0x537   : > { %11243 = vst.msk [vmem:[#allocation3 + $0x70] sm:$0xff] %vm6259_vm11, %v20810_v10  ;;  %v1717_v25 = vld [vmem:[#allocation2 + $0x19c] sm:$0x4]  ;;  %1637 = vst [vmem:[#allocation2 + $0x130] sm:$0x1] %v1636_v1  ;;  %v11194_v36 = vrot.slane %v11180_v50, %v16483_v11  ;;  %v9538_v22 = vcombine.low %v20087_v18, %v20109_v43  ;;  %v12677_v57 = vshll.u32 %v12290_v40, 16  ;;  %v11496_v54 = vcombine.low %v15084_v23, %v11335_v63 }
 0x538   : > { %v15127_v21 = vld.sshfl [vmem:[#allocation2 + $0x19c] sm:$0x3 pattern:$0x76325410]  ;;  %v15725_v34 = vld [vmem:[%s20531_s3 + $0x1e4] ss:$8 sps:$4 sm:$0xff]   ;;  %v9782_v55 = vcombine.high %v20101_v37, %v20101_v37 }
 0x539   : > { %v15724_v9 = vld.sshfl [vmem:[#allocation2 + $0xe0] sm:$0x33 pattern:$0x76325410]  ;;  %15403 = vmatprep.subr.bf16.mxu1 %v15725_v34  ;;  %v1718_v7 = vsel %vm16144_vm3, 0, %v1717_v25  ;;  %v12015_v32 = vcombine.low %v20053_v48, %v15127_v21  ;;  %4167 = vst.msk [vmem:[#allocation3 + $0x100] sm:$0xff] %vm4158_vm1, %v4148_v42  ;;  %v11195_v10 = vcombine.low %v11187_v26, %v11194_v36  ;;  %v11510_v25 = vrot.slane %v11496_v54, %v16483_v11 }
 0x53a   : > { %v11320_v31 = vcombine.high %v15724_v9, %v15724_v9  ;;  %1719 = vst [vmem:[#allocation2 + $0x19c] sm:$0x4] %v1718_v7  ;;  %v13757_v2 = vld [vmem:[#allocation3 + $0x80] sm:$0xff]  ;;  %v12673_v0 = vrot.slane %v12671_v41, 6  ;;  %v13762_v1 = vld [vmem:[#allocation3 + $0xa8] sm:$0xff]  ;;  %4585 = vst.msk [vmem:[#allocation3 + $0x100] sm:$0xff] %vm4576_vm7, %v19579_v59 }
 0x53b   : > { %v12029_v3 = vrot.slane %v12015_v32, %v16483_v11  ;;  %v20125_v28 = vld.sshfl [vmem:[#allocation2 + $0x18] sm:$0x33 pattern:$0x76325410]  ;;  %14246 = vmatmul.mubr.bf16.gmra.mrb[16].mxu1 %v13757_v2  ;;  %v15726_v23 = vld [vmem:[%s20531_s3 + $0x1e0] ss:$8 sps:$4 sm:$0xff]   ;;  %11227 = vrot.lane.b32.xlu1 %v11195_v10, %s15738_s27 }
 0x53c   : > { %v11495_v6 = vcombine.low %v11320_v31, %v15083_v45  ;;  %v12679_v45 = vrot.slane %v12677_v57, 7  ;;  %14255 = vmatprep.mubr.bf16.mxu1 %v13762_v1  ;;  %15419 = vmatpush1.bf16.msra.mxu1 %v15726_v23  ;;  %v12674_v50 = vor.u32 %v12673_v0, %v19936_v47  ;;  %v10141_v26 = vshll.u32 %v20101_v37, 16  ;;  %v15727_v59 = vld [vmem:[%s20531_s3 + $0x1f4] ss:$8 sps:$4 sm:$0xff]   ;;  %v15728_v57 = vld [vmem:[%s20531_s3 + $0x1f0] ss:$8 sps:$4 sm:$0xff]  }
 0x53d   : > { %v12030_v61 = vcombine.low %v20065_v39, %v12029_v3  ;;  %15404 = vmatprep.subr.bf16.mxu1 %v15727_v59  ;;  %v15151_v21 = vld.sshfl [vmem:[#allocation2 + $0x134] sm:$0x13 pattern:$0x76325410]  ;;  %v10145_v9 = vshrl.u32 %v20101_v37, 16  ;;  %v8844_v31 = vcombine.high %v20125_v28, %v20125_v28  ;;  %v8829_v47 = vcombine.high %v19931_v38, %v19931_v38  ;;  %v13708_v3 = vpop.permute.xlu0 %13707 }
 0x53e   : > { %v11503_v40 = vrot.slane %v11495_v6, %v16483_v11  ;;  %v20148_v39 = vld.sshfl [vmem:[#allocation2 + $0x130] sm:$0x33 pattern:$0x76325410]  ;;  %v12306_v63 = vcombine.high %v15151_v21, %v15151_v21  ;;  %v12675_v34 = vrot.slane %v12674_v50, 2  ;;  %v12701_v7 = vshll.u32 %v15151_v21, 16 }
 0x53f   : > { %v20152_v42 = vcombine.high %v20148_v39, %v20148_v39  ;;  %v12682_v41 = vshrl.u32 %v20148_v39, 16  ;;  %v12685_v37 = vshll.u32 %v20148_v39, 16  ;;  %v12705_v36 = vshrl.u32 %v15151_v21, 16  ;;  %12047 = vrot.lane.b32.xlu1 %v12030_v61, %s15740_s30 }
 0x540   : > { %v11511_v32 = vcombine.low %v11503_v40, %v11510_v25  ;;  %15420 = vmatpush1.bf16.msra.mxu1 %v15728_v57  ;;  %v12680_v38 = vsel %vm16733_vm15, %v12675_v34, %v12679_v45  ;;  %v12703_v6 = vrot.slane %v12701_v7, 7  ;;  %v12711_v2 = vshll.u32 %v12306_v63, 16 }
 0x541   : > { %v12684_v0 = vrot.slane %v12682_v41, 6  ;;  %v12687_v54 = vrot.slane %v12685_v37, 7  ;;  %v12691_v1 = vshll.u32 %v20152_v42, 16  ;;  %v12695_v10 = vshrl.u32 %v20152_v42, 16 }
 0x542   : > { %11641 = vst.msk [vmem:[#allocation3 + $0x38] sm:$0xff] %vm4158_vm1, %v11511_v32  ;;  %v12707_v40 = vrot.slane %v12705_v36, 6  ;;  %v12713_v23 = vrot.slane %v12711_v2, 7  ;;  %v10143_v50 = vrot.slane %v10141_v26, 7  ;;  %v10147_v21 = vrot.slane %v10145_v9, 6 }
 0x543   : > { %12059 = vst.msk [vmem:[#allocation3 + $0x38] sm:$0xff] %vm4576_vm7, %v20003_v16  ;;  %v12688_v45 = vor.u32 %v12687_v54, %v12684_v0  ;;  %v12693_v25 = vrot.slane %v12691_v1, 7  ;;  %v12697_v59 = vrot.slane %v12695_v10, 6  ;;  %v10151_v34 = vshll.u32 %v9782_v55, 16  ;;  %9555 = vrot.lane.b32.xlu1 %v9538_v22, %s15740_s30 }
 0x544   : > { %12896 = vst.msk [vmem:[#allocation3 + $0x38] sm:$0xff] %vm5421_vm8, %v20083_v17  ;;  %v12708_v61 = vor.u32 %v12707_v40, %v12703_v6  ;;  %v10144_v63 = vsel %vm16733_vm15, %v19721_v19, %v10143_v50  ;;  %v10148_v17 = vor.u32 %v10147_v21, %v10143_v50  ;;  %v14987_v55 = vld.sshfl [vmem:[#allocation2 + $0x14] sm:$0x3 pattern:$0x76325410]  ;;  %v9005_v54 = vcombine.low %v20125_v28, %v8844_v31 }
 0x545   : > { %13733 = vst.msk [vmem:[#allocation3 + $0x38] sm:$0xff] %vm6259_vm11, %v13708_v3  ;;  %v12689_v16 = vrot.slane %v12688_v45, 2  ;;  %v12698_v26 = vor.u32 %v12697_v59, %v12693_v25  ;;  %v10153_v32 = vrot.slane %v10151_v34, 7  ;;  %v9004_v1 = vcombine.low %v8829_v47, %v14987_v55 }
 0x546   : > { %v12709_v7 = vrot.slane %v12708_v61, 2  ;;  %v10149_v37 = vrot.slane %v10148_v17, 2  ;;  %v20186_v3 = vld.sshfl [vmem:[#allocation2 + $0x60] sm:$0x33 pattern:$0x76325410] }
 0x547   : > { %v12694_v9 = vsel %vm16733_vm15, %v12689_v16, %v12693_v25  ;;  %v12699_v41 = vrot.slane %v12698_v26, 2  ;;  %v15055_v10 = vld.sshfl [vmem:[#allocation2 + $0x64] sm:$0x13 pattern:$0x76325410]  ;;  %v20195_v50 = vcombine.high %v20186_v3, %v20186_v3  ;;  %v10190_v31 = vshrl.u32 %v20186_v3, 16  ;;  %v11216_v26 = vpop.permute.xlu0 %11215 }
 0x548   : > { %v12714_v36 = vsel %vm16733_vm15, %v12709_v7, %v12713_v23  ;;  %v12851_v19 = vcombine.low %v12680_v38, %v12694_v9  ;;  %v10154_v18 = vsel %vm16733_vm15, %v10149_v37, %v10153_v32  ;;  %v9012_v23 = vrot.slane %v9004_v1, %v16483_v11 }
 0x549   : > { %v12704_v57 = vsel %vm16733_vm15, %v12699_v41, %v12703_v6  ;;  %v10342_v2 = vcombine.low %v10144_v63, %v10154_v18  ;;  %v9019_v6 = vrot.slane %v9005_v54, %v16483_v11  ;;  %v9814_v59 = vcombine.high %v15055_v10, %v15055_v10 }
 0x54a   : > { %v12852_v43 = vcombine.low %v12704_v57, %v12714_v36  ;;  %v12859_v22 = vrot.slane %v12851_v19, %v16483_v11  ;;  %v10193_v47 = vshll.u32 %v20186_v3, 16  ;;  %v10199_v21 = vshll.u32 %v20195_v50, 16  ;;  %v15175_v19 = vld.sshfl [vmem:[#allocation2 + $0x19c] sm:$0x13 pattern:$0x76325410] }
 0x54b   : > { %v10350_v40 = vrot.slane %v10342_v2, %v16483_v11  ;;  %v10385_v45 = vpop.permute.xlu1 %10384  ;;  %v9020_v28 = vcombine.low %v9012_v23, %v9019_v6  ;;  %v10203_v61 = vshrl.u32 %v20195_v50, 16  ;;  %v10343_v63 = vcombine.low %v19833_v29, %v19837_v51 }
 0x54c   : > { %v13748_v0 = vld [vmem:[#allocation3 + $0x38] sm:$0xff]  ;;  %v12866_v38 = vrot.slane %v12852_v43, %v16483_v11  ;;  %10407 = vst.msk [vmem:[#allocation3 + $0x90] sm:$0xff] %vm5421_vm8, %v10385_v45  ;;  %v10192_v34 = vrot.slane %v10190_v31, 6  ;;  %v10195_v16 = vrot.slane %v10193_v47, 7  ;;  %v10201_v7 = vrot.slane %v10199_v21, 7 }
 0x54d   : > { %14338 = vmatprep.mubr.bf16.mxu0 %v13748_v0  ;;  %11244 = vst.msk [vmem:[#allocation3 + $0x90] sm:$0xff] %vm6259_vm11, %v19550_v53  ;;  %v10205_v53 = vrot.slane %v10203_v61, 6  ;;  %v10209_v32 = vshll.u32 %v15055_v10, 16  ;;  %v10357_v9 = vrot.slane %v10343_v63, %v16483_v11  ;;  %v10213_v37 = vshrl.u32 %v15055_v10, 16  ;;  %v20224_v10 = vpop.permute.xlu0 %12035  ;;  %v1677_v61 = vld [vmem:[#allocation2 + $0xcc] sm:$0x4] }
 0x54e   : > { %v12867_v25 = vcombine.low %v12859_v22, %v12866_v38  ;;  %9150 = vst.msk [vmem:[#allocation3 + $0x30] sm:$0xff] %vm4158_vm1, %v9020_v28  ;;  %v10196_v41 = vor.u32 %v10195_v16, %v10192_v34  ;;  %v10219_v36 = vshll.u32 %v9814_v59, 16  ;;  %v13143_v2 = vcombine.high %v15175_v19, %v15175_v19 }
 0x54f   : > { %v5405_v17 = vpop.permute.xlu1 %5404  ;;  %9567 = vst.msk [vmem:[#allocation3 + $0x30] sm:$0xff] %vm4576_vm7, %v20031_v44  ;;  %v10206_v29 = vor.u32 %v10205_v53, %v10201_v7  ;;  %v10211_v51 = vrot.slane %v10209_v32, 7  ;;  %v13127_v44 = vcombine.high %v19961_v12, %v19961_v12  ;;  %v10358_v55 = vcombine.low %v10350_v40, %v10357_v9 }
 0x550   : > { %12884 = vrot.lane.b32.xlu1 %v12867_v25, %s15737_s26  ;;  %5427 = vst.msk [vmem:[#allocation3 + $0xa0] sm:$0xff] %vm5421_vm8, %v5405_v17  ;;  %10404 = vst.msk [vmem:[#allocation3 + $0x30] sm:$0xff] %vm5421_vm8, %v20127_v60  ;;  %v10197_v57 = vrot.slane %v10196_v41, 2  ;;  %v10215_v18 = vrot.slane %v10213_v37, 6  ;;  %v10221_v43 = vrot.slane %v10219_v36, 7  ;;  %v13508_v0 = vshrl.u32 %v19961_v12, 16 }
 0x551   : > { %6265 = vst.msk [vmem:[#allocation3 + $0xa0] sm:$0xff] %vm6259_vm11, %v19516_v46  ;;  %11241 = vst.msk [vmem:[#allocation3 + $0x30] sm:$0xff] %vm6259_vm11, %v11216_v26  ;;  %v10207_v22 = vrot.slane %v10206_v29, 2  ;;  %v13514_v54 = vshll.u32 %v13127_v44, 16  ;;  %v13519_v1 = vshrl.u32 %v20026_v27, 16  ;;  %v13522_v23 = vshll.u32 %v20026_v27, 16  ;;  %v20238_v29 = vpop.permute.xlu0 %9543 }
 0x552   : > { %v10202_v46 = vsel %vm16733_vm15, %v10197_v57, %v10201_v7  ;;  %v10216_v60 = vor.u32 %v10215_v18, %v10211_v51  ;;  %v13510_v6 = vrot.slane %v13508_v0, 6  ;;  %v13528_v59 = vshll.u32 %v20053_v48, 16  ;;  %v13766_v17 = vld [vmem:[#allocation3 + $0xc8] sm:$0xff] }
 0x553   : > { %v10212_v38 = vsel %vm16733_vm15, %v10207_v22, %v10211_v51  ;;  %v10359_v40 = vcombine.low %v19847_v35, %v10202_v46  ;;  %v13516_v45 = vrot.slane %v13514_v54, 7  ;;  %v13521_v25 = vrot.slane %v13519_v1, 6  ;;  %v15097_v54 = vld.sshfl [vmem:[#allocation2 + $0x11c] sm:$0x3 pattern:$0x76325410] }
 0x554   : > { %10390 = vrot.lane.b32.xlu1 %v10358_v55, %s15737_s26  ;;  %v10217_v12 = vrot.slane %v10216_v60, 2  ;;  %v13511_v31 = vor.u32 %v13510_v6, %v19999_v33  ;;  %v13524_v47 = vrot.slane %v13522_v23, 7  ;;  %v13532_v21 = vshrl.u32 %v20053_v48, 16 }
 0x555   : > { %v10367_v28 = vrot.slane %v10359_v40, %v16483_v11  ;;  %v13530_v34 = vrot.slane %v13528_v59, 7  ;;  %v13538_v16 = vshll.u32 %v15175_v19, 16  ;;  %v13542_v27 = vshrl.u32 %v15175_v19, 16 }
 0x556   : > { %v10222_v35 = vsel %vm16733_vm15, %v10217_v12, %v10221_v43  ;;  %v13512_v53 = vrot.slane %v13511_v31, 2  ;;  %v13525_v32 = vor.u32 %v13524_v47, %v13521_v25  ;;  %v13534_v9 = vrot.slane %v13532_v21, 6  ;;  %v15096_v60 = vld.sshfl [vmem:[#allocation2 + $0x118] sm:$0x33 pattern:$0x76325410] }
 0x557   : > { %v10360_v7 = vcombine.low %v10212_v38, %v10222_v35  ;;  %v13540_v41 = vrot.slane %v13538_v16, 7  ;;  %v13544_v48 = vrot.slane %v13542_v27, 6  ;;  %v13548_v37 = vshll.u32 %v13143_v2, 16 }
 0x558   : > { %v13761_v63 = vld [vmem:[#allocation3 + $0xa0] sm:$0xff]  ;;  %v13747_v26 = vld [vmem:[#allocation3 + $0x30] sm:$0xff]  ;;  %v1678_v36 = vsel %vm16144_vm3, 0, %v1677_v61  ;;  %v13517_v19 = vsel %vm16733_vm15, %v13512_v53, %v13516_v45  ;;  %v13526_v44 = vrot.slane %v13525_v32, 2  ;;  %v13535_v55 = vor.u32 %v13534_v9, %v13530_v34  ;;  %v20266_v61 = vpop.permute.xlu0 %12872 }
 0x559   : > { %14256 = vmatmul.mubr.bf16.gmra.mrb[20].mxu1 %v13761_v63  ;;  %14339 = vmatmul.mubr.bf16.gmra.mrb[76].mxu0 %v13747_v26  ;;  %v10374_v51 = vrot.slane %v10360_v7, %v16483_v11  ;;  %1679 = vst [vmem:[#allocation2 + $0xcc] sm:$0x4] %v1678_v36  ;;  %v13545_v57 = vor.u32 %v13544_v48, %v13540_v41  ;;  %v13550_v18 = vrot.slane %v13548_v37, 7  ;;  %v11016_v43 = vshrl.u32 %v20013_v20, 16 }
 0x55a   : > { %v5407_v33 = vpop.permute.xlu1 %5406  ;;  %14265 = vmatprep.mubr.bf16.mxu1 %v13766_v17  ;;  %v13531_v2 = vsel %vm16733_vm15, %v13526_v44, %v13530_v34  ;;  %v13536_v0 = vrot.slane %v13535_v55, 2  ;;  %v11027_v46 = vshrl.u32 %v20029_v8, 16  ;;  %v20252_v1 = vld.sshfl [vmem:[#allocation2 + $0x120] sm:$0x33 pattern:$0x76325410]  ;;  %v11425_v26 = vcombine.high %v15096_v60, %v15096_v60 }
 0x55b   : > { %5428 = vst.msk [vmem:[#allocation3 + $0xc0] sm:$0xff] %vm5421_vm8, %v5407_v33  ;;  %v10375_v22 = vcombine.low %v10367_v28, %v10374_v51  ;;  %v15000_v38 = vld.sshfl [vmem:[#allocation2 + $0x48] sm:$0x33 pattern:$0x76325410]  ;;  %v13546_v40 = vrot.slane %v13545_v57, 2  ;;  %v13688_v6 = vcombine.low %v13517_v19, %v13531_v2 }
 0x55c   : > { %6266 = vst.msk [vmem:[#allocation3 + $0xc0] sm:$0xff] %vm6259_vm11, %v19610_v14  ;;  %v11018_v23 = vrot.slane %v11016_v43, 6  ;;  %v11022_v12 = vshll.u32 %v10635_v49, 16  ;;  %v13541_v20 = vsel %vm16733_vm15, %v13536_v0, %v13540_v41  ;;  %v11029_v45 = vrot.slane %v11027_v46, 6  ;;  %v13770_v33 = vld [vmem:[#allocation3 + $0xe8] sm:$0xff] }
 0x55d   : > { %10392 = vrot.lane.b32.xlu1 %v10375_v22, %s15737_s26  ;;  %v11030_v25 = vshll.u32 %v20029_v8, 16  ;;  %v11036_v59 = vshll.u32 %v20069_v30, 16  ;;  %v13551_v28 = vsel %vm16733_vm15, %v13546_v40, %v13550_v18  ;;  %v13696_v31 = vrot.slane %v13688_v6, %v16483_v11  ;;  %v15086_v36 = vld.sshfl [vmem:[#allocation2 + $0xf0] sm:$0x33 pattern:$0x76325410] }
 0x55e   : > { %v10387_v14 = vpop.permute.xlu1 %10386  ;;  %v11019_v47 = vor.u32 %v11018_v23, %v20049_v58  ;;  %v11024_v21 = vrot.slane %v11022_v12, 7  ;;  %v13689_v63 = vcombine.low %v13541_v20, %v13551_v28  ;;  %v11040_v8 = vshrl.u32 %v20069_v30, 16  ;;  %v15001_v18 = vld.sshfl [vmem:[#allocation2 + $0x4c] sm:$0x3 pattern:$0x76325410] }
 0x55f   : > { %10408 = vst.msk [vmem:[#allocation3 + $0xb0] sm:$0xff] %vm5421_vm8, %v10387_v14  ;;  %v11032_v35 = vrot.slane %v11030_v25, 7  ;;  %v11038_v34 = vrot.slane %v11036_v59, 7  ;;  %v8934_v17 = vcombine.high %v15000_v38, %v15000_v38  ;;  %v11580_v30 = vcombine.low %v15096_v60, %v11425_v26  ;;  %v20279_v14 = vpop.permute.xlu0 %10380 }
 0x560   : > { %11245 = vst.msk [vmem:[#allocation3 + $0xb0] sm:$0xff] %vm6259_vm11, %v19480_v62  ;;  %v15079_v16 = vld.sshfl [vmem:[#allocation2 + $0xcc] sm:$0x13 pattern:$0x76325410]  ;;  %v11020_v27 = vrot.slane %v11019_v47, 2  ;;  %v11581_v62 = vcombine.low %v15097_v54, %v20252_v1  ;;  %v13703_v53 = vrot.slane %v13689_v63, %v16483_v11 }
 0x561   : > { %v10651_v32 = vcombine.high %v15079_v16, %v15079_v16  ;;  %v11033_v9 = vor.u32 %v11032_v35, %v11029_v45  ;;  %v11042_v58 = vrot.slane %v11040_v8, 6  ;;  %v11046_v48 = vshll.u32 %v15079_v16, 16  ;;  %v20275_v49 = vld.sshfl [vmem:[#allocation2 + $0x50] sm:$0x33 pattern:$0x76325410] }
 0x562   : > { %v11025_v41 = vsel %vm16733_vm15, %v11020_v27, %v11024_v21  ;;  %v11050_v37 = vshrl.u32 %v15079_v16, 16  ;;  %v13704_v19 = vcombine.low %v13696_v31, %v13703_v53  ;;  %v11588_v2 = vrot.slane %v11580_v30, %v16483_v11  ;;  %v15085_v46 = vld.sshfl [vmem:[#allocation2 + $0xec] sm:$0x3 pattern:$0x76325410] }
 0x563   : > { %v13765_v7 = vld [vmem:[#allocation3 + $0xc0] sm:$0xff]  ;;  %v11034_v44 = vrot.slane %v11033_v9, 2  ;;  %v11043_v55 = vor.u32 %v11042_v58, %v11038_v34  ;;  %v11056_v57 = vshll.u32 %v10651_v32, 16  ;;  %v11048_v43 = vrot.slane %v11046_v48, 7 }
 0x564   : > { %14266 = vmatmul.mubr.bf16.gmra.mrb[24].mxu1 %v13765_v7  ;;  %v11052_v22 = vrot.slane %v11050_v37, 6  ;;  %v11595_v0 = vrot.slane %v11581_v62, %v16483_v11  ;;  %v15087_v54 = vld.sshfl [vmem:[#allocation2 + $0xf4] sm:$0x3 pattern:$0x76325410]  ;;  %13721 = vrot.lane.b32.xlu1 %v13704_v19, %s15738_s27  ;;  %v9089_v12 = vcombine.low %v15000_v38, %v8934_v17  ;;  %v9090_v28 = vcombine.low %v15001_v18, %v20275_v49 }
 0x565   : > { %v20273_v51 = vpop.permute.xlu1 %10388  ;;  %14275 = vmatprep.mubr.bf16.mxu1 %v13770_v33  ;;  %v14989_v60 = vld.sshfl [vmem:[#allocation2 + $0x1c] sm:$0x3 pattern:$0x76325410]  ;;  %v11039_v40 = vsel %vm16733_vm15, %v11034_v44, %v11038_v34  ;;  %v11044_v6 = vrot.slane %v11043_v55, 2  ;;  %v11058_v23 = vrot.slane %v11056_v57, 7  ;;  %v11350_v35 = vcombine.high %v15086_v36, %v15086_v36 }
 0x566   : > { %v14990_v20 = vld.sshfl [vmem:[#allocation2 + $0x20] sm:$0x33 pattern:$0x76325410]  ;;  %v11053_v45 = vor.u32 %v11052_v22, %v11048_v43  ;;  %v11196_v25 = vcombine.low %v11025_v41, %v11039_v40  ;;  %v11596_v59 = vcombine.low %v11588_v2, %v11595_v0  ;;  %v9097_v63 = vrot.slane %v9089_v12, %v16483_v11  ;;  %v13774_v12 = vld [vmem:[#allocation3 + $0x108] sm:$0xff] }
 0x567   : > { %v14991_v31 = vld.sshfl [vmem:[#allocation2 + $0x24] sm:$0x3 pattern:$0x76325410]  ;;  %v11049_v21 = vsel %vm16733_vm15, %v11044_v6, %v11048_v43  ;;  %v11512_v8 = vcombine.low %v15085_v46, %v15086_v36  ;;  %v9104_v27 = vrot.slane %v9090_v28, %v16483_v11  ;;  %v8859_v26 = vcombine.high %v14990_v20, %v14990_v20 }
 0x568   : > { %v15100_v34 = vld.sshfl [vmem:[#allocation2 + $0x128] sm:$0x33 pattern:$0x76325410]  ;;  %v11054_v16 = vrot.slane %v11053_v45, 2  ;;  %v11204_v38 = vrot.slane %v11196_v25, %v16483_v11  ;;  %11646 = vst.msk [vmem:[#allocation3 + $0xd8] sm:$0xff] %vm4158_vm1, %v11596_v59  ;;  %v11513_v17 = vcombine.low %v11350_v35, %v15087_v54  ;;  %v9021_v53 = vcombine.low %v14989_v60, %v14990_v20 }
 0x569   : > { %v5409_v47 = vpop.permute.xlu1 %5408  ;;  %v15099_v62 = vld.sshfl [vmem:[#allocation2 + $0x124] sm:$0x3 pattern:$0x76325410]  ;;  %12064 = vst.msk [vmem:[#allocation3 + $0xd8] sm:$0xff] %vm4576_vm7, %v19739_v52  ;;  %v11520_v7 = vrot.slane %v11512_v8, %v16483_v11  ;;  %v11440_v32 = vcombine.high %v20252_v1, %v20252_v1  ;;  %v9105_v33 = vcombine.low %v9097_v63, %v9104_v27  ;;  %v9022_v41 = vcombine.low %v8859_v26, %v14991_v31  ;;  %v13755_v35 = vld [vmem:[#allocation3 + $0x70] sm:$0xff] }
 0x56a   : > { %5429 = vst.msk [vmem:[#allocation3 + $0xe0] sm:$0xff] %vm5421_vm8, %v5409_v47  ;;  %v15004_v9 = vld.sshfl [vmem:[#allocation2 + $0x58] sm:$0x33 pattern:$0x76325410]  ;;  %v11059_v58 = vsel %vm16733_vm15, %v11054_v16, %v11058_v23  ;;  %12901 = vst.msk [vmem:[#allocation3 + $0xd8] sm:$0xff] %vm5421_vm8, %v19944_v13  ;;  %v11455_v48 = vcombine.high %v15100_v34, %v15100_v34  ;;  %v11527_v30 = vrot.slane %v11513_v17, %v16483_v11 }
 0x56b   : > { %6267 = vst.msk [vmem:[#allocation3 + $0xe0] sm:$0xff] %vm6259_vm11, %v19632_v24  ;;  %v13710_v24 = vpop.permute.xlu0 %13709  ;;  %v15101_v37 = vld.sshfl [vmem:[#allocation2 + $0x12c] sm:$0x3 pattern:$0x76325410]  ;;  %v11197_v52 = vcombine.low %v11049_v21, %v11059_v58  ;;  %v9029_v36 = vrot.slane %v9021_v53, %v16483_v11  ;;  %v11597_v19 = vcombine.low %v11440_v32, %v15099_v62  ;;  %v9036_v15 = vrot.slane %v9022_v41, %v16483_v11  ;;  %v13756_v21 = vld [vmem:[#allocation3 + $0x78] sm:$0xff] }
 0x56c   : > { %v15005_v44 = vld.sshfl [vmem:[#allocation2 + $0x5c] sm:$0x3 pattern:$0x76325410]  ;;  %9155 = vst.msk [vmem:[#allocation3 + $0xd0] sm:$0xff] %vm4158_vm1, %v9105_v33  ;;  %v11598_v1 = vcombine.low %v15100_v34, %v11455_v48  ;;  %v8949_v55 = vcombine.high %v20275_v49, %v20275_v49  ;;  %v8964_v57 = vcombine.high %v15004_v9, %v15004_v9  ;;  %v11528_v43 = vcombine.low %v11520_v7, %v11527_v30  ;;  %v13763_v27 = vld [vmem:[#allocation3 + $0xb0] sm:$0xff] }
 0x56d   : > { %v15103_v13 = vld.sshfl [vmem:[#allocation2 + $0x134] sm:$0x3 pattern:$0x76325410]  ;;  %v11211_v18 = vrot.slane %v11197_v52, %v16483_v11  ;;  %9572 = vst.msk [vmem:[#allocation3 + $0xd0] sm:$0xff] %vm4576_vm7, %v19790_v4  ;;  %v11605_v22 = vrot.slane %v11597_v19, %v16483_v11  ;;  %v11614_v2 = vcombine.low %v15101_v37, %v20148_v39  ;;  %v9037_v46 = vcombine.low %v9029_v36, %v9036_v15  ;;  %v13760_v34 = vld [vmem:[#allocation3 + $0x98] sm:$0xff] }
 0x56e   : > { %v15007_v0 = vld.sshfl [vmem:[#allocation2 + $0x64] sm:$0x3 pattern:$0x76325410]  ;;  %10409 = vst.msk [vmem:[#allocation3 + $0xd0] sm:$0xff] %vm5421_vm8, %v20273_v51  ;;  %v11612_v54 = vrot.slane %v11598_v1, %v16483_v11  ;;  %v9106_v49 = vcombine.low %v8949_v55, %v20045_v5  ;;  %v9107_v60 = vcombine.low %v15004_v9, %v8964_v57  ;;  %v11615_v4 = vcombine.low %v20152_v42, %v15103_v13 }
 0x56f   : > { %v11212_v40 = vcombine.low %v11204_v38, %v11211_v18  ;;  %11642 = vst.msk [vmem:[#allocation3 + $0x58] sm:$0xff] %vm4158_vm1, %v11528_v43  ;;  %v11622_v23 = vrot.slane %v11614_v2, %v16483_v11  ;;  %v9123_v39 = vcombine.low %v15005_v44, %v20186_v3  ;;  %9151 = vst.msk [vmem:[#allocation3 + $0x50] sm:$0xff] %vm4158_vm1, %v9037_v46  ;;  %v11218_v51 = vpop.permute.xlu0 %11217  ;;  %v13759_v38 = vld [vmem:[#allocation3 + $0x90] sm:$0xff]  ;;  %vm14601_vm3 = vcmask 519168  }
 0x570   : > { %12060 = vst.msk [vmem:[#allocation3 + $0x58] sm:$0xff] %vm4576_vm7, %v20224_v10  ;;  %v11613_v5 = vcombine.low %v11605_v22, %v11612_v54  ;;  %v9114_v20 = vrot.slane %v9106_v49, %v16483_v11  ;;  %v9121_v45 = vrot.slane %v9107_v60, %v16483_v11  ;;  %v9124_v25 = vcombine.low %v20195_v50, %v15007_v0  ;;  %v20812_v0 = vld [vmem:[#allocation4_spill] sm:$0xff] }
 0x571   : > { %11229 = vrot.lane.b32.xlu1 %v11212_v40, %s15738_s27  ;;  %9568 = vst.msk [vmem:[#allocation3 + $0x50] sm:$0xff] %vm4576_vm7, %v20238_v29  ;;  %v11629_v42 = vrot.slane %v11615_v4, %v16483_v11  ;;  %v9131_v3 = vrot.slane %v9123_v39, %v16483_v11  ;;  %v13845_v46 = vsub.s32 0, %v20812_v0  ;;  %v13841_v54 = vld [vmem:[%s20532_s4] sm:$0x3]  ;;  %v13849_v49 = vsub.s32 1, %v20812_v0 }
 0x572   : > { %v13769_v6 = vld [vmem:[#allocation3 + $0xe0] sm:$0xff]  ;;  %12897 = vst.msk [vmem:[#allocation3 + $0x58] sm:$0xff] %vm5421_vm8, %v20266_v61  ;;  %10405 = vst.msk [vmem:[#allocation3 + $0x50] sm:$0xff] %vm5421_vm8, %v20279_v14  ;;  %v9122_v50 = vcombine.low %v9114_v20, %v9121_v45  ;;  %v9138_v59 = vrot.slane %v9124_v25, %v16483_v11 }
 0x573   : > { %14276 = vmatmul.mubr.bf16.gmra.mrb[28].mxu1 %v13769_v6  ;;  %13734 = vst.msk [vmem:[#allocation3 + $0x58] sm:$0xff] %vm6259_vm11, %v13710_v24  ;;  %11242 = vst.msk [vmem:[#allocation3 + $0x50] sm:$0xff] %vm6259_vm11, %v11218_v51  ;;  %v11630_v29 = vcombine.low %v11622_v23, %v11629_v42  ;;  %v20366_v60 = vrot.slane %v13841_v54, %v13845_v46  ;;  %v20368_v40 = vrot.slane %v13841_v54, %v13849_v49 }
 0x574   : > { %14285 = vmatprep.mubr.bf16.mxu1 %v13774_v12  ;;  %v13718_v10 = vpop.permute.xlu1 %13717  ;;  %11647 = vst.msk [vmem:[#allocation3 + $0xf8] sm:$0xff] %vm4158_vm1, %v11613_v5  ;;  %9156 = vst.msk [vmem:[#allocation3 + $0xf0] sm:$0xff] %vm4158_vm1, %v9122_v50  ;;  %v9139_v61 = vcombine.low %v9131_v3, %v9138_v59 }
 0x575   : > { %13738 = vst.msk [vmem:[#allocation3 + $0xd8] sm:$0xff] %vm6259_vm11, %v13718_v10 }
 0x576   : > { %11648 = vst.msk [vmem:[#allocation3 + $0x118] sm:$0xff] %vm4158_vm1, %v11630_v29  ;;  %9157 = vst.msk [vmem:[#allocation3 + $0x110] sm:$0xff] %vm4158_vm1, %v9139_v61 }
 0x57a   : > { %v13752_v14 = vld [vmem:[#allocation3 + $0x58] sm:$0xff]  ;;  %v13751_v28 = vld [vmem:[#allocation3 + $0x50] sm:$0xff] }
 0x57b   : > { %14348 = vmatprep.mubr.bf16.mxu0 %v13752_v14 }
 0x57c   : > { %14349 = vmatmul.mubr.bf16.gmra.mrb[80].mxu0 %v13751_v28  ;;  %v13768_v26 = vld [vmem:[#allocation3 + $0xd8] sm:$0xff] }
 0x57f   : > { %v5411_v31 = vpop.permute.xlu1 %5410 }
 0x580   : > { %5430 = vst.msk [vmem:[#allocation3 + $0x100] sm:$0xff] %vm5421_vm8, %v5411_v31 }
 0x581   : > { %6268 = vst.msk [vmem:[#allocation3 + $0x100] sm:$0xff] %vm6259_vm11, %v19671_v56  ;;  %v13764_v56 = vld [vmem:[#allocation3 + $0xb8] sm:$0xff] }
 0x588   : > { %v13773_v11 = vld [vmem:[#allocation3 + $0x100] sm:$0xff] }
 0x589   : > { %v11226_v47 = vpop.permute.xlu1 %11225  ;;  %14286 = vmatmul.mubr.bf16.gmra.mrb[32].mxu1 %v13773_v11 }
 0x58a   : > { %11246 = vst.msk [vmem:[#allocation3 + $0xd0] sm:$0xff] %vm6259_vm11, %v11226_v47  ;;  %14358 = vmatprep.mubr.bf16.mxu1 %v13756_v21 }
 0x58d   : > { %v12046_v63 = vpop.permute.xlu1 %12045 }
 0x58e   : > { %12065 = vst.msk [vmem:[#allocation3 + $0xf8] sm:$0xff] %vm4576_vm7, %v12046_v63 }
 0x591   : > { %v9554_v8 = vpop.permute.xlu1 %9553  ;;  %14359 = vmatmul.mubr.bf16.vlgmr.msra.gmra.mrb[12].mxu1 %v13755_v35  ;;  %v13767_v17 = vld [vmem:[#allocation3 + $0xd0] sm:$0xff] }
 0x592   : > { %9573 = vst.msk [vmem:[#allocation3 + $0xf0] sm:$0xff] %vm4576_vm7, %v9554_v8  ;;  %14368 = vmatprep.mubr.bf16.mxu1 %v13760_v34 }
 0x598   : > { %v12883_v16 = vpop.permute.xlu1 %12882 }
 0x599   : > { %12902 = vst.msk [vmem:[#allocation3 + $0xf8] sm:$0xff] %vm5421_vm8, %v12883_v16  ;;  %14369 = vmatmul.mubr.bf16.gmra.mrb[16].mxu1 %v13759_v38 }
 0x59a   : > { %14378 = vmatprep.mubr.bf16.mxu1 %v13764_v56 }
 0x5a1   : > { %14379 = vmatmul.mubr.bf16.gmra.mrb[20].mxu1 %v13763_v27 }
 0x5a2   : > { %14388 = vmatprep.mubr.bf16.mxu1 %v13768_v26 }
 0x5a3   : > { %v13720_v62 = vpop.permute.xlu1 %13719 }
 0x5a4   : > { %13739 = vst.msk [vmem:[#allocation3 + $0xf8] sm:$0xff] %vm6259_vm11, %v13720_v62 }
 0x5a9   : > { %14389 = vmatmul.mubr.bf16.gmra.mrb[24].mxu1 %v13767_v17 }
 0x5ab   : > { %v13772_v7 = vld [vmem:[#allocation3 + $0xf8] sm:$0xff] }
 0x5ac   : > { %14398 = vmatprep.mubr.bf16.mxu1 %v13772_v7 }
 0x5ad   : > { %v11228_v53 = vpop.permute.xlu1 %11227 }
 0x5b1   : > { %v12048_v32 = vpop.permute.xlu1 %12047 }
 0x5b2   : > { %12066 = vst.msk [vmem:[#allocation3 + $0x118] sm:$0xff] %vm4576_vm7, %v12048_v32 }
 0x5b5   : > { %v9556_v9 = vpop.permute.xlu1 %9555 }
 0x5b6   : > { %9574 = vst.msk [vmem:[#allocation3 + $0x110] sm:$0xff] %vm4576_vm7, %v9556_v9 }
 0x5c2   : > { %v12885_v58 = vpop.permute.xlu1 %12884 }
 0x5c3   : > { %12903 = vst.msk [vmem:[#allocation3 + $0x118] sm:$0xff] %vm5421_vm8, %v12885_v58 }
 0x5c6   : > { %v10391_v33 = vpop.permute.xlu1 %10390 }
 0x5c7   : > { %10410 = vst.msk [vmem:[#allocation3 + $0xf0] sm:$0xff] %vm5421_vm8, %v10391_v33 }
 0x5c8   : > { %11247 = vst.msk [vmem:[#allocation3 + $0xf0] sm:$0xff] %vm6259_vm11, %v11228_v53 }
 0x5cd   : > { %v14207_v24 = vpop.f32.mrb[0].mxu1 }
 0x5ce   : > { %v14209_v48 = vpop.f32.mrb[1].mxu1  ;;  %v14208_v6 = vadd.f32 %v14207_v24, %v20366_v60 }
 0x5cf   : > { %v13771_v41 = vld [vmem:[#allocation3 + $0xf0] sm:$0xff]  ;;  %v10393_v37 = vpop.permute.xlu1 %10392  ;;  %v14211_v52 = vpop.f32.mrb[2].mxu1  ;;  %v14210_v4 = vadd.f32 %v14209_v48, %v20368_v40 }
 0x5d0   : > { %14399 = vmatmul.mubr.bf16.gmra.mrb[28].mxu1 %v13771_v41  ;;  %10411 = vst.msk [vmem:[#allocation3 + $0x110] sm:$0xff] %vm5421_vm8, %v10393_v37  ;;  %v14213_v30 = vpop.f32.mrb[3].mxu1  ;;  %v14212_v23 = vadd.f32 %v14211_v52, %v20366_v60 }
 0x5d1   : > { %v14214_v51 = vadd.f32 %v14213_v30, %v20368_v40 }
 0x5d5   : > { %v14217_v36 = vpop.f32.mrb[4].mxu1 }
 0x5d6   : > { %v14219_v19 = vpop.f32.mrb[5].mxu1  ;;  %v13722_v44 = vpop.permute.xlu1 %13721  ;;  %v14218_v31 = vadd.f32 %v14217_v36, %v20366_v60 }
 0x5d7   : > { %v14221_v15 = vpop.f32.mrb[6].mxu1  ;;  %13740 = vst.msk [vmem:[#allocation3 + $0x118] sm:$0xff] %vm6259_vm11, %v13722_v44  ;;  %v14220_v11 = vadd.f32 %v14219_v19, %v20368_v40 }
 0x5d8   : > { %v14223_v1 = vpop.f32.mrb[7].mxu1  ;;  %v14222_v47 = vadd.f32 %v14221_v15, %v20366_v60 }
 0x5d9   : > { %v14224_v63 = vadd.f32 %v14223_v1, %v20368_v40 }
 0x5dd   : > { %v14227_v55 = vpop.f32.mrb[8].mxu1 }
 0x5de   : > { %v14229_v57 = vpop.f32.mrb[9].mxu1  ;;  %v13776_v13 = vld [vmem:[#allocation3 + $0x118] sm:$0xff]  ;;  %v14228_v58 = vadd.f32 %v14227_v55, %v20366_v60 }
 0x5df   : > { %v14231_v18 = vpop.f32.mrb[10].mxu1  ;;  %14408 = vmatprep.mubr.bf16.mxu1 %v13776_v13  ;;  %v14230_v33 = vadd.f32 %v14229_v57, %v20368_v40 }
 0x5e0   : > { %v14233_v43 = vpop.f32.mrb[11].mxu1  ;;  %v14232_v24 = vadd.f32 %v14231_v18, %v20366_v60 }
 0x5e1   : > { %v14234_v52 = vadd.f32 %v14233_v43, %v20368_v40 }
 0x5e3   : > { %v11230_v22 = vpop.permute.xlu1 %11229 }
 0x5e4   : > { %11248 = vst.msk [vmem:[#allocation3 + $0x110] sm:$0xff] %vm6259_vm11, %v11230_v22 }
 0x5eb   : > { %v13775_v2 = vld [vmem:[#allocation3 + $0x110] sm:$0xff] }
 0x5ec   : > { %14409 = vmatmul.mubr.bf16.gmra.mrb[32].mxu1 %v13775_v2 }
 0x601   : > { %v14330_v39 = vpop.f32.mrb[72].mxu0 }
 0x602   : > { %v14332_v12 = vpop.f32.mrb[73].mxu0  ;;  %v14331_v5 = vadd.f32 %v14330_v39, %v14208_v6 }
 0x603   : > { %v14334_v20 = vpop.f32.mrb[74].mxu0  ;;  %v14333_v45 = vadd.f32 %v14332_v12, %v14210_v4 }
 0x604   : > { %v14336_v25 = vpop.f32.mrb[75].mxu0  ;;  %v14419_v42 = vmax.f32 %v14331_v5, 0.0  ;;  %v14335_v3 = vadd.f32 %v14334_v20, %v14212_v23 }
 0x605   : > { %v14420_v10 = vmax.f32 %v14333_v45, 0.0  ;;  %v14337_v50 = vadd.f32 %v14336_v25, %v14214_v51 }
 0x606   : > { %v14421_v59 = vmax.f32 %v14335_v3, 0.0 }
 0x607   : > { %v20374_v29 = vmax.f32 %v14419_v42, %v14420_v10  ;;  %v14422_v61 = vmax.f32 %v14337_v50, 0.0 }
 0x609   : > { %v20376_v14 = vmax.f32 %v14421_v59, %v14422_v61 }
 0x60b   : > { %v15508_v28 = vpack.i.bf16 %v20376_v14, %v20374_v29 }
 0x60d   : > { %15509 = vrot.lane.b32.xlu0 %v15508_v28, %s15737_s26 }
 0x62c   : > { %v14340_v21 = vpop.f32.mrb[76].mxu0 }
 0x62d   : > { %v14341_v35 = vadd.f32 %v14340_v21, %v14218_v31  ;;  %v14342_v8 = vpop.f32.mrb[77].mxu0 }
 0x62e   : > { %v14343_v34 = vadd.f32 %v14342_v8, %v14220_v11  ;;  %v14344_v16 = vpop.f32.mrb[78].mxu0 }
 0x62f   : > { %v14423_v38 = vmax.f32 %v14341_v35, 0.0  ;;  %v14345_v56 = vadd.f32 %v14344_v16, %v14222_v47  ;;  %v14346_v27 = vpop.f32.mrb[79].mxu0 }
 0x630   : > { %v14424_v26 = vmax.f32 %v14343_v34, 0.0  ;;  %v14347_v62 = vadd.f32 %v14346_v27, %v14224_v63 }
 0x631   : > { %v14425_v17 = vmax.f32 %v14345_v56, 0.0 }
 0x632   : > { %v20385_v7 = vmax.f32 %v14423_v38, %v14424_v26  ;;  %v14426_v53 = vmax.f32 %v14347_v62, 0.0 }
 0x634   : > { %v20387_v32 = vmax.f32 %v14425_v17, %v14426_v53 }
 0x636   : > { %v15513_v9 = vpack.i.bf16 %v20387_v32, %v20385_v7 }
 0x638   : > { %15514 = vrot.lane.b32.xlu1 %v15513_v9, %s15737_s26 }
 0x64f   : > { %v14350_v41 = vpop.f32.mrb[80].mxu0 }
 0x650   : > { %v14351_v48 = vadd.f32 %v14350_v41, %v14228_v58  ;;  %v14352_v37 = vpop.f32.mrb[81].mxu0 }
 0x651   : > { %v14353_v30 = vadd.f32 %v14352_v37, %v14230_v33  ;;  %v14354_v36 = vpop.f32.mrb[82].mxu0 }
 0x652   : > { %v14427_v19 = vmax.f32 %v14351_v48, 0.0  ;;  %v14355_v44 = vadd.f32 %v14354_v36, %v14232_v24  ;;  %v14356_v15 = vpop.f32.mrb[83].mxu0 }
 0x653   : > { %v14428_v1 = vmax.f32 %v14353_v30, 0.0  ;;  %v14357_v13 = vadd.f32 %v14356_v15, %v14234_v52 }
 0x654   : > { %v14429_v22 = vmax.f32 %v14355_v44, 0.0 }
 0x655   : > { %v20396_v2 = vmax.f32 %v14427_v19, %v14428_v1  ;;  %v14430_v55 = vmax.f32 %v14357_v13, 0.0 }
 0x657   : > { %v20398_v0 = vmax.f32 %v14429_v22, %v14430_v55 }
 0x659   : > { %v15518_v57 = vpack.i.bf16 %v20398_v0, %v20396_v2 }
 0x65b   : > { %15519 = vrot.lane.b32.xlu0 %v15518_v57, %s15737_s26 }
 0x664   : > { %v14360_v18 = vpop.f32.mrb[12].mxu1 }
 0x665   : > { %v15445_v43 = vadd.f32 %v14360_v18, %v20366_v60  ;;  %v14362_v46 = vpop.f32.mrb[13].mxu1 }
 0x666   : > { %v15446_v54 = vadd.f32 %v14362_v46, %v20368_v40  ;;  %v14364_v49 = vpop.f32.mrb[14].mxu1 }
 0x667   : > { %v14431_v6 = vmax.f32 %v15445_v43, 0.0  ;;  %v15447_v4 = vadd.f32 %v14364_v49, %v20366_v60  ;;  %v14366_v23 = vpop.f32.mrb[15].mxu1 }
 0x668   : > { %v14432_v39 = vmax.f32 %v15446_v54, 0.0  ;;  %v15448_v51 = vadd.f32 %v14366_v23, %v20368_v40 }
 0x669   : > { %v14433_v12 = vmax.f32 %v15447_v4, 0.0 }
 0x66a   : > { %v20407_v5 = vmax.f32 %v14431_v6, %v14432_v39  ;;  %v14434_v20 = vmax.f32 %v15448_v51, 0.0 }
 0x66c   : > { %v20409_v45 = vmax.f32 %v14433_v12, %v14434_v20  ;;  %v14370_v25 = vpop.f32.mrb[16].mxu1 }
 0x66d   : > { %v15449_v42 = vadd.f32 %v14370_v25, %v20366_v60  ;;  %v14372_v3 = vpop.f32.mrb[17].mxu1 }
 0x66e   : > { %v15523_v10 = vpack.i.bf16 %v20409_v45, %v20407_v5  ;;  %v15450_v50 = vadd.f32 %v14372_v3, %v20368_v40  ;;  %v14374_v59 = vpop.f32.mrb[18].mxu1 }
 0x66f   : > { %v14435_v61 = vmax.f32 %v15449_v42, 0.0  ;;  %v15451_v28 = vadd.f32 %v14374_v59, %v20366_v60  ;;  %v14376_v31 = vpop.f32.mrb[19].mxu1 }
 0x670   : > { %v14436_v11 = vmax.f32 %v15450_v50, 0.0  ;;  %v15452_v47 = vadd.f32 %v14376_v31, %v20368_v40  ;;  %15524 = vrot.lane.b32.xlu1 %v15523_v10, %s15737_s26 }
 0x671   : > { %v14437_v21 = vmax.f32 %v15451_v28, 0.0 }
 0x672   : > { %v20418_v63 = vmax.f32 %v14435_v61, %v14436_v11  ;;  %v14438_v35 = vmax.f32 %v15452_v47, 0.0 }
 0x674   : > { %v20420_v8 = vmax.f32 %v14437_v21, %v14438_v35  ;;  %v14380_v34 = vpop.f32.mrb[20].mxu1 }
 0x675   : > { %v15453_v16 = vadd.f32 %v14380_v34, %v20366_v60  ;;  %v14382_v38 = vpop.f32.mrb[21].mxu1 }
 0x676   : > { %v15528_v56 = vpack.i.bf16 %v20420_v8, %v20418_v63  ;;  %v15454_v27 = vadd.f32 %v14382_v38, %v20368_v40  ;;  %v14384_v26 = vpop.f32.mrb[22].mxu1 }
 0x677   : > { %v14439_v62 = vmax.f32 %v15453_v16, 0.0  ;;  %v15455_v17 = vadd.f32 %v14384_v26, %v20366_v60  ;;  %v14386_v53 = vpop.f32.mrb[23].mxu1 }
 0x678   : > { %v14440_v9 = vmax.f32 %v15454_v27, 0.0  ;;  %v15456_v58 = vadd.f32 %v14386_v53, %v20368_v40  ;;  %15529 = vrot.lane.b32.xlu0 %v15528_v56, %s15737_s26 }
 0x679   : > { %v14441_v33 = vmax.f32 %v15455_v17, 0.0 }
 0x67a   : > { %v20429_v41 = vmax.f32 %v14439_v62, %v14440_v9  ;;  %v14442_v24 = vmax.f32 %v15456_v58, 0.0 }
 0x67c   : > { %v20431_v48 = vmax.f32 %v14441_v33, %v14442_v24  ;;  %v14390_v37 = vpop.f32.mrb[24].mxu1 }
 0x67d   : > { %v15457_v52 = vadd.f32 %v14390_v37, %v20366_v60  ;;  %v14392_v30 = vpop.f32.mrb[25].mxu1 }
 0x67e   : > { %v15533_v36 = vpack.i.bf16 %v20431_v48, %v20429_v41  ;;  %v15458_v19 = vadd.f32 %v14392_v30, %v20368_v40  ;;  %v14394_v44 = vpop.f32.mrb[26].mxu1 }
 0x67f   : > { %v15510_v15 = vpop.permute.xlu0 %15509  ;;  %v14443_v1 = vmax.f32 %v15457_v52, 0.0  ;;  %v15459_v13 = vadd.f32 %v14394_v44, %v20366_v60  ;;  %v14396_v22 = vpop.f32.mrb[27].mxu1 }
 0x680   : > { %v15512_v55 = vunpack.i.h.bf16 %v15510_v15  ;;  %v15511_v57 = vunpack.i.l.bf16 %v15510_v15  ;;  %v14444_v18 = vmax.f32 %v15458_v19, 0.0  ;;  %v15460_v43 = vadd.f32 %v14396_v22, %v20368_v40  ;;  %15534 = vrot.lane.b32.xlu1 %v15533_v36, %s15737_s26 }
 0x681   : > { %v14445_v46 = vmax.f32 %v15459_v13, 0.0 }
 0x682   : > { %v14512_v54 = vmax.f32 %v20376_v14, %v15512_v55  ;;  %v14511_v49 = vmax.f32 %v20374_v29, %v15511_v57  ;;  %v20443_v6 = vmax.f32 %v14443_v1, %v14444_v18  ;;  %v14446_v4 = vmax.f32 %v15460_v43, 0.0 }
 0x684   : > { %v15261_v23 = vpack.c.bf16 %v14512_v54, %v14512_v54  ;;  %v15260_v39 = vpack.c.bf16 %v14511_v49, %v14511_v49  ;;  %v20450_v51 = vmax.f32 %v14445_v46, %v14446_v4 }
 0x686   : > { %14603 = vst.msk [vmem:[%s20448_s6 + $0x4] sm:$0xf] %vm14601_vm3, %v15261_v23  ;;  %14602 = vst.msk [vmem:[%s20448_s6] sm:$0xf] %vm14601_vm3, %v15260_v39  ;;  %v15538_v29 = vpack.i.bf16 %v20450_v51, %v20443_v6 }
 0x688   : > { %15539 = vrot.lane.b32.xlu0 %v15538_v29, %s15737_s26 }
 0x6a3   : > { %v14400_v14 = vpop.f32.mrb[28].mxu1 }
 0x6a4   : > { %v15461_v12 = vadd.f32 %v14400_v14, %v20366_v60  ;;  %v14402_v20 = vpop.f32.mrb[29].mxu1 }
 0x6a5   : > { %v15462_v25 = vadd.f32 %v14402_v20, %v20368_v40  ;;  %v14404_v42 = vpop.f32.mrb[30].mxu1 }
 0x6a6   : > { %v14447_v3 = vmax.f32 %v15461_v12, 0.0  ;;  %v15463_v10 = vadd.f32 %v14404_v42, %v20366_v60  ;;  %v14406_v50 = vpop.f32.mrb[31].mxu1 }
 0x6a7   : > { %v14448_v59 = vmax.f32 %v15462_v25, 0.0  ;;  %v15464_v61 = vadd.f32 %v14406_v50, %v20368_v40 }
 0x6a8   : > { %v14449_v28 = vmax.f32 %v15463_v10, 0.0 }
 0x6a9   : > { %v20463_v31 = vmax.f32 %v14447_v3, %v14448_v59  ;;  %v14450_v11 = vmax.f32 %v15464_v61, 0.0 }
 0x6aa   : > { %v15515_v47 = vpop.permute.xlu1 %15514 }
 0x6ab   : > { %v20465_v21 = vmax.f32 %v14449_v28, %v14450_v11  ;;  %v15517_v35 = vunpack.i.h.bf16 %v15515_v47  ;;  %v15516_v34 = vunpack.i.l.bf16 %v15515_v47 }
 0x6ad   : > { %v15543_v16 = vpack.i.bf16 %v20465_v21, %v20463_v31  ;;  %v14514_v38 = vmax.f32 %v20387_v32, %v15517_v35  ;;  %v14513_v56 = vmax.f32 %v20385_v7, %v15516_v34 }
 0x6af   : > { %15544 = vrot.lane.b32.xlu1 %v15543_v16, %s15737_s26  ;;  %v15263_v27 = vpack.c.bf16 %v14514_v38, %v14514_v38  ;;  %v15262_v26 = vpack.c.bf16 %v14513_v56, %v14513_v56 }
 0x6b1   : > { %14605 = vst.msk [vmem:[%s20448_s6 + $0xc] sm:$0xf] %vm14601_vm3, %v15263_v27  ;;  %14604 = vst.msk [vmem:[%s20448_s6 + $0x8] sm:$0xf] %vm14601_vm3, %v15262_v26 }
 0x6bf   : > { %v14410_v62 = vpop.f32.mrb[32].mxu1 }
 0x6c0   : > { %v15465_v17 = vadd.f32 %v14410_v62, %v20366_v60  ;;  %v14412_v53 = vpop.f32.mrb[33].mxu1 }
 0x6c1   : > { %v15466_v9 = vadd.f32 %v14412_v53, %v20368_v40  ;;  %v14414_v58 = vpop.f32.mrb[34].mxu1 }
 0x6c2   : > { %v14451_v33 = vmax.f32 %v15465_v17, 0.0  ;;  %v15467_v32 = vadd.f32 %v14414_v58, %v20366_v60  ;;  %v14416_v24 = vpop.f32.mrb[35].mxu1 }
 0x6c3   : > { %v14452_v7 = vmax.f32 %v15466_v9, 0.0  ;;  %v15468_v37 = vadd.f32 %v14416_v24, %v20368_v40 }
 0x6c4   : > { %v14453_v52 = vmax.f32 %v15467_v32, 0.0 }
 0x6c5   : > { %v20480_v30 = vmax.f32 %v14451_v33, %v14452_v7  ;;  %v14454_v36 = vmax.f32 %v15468_v37, 0.0 }
 0x6c7   : > { %v14472_v19 = vmax.f32 %v14453_v52, %v14454_v36 }
 0x6c9   : > { %v15548_v44 = vpack.i.bf16 %v14472_v19, %v20480_v30 }
 0x6cb   : > { %15549 = vrot.lane.b32.xlu0 %v15548_v44, %s15737_s26 }
 0x6cd   : > { %v15520_v15 = vpop.permute.xlu0 %15519 }
 0x6ce   : > { %v15522_v1 = vunpack.i.h.bf16 %v15520_v15  ;;  %v15521_v60 = vunpack.i.l.bf16 %v15520_v15 }
 0x6d0   : > { %v14516_v13 = vmax.f32 %v20398_v0, %v15522_v1  ;;  %v14515_v22 = vmax.f32 %v20396_v2, %v15521_v60 }
 0x6d2   : > { %v15265_v55 = vpack.c.bf16 %v14516_v13, %v14516_v13  ;;  %v15264_v40 = vpack.c.bf16 %v14515_v22, %v14515_v22 }
 0x6d4   : > { %14607 = vst.msk [vmem:[%s20448_s6 + $0x14] sm:$0xf] %vm14601_vm3, %v15265_v55  ;;  %14606 = vst.msk [vmem:[%s20448_s6 + $0x10] sm:$0xf] %vm14601_vm3, %v15264_v40 }
 0x6e2   : > { %v15525_v57 = vpop.permute.xlu1 %15524 }
 0x6e3   : > { %v15527_v18 = vunpack.i.h.bf16 %v15525_v57  ;;  %v15526_v43 = vunpack.i.l.bf16 %v15525_v57 }
 0x6e5   : > { %v14518_v46 = vmax.f32 %v20409_v45, %v15527_v18  ;;  %v14517_v54 = vmax.f32 %v20407_v5, %v15526_v43 }
 0x6e7   : > { %v15267_v49 = vpack.c.bf16 %v14518_v46, %v14518_v46  ;;  %v15266_v4 = vpack.c.bf16 %v14517_v54, %v14517_v54 }
 0x6e9   : > { %14609 = vst.msk [vmem:[%s20448_s6 + $0x1c] sm:$0xf] %vm14601_vm3, %v15267_v49  ;;  %14608 = vst.msk [vmem:[%s20448_s6 + $0x18] sm:$0xf] %vm14601_vm3, %v15266_v4 }
 0x6ea   : > { %v15530_v2 = vpop.permute.xlu0 %15529 }
 0x6eb   : > { %v15532_v0 = vunpack.i.h.bf16 %v15530_v2  ;;  %v15531_v23 = vunpack.i.l.bf16 %v15530_v2 }
 0x6ed   : > { %v14520_v39 = vmax.f32 %v20420_v8, %v15532_v0  ;;  %v14519_v29 = vmax.f32 %v20418_v63, %v15531_v23 }
 0x6ef   : > { %v15269_v14 = vpack.c.bf16 %v14520_v39, %v14520_v39  ;;  %v15268_v12 = vpack.c.bf16 %v14519_v29, %v14519_v29 }
 0x6f1   : > { %14611 = vst.msk [vmem:[%s20448_s6 + $0x24] sm:$0xf] %vm14601_vm3, %v15269_v14  ;;  %14610 = vst.msk [vmem:[%s20448_s6 + $0x20] sm:$0xf] %vm14601_vm3, %v15268_v12 }
 0x6f2   : > { %v15535_v5 = vpop.permute.xlu1 %15534 }
 0x6f3   : > { %v15537_v45 = vunpack.i.h.bf16 %v15535_v5  ;;  %v15536_v20 = vunpack.i.l.bf16 %v15535_v5 }
 0x6f5   : > { %v14522_v25 = vmax.f32 %v20431_v48, %v15537_v45  ;;  %v14521_v42 = vmax.f32 %v20429_v41, %v15536_v20 }
 0x6f7   : > { %v15271_v3 = vpack.c.bf16 %v14522_v25, %v14522_v25  ;;  %v15270_v10 = vpack.c.bf16 %v14521_v42, %v14521_v42 }
 0x6f9   : > { %14613 = vst.msk [vmem:[%s20448_s6 + $0x2c] sm:$0xf] %vm14601_vm3, %v15271_v3  ;;  %14612 = vst.msk [vmem:[%s20448_s6 + $0x28] sm:$0xf] %vm14601_vm3, %v15270_v10 }
 0x6fa   : > { %v15540_v63 = vpop.permute.xlu0 %15539 }
 0x6fb   : > { %v15542_v8 = vunpack.i.h.bf16 %v15540_v63  ;;  %v15541_v50 = vunpack.i.l.bf16 %v15540_v63 }
 0x6fd   : > { %v14524_v59 = vmax.f32 %v20450_v51, %v15542_v8  ;;  %v14523_v61 = vmax.f32 %v20443_v6, %v15541_v50 }
 0x6ff   : > { %v15273_v28 = vpack.c.bf16 %v14524_v59, %v14524_v59  ;;  %v15272_v11 = vpack.c.bf16 %v14523_v61, %v14523_v61 }
 0x701   : > { %14615 = vst.msk [vmem:[%s20448_s6 + $0x34] sm:$0xf] %vm14601_vm3, %v15273_v28  ;;  %14614 = vst.msk [vmem:[%s20448_s6 + $0x30] sm:$0xf] %vm14601_vm3, %v15272_v11 }
 0x721   : > { %v15545_v41 = vpop.permute.xlu1 %15544 }
 0x722   : > { %v15547_v48 = vunpack.i.h.bf16 %v15545_v41  ;;  %v15546_v47 = vunpack.i.l.bf16 %v15545_v41 }
 0x724   : > { %v14526_v35 = vmax.f32 %v20465_v21, %v15547_v48  ;;  %v14525_v34 = vmax.f32 %v20463_v31, %v15546_v47 }
 0x726   : > { %v15275_v16 = vpack.c.bf16 %v14526_v35, %v14526_v35  ;;  %v15274_v38 = vpack.c.bf16 %v14525_v34, %v14525_v34 }
 0x728   : > { %14617 = vst.msk [vmem:[%s20448_s6 + $0x3c] sm:$0xf] %vm14601_vm3, %v15275_v16  ;;  %14616 = vst.msk [vmem:[%s20448_s6 + $0x38] sm:$0xf] %vm14601_vm3, %v15274_v38 }
 0x73d   : > { %v15550_v6 = vpop.permute.xlu0 %15549 }
 0x73e   : > { %v15552_v51 = vunpack.i.h.bf16 %v15550_v6  ;;  %v15551_v56 = vunpack.i.l.bf16 %v15550_v6 }
 0x740   : > { %v14528_v27 = vmax.f32 %v14472_v19, %v15552_v51  ;;  %v14527_v26 = vmax.f32 %v20480_v30, %v15551_v56 }
 0x742   : > { %v15277_v62 = vpack.c.bf16 %v14528_v27, %v14528_v27  ;;  %v15276_v17 = vpack.c.bf16 %v14527_v26, %v14527_v26 }
 0x744   : > { %14619 = vst.msk [vmem:[%s20448_s6 + $0x44] sm:$0xf] %vm14601_vm3, %v15277_v62  ;;  %14618 = vst.msk [vmem:[%s20448_s6 + $0x40] sm:$0xf] %vm14601_vm3, %v15276_v17 }
 0x745 PF: > { %s15_s18 = sadd.s32 1, %s15735_s18  }
 0x746   : > { %p12_p4 = scmp.ge.s32.totalorder %s15_s18, 4  }
 0x748   :  { %14 = sbr.rel (!%p12_p4) target bundleno = 1 (0x1), region = 78 }

</bundles_post_ra>
